<compile_context>
chip_gen: v7x
topology: tpu7x:2x2x1
jax: 0.10.0
libtpu: 0.0.40
codegen_flags: <defaults>
</compile_context>

<pallas_src>
import math
from functools import partial

import jax
import jax.numpy as jnp
from jax import lax
from jax.experimental import pallas as pl
from jax.experimental.pallas import tpu as pltpu


def _round_up(x, m):
    return (x + m - 1) // m * m


# --------------------------- tiled matmul (+bias, +optional residual) --------

def _mm_kernel(x_ref, w_ref, b_ref, o_ref, acc_ref):
    @pl.when(pl.program_id(2) == 0)
    def _():
        acc_ref[...] = jnp.zeros_like(acc_ref)

    acc_ref[...] += jnp.dot(x_ref[...], w_ref[...],
                            preferred_element_type=jnp.float32)

    @pl.when(pl.program_id(2) == pl.num_programs(2) - 1)
    def _():
        o_ref[...] = acc_ref[...] + b_ref[...]


def _mm_res_kernel(x_ref, w_ref, b_ref, r_ref, o_ref, acc_ref):
    @pl.when(pl.program_id(2) == 0)
    def _():
        acc_ref[...] = jnp.zeros_like(acc_ref)

    acc_ref[...] += jnp.dot(x_ref[...], w_ref[...],
                            preferred_element_type=jnp.float32)

    @pl.when(pl.program_id(2) == pl.num_programs(2) - 1)
    def _():
        # bias + residual epilogue fused, done in f32
        o_ref[...] = acc_ref[...] + b_ref[...] + r_ref[...]


def matmul_bias(x2d, w, b, residual=None, *, tm_max=256, tk_max=512):
    """out = x2d @ w + b (+ residual), tiled over (M, N, K).

    - operands cast to bf16 for the MXU, accumulate + epilogue in f32
    - K accumulated across the last ('arbitrary') grid axis into VMEM scratch
    - M padded to a multiple of 8, K and N padded to multiples of 128 so all
      blocks are (8,128)-aligned and output stores are lane-dense.
    Tile sizes keep double-buffered VMEM use far below v7x's 64 MiB.
    """
    M, K = x2d.shape
    N = w.shape[1]

    Mp = _round_up(M, 8)
    tm = min(tm_max, Mp)
    Mp = _round_up(Mp, tm)
    Np = _round_up(N, 128)
    tn = 128
    Kp = _round_up(K, 128)
    tk = max(d for d in (128, 256, 384, 512) if d <= tk_max and Kp % d == 0)

    xb = jnp.pad(x2d, ((0, Mp - M), (0, Kp - K))).astype(jnp.bfloat16)
    wb = jnp.pad(w, ((0, Kp - K), (0, Np - N))).astype(jnp.bfloat16)
    bb = jnp.pad(b.astype(jnp.float32), (0, Np - N)).reshape(1, Np)

    grid = (Mp // tm, Np // tn, Kp // tk)
    in_specs = [
        pl.BlockSpec((tm, tk), lambda i, j, k: (i, k)),
        pl.BlockSpec((tk, tn), lambda i, j, k: (k, j)),
        pl.BlockSpec((1, tn), lambda i, j, k: (0, j)),
    ]
    args = [xb, wb, bb]
    kern = _mm_kernel
    if residual is not None:
        rb = jnp.pad(residual.astype(jnp.float32), ((0, Mp - M), (0, Np - N)))
        in_specs.append(pl.BlockSpec((tm, tn), lambda i, j, k: (i, j)))
        args.append(rb)
        kern = _mm_res_kernel

    out = pl.pallas_call(
        kern,
        out_shape=jax.ShapeDtypeStruct((Mp, Np), jnp.float32),
        grid=grid,
        in_specs=in_specs,
        out_specs=pl.BlockSpec((tm, tn), lambda i, j, k: (i, j)),
        scratch_shapes=[pltpu.VMEM((tm, tn), jnp.float32)],
        compiler_params=pltpu.CompilerParams(
            dimension_semantics=("parallel", "parallel", "arbitrary")),
    )(*args)
    return out[:M, :N]


# --------------------------- GroupNorm (+optional SiLU) ----------------------

def _groupnorm_kernel(x_ref, g_ref, b_ref, cg_ref, gc_ref, o_ref, *,
                      group_size, apply_swish):
    x = x_ref[0]                                   # (HW, C) f32
    hw = x.shape[0]
    n = float(hw * group_size)
    cg = cg_ref[...]                               # (C, G) channel->group
    gc = gc_ref[...]                               # (G, C) group->channel
    # two-pass stats (mean, then centered sumsq) for numerical stability,
    # group reduction via a (C,G) indicator instead of a dense (C,C) matrix.
    s = jnp.sum(x, axis=0, keepdims=True)                               # (1,C)
    mean_g = jnp.dot(s, cg, preferred_element_type=jnp.float32) / n     # (1,G)
    mean_c = jnp.dot(mean_g, gc, preferred_element_type=jnp.float32)    # (1,C)
    d = x - mean_c
    q = jnp.sum(d * d, axis=0, keepdims=True)                           # (1,C)
    var_g = jnp.dot(q, cg, preferred_element_type=jnp.float32) / n
    var_c = jnp.dot(var_g, gc, preferred_element_type=jnp.float32)
    inv = lax.rsqrt(var_c + 1e-6)
    y = d * inv * g_ref[...] + b_ref[...]
    if apply_swish:
        y = y * (1.0 / (1.0 + jnp.exp(-y)))        # SiLU / swish
    o_ref[0] = y


def group_norm(x, gamma, beta, *, num_groups=32, apply_swish=False):
    # TODO(synk): tile HW with a stats+normalize two-pass grid for large
    # resolutions; at these sizes one (HW, C) block per batch fits easily.
    B, H, W, C = x.shape
    HW = H * W
    cs = C // num_groups
    cg = jnp.repeat(jnp.eye(num_groups, dtype=jnp.float32), cs, axis=0)  # (C,G)
    gc = cg.T                                                            # (G,C)
    x3 = x.reshape(B, HW, C)
    kern = partial(_groupnorm_kernel, group_size=cs, apply_swish=apply_swish)
    out = pl.pallas_call(
        kern,
        out_shape=jax.ShapeDtypeStruct((B, HW, C), jnp.float32),
        grid=(B,),
        in_specs=[pl.BlockSpec((1, HW, C), lambda b: (b, 0, 0)),
                  pl.BlockSpec((1, C), lambda b: (0, 0)),
                  pl.BlockSpec((1, C), lambda b: (0, 0)),
                  pl.BlockSpec((C, num_groups), lambda b: (0, 0)),
                  pl.BlockSpec((num_groups, C), lambda b: (0, 0))],
        out_specs=pl.BlockSpec((1, HW, C), lambda b: (b, 0, 0)),
        compiler_params=pltpu.CompilerParams(
            dimension_semantics=("parallel",)),
    )(x3, gamma.reshape(1, C), beta.reshape(1, C), cg, gc)
    return out.reshape(B, H, W, C)


# --------------------------- single-head SDPA --------------------------------

def _attention_kernel(q_ref, k_ref, v_ref, o_ref, *, scale):
    # fold 1/sqrt(C) into q (T,C) instead of scaling the (T,T) scores
    q = (q_ref[0] * scale).astype(jnp.bfloat16)
    k = k_ref[0].astype(jnp.bfloat16)
    v = v_ref[0].astype(jnp.bfloat16)
    s = lax.dot_general(q, k, (((1,), (1,)), ((), ())),
                        preferred_element_type=jnp.float32)        # (T, T)
    m = jnp.max(s, axis=-1, keepdims=True)
    p = jnp.exp(s - m)
    l = jnp.sum(p, axis=-1, keepdims=True)
    o = jnp.dot(p.astype(jnp.bfloat16), v, preferred_element_type=jnp.float32)
    o_ref[0] = o * pl.reciprocal(l, approx=True)   # EUP slot, not a VPU divide


def sdp_attention(q, k, v):
    """softmax(q k^T / sqrt(C)) v per batch element (single head)."""
    # TODO(synk): flash-style KV tiling (m/l/acc scratch) for T >> mid-block
    # sizes so VMEM stays O(T*tk) on v7x's 64 MiB.
    B, T, C = q.shape
    kern = partial(_attention_kernel, scale=1.0 / math.sqrt(C))
    return pl.pallas_call(
        kern,
        out_shape=jax.ShapeDtypeStruct((B, T, C), jnp.float32),
        grid=(B,),
        in_specs=[pl.BlockSpec((1, T, C), lambda b: (b, 0, 0))] * 3,
        out_specs=pl.BlockSpec((1, T, C), lambda b: (b, 0, 0)),
        compiler_params=pltpu.CompilerParams(
            dimension_semantics=("parallel",)),
    )(q, k, v)


# --------------------------- conv wrappers (im2col glue) ---------------------

def conv3x3_same(x, w, b, residual=None):
    # x: (B,H,W,Cin), w: (3,3,Cin,Cout); stride 1, padding 1 (PyTorch "same")
    B, H, W, Cin = x.shape
    Cout = w.shape[-1]
    xp = jnp.pad(x, ((0, 0), (1, 1), (1, 1), (0, 0)))
    cols = [xp[:, ky:ky + H, kx:kx + W, :]
            for ky in range(3) for kx in range(3)]
    patches = jnp.concatenate(cols, axis=-1).reshape(B * H * W, 9 * Cin)
    # TODO(synk): fold the 9-tap window into the matmul K axis with in-kernel
    # shifted loads to avoid materializing the 9x im2col patches in HBM.
    res2d = None if residual is None else residual.reshape(B * H * W, Cout)
    out = matmul_bias(patches, w.reshape(9 * Cin, Cout), b, res2d)
    return out.reshape(B, H, W, Cout)


def conv3x3_down(x, w, b):
    # PyTorch Downsample: F.pad (right/bottom by 1) then conv k=3, s=2, p=0
    B, H, W, Cin = x.shape
    Cout = w.shape[-1]
    Ho, Wo = H // 2, W // 2
    xp = jnp.pad(x, ((0, 0), (0, 1), (0, 1), (0, 0)))
    cols = [xp[:, ky:ky + 2 * Ho:2, kx:kx + 2 * Wo:2, :]
            for ky in range(3) for kx in range(3)]
    patches = jnp.concatenate(cols, axis=-1).reshape(B * Ho * Wo, 9 * Cin)
    out = matmul_bias(patches, w.reshape(9 * Cin, Cout), b)
    return out.reshape(B, Ho, Wo, Cout)


def conv1x1(x, w, b, residual=None):
    B, H, W, Cin = x.shape
    Cout = w.shape[-1]
    res2d = None if residual is None else residual.reshape(B * H * W, Cout)
    out = matmul_bias(x.reshape(B * H * W, Cin), w, b, res2d)
    return out.reshape(B, H, W, Cout)


# --------------------------- modules ------------------------------------------

def resnet_block(x, p):
    h = group_norm(x, p['norm1_g'], p['norm1_b'], apply_swish=True)
    h = conv3x3_same(h, p['conv1_w'], p['conv1_b'])
    h = group_norm(h, p['norm2_g'], p['norm2_b'], apply_swish=True)
    shortcut = x
    if 'nin_w' in p:
        shortcut = conv1x1(x, p['nin_w'], p['nin_b'])
    # residual add fused into the conv2 matmul epilogue (saves one HBM pass)
    return conv3x3_same(h, p['conv2_w'], p['conv2_b'], residual=shortcut)


def attn_block(x, p):
    B, H, W, C = x.shape
    h = group_norm(x, p['norm_g'], p['norm_b'], apply_swish=False)
    # fused q/k/v projection: one (C, 3C) matmul instead of three launches
    w_qkv = jnp.concatenate([p['q_w'], p['k_w'], p['v_w']], axis=1)
    b_qkv = jnp.concatenate([p['q_b'], p['k_b'], p['v_b']], axis=0)
    qkv = matmul_bias(h.reshape(B * H * W, C), w_qkv, b_qkv)
    qkv = qkv.reshape(B, H * W, 3 * C)
    q, k, v = qkv[..., :C], qkv[..., C:2 * C], qkv[..., 2 * C:]
    a = sdp_attention(q, k, v).reshape(B, H, W, C)
    # residual add fused into the output-projection matmul epilogue
    return conv1x1(a, p['proj_w'], p['proj_b'], residual=x)


def encoder_forward(params, x_nchw, cfg):
    x = jnp.transpose(x_nchw, (0, 2, 3, 1)).astype(jnp.float32)   # NCHW -> NHWC
    h = conv3x3_same(x, params['conv_in_w'], params['conv_in_b'])
    num_res = len(cfg['ch_mult'])
    for i_level in range(num_res):
        for i_block in range(cfg['num_res_blocks']):
            h = resnet_block(h, params['down'][i_level]['block'][i_block])
            # (no per-level attn: Encoder builds empty attn ModuleLists)
        if i_level != num_res - 1:
            d = params['down'][i_level]['downsample']
            h = conv3x3_down(h, d['w'], d['b'])
    h = resnet_block(h, params['mid_block1'])
    h = attn_block(h, params['mid_attn'])
    h = resnet_block(h, params['mid_block2'])
    h = group_norm(h, params['norm_out_g'], params['norm_out_b'], apply_swish=True)
    h = conv3x3_same(h, params['conv_out_w'], params['conv_out_b'])
    return jnp.transpose(h, (0, 3, 1, 2))                         # back to NCHW


# --------------------------- deterministic init --------------------------------

def init_params(key, cfg):
    ch = cfg['ch']
    ch_mult = cfg['ch_mult']
    keys = iter(jax.random.split(key, 256))

    def conv_w(kh, kw, cin, cout):
        return 0.05 * jax.random.normal(next(keys), (kh, kw, cin, cout), jnp.float32)

    def lin_w(cin, cout):
        return 0.05 * jax.random.normal(next(keys), (cin, cout), jnp.float32)

    def norm_p(c):
        return jnp.ones((c,), jnp.float32), jnp.zeros((c,), jnp.float32)

    def resnet_p(cin, cout):
        p = {}
        p['norm1_g'], p['norm1_b'] = norm_p(cin)
        p['conv1_w'] = conv_w(3, 3, cin, cout)
        p['conv1_b'] = jnp.zeros((cout,), jnp.float32)
        p['norm2_g'], p['norm2_b'] = norm_p(cout)
        p['conv2_w'] = conv_w(3, 3, cout, cout)
        p['conv2_b'] = jnp.zeros((cout,), jnp.float32)
        if cin != cout:
            p['nin_w'] = lin_w(cin, cout)
            p['nin_b'] = jnp.zeros((cout,), jnp.float32)
        return p

    params = {
        'conv_in_w': conv_w(3, 3, cfg['in_channels'], ch),
        'conv_in_b': jnp.zeros((ch,), jnp.float32),
    }
    in_ch_mult = (1,) + tuple(ch_mult)
    down = []
    block_in = ch
    for i_level in range(len(ch_mult)):
        block_in = ch * in_ch_mult[i_level]
        block_out = ch * ch_mult[i_level]
        blocks = []
        for _ in range(cfg['num_res_blocks']):
            blocks.append(resnet_p(block_in, block_out))
            block_in = block_out
        level = {'block': blocks}
        if i_level != len(ch_mult) - 1:
            level['downsample'] = {'w': conv_w(3, 3, block_in, block_in),
                                   'b': jnp.zeros((block_in,), jnp.float32)}
        down.append(level)
    params['down'] = down

    params['mid_block1'] = resnet_p(block_in, block_in)
    attn = {}
    attn['norm_g'], attn['norm_b'] = norm_p(block_in)
    for name in ('q', 'k', 'v', 'proj'):
        attn[f'{name}_w'] = lin_w(block_in, block_in)
        attn[f'{name}_b'] = jnp.zeros((block_in,), jnp.float32)
    params['mid_attn'] = attn
    params['mid_block2'] = resnet_p(block_in, block_in)
    params['norm_out_g'], params['norm_out_b'] = norm_p(block_in)
    params['conv_out_w'] = conv_w(3, 3, block_in, 2 * cfg['z_channels'])
    params['conv_out_b'] = jnp.zeros((2 * cfg['z_channels'],), jnp.float32)
    return params


# --------------------------- main ----------------------------------------------

if __name__ == "__main__":
    cfg = dict(resolution=16, in_channels=3, ch=32, out_ch=3,
               ch_mult=[1, 2], num_res_blocks=1, z_channels=4)
    key = jax.random.PRNGKey(0)
    pkey, xkey = jax.random.split(key)
    params = init_params(pkey, cfg)
    x = jax.random.normal(
        xkey, (2, cfg['in_channels'], cfg['resolution'], cfg['resolution']),
        jnp.float32)

    fwd = jax.jit(partial(encoder_forward, cfg=cfg))
    out = fwd(params, x)
    jax.block_until_ready(out)
    assert out.shape == (2, 2 * cfg['z_channels'],
                         cfg['resolution'] // 2, cfg['resolution'] // 2), out.shape
    assert bool(jnp.all(jnp.isfinite(out)))
    print("KERNEL_OK")
</pallas_src>

<mosaic_0001>
module attributes {stable_mosaic.version = 11 : i64} {
  func.func @_mm_kernel(%arg0: i32, %arg1: i32, %arg2: i32, %arg3: memref<256x128xbf16, #tpu.memory_space<vmem>>, %arg4: memref<128x128xbf16, #tpu.memory_space<vmem>>, %arg5: memref<1x128xf32, #tpu.memory_space<vmem>>, %arg6: memref<256x128xf32, #tpu.memory_space<vmem>>, %arg7: memref<256x128xf32, #tpu.memory_space<vmem>>) attributes {dimension_semantics = [#tpu.dimension_semantics<parallel>, #tpu.dimension_semantics<parallel>, #tpu.dimension_semantics<arbitrary>], iteration_bounds = array<i64: 2, 1, 1>, scalar_prefetch = 0 : i64, scratch_operands = 1 : i64, tpu.core_type = #tpu.core_type<tc>, window_params = [{transform_indices = @transform_0, window_bounds = array<i64: 256, 128>}, {transform_indices = @transform_1, window_bounds = array<i64: 128, 128>}, {transform_indices = @transform_2, window_bounds = array<i64: 1, 128>}, {transform_indices = @transform_3, window_bounds = array<i64: 256, 128>}]} {
    %c0_i32 = arith.constant 0 : i32
    %0 = arith.cmpi eq, %arg2, %c0_i32 : i32
    %1 = arith.extui %0 : i1 to i32
    %c0_i32_0 = arith.constant 0 : i32
    %2 = arith.cmpi ne, %1, %c0_i32_0 : i32
    scf.if %2 {
      %cst_10 = arith.constant 0.000000e+00 : f32
      %12 = vector.broadcast %cst_10 : f32 to vector<256x128xf32>
      %c0_11 = arith.constant 0 : index
      %c0_12 = arith.constant 0 : index
      %13 = vector.load %arg7[%c0_11, %c0_12] : memref<256x128xf32, #tpu.memory_space<vmem>>, vector<256x128xf32>
      tpu.vector_store %arg7[%c0_11, %c0_12], %12 {strides = array<i32>} : memref<256x128xf32, #tpu.memory_space<vmem>>, vector<256x128xf32>,
    } else {
    }
    %c0 = arith.constant 0 : index
    %c0_1 = arith.constant 0 : index
    %3 = vector.load %arg7[%c0, %c0_1] : memref<256x128xf32, #tpu.memory_space<vmem>>, vector<256x128xf32>
    %c0_2 = arith.constant 0 : index
    %c0_3 = arith.constant 0 : index
    %4 = vector.load %arg3[%c0_2, %c0_3] : memref<256x128xbf16, #tpu.memory_space<vmem>>, vector<256x128xbf16>
    %c0_4 = arith.constant 0 : index
    %c0_5 = arith.constant 0 : index
    %5 = vector.load %arg4[%c0_4, %c0_5] : memref<128x128xbf16, #tpu.memory_space<vmem>>, vector<128x128xbf16>
    %cst = arith.constant dense<0.000000e+00> : vector<256x128xf32>
    %6 = tpu.matmul %4, %5, %cst {dimension_numbers = #tpu.dot_dimension_numbers<[1], [0], [0], [1], [0, 0, 1, 1], [], []>} : vector<256x128xbf16>, vector<128x128xbf16>, vector<256x128xf32> -> vector<256x128xf32>
    %7 = arith.addf %3, %6 : vector<256x128xf32>
    %c0_6 = arith.constant 0 : index
    %c0_7 = arith.constant 0 : index
    %8 = vector.load %arg7[%c0_6, %c0_7] : memref<256x128xf32, #tpu.memory_space<vmem>>, vector<256x128xf32>
    tpu.vector_store %arg7[%c0_6, %c0_7], %7 {strides = array<i32>} : memref<256x128xf32, #tpu.memory_space<vmem>>, vector<256x128xf32>,
    %c0_i32_8 = arith.constant 0 : i32
    %9 = arith.cmpi eq, %arg2, %c0_i32_8 : i32
    %10 = arith.extui %9 : i1 to i32
    %c0_i32_9 = arith.constant 0 : i32
    %11 = arith.cmpi ne, %10, %c0_i32_9 : i32
    scf.if %11 {
      %c0_10 = arith.constant 0 : index
      %c0_11 = arith.constant 0 : index
      %12 = vector.load %arg7[%c0_10, %c0_11] : memref<256x128xf32, #tpu.memory_space<vmem>>, vector<256x128xf32>
      %c0_12 = arith.constant 0 : index
      %c0_13 = arith.constant 0 : index
      %13 = vector.load %arg5[%c0_12, %c0_13] : memref<1x128xf32, #tpu.memory_space<vmem>>, vector<1x128xf32>
      %14 = vector.broadcast %13 : vector<1x128xf32> to vector<256x128xf32>
      %15 = arith.addf %12, %14 : vector<256x128xf32>
      %c0_14 = arith.constant 0 : index
      %c0_15 = arith.constant 0 : index
      %16 = vector.load %arg6[%c0_14, %c0_15] : memref<256x128xf32, #tpu.memory_space<vmem>>, vector<256x128xf32>
      tpu.vector_store %arg6[%c0_14, %c0_15], %15 {strides = array<i32>} : memref<256x128xf32, #tpu.memory_space<vmem>>, vector<256x128xf32>,
    } else {
    }
    return
  }
  func.func @transform_0(%arg0: i32, %arg1: i32, %arg2: i32) -> (i32, i32) {
    %c0_i32 = arith.constant 0 : i32
    return %arg0, %arg2 : i32, i32
  }
  func.func @transform_1(%arg0: i32, %arg1: i32, %arg2: i32) -> (i32, i32) {
    %c0_i32 = arith.constant 0 : i32
    return %arg2, %arg1 : i32, i32
  }
  func.func @transform_2(%arg0: i32, %arg1: i32, %arg2: i32) -> (i32, i32) {
    %c0_i32 = arith.constant 0 : i32
    %c0_i32_0 = arith.constant 0 : i32
    return %c0_i32, %arg1 : i32, i32
  }
  func.func @transform_3(%arg0: i32, %arg1: i32, %arg2: i32) -> (i32, i32) {
    %c0_i32 = arith.constant 0 : i32
    return %arg0, %arg1 : i32, i32
  }
}

module attributes {stable_mosaic.version = 11 : i64} {
  func.func @_groupnorm_kernel(%arg0: i32, %arg1: memref<1x256x32xf32, #tpu.memory_space<vmem>>, %arg2: memref<1x32xf32, #tpu.memory_space<vmem>>, %arg3: memref<1x32xf32, #tpu.memory_space<vmem>>, %arg4: memref<32x32xf32, #tpu.memory_space<vmem>>, %arg5: memref<32x32xf32, #tpu.memory_space<vmem>>, %arg6: memref<1x256x32xf32, #tpu.memory_space<vmem>>) attributes {dimension_semantics = [#tpu.dimension_semantics<parallel>], iteration_bounds = array<i64: 2>, scalar_prefetch = 0 : i64, scratch_operands = 0 : i64, tpu.core_type = #tpu.core_type<tc>, window_params = [{transform_indices = @transform_0, window_bounds = array<i64: 1, 256, 32>}, {pipeline_mode = #tpu.pipeline_mode<synchronous>, transform_indices = @transform_1, window_bounds = array<i64: 1, 32>}, {pipeline_mode = #tpu.pipeline_mode<synchronous>, transform_indices = @transform_2, window_bounds = array<i64: 1, 32>}, {pipeline_mode = #tpu.pipeline_mode<synchronous>, transform_indices = @transform_3, window_bounds = array<i64: 32, 32>}, {pipeline_mode = #tpu.pipeline_mode<synchronous>, transform_indices = @transform_4, window_bounds = array<i64: 32, 32>}, {transform_indices = @transform_5, window_bounds = array<i64: 1, 256, 32>}]} {
    %c0 = arith.constant 0 : index
    %c0_0 = arith.constant 0 : index
    %c0_1 = arith.constant 0 : index
    %0 = vector.load %arg1[%c0, %c0_0, %c0_1] : memref<1x256x32xf32, #tpu.memory_space<vmem>>, vector<1x256x32xf32>
    %1 = vector.shape_cast %0 : vector<1x256x32xf32> to vector<256x32xf32>
    %c0_2 = arith.constant 0 : index
    %c0_3 = arith.constant 0 : index
    %2 = vector.load %arg4[%c0_2, %c0_3] : memref<32x32xf32, #tpu.memory_space<vmem>>, vector<32x32xf32>
    %c0_4 = arith.constant 0 : index
    %c0_5 = arith.constant 0 : index
    %3 = vector.load %arg5[%c0_4, %c0_5] : memref<32x32xf32, #tpu.memory_space<vmem>>, vector<32x32xf32>
    %cst = arith.constant dense<0.000000e+00> : vector<32xf32>
    %4 = vector.multi_reduction <add>, %1, %cst [0] : vector<256x32xf32> to vector<32xf32>
    %5 = vector.shape_cast %4 : vector<32xf32> to vector<1x32xf32>
    %cst_6 = arith.constant dense<0.000000e+00> : vector<1x32xf32>
    %6 = tpu.matmul %5, %2, %cst_6 {dimension_numbers = #tpu.dot_dimension_numbers<[1], [0], [0], [1], [0, 0, 1, 1], [], []>} : vector<1x32xf32>, vector<32x32xf32>, vector<1x32xf32> -> vector<1x32xf32>
    %cst_7 = arith.constant 2.560000e+02 : f32
    %7 = vector.broadcast %cst_7 : f32 to vector<1x32xf32>
    %8 = arith.divf %6, %7 : vector<1x32xf32>
    %cst_8 = arith.constant dense<0.000000e+00> : vector<1x32xf32>
    %9 = tpu.matmul %8, %3, %cst_8 {dimension_numbers = #tpu.dot_dimension_numbers<[1], [0], [0], [1], [0, 0, 1, 1], [], []>} : vector<1x32xf32>, vector<32x32xf32>, vector<1x32xf32> -> vector<1x32xf32>
    %10 = vector.broadcast %9 : vector<1x32xf32> to vector<256x32xf32>
    %11 = arith.subf %1, %10 : vector<256x32xf32>
    %12 = arith.mulf %11, %11 : vector<256x32xf32>
    %cst_9 = arith.constant dense<0.000000e+00> : vector<32xf32>
    %13 = vector.multi_reduction <add>, %12, %cst_9 [0] : vector<256x32xf32> to vector<32xf32>
    %14 = vector.shape_cast %13 : vector<32xf32> to vector<1x32xf32>
    %cst_10 = arith.constant dense<0.000000e+00> : vector<1x32xf32>
    %15 = tpu.matmul %14, %2, %cst_10 {dimension_numbers = #tpu.dot_dimension_numbers<[1], [0], [0], [1], [0, 0, 1, 1], [], []>} : vector<1x32xf32>, vector<32x32xf32>, vector<1x32xf32> -> vector<1x32xf32>
    %cst_11 = arith.constant 2.560000e+02 : f32
    %16 = vector.broadcast %cst_11 : f32 to vector<1x32xf32>
    %17 = arith.divf %15, %16 : vector<1x32xf32>
    %cst_12 = arith.constant dense<0.000000e+00> : vector<1x32xf32>
    %18 = tpu.matmul %17, %3, %cst_12 {dimension_numbers = #tpu.dot_dimension_numbers<[1], [0], [0], [1], [0, 0, 1, 1], [], []>} : vector<1x32xf32>, vector<32x32xf32>, vector<1x32xf32> -> vector<1x32xf32>
    %cst_13 = arith.constant 9.99999997E-7 : f32
    %19 = vector.broadcast %cst_13 : f32 to vector<1x32xf32>
    %20 = arith.addf %18, %19 : vector<1x32xf32>
    %21 = math.rsqrt %20 : vector<1x32xf32>
    %22 = vector.broadcast %21 : vector<1x32xf32> to vector<256x32xf32>
    %23 = arith.mulf %11, %22 : vector<256x32xf32>
    %c0_14 = arith.constant 0 : index
    %c0_15 = arith.constant 0 : index
    %24 = vector.load %arg2[%c0_14, %c0_15] : memref<1x32xf32, #tpu.memory_space<vmem>>, vector<1x32xf32>
    %25 = vector.broadcast %24 : vector<1x32xf32> to vector<256x32xf32>
    %26 = arith.mulf %23, %25 : vector<256x32xf32>
    %c0_16 = arith.constant 0 : index
    %c0_17 = arith.constant 0 : index
    %27 = vector.load %arg3[%c0_16, %c0_17] : memref<1x32xf32, #tpu.memory_space<vmem>>, vector<1x32xf32>
    %28 = vector.broadcast %27 : vector<1x32xf32> to vector<256x32xf32>
    %29 = arith.addf %26, %28 : vector<256x32xf32>
    %cst_18 = arith.constant 0.000000e+00 : f32
    %30 = vector.broadcast %cst_18 : f32 to vector<256x32xf32>
    %31 = arith.subf %30, %29 : vector<256x32xf32>
    %32 = math.exp %31 : vector<256x32xf32>
    %cst_19 = arith.constant 1.000000e+00 : f32
    %33 = vector.broadcast %cst_19 : f32 to vector<256x32xf32>
    %34 = arith.addf %33, %32 : vector<256x32xf32>
    %cst_20 = arith.constant 1.000000e+00 : f32
    %35 = vector.broadcast %cst_20 : f32 to vector<256x32xf32>
    %36 = arith.divf %35, %34 : vector<256x32xf32>
    %37 = arith.mulf %29, %36 : vector<256x32xf32>
    %c0_21 = arith.constant 0 : index
    %c0_22 = arith.constant 0 : index
    %c0_23 = arith.constant 0 : index
    %38 = vector.load %arg6[%c0_21, %c0_22, %c0_23] : memref<1x256x32xf32, #tpu.memory_space<vmem>>, vector<1x256x32xf32>
    %39 = vector.shape_cast %38 : vector<1x256x32xf32> to vector<256x32xf32>
    %40 = vector.shape_cast %37 : vector<256x32xf32> to vector<1x256x32xf32>
    tpu.vector_store %arg6[%c0_21, %c0_22, %c0_23], %40 {strides = array<i32>} : memref<1x256x32xf32, #tpu.memory_space<vmem>>, vector<1x256x32xf32>,
    return
  }
  func.func @transform_0(%arg0: i32) -> (i32, i32, i32) {
    %c0_i32 = arith.constant 0 : i32
    %c0_i32_0 = arith.constant 0 : i32
    %c0_i32_1 = arith.constant 0 : i32
    return %arg0, %c0_i32, %c0_i32_0 : i32, i32, i32
  }
  func.func @transform_1(%arg0: i32) -> (i32, i32) {
    %c0_i32 = arith.constant 0 : i32
    %c0_i32_0 = arith.constant 0 : i32
    %c0_i32_1 = arith.constant 0 : i32
    return %c0_i32, %c0_i32_0 : i32, i32
  }
  func.func @transform_2(%arg0: i32) -> (i32, i32) {
    %c0_i32 = arith.constant 0 : i32
    %c0_i32_0 = arith.constant 0 : i32
    %c0_i32_1 = arith.constant 0 : i32
    return %c0_i32, %c0_i32_0 : i32, i32
  }
  func.func @transform_3(%arg0: i32) -> (i32, i32) {
    %c0_i32 = arith.constant 0 : i32
    %c0_i32_0 = arith.constant 0 : i32
    %c0_i32_1 = arith.constant 0 : i32
    return %c0_i32, %c0_i32_0 : i32, i32
  }
  func.func @transform_4(%arg0: i32) -> (i32, i32) {
    %c0_i32 = arith.constant 0 : i32
    %c0_i32_0 = arith.constant 0 : i32
    %c0_i32_1 = arith.constant 0 : i32
    return %c0_i32, %c0_i32_0 : i32, i32
  }
  func.func @transform_5(%arg0: i32) -> (i32, i32, i32) {
    %c0_i32 = arith.constant 0 : i32
    %c0_i32_0 = arith.constant 0 : i32
    %c0_i32_1 = arith.constant 0 : i32
    return %arg0, %c0_i32, %c0_i32_0 : i32, i32, i32
  }
}

module attributes {stable_mosaic.version = 11 : i64} {
  func.func @_mm_kernel(%arg0: i32, %arg1: i32, %arg2: i32, %arg3: memref<256x384xbf16, #tpu.memory_space<vmem>>, %arg4: memref<384x128xbf16, #tpu.memory_space<vmem>>, %arg5: memref<1x128xf32, #tpu.memory_space<vmem>>, %arg6: memref<256x128xf32, #tpu.memory_space<vmem>>, %arg7: memref<256x128xf32, #tpu.memory_space<vmem>>) attributes {dimension_semantics = [#tpu.dimension_semantics<parallel>, #tpu.dimension_semantics<parallel>, #tpu.dimension_semantics<arbitrary>], iteration_bounds = array<i64: 2, 1, 1>, scalar_prefetch = 0 : i64, scratch_operands = 1 : i64, tpu.core_type = #tpu.core_type<tc>, window_params = [{transform_indices = @transform_0, window_bounds = array<i64: 256, 384>}, {transform_indices = @transform_1, window_bounds = array<i64: 384, 128>}, {transform_indices = @transform_2, window_bounds = array<i64: 1, 128>}, {transform_indices = @transform_3, window_bounds = array<i64: 256, 128>}]} {
    %c0_i32 = arith.constant 0 : i32
    %0 = arith.cmpi eq, %arg2, %c0_i32 : i32
    %1 = arith.extui %0 : i1 to i32
    %c0_i32_0 = arith.constant 0 : i32
    %2 = arith.cmpi ne, %1, %c0_i32_0 : i32
    scf.if %2 {
      %cst_10 = arith.constant 0.000000e+00 : f32
      %12 = vector.broadcast %cst_10 : f32 to vector<256x128xf32>
      %c0_11 = arith.constant 0 : index
      %c0_12 = arith.constant 0 : index
      %13 = vector.load %arg7[%c0_11, %c0_12] : memref<256x128xf32, #tpu.memory_space<vmem>>, vector<256x128xf32>
      tpu.vector_store %arg7[%c0_11, %c0_12], %12 {strides = array<i32>} : memref<256x128xf32, #tpu.memory_space<vmem>>, vector<256x128xf32>,
    } else {
    }
    %c0 = arith.constant 0 : index
    %c0_1 = arith.constant 0 : index
    %3 = vector.load %arg7[%c0, %c0_1] : memref<256x128xf32, #tpu.memory_space<vmem>>, vector<256x128xf32>
    %c0_2 = arith.constant 0 : index
    %c0_3 = arith.constant 0 : index
    %4 = vector.load %arg3[%c0_2, %c0_3] : memref<256x384xbf16, #tpu.memory_space<vmem>>, vector<256x384xbf16>
    %c0_4 = arith.constant 0 : index
    %c0_5 = arith.constant 0 : index
    %5 = vector.load %arg4[%c0_4, %c0_5] : memref<384x128xbf16, #tpu.memory_space<vmem>>, vector<384x128xbf16>
    %cst = arith.constant dense<0.000000e+00> : vector<256x128xf32>
    %6 = tpu.matmul %4, %5, %cst {dimension_numbers = #tpu.dot_dimension_numbers<[1], [0], [0], [1], [0, 0, 1, 1], [], []>} : vector<256x384xbf16>, vector<384x128xbf16>, vector<256x128xf32> -> vector<256x128xf32>
    %7 = arith.addf %3, %6 : vector<256x128xf32>
    %c0_6 = arith.constant 0 : index
    %c0_7 = arith.constant 0 : index
    %8 = vector.load %arg7[%c0_6, %c0_7] : memref<256x128xf32, #tpu.memory_space<vmem>>, vector<256x128xf32>
    tpu.vector_store %arg7[%c0_6, %c0_7], %7 {strides = array<i32>} : memref<256x128xf32, #tpu.memory_space<vmem>>, vector<256x128xf32>,
    %c0_i32_8 = arith.constant 0 : i32
    %9 = arith.cmpi eq, %arg2, %c0_i32_8 : i32
    %10 = arith.extui %9 : i1 to i32
    %c0_i32_9 = arith.constant 0 : i32
    %11 = arith.cmpi ne, %10, %c0_i32_9 : i32
    scf.if %11 {
      %c0_10 = arith.constant 0 : index
      %c0_11 = arith.constant 0 : index
      %12 = vector.load %arg7[%c0_10, %c0_11] : memref<256x128xf32, #tpu.memory_space<vmem>>, vector<256x128xf32>
      %c0_12 = arith.constant 0 : index
      %c0_13 = arith.constant 0 : index
      %13 = vector.load %arg5[%c0_12, %c0_13] : memref<1x128xf32, #tpu.memory_space<vmem>>, vector<1x128xf32>
      %14 = vector.broadcast %13 : vector<1x128xf32> to vector<256x128xf32>
      %15 = arith.addf %12, %14 : vector<256x128xf32>
      %c0_14 = arith.constant 0 : index
      %c0_15 = arith.constant 0 : index
      %16 = vector.load %arg6[%c0_14, %c0_15] : memref<256x128xf32, #tpu.memory_space<vmem>>, vector<256x128xf32>
      tpu.vector_store %arg6[%c0_14, %c0_15], %15 {strides = array<i32>} : memref<256x128xf32, #tpu.memory_space<vmem>>, vector<256x128xf32>,
    } else {
    }
    return
  }
  func.func @transform_0(%arg0: i32, %arg1: i32, %arg2: i32) -> (i32, i32) {
    %c0_i32 = arith.constant 0 : i32
    return %arg0, %arg2 : i32, i32
  }
  func.func @transform_1(%arg0: i32, %arg1: i32, %arg2: i32) -> (i32, i32) {
    %c0_i32 = arith.constant 0 : i32
    return %arg2, %arg1 : i32, i32
  }
  func.func @transform_2(%arg0: i32, %arg1: i32, %arg2: i32) -> (i32, i32) {
    %c0_i32 = arith.constant 0 : i32
    %c0_i32_0 = arith.constant 0 : i32
    return %c0_i32, %arg1 : i32, i32
  }
  func.func @transform_3(%arg0: i32, %arg1: i32, %arg2: i32) -> (i32, i32) {
    %c0_i32 = arith.constant 0 : i32
    return %arg0, %arg1 : i32, i32
  }
}

module attributes {stable_mosaic.version = 11 : i64} {
  func.func @_mm_res_kernel(%arg0: i32, %arg1: i32, %arg2: i32, %arg3: memref<256x384xbf16, #tpu.memory_space<vmem>>, %arg4: memref<384x128xbf16, #tpu.memory_space<vmem>>, %arg5: memref<1x128xf32, #tpu.memory_space<vmem>>, %arg6: memref<256x128xf32, #tpu.memory_space<vmem>>, %arg7: memref<256x128xf32, #tpu.memory_space<vmem>>, %arg8: memref<256x128xf32, #tpu.memory_space<vmem>>) attributes {dimension_semantics = [#tpu.dimension_semantics<parallel>, #tpu.dimension_semantics<parallel>, #tpu.dimension_semantics<arbitrary>], iteration_bounds = array<i64: 2, 1, 1>, scalar_prefetch = 0 : i64, scratch_operands = 1 : i64, tpu.core_type = #tpu.core_type<tc>, window_params = [{transform_indices = @transform_0, window_bounds = array<i64: 256, 384>}, {transform_indices = @transform_1, window_bounds = array<i64: 384, 128>}, {transform_indices = @transform_2, window_bounds = array<i64: 1, 128>}, {transform_indices = @transform_3, window_bounds = array<i64: 256, 128>}, {transform_indices = @transform_4, window_bounds = array<i64: 256, 128>}]} {
    %c0_i32 = arith.constant 0 : i32
    %0 = arith.cmpi eq, %arg2, %c0_i32 : i32
    %1 = arith.extui %0 : i1 to i32
    %c0_i32_0 = arith.constant 0 : i32
    %2 = arith.cmpi ne, %1, %c0_i32_0 : i32
    scf.if %2 {
      %cst_10 = arith.constant 0.000000e+00 : f32
      %12 = vector.broadcast %cst_10 : f32 to vector<256x128xf32>
      %c0_11 = arith.constant 0 : index
      %c0_12 = arith.constant 0 : index
      %13 = vector.load %arg8[%c0_11, %c0_12] : memref<256x128xf32, #tpu.memory_space<vmem>>, vector<256x128xf32>
      tpu.vector_store %arg8[%c0_11, %c0_12], %12 {strides = array<i32>} : memref<256x128xf32, #tpu.memory_space<vmem>>, vector<256x128xf32>,
    } else {
    }
    %c0 = arith.constant 0 : index
    %c0_1 = arith.constant 0 : index
    %3 = vector.load %arg8[%c0, %c0_1] : memref<256x128xf32, #tpu.memory_space<vmem>>, vector<256x128xf32>
    %c0_2 = arith.constant 0 : index
    %c0_3 = arith.constant 0 : index
    %4 = vector.load %arg3[%c0_2, %c0_3] : memref<256x384xbf16, #tpu.memory_space<vmem>>, vector<256x384xbf16>
    %c0_4 = arith.constant 0 : index
    %c0_5 = arith.constant 0 : index
    %5 = vector.load %arg4[%c0_4, %c0_5] : memref<384x128xbf16, #tpu.memory_space<vmem>>, vector<384x128xbf16>
    %cst = arith.constant dense<0.000000e+00> : vector<256x128xf32>
    %6 = tpu.matmul %4, %5, %cst {dimension_numbers = #tpu.dot_dimension_numbers<[1], [0], [0], [1], [0, 0, 1, 1], [], []>} : vector<256x384xbf16>, vector<384x128xbf16>, vector<256x128xf32> -> vector<256x128xf32>
    %7 = arith.addf %3, %6 : vector<256x128xf32>
    %c0_6 = arith.constant 0 : index
    %c0_7 = arith.constant 0 : index
    %8 = vector.load %arg8[%c0_6, %c0_7] : memref<256x128xf32, #tpu.memory_space<vmem>>, vector<256x128xf32>
    tpu.vector_store %arg8[%c0_6, %c0_7], %7 {strides = array<i32>} : memref<256x128xf32, #tpu.memory_space<vmem>>, vector<256x128xf32>,
    %c0_i32_8 = arith.constant 0 : i32
    %9 = arith.cmpi eq, %arg2, %c0_i32_8 : i32
    %10 = arith.extui %9 : i1 to i32
    %c0_i32_9 = arith.constant 0 : i32
    %11 = arith.cmpi ne, %10, %c0_i32_9 : i32
    scf.if %11 {
      %c0_10 = arith.constant 0 : index
      %c0_11 = arith.constant 0 : index
      %12 = vector.load %arg8[%c0_10, %c0_11] : memref<256x128xf32, #tpu.memory_space<vmem>>, vector<256x128xf32>
      %c0_12 = arith.constant 0 : index
      %c0_13 = arith.constant 0 : index
      %13 = vector.load %arg5[%c0_12, %c0_13] : memref<1x128xf32, #tpu.memory_space<vmem>>, vector<1x128xf32>
      %14 = vector.broadcast %13 : vector<1x128xf32> to vector<256x128xf32>
      %15 = arith.addf %12, %14 : vector<256x128xf32>
      %c0_14 = arith.constant 0 : index
      %c0_15 = arith.constant 0 : index
      %16 = vector.load %arg6[%c0_14, %c0_15] : memref<256x128xf32, #tpu.memory_space<vmem>>, vector<256x128xf32>
      %17 = arith.addf %15, %16 : vector<256x128xf32>
      %c0_16 = arith.constant 0 : index
      %c0_17 = arith.constant 0 : index
      %18 = vector.load %arg7[%c0_16, %c0_17] : memref<256x128xf32, #tpu.memory_space<vmem>>, vector<256x128xf32>
      tpu.vector_store %arg7[%c0_16, %c0_17], %17 {strides = array<i32>} : memref<256x128xf32, #tpu.memory_space<vmem>>, vector<256x128xf32>,
    } else {
    }
    return
  }
  func.func @transform_0(%arg0: i32, %arg1: i32, %arg2: i32) -> (i32, i32) {
    %c0_i32 = arith.constant 0 : i32
    return %arg0, %arg2 : i32, i32
  }
  func.func @transform_1(%arg0: i32, %arg1: i32, %arg2: i32) -> (i32, i32) {
    %c0_i32 = arith.constant 0 : i32
    return %arg2, %arg1 : i32, i32
  }
  func.func @transform_2(%arg0: i32, %arg1: i32, %arg2: i32) -> (i32, i32) {
    %c0_i32 = arith.constant 0 : i32
    %c0_i32_0 = arith.constant 0 : i32
    return %c0_i32, %arg1 : i32, i32
  }
  func.func @transform_3(%arg0: i32, %arg1: i32, %arg2: i32) -> (i32, i32) {
    %c0_i32 = arith.constant 0 : i32
    return %arg0, %arg1 : i32, i32
  }
  func.func @transform_4(%arg0: i32, %arg1: i32, %arg2: i32) -> (i32, i32) {
    %c0_i32 = arith.constant 0 : i32
    return %arg0, %arg1 : i32, i32
  }
}

module attributes {stable_mosaic.version = 11 : i64} {
  func.func @_groupnorm_kernel(%arg0: i32, %arg1: memref<1x64x32xf32, #tpu.memory_space<vmem>>, %arg2: memref<1x32xf32, #tpu.memory_space<vmem>>, %arg3: memref<1x32xf32, #tpu.memory_space<vmem>>, %arg4: memref<32x32xf32, #tpu.memory_space<vmem>>, %arg5: memref<32x32xf32, #tpu.memory_space<vmem>>, %arg6: memref<1x64x32xf32, #tpu.memory_space<vmem>>) attributes {dimension_semantics = [#tpu.dimension_semantics<parallel>], iteration_bounds = array<i64: 2>, scalar_prefetch = 0 : i64, scratch_operands = 0 : i64, tpu.core_type = #tpu.core_type<tc>, window_params = [{transform_indices = @transform_0, window_bounds = array<i64: 1, 64, 32>}, {pipeline_mode = #tpu.pipeline_mode<synchronous>, transform_indices = @transform_1, window_bounds = array<i64: 1, 32>}, {pipeline_mode = #tpu.pipeline_mode<synchronous>, transform_indices = @transform_2, window_bounds = array<i64: 1, 32>}, {pipeline_mode = #tpu.pipeline_mode<synchronous>, transform_indices = @transform_3, window_bounds = array<i64: 32, 32>}, {pipeline_mode = #tpu.pipeline_mode<synchronous>, transform_indices = @transform_4, window_bounds = array<i64: 32, 32>}, {transform_indices = @transform_5, window_bounds = array<i64: 1, 64, 32>}]} {
    %c0 = arith.constant 0 : index
    %c0_0 = arith.constant 0 : index
    %c0_1 = arith.constant 0 : index
    %0 = vector.load %arg1[%c0, %c0_0, %c0_1] : memref<1x64x32xf32, #tpu.memory_space<vmem>>, vector<1x64x32xf32>
    %1 = vector.shape_cast %0 : vector<1x64x32xf32> to vector<64x32xf32>
    %c0_2 = arith.constant 0 : index
    %c0_3 = arith.constant 0 : index
    %2 = vector.load %arg4[%c0_2, %c0_3] : memref<32x32xf32, #tpu.memory_space<vmem>>, vector<32x32xf32>
    %c0_4 = arith.constant 0 : index
    %c0_5 = arith.constant 0 : index
    %3 = vector.load %arg5[%c0_4, %c0_5] : memref<32x32xf32, #tpu.memory_space<vmem>>, vector<32x32xf32>
    %cst = arith.constant dense<0.000000e+00> : vector<32xf32>
    %4 = vector.multi_reduction <add>, %1, %cst [0] : vector<64x32xf32> to vector<32xf32>
    %5 = vector.shape_cast %4 : vector<32xf32> to vector<1x32xf32>
    %cst_6 = arith.constant dense<0.000000e+00> : vector<1x32xf32>
    %6 = tpu.matmul %5, %2, %cst_6 {dimension_numbers = #tpu.dot_dimension_numbers<[1], [0], [0], [1], [0, 0, 1, 1], [], []>} : vector<1x32xf32>, vector<32x32xf32>, vector<1x32xf32> -> vector<1x32xf32>
    %cst_7 = arith.constant 6.400000e+01 : f32
    %7 = vector.broadcast %cst_7 : f32 to vector<1x32xf32>
    %8 = arith.divf %6, %7 : vector<1x32xf32>
    %cst_8 = arith.constant dense<0.000000e+00> : vector<1x32xf32>
    %9 = tpu.matmul %8, %3, %cst_8 {dimension_numbers = #tpu.dot_dimension_numbers<[1], [0], [0], [1], [0, 0, 1, 1], [], []>} : vector<1x32xf32>, vector<32x32xf32>, vector<1x32xf32> -> vector<1x32xf32>
    %10 = vector.broadcast %9 : vector<1x32xf32> to vector<64x32xf32>
    %11 = arith.subf %1, %10 : vector<64x32xf32>
    %12 = arith.mulf %11, %11 : vector<64x32xf32>
    %cst_9 = arith.constant dense<0.000000e+00> : vector<32xf32>
    %13 = vector.multi_reduction <add>, %12, %cst_9 [0] : vector<64x32xf32> to vector<32xf32>
    %14 = vector.shape_cast %13 : vector<32xf32> to vector<1x32xf32>
    %cst_10 = arith.constant dense<0.000000e+00> : vector<1x32xf32>
    %15 = tpu.matmul %14, %2, %cst_10 {dimension_numbers = #tpu.dot_dimension_numbers<[1], [0], [0], [1], [0, 0, 1, 1], [], []>} : vector<1x32xf32>, vector<32x32xf32>, vector<1x32xf32> -> vector<1x32xf32>
    %cst_11 = arith.constant 6.400000e+01 : f32
    %16 = vector.broadcast %cst_11 : f32 to vector<1x32xf32>
    %17 = arith.divf %15, %16 : vector<1x32xf32>
    %cst_12 = arith.constant dense<0.000000e+00> : vector<1x32xf32>
    %18 = tpu.matmul %17, %3, %cst_12 {dimension_numbers = #tpu.dot_dimension_numbers<[1], [0], [0], [1], [0, 0, 1, 1], [], []>} : vector<1x32xf32>, vector<32x32xf32>, vector<1x32xf32> -> vector<1x32xf32>
    %cst_13 = arith.constant 9.99999997E-7 : f32
    %19 = vector.broadcast %cst_13 : f32 to vector<1x32xf32>
    %20 = arith.addf %18, %19 : vector<1x32xf32>
    %21 = math.rsqrt %20 : vector<1x32xf32>
    %22 = vector.broadcast %21 : vector<1x32xf32> to vector<64x32xf32>
    %23 = arith.mulf %11, %22 : vector<64x32xf32>
    %c0_14 = arith.constant 0 : index
    %c0_15 = arith.constant 0 : index
    %24 = vector.load %arg2[%c0_14, %c0_15] : memref<1x32xf32, #tpu.memory_space<vmem>>, vector<1x32xf32>
    %25 = vector.broadcast %24 : vector<1x32xf32> to vector<64x32xf32>
    %26 = arith.mulf %23, %25 : vector<64x32xf32>
    %c0_16 = arith.constant 0 : index
    %c0_17 = arith.constant 0 : index
    %27 = vector.load %arg3[%c0_16, %c0_17] : memref<1x32xf32, #tpu.memory_space<vmem>>, vector<1x32xf32>
    %28 = vector.broadcast %27 : vector<1x32xf32> to vector<64x32xf32>
    %29 = arith.addf %26, %28 : vector<64x32xf32>
    %cst_18 = arith.constant 0.000000e+00 : f32
    %30 = vector.broadcast %cst_18 : f32 to vector<64x32xf32>
    %31 = arith.subf %30, %29 : vector<64x32xf32>
    %32 = math.exp %31 : vector<64x32xf32>
    %cst_19 = arith.constant 1.000000e+00 : f32
    %33 = vector.broadcast %cst_19 : f32 to vector<64x32xf32>
    %34 = arith.addf %33, %32 : vector<64x32xf32>
    %cst_20 = arith.constant 1.000000e+00 : f32
    %35 = vector.broadcast %cst_20 : f32 to vector<64x32xf32>
    %36 = arith.divf %35, %34 : vector<64x32xf32>
    %37 = arith.mulf %29, %36 : vector<64x32xf32>
    %c0_21 = arith.constant 0 : index
    %c0_22 = arith.constant 0 : index
    %c0_23 = arith.constant 0 : index
    %38 = vector.load %arg6[%c0_21, %c0_22, %c0_23] : memref<1x64x32xf32, #tpu.memory_space<vmem>>, vector<1x64x32xf32>
    %39 = vector.shape_cast %38 : vector<1x64x32xf32> to vector<64x32xf32>
    %40 = vector.shape_cast %37 : vector<64x32xf32> to vector<1x64x32xf32>
    tpu.vector_store %arg6[%c0_21, %c0_22, %c0_23], %40 {strides = array<i32>} : memref<1x64x32xf32, #tpu.memory_space<vmem>>, vector<1x64x32xf32>,
    return
  }
  func.func @transform_0(%arg0: i32) -> (i32, i32, i32) {
    %c0_i32 = arith.constant 0 : i32
    %c0_i32_0 = arith.constant 0 : i32
    %c0_i32_1 = arith.constant 0 : i32
    return %arg0, %c0_i32, %c0_i32_0 : i32, i32, i32
  }
  func.func @transform_1(%arg0: i32) -> (i32, i32) {
    %c0_i32 = arith.constant 0 : i32
    %c0_i32_0 = arith.constant 0 : i32
    %c0_i32_1 = arith.constant 0 : i32
    return %c0_i32, %c0_i32_0 : i32, i32
  }
  func.func @transform_2(%arg0: i32) -> (i32, i32) {
    %c0_i32 = arith.constant 0 : i32
    %c0_i32_0 = arith.constant 0 : i32
    %c0_i32_1 = arith.constant 0 : i32
    return %c0_i32, %c0_i32_0 : i32, i32
  }
  func.func @transform_3(%arg0: i32) -> (i32, i32) {
    %c0_i32 = arith.constant 0 : i32
    %c0_i32_0 = arith.constant 0 : i32
    %c0_i32_1 = arith.constant 0 : i32
    return %c0_i32, %c0_i32_0 : i32, i32
  }
  func.func @transform_4(%arg0: i32) -> (i32, i32) {
    %c0_i32 = arith.constant 0 : i32
    %c0_i32_0 = arith.constant 0 : i32
    %c0_i32_1 = arith.constant 0 : i32
    return %c0_i32, %c0_i32_0 : i32, i32
  }
  func.func @transform_5(%arg0: i32) -> (i32, i32, i32) {
    %c0_i32 = arith.constant 0 : i32
    %c0_i32_0 = arith.constant 0 : i32
    %c0_i32_1 = arith.constant 0 : i32
    return %arg0, %c0_i32, %c0_i32_0 : i32, i32, i32
  }
}

module attributes {stable_mosaic.version = 11 : i64} {
  func.func @_mm_kernel(%arg0: i32, %arg1: i32, %arg2: i32, %arg3: memref<128x384xbf16, #tpu.memory_space<vmem>>, %arg4: memref<384x128xbf16, #tpu.memory_space<vmem>>, %arg5: memref<1x128xf32, #tpu.memory_space<vmem>>, %arg6: memref<128x128xf32, #tpu.memory_space<vmem>>, %arg7: memref<128x128xf32, #tpu.memory_space<vmem>>) attributes {dimension_semantics = [#tpu.dimension_semantics<parallel>, #tpu.dimension_semantics<parallel>, #tpu.dimension_semantics<arbitrary>], iteration_bounds = array<i64: 1, 1, 1>, scalar_prefetch = 0 : i64, scratch_operands = 1 : i64, tpu.core_type = #tpu.core_type<tc>, window_params = [{transform_indices = @transform_0, window_bounds = array<i64: 128, 384>}, {transform_indices = @transform_1, window_bounds = array<i64: 384, 128>}, {transform_indices = @transform_2, window_bounds = array<i64: 1, 128>}, {transform_indices = @transform_3, window_bounds = array<i64: 128, 128>}]} {
    %c0_i32 = arith.constant 0 : i32
    %0 = arith.cmpi eq, %arg2, %c0_i32 : i32
    %1 = arith.extui %0 : i1 to i32
    %c0_i32_0 = arith.constant 0 : i32
    %2 = arith.cmpi ne, %1, %c0_i32_0 : i32
    scf.if %2 {
      %cst_10 = arith.constant 0.000000e+00 : f32
      %12 = vector.broadcast %cst_10 : f32 to vector<128x128xf32>
      %c0_11 = arith.constant 0 : index
      %c0_12 = arith.constant 0 : index
      %13 = vector.load %arg7[%c0_11, %c0_12] : memref<128x128xf32, #tpu.memory_space<vmem>>, vector<128x128xf32>
      tpu.vector_store %arg7[%c0_11, %c0_12], %12 {strides = array<i32>} : memref<128x128xf32, #tpu.memory_space<vmem>>, vector<128x128xf32>,
    } else {
    }
    %c0 = arith.constant 0 : index
    %c0_1 = arith.constant 0 : index
    %3 = vector.load %arg7[%c0, %c0_1] : memref<128x128xf32, #tpu.memory_space<vmem>>, vector<128x128xf32>
    %c0_2 = arith.constant 0 : index
    %c0_3 = arith.constant 0 : index
    %4 = vector.load %arg3[%c0_2, %c0_3] : memref<128x384xbf16, #tpu.memory_space<vmem>>, vector<128x384xbf16>
    %c0_4 = arith.constant 0 : index
    %c0_5 = arith.constant 0 : index
    %5 = vector.load %arg4[%c0_4, %c0_5] : memref<384x128xbf16, #tpu.memory_space<vmem>>, vector<384x128xbf16>
    %cst = arith.constant dense<0.000000e+00> : vector<128x128xf32>
    %6 = tpu.matmul %4, %5, %cst {dimension_numbers = #tpu.dot_dimension_numbers<[1], [0], [0], [1], [0, 0, 1, 1], [], []>} : vector<128x384xbf16>, vector<384x128xbf16>, vector<128x128xf32> -> vector<128x128xf32>
    %7 = arith.addf %3, %6 : vector<128x128xf32>
    %c0_6 = arith.constant 0 : index
    %c0_7 = arith.constant 0 : index
    %8 = vector.load %arg7[%c0_6, %c0_7] : memref<128x128xf32, #tpu.memory_space<vmem>>, vector<128x128xf32>
    tpu.vector_store %arg7[%c0_6, %c0_7], %7 {strides = array<i32>} : memref<128x128xf32, #tpu.memory_space<vmem>>, vector<128x128xf32>,
    %c0_i32_8 = arith.constant 0 : i32
    %9 = arith.cmpi eq, %arg2, %c0_i32_8 : i32
    %10 = arith.extui %9 : i1 to i32
    %c0_i32_9 = arith.constant 0 : i32
    %11 = arith.cmpi ne, %10, %c0_i32_9 : i32
    scf.if %11 {
      %c0_10 = arith.constant 0 : index
      %c0_11 = arith.constant 0 : index
      %12 = vector.load %arg7[%c0_10, %c0_11] : memref<128x128xf32, #tpu.memory_space<vmem>>, vector<128x128xf32>
      %c0_12 = arith.constant 0 : index
      %c0_13 = arith.constant 0 : index
      %13 = vector.load %arg5[%c0_12, %c0_13] : memref<1x128xf32, #tpu.memory_space<vmem>>, vector<1x128xf32>
      %14 = vector.broadcast %13 : vector<1x128xf32> to vector<128x128xf32>
      %15 = arith.addf %12, %14 : vector<128x128xf32>
      %c0_14 = arith.constant 0 : index
      %c0_15 = arith.constant 0 : index
      %16 = vector.load %arg6[%c0_14, %c0_15] : memref<128x128xf32, #tpu.memory_space<vmem>>, vector<128x128xf32>
      tpu.vector_store %arg6[%c0_14, %c0_15], %15 {strides = array<i32>} : memref<128x128xf32, #tpu.memory_space<vmem>>, vector<128x128xf32>,
    } else {
    }
    return
  }
  func.func @transform_0(%arg0: i32, %arg1: i32, %arg2: i32) -> (i32, i32) {
    %c0_i32 = arith.constant 0 : i32
    return %arg0, %arg2 : i32, i32
  }
  func.func @transform_1(%arg0: i32, %arg1: i32, %arg2: i32) -> (i32, i32) {
    %c0_i32 = arith.constant 0 : i32
    return %arg2, %arg1 : i32, i32
  }
  func.func @transform_2(%arg0: i32, %arg1: i32, %arg2: i32) -> (i32, i32) {
    %c0_i32 = arith.constant 0 : i32
    %c0_i32_0 = arith.constant 0 : i32
    return %c0_i32, %arg1 : i32, i32
  }
  func.func @transform_3(%arg0: i32, %arg1: i32, %arg2: i32) -> (i32, i32) {
    %c0_i32 = arith.constant 0 : i32
    return %arg0, %arg1 : i32, i32
  }
}

module attributes {stable_mosaic.version = 11 : i64} {
  func.func @_groupnorm_kernel(%arg0: i32, %arg1: memref<1x64x64xf32, #tpu.memory_space<vmem>>, %arg2: memref<1x64xf32, #tpu.memory_space<vmem>>, %arg3: memref<1x64xf32, #tpu.memory_space<vmem>>, %arg4: memref<64x32xf32, #tpu.memory_space<vmem>>, %arg5: memref<32x64xf32, #tpu.memory_space<vmem>>, %arg6: memref<1x64x64xf32, #tpu.memory_space<vmem>>) attributes {dimension_semantics = [#tpu.dimension_semantics<parallel>], iteration_bounds = array<i64: 2>, scalar_prefetch = 0 : i64, scratch_operands = 0 : i64, tpu.core_type = #tpu.core_type<tc>, window_params = [{transform_indices = @transform_0, window_bounds = array<i64: 1, 64, 64>}, {pipeline_mode = #tpu.pipeline_mode<synchronous>, transform_indices = @transform_1, window_bounds = array<i64: 1, 64>}, {pipeline_mode = #tpu.pipeline_mode<synchronous>, transform_indices = @transform_2, window_bounds = array<i64: 1, 64>}, {pipeline_mode = #tpu.pipeline_mode<synchronous>, transform_indices = @transform_3, window_bounds = array<i64: 64, 32>}, {pipeline_mode = #tpu.pipeline_mode<synchronous>, transform_indices = @transform_4, window_bounds = array<i64: 32, 64>}, {transform_indices = @transform_5, window_bounds = array<i64: 1, 64, 64>}]} {
    %c0 = arith.constant 0 : index
    %c0_0 = arith.constant 0 : index
    %c0_1 = arith.constant 0 : index
    %0 = vector.load %arg1[%c0, %c0_0, %c0_1] : memref<1x64x64xf32, #tpu.memory_space<vmem>>, vector<1x64x64xf32>
    %1 = vector.shape_cast %0 : vector<1x64x64xf32> to vector<64x64xf32>
    %c0_2 = arith.constant 0 : index
    %c0_3 = arith.constant 0 : index
    %2 = vector.load %arg4[%c0_2, %c0_3] : memref<64x32xf32, #tpu.memory_space<vmem>>, vector<64x32xf32>
    %c0_4 = arith.constant 0 : index
    %c0_5 = arith.constant 0 : index
    %3 = vector.load %arg5[%c0_4, %c0_5] : memref<32x64xf32, #tpu.memory_space<vmem>>, vector<32x64xf32>
    %cst = arith.constant dense<0.000000e+00> : vector<64xf32>
    %4 = vector.multi_reduction <add>, %1, %cst [0] : vector<64x64xf32> to vector<64xf32>
    %5 = vector.shape_cast %4 : vector<64xf32> to vector<1x64xf32>
    %cst_6 = arith.constant dense<0.000000e+00> : vector<1x32xf32>
    %6 = tpu.matmul %5, %2, %cst_6 {dimension_numbers = #tpu.dot_dimension_numbers<[1], [0], [0], [1], [0, 0, 1, 1], [], []>} : vector<1x64xf32>, vector<64x32xf32>, vector<1x32xf32> -> vector<1x32xf32>
    %cst_7 = arith.constant 1.280000e+02 : f32
    %7 = vector.broadcast %cst_7 : f32 to vector<1x32xf32>
    %8 = arith.divf %6, %7 : vector<1x32xf32>
    %cst_8 = arith.constant dense<0.000000e+00> : vector<1x64xf32>
    %9 = tpu.matmul %8, %3, %cst_8 {dimension_numbers = #tpu.dot_dimension_numbers<[1], [0], [0], [1], [0, 0, 1, 1], [], []>} : vector<1x32xf32>, vector<32x64xf32>, vector<1x64xf32> -> vector<1x64xf32>
    %10 = vector.broadcast %9 : vector<1x64xf32> to vector<64x64xf32>
    %11 = arith.subf %1, %10 : vector<64x64xf32>
    %12 = arith.mulf %11, %11 : vector<64x64xf32>
    %cst_9 = arith.constant dense<0.000000e+00> : vector<64xf32>
    %13 = vector.multi_reduction <add>, %12, %cst_9 [0] : vector<64x64xf32> to vector<64xf32>
    %14 = vector.shape_cast %13 : vector<64xf32> to vector<1x64xf32>
    %cst_10 = arith.constant dense<0.000000e+00> : vector<1x32xf32>
    %15 = tpu.matmul %14, %2, %cst_10 {dimension_numbers = #tpu.dot_dimension_numbers<[1], [0], [0], [1], [0, 0, 1, 1], [], []>} : vector<1x64xf32>, vector<64x32xf32>, vector<1x32xf32> -> vector<1x32xf32>
    %cst_11 = arith.constant 1.280000e+02 : f32
    %16 = vector.broadcast %cst_11 : f32 to vector<1x32xf32>
    %17 = arith.divf %15, %16 : vector<1x32xf32>
    %cst_12 = arith.constant dense<0.000000e+00> : vector<1x64xf32>
    %18 = tpu.matmul %17, %3, %cst_12 {dimension_numbers = #tpu.dot_dimension_numbers<[1], [0], [0], [1], [0, 0, 1, 1], [], []>} : vector<1x32xf32>, vector<32x64xf32>, vector<1x64xf32> -> vector<1x64xf32>
    %cst_13 = arith.constant 9.99999997E-7 : f32
    %19 = vector.broadcast %cst_13 : f32 to vector<1x64xf32>
    %20 = arith.addf %18, %19 : vector<1x64xf32>
    %21 = math.rsqrt %20 : vector<1x64xf32>
    %22 = vector.broadcast %21 : vector<1x64xf32> to vector<64x64xf32>
    %23 = arith.mulf %11, %22 : vector<64x64xf32>
    %c0_14 = arith.constant 0 : index
    %c0_15 = arith.constant 0 : index
    %24 = vector.load %arg2[%c0_14, %c0_15] : memref<1x64xf32, #tpu.memory_space<vmem>>, vector<1x64xf32>
    %25 = vector.broadcast %24 : vector<1x64xf32> to vector<64x64xf32>
    %26 = arith.mulf %23, %25 : vector<64x64xf32>
    %c0_16 = arith.constant 0 : index
    %c0_17 = arith.constant 0 : index
    %27 = vector.load %arg3[%c0_16, %c0_17] : memref<1x64xf32, #tpu.memory_space<vmem>>, vector<1x64xf32>
    %28 = vector.broadcast %27 : vector<1x64xf32> to vector<64x64xf32>
    %29 = arith.addf %26, %28 : vector<64x64xf32>
    %cst_18 = arith.constant 0.000000e+00 : f32
    %30 = vector.broadcast %cst_18 : f32 to vector<64x64xf32>
    %31 = arith.subf %30, %29 : vector<64x64xf32>
    %32 = math.exp %31 : vector<64x64xf32>
    %cst_19 = arith.constant 1.000000e+00 : f32
    %33 = vector.broadcast %cst_19 : f32 to vector<64x64xf32>
    %34 = arith.addf %33, %32 : vector<64x64xf32>
    %cst_20 = arith.constant 1.000000e+00 : f32
    %35 = vector.broadcast %cst_20 : f32 to vector<64x64xf32>
    %36 = arith.divf %35, %34 : vector<64x64xf32>
    %37 = arith.mulf %29, %36 : vector<64x64xf32>
    %c0_21 = arith.constant 0 : index
    %c0_22 = arith.constant 0 : index
    %c0_23 = arith.constant 0 : index
    %38 = vector.load %arg6[%c0_21, %c0_22, %c0_23] : memref<1x64x64xf32, #tpu.memory_space<vmem>>, vector<1x64x64xf32>
    %39 = vector.shape_cast %38 : vector<1x64x64xf32> to vector<64x64xf32>
    %40 = vector.shape_cast %37 : vector<64x64xf32> to vector<1x64x64xf32>
    tpu.vector_store %arg6[%c0_21, %c0_22, %c0_23], %40 {strides = array<i32>} : memref<1x64x64xf32, #tpu.memory_space<vmem>>, vector<1x64x64xf32>,
    return
  }
  func.func @transform_0(%arg0: i32) -> (i32, i32, i32) {
    %c0_i32 = arith.constant 0 : i32
    %c0_i32_0 = arith.constant 0 : i32
    %c0_i32_1 = arith.constant 0 : i32
    return %arg0, %c0_i32, %c0_i32_0 : i32, i32, i32
  }
  func.func @transform_1(%arg0: i32) -> (i32, i32) {
    %c0_i32 = arith.constant 0 : i32
    %c0_i32_0 = arith.constant 0 : i32
    %c0_i32_1 = arith.constant 0 : i32
    return %c0_i32, %c0_i32_0 : i32, i32
  }
  func.func @transform_2(%arg0: i32) -> (i32, i32) {
    %c0_i32 = arith.constant 0 : i32
    %c0_i32_0 = arith.constant 0 : i32
    %c0_i32_1 = arith.constant 0 : i32
    return %c0_i32, %c0_i32_0 : i32, i32
  }
  func.func @transform_3(%arg0: i32) -> (i32, i32) {
    %c0_i32 = arith.constant 0 : i32
    %c0_i32_0 = arith.constant 0 : i32
    %c0_i32_1 = arith.constant 0 : i32
    return %c0_i32, %c0_i32_0 : i32, i32
  }
  func.func @transform_4(%arg0: i32) -> (i32, i32) {
    %c0_i32 = arith.constant 0 : i32
    %c0_i32_0 = arith.constant 0 : i32
    %c0_i32_1 = arith.constant 0 : i32
    return %c0_i32, %c0_i32_0 : i32, i32
  }
  func.func @transform_5(%arg0: i32) -> (i32, i32, i32) {
    %c0_i32 = arith.constant 0 : i32
    %c0_i32_0 = arith.constant 0 : i32
    %c0_i32_1 = arith.constant 0 : i32
    return %arg0, %c0_i32, %c0_i32_0 : i32, i32, i32
  }
}

module attributes {stable_mosaic.version = 11 : i64} {
  func.func @_mm_kernel(%arg0: i32, %arg1: i32, %arg2: i32, %arg3: memref<128x128xbf16, #tpu.memory_space<vmem>>, %arg4: memref<128x128xbf16, #tpu.memory_space<vmem>>, %arg5: memref<1x128xf32, #tpu.memory_space<vmem>>, %arg6: memref<128x128xf32, #tpu.memory_space<vmem>>, %arg7: memref<128x128xf32, #tpu.memory_space<vmem>>) attributes {dimension_semantics = [#tpu.dimension_semantics<parallel>, #tpu.dimension_semantics<parallel>, #tpu.dimension_semantics<arbitrary>], iteration_bounds = array<i64: 1, 1, 1>, scalar_prefetch = 0 : i64, scratch_operands = 1 : i64, tpu.core_type = #tpu.core_type<tc>, window_params = [{transform_indices = @transform_0, window_bounds = array<i64: 128, 128>}, {transform_indices = @transform_1, window_bounds = array<i64: 128, 128>}, {transform_indices = @transform_2, window_bounds = array<i64: 1, 128>}, {transform_indices = @transform_3, window_bounds = array<i64: 128, 128>}]} {
    %c0_i32 = arith.constant 0 : i32
    %0 = arith.cmpi eq, %arg2, %c0_i32 : i32
    %1 = arith.extui %0 : i1 to i32
    %c0_i32_0 = arith.constant 0 : i32
    %2 = arith.cmpi ne, %1, %c0_i32_0 : i32
    scf.if %2 {
      %cst_10 = arith.constant 0.000000e+00 : f32
      %12 = vector.broadcast %cst_10 : f32 to vector<128x128xf32>
      %c0_11 = arith.constant 0 : index
      %c0_12 = arith.constant 0 : index
      %13 = vector.load %arg7[%c0_11, %c0_12] : memref<128x128xf32, #tpu.memory_space<vmem>>, vector<128x128xf32>
      tpu.vector_store %arg7[%c0_11, %c0_12], %12 {strides = array<i32>} : memref<128x128xf32, #tpu.memory_space<vmem>>, vector<128x128xf32>,
    } else {
    }
    %c0 = arith.constant 0 : index
    %c0_1 = arith.constant 0 : index
    %3 = vector.load %arg7[%c0, %c0_1] : memref<128x128xf32, #tpu.memory_space<vmem>>, vector<128x128xf32>
    %c0_2 = arith.constant 0 : index
    %c0_3 = arith.constant 0 : index
    %4 = vector.load %arg3[%c0_2, %c0_3] : memref<128x128xbf16, #tpu.memory_space<vmem>>, vector<128x128xbf16>
    %c0_4 = arith.constant 0 : index
    %c0_5 = arith.constant 0 : index
    %5 = vector.load %arg4[%c0_4, %c0_5] : memref<128x128xbf16, #tpu.memory_space<vmem>>, vector<128x128xbf16>
    %cst = arith.constant dense<0.000000e+00> : vector<128x128xf32>
    %6 = tpu.matmul %4, %5, %cst {dimension_numbers = #tpu.dot_dimension_numbers<[1], [0], [0], [1], [0, 0, 1, 1], [], []>} : vector<128x128xbf16>, vector<128x128xbf16>, vector<128x128xf32> -> vector<128x128xf32>
    %7 = arith.addf %3, %6 : vector<128x128xf32>
    %c0_6 = arith.constant 0 : index
    %c0_7 = arith.constant 0 : index
    %8 = vector.load %arg7[%c0_6, %c0_7] : memref<128x128xf32, #tpu.memory_space<vmem>>, vector<128x128xf32>
    tpu.vector_store %arg7[%c0_6, %c0_7], %7 {strides = array<i32>} : memref<128x128xf32, #tpu.memory_space<vmem>>, vector<128x128xf32>,
    %c0_i32_8 = arith.constant 0 : i32
    %9 = arith.cmpi eq, %arg2, %c0_i32_8 : i32
    %10 = arith.extui %9 : i1 to i32
    %c0_i32_9 = arith.constant 0 : i32
    %11 = arith.cmpi ne, %10, %c0_i32_9 : i32
    scf.if %11 {
      %c0_10 = arith.constant 0 : index
      %c0_11 = arith.constant 0 : index
      %12 = vector.load %arg7[%c0_10, %c0_11] : memref<128x128xf32, #tpu.memory_space<vmem>>, vector<128x128xf32>
      %c0_12 = arith.constant 0 : index
      %c0_13 = arith.constant 0 : index
      %13 = vector.load %arg5[%c0_12, %c0_13] : memref<1x128xf32, #tpu.memory_space<vmem>>, vector<1x128xf32>
      %14 = vector.broadcast %13 : vector<1x128xf32> to vector<128x128xf32>
      %15 = arith.addf %12, %14 : vector<128x128xf32>
      %c0_14 = arith.constant 0 : index
      %c0_15 = arith.constant 0 : index
      %16 = vector.load %arg6[%c0_14, %c0_15] : memref<128x128xf32, #tpu.memory_space<vmem>>, vector<128x128xf32>
      tpu.vector_store %arg6[%c0_14, %c0_15], %15 {strides = array<i32>} : memref<128x128xf32, #tpu.memory_space<vmem>>, vector<128x128xf32>,
    } else {
    }
    return
  }
  func.func @transform_0(%arg0: i32, %arg1: i32, %arg2: i32) -> (i32, i32) {
    %c0_i32 = arith.constant 0 : i32
    return %arg0, %arg2 : i32, i32
  }
  func.func @transform_1(%arg0: i32, %arg1: i32, %arg2: i32) -> (i32, i32) {
    %c0_i32 = arith.constant 0 : i32
    return %arg2, %arg1 : i32, i32
  }
  func.func @transform_2(%arg0: i32, %arg1: i32, %arg2: i32) -> (i32, i32) {
    %c0_i32 = arith.constant 0 : i32
    %c0_i32_0 = arith.constant 0 : i32
    return %c0_i32, %arg1 : i32, i32
  }
  func.func @transform_3(%arg0: i32, %arg1: i32, %arg2: i32) -> (i32, i32) {
    %c0_i32 = arith.constant 0 : i32
    return %arg0, %arg1 : i32, i32
  }
}

module attributes {stable_mosaic.version = 11 : i64} {
  func.func @_mm_res_kernel(%arg0: i32, %arg1: i32, %arg2: i32, %arg3: memref<128x128xbf16, #tpu.memory_space<vmem>>, %arg4: memref<128x128xbf16, #tpu.memory_space<vmem>>, %arg5: memref<1x128xf32, #tpu.memory_space<vmem>>, %arg6: memref<128x128xf32, #tpu.memory_space<vmem>>, %arg7: memref<128x128xf32, #tpu.memory_space<vmem>>, %arg8: memref<128x128xf32, #tpu.memory_space<vmem>>) attributes {dimension_semantics = [#tpu.dimension_semantics<parallel>, #tpu.dimension_semantics<parallel>, #tpu.dimension_semantics<arbitrary>], iteration_bounds = array<i64: 1, 1, 5>, scalar_prefetch = 0 : i64, scratch_operands = 1 : i64, tpu.core_type = #tpu.core_type<tc>, window_params = [{transform_indices = @transform_0, window_bounds = array<i64: 128, 128>}, {transform_indices = @transform_1, window_bounds = array<i64: 128, 128>}, {transform_indices = @transform_2, window_bounds = array<i64: 1, 128>}, {transform_indices = @transform_3, window_bounds = array<i64: 128, 128>}, {transform_indices = @transform_4, window_bounds = array<i64: 128, 128>}]} {
    %c0_i32 = arith.constant 0 : i32
    %0 = arith.cmpi eq, %arg2, %c0_i32 : i32
    %1 = arith.extui %0 : i1 to i32
    %c0_i32_0 = arith.constant 0 : i32
    %2 = arith.cmpi ne, %1, %c0_i32_0 : i32
    scf.if %2 {
      %cst_9 = arith.constant 0.000000e+00 : f32
      %12 = vector.broadcast %cst_9 : f32 to vector<128x128xf32>
      %c0_10 = arith.constant 0 : index
      %c0_11 = arith.constant 0 : index
      %13 = vector.load %arg8[%c0_10, %c0_11] : memref<128x128xf32, #tpu.memory_space<vmem>>, vector<128x128xf32>
      tpu.vector_store %arg8[%c0_10, %c0_11], %12 {strides = array<i32>} : memref<128x128xf32, #tpu.memory_space<vmem>>, vector<128x128xf32>,
    } else {
    }
    %c0 = arith.constant 0 : index
    %c0_1 = arith.constant 0 : index
    %3 = vector.load %arg8[%c0, %c0_1] : memref<128x128xf32, #tpu.memory_space<vmem>>, vector<128x128xf32>
    %c0_2 = arith.constant 0 : index
    %c0_3 = arith.constant 0 : index
    %4 = vector.load %arg3[%c0_2, %c0_3] : memref<128x128xbf16, #tpu.memory_space<vmem>>, vector<128x128xbf16>
    %c0_4 = arith.constant 0 : index
    %c0_5 = arith.constant 0 : index
    %5 = vector.load %arg4[%c0_4, %c0_5] : memref<128x128xbf16, #tpu.memory_space<vmem>>, vector<128x128xbf16>
    %cst = arith.constant dense<0.000000e+00> : vector<128x128xf32>
    %6 = tpu.matmul %4, %5, %cst {dimension_numbers = #tpu.dot_dimension_numbers<[1], [0], [0], [1], [0, 0, 1, 1], [], []>} : vector<128x128xbf16>, vector<128x128xbf16>, vector<128x128xf32> -> vector<128x128xf32>
    %7 = arith.addf %3, %6 : vector<128x128xf32>
    %c0_6 = arith.constant 0 : index
    %c0_7 = arith.constant 0 : index
    %8 = vector.load %arg8[%c0_6, %c0_7] : memref<128x128xf32, #tpu.memory_space<vmem>>, vector<128x128xf32>
    tpu.vector_store %arg8[%c0_6, %c0_7], %7 {strides = array<i32>} : memref<128x128xf32, #tpu.memory_space<vmem>>, vector<128x128xf32>,
    %c4_i32 = arith.constant 4 : i32
    %9 = arith.cmpi eq, %arg2, %c4_i32 : i32
    %10 = arith.extui %9 : i1 to i32
    %c0_i32_8 = arith.constant 0 : i32
    %11 = arith.cmpi ne, %10, %c0_i32_8 : i32
    scf.if %11 {
      %c0_9 = arith.constant 0 : index
      %c0_10 = arith.constant 0 : index
      %12 = vector.load %arg8[%c0_9, %c0_10] : memref<128x128xf32, #tpu.memory_space<vmem>>, vector<128x128xf32>
      %c0_11 = arith.constant 0 : index
      %c0_12 = arith.constant 0 : index
      %13 = vector.load %arg5[%c0_11, %c0_12] : memref<1x128xf32, #tpu.memory_space<vmem>>, vector<1x128xf32>
      %14 = vector.broadcast %13 : vector<1x128xf32> to vector<128x128xf32>
      %15 = arith.addf %12, %14 : vector<128x128xf32>
      %c0_13 = arith.constant 0 : index
      %c0_14 = arith.constant 0 : index
      %16 = vector.load %arg6[%c0_13, %c0_14] : memref<128x128xf32, #tpu.memory_space<vmem>>, vector<128x128xf32>
      %17 = arith.addf %15, %16 : vector<128x128xf32>
      %c0_15 = arith.constant 0 : index
      %c0_16 = arith.constant 0 : index
      %18 = vector.load %arg7[%c0_15, %c0_16] : memref<128x128xf32, #tpu.memory_space<vmem>>, vector<128x128xf32>
      tpu.vector_store %arg7[%c0_15, %c0_16], %17 {strides = array<i32>} : memref<128x128xf32, #tpu.memory_space<vmem>>, vector<128x128xf32>,
    } else {
    }
    return
  }
  func.func @transform_0(%arg0: i32, %arg1: i32, %arg2: i32) -> (i32, i32) {
    %c0_i32 = arith.constant 0 : i32
    return %arg0, %arg2 : i32, i32
  }
  func.func @transform_1(%arg0: i32, %arg1: i32, %arg2: i32) -> (i32, i32) {
    %c0_i32 = arith.constant 0 : i32
    return %arg2, %arg1 : i32, i32
  }
  func.func @transform_2(%arg0: i32, %arg1: i32, %arg2: i32) -> (i32, i32) {
    %c0_i32 = arith.constant 0 : i32
    %c0_i32_0 = arith.constant 0 : i32
    return %c0_i32, %arg1 : i32, i32
  }
  func.func @transform_3(%arg0: i32, %arg1: i32, %arg2: i32) -> (i32, i32) {
    %c0_i32 = arith.constant 0 : i32
    return %arg0, %arg1 : i32, i32
  }
  func.func @transform_4(%arg0: i32, %arg1: i32, %arg2: i32) -> (i32, i32) {
    %c0_i32 = arith.constant 0 : i32
    return %arg0, %arg1 : i32, i32
  }
}

module attributes {stable_mosaic.version = 11 : i64} {
  func.func @_groupnorm_kernel(%arg0: i32, %arg1: memref<1x64x64xf32, #tpu.memory_space<vmem>>, %arg2: memref<1x64xf32, #tpu.memory_space<vmem>>, %arg3: memref<1x64xf32, #tpu.memory_space<vmem>>, %arg4: memref<64x32xf32, #tpu.memory_space<vmem>>, %arg5: memref<32x64xf32, #tpu.memory_space<vmem>>, %arg6: memref<1x64x64xf32, #tpu.memory_space<vmem>>) attributes {dimension_semantics = [#tpu.dimension_semantics<parallel>], iteration_bounds = array<i64: 2>, scalar_prefetch = 0 : i64, scratch_operands = 0 : i64, tpu.core_type = #tpu.core_type<tc>, window_params = [{transform_indices = @transform_0, window_bounds = array<i64: 1, 64, 64>}, {pipeline_mode = #tpu.pipeline_mode<synchronous>, transform_indices = @transform_1, window_bounds = array<i64: 1, 64>}, {pipeline_mode = #tpu.pipeline_mode<synchronous>, transform_indices = @transform_2, window_bounds = array<i64: 1, 64>}, {pipeline_mode = #tpu.pipeline_mode<synchronous>, transform_indices = @transform_3, window_bounds = array<i64: 64, 32>}, {pipeline_mode = #tpu.pipeline_mode<synchronous>, transform_indices = @transform_4, window_bounds = array<i64: 32, 64>}, {transform_indices = @transform_5, window_bounds = array<i64: 1, 64, 64>}]} {
    %c0 = arith.constant 0 : index
    %c0_0 = arith.constant 0 : index
    %c0_1 = arith.constant 0 : index
    %0 = vector.load %arg1[%c0, %c0_0, %c0_1] : memref<1x64x64xf32, #tpu.memory_space<vmem>>, vector<1x64x64xf32>
    %1 = vector.shape_cast %0 : vector<1x64x64xf32> to vector<64x64xf32>
    %c0_2 = arith.constant 0 : index
    %c0_3 = arith.constant 0 : index
    %2 = vector.load %arg4[%c0_2, %c0_3] : memref<64x32xf32, #tpu.memory_space<vmem>>, vector<64x32xf32>
    %c0_4 = arith.constant 0 : index
    %c0_5 = arith.constant 0 : index
    %3 = vector.load %arg5[%c0_4, %c0_5] : memref<32x64xf32, #tpu.memory_space<vmem>>, vector<32x64xf32>
    %cst = arith.constant dense<0.000000e+00> : vector<64xf32>
    %4 = vector.multi_reduction <add>, %1, %cst [0] : vector<64x64xf32> to vector<64xf32>
    %5 = vector.shape_cast %4 : vector<64xf32> to vector<1x64xf32>
    %cst_6 = arith.constant dense<0.000000e+00> : vector<1x32xf32>
    %6 = tpu.matmul %5, %2, %cst_6 {dimension_numbers = #tpu.dot_dimension_numbers<[1], [0], [0], [1], [0, 0, 1, 1], [], []>} : vector<1x64xf32>, vector<64x32xf32>, vector<1x32xf32> -> vector<1x32xf32>
    %cst_7 = arith.constant 1.280000e+02 : f32
    %7 = vector.broadcast %cst_7 : f32 to vector<1x32xf32>
    %8 = arith.divf %6, %7 : vector<1x32xf32>
    %cst_8 = arith.constant dense<0.000000e+00> : vector<1x64xf32>
    %9 = tpu.matmul %8, %3, %cst_8 {dimension_numbers = #tpu.dot_dimension_numbers<[1], [0], [0], [1], [0, 0, 1, 1], [], []>} : vector<1x32xf32>, vector<32x64xf32>, vector<1x64xf32> -> vector<1x64xf32>
    %10 = vector.broadcast %9 : vector<1x64xf32> to vector<64x64xf32>
    %11 = arith.subf %1, %10 : vector<64x64xf32>
    %12 = arith.mulf %11, %11 : vector<64x64xf32>
    %cst_9 = arith.constant dense<0.000000e+00> : vector<64xf32>
    %13 = vector.multi_reduction <add>, %12, %cst_9 [0] : vector<64x64xf32> to vector<64xf32>
    %14 = vector.shape_cast %13 : vector<64xf32> to vector<1x64xf32>
    %cst_10 = arith.constant dense<0.000000e+00> : vector<1x32xf32>
    %15 = tpu.matmul %14, %2, %cst_10 {dimension_numbers = #tpu.dot_dimension_numbers<[1], [0], [0], [1], [0, 0, 1, 1], [], []>} : vector<1x64xf32>, vector<64x32xf32>, vector<1x32xf32> -> vector<1x32xf32>
    %cst_11 = arith.constant 1.280000e+02 : f32
    %16 = vector.broadcast %cst_11 : f32 to vector<1x32xf32>
    %17 = arith.divf %15, %16 : vector<1x32xf32>
    %cst_12 = arith.constant dense<0.000000e+00> : vector<1x64xf32>
    %18 = tpu.matmul %17, %3, %cst_12 {dimension_numbers = #tpu.dot_dimension_numbers<[1], [0], [0], [1], [0, 0, 1, 1], [], []>} : vector<1x32xf32>, vector<32x64xf32>, vector<1x64xf32> -> vector<1x64xf32>
    %cst_13 = arith.constant 9.99999997E-7 : f32
    %19 = vector.broadcast %cst_13 : f32 to vector<1x64xf32>
    %20 = arith.addf %18, %19 : vector<1x64xf32>
    %21 = math.rsqrt %20 : vector<1x64xf32>
    %22 = vector.broadcast %21 : vector<1x64xf32> to vector<64x64xf32>
    %23 = arith.mulf %11, %22 : vector<64x64xf32>
    %c0_14 = arith.constant 0 : index
    %c0_15 = arith.constant 0 : index
    %24 = vector.load %arg2[%c0_14, %c0_15] : memref<1x64xf32, #tpu.memory_space<vmem>>, vector<1x64xf32>
    %25 = vector.broadcast %24 : vector<1x64xf32> to vector<64x64xf32>
    %26 = arith.mulf %23, %25 : vector<64x64xf32>
    %c0_16 = arith.constant 0 : index
    %c0_17 = arith.constant 0 : index
    %27 = vector.load %arg3[%c0_16, %c0_17] : memref<1x64xf32, #tpu.memory_space<vmem>>, vector<1x64xf32>
    %28 = vector.broadcast %27 : vector<1x64xf32> to vector<64x64xf32>
    %29 = arith.addf %26, %28 : vector<64x64xf32>
    %c0_18 = arith.constant 0 : index
    %c0_19 = arith.constant 0 : index
    %c0_20 = arith.constant 0 : index
    %30 = vector.load %arg6[%c0_18, %c0_19, %c0_20] : memref<1x64x64xf32, #tpu.memory_space<vmem>>, vector<1x64x64xf32>
    %31 = vector.shape_cast %30 : vector<1x64x64xf32> to vector<64x64xf32>
    %32 = vector.shape_cast %29 : vector<64x64xf32> to vector<1x64x64xf32>
    tpu.vector_store %arg6[%c0_18, %c0_19, %c0_20], %32 {strides = array<i32>} : memref<1x64x64xf32, #tpu.memory_space<vmem>>, vector<1x64x64xf32>,
    return
  }
  func.func @transform_0(%arg0: i32) -> (i32, i32, i32) {
    %c0_i32 = arith.constant 0 : i32
    %c0_i32_0 = arith.constant 0 : i32
    %c0_i32_1 = arith.constant 0 : i32
    return %arg0, %c0_i32, %c0_i32_0 : i32, i32, i32
  }
  func.func @transform_1(%arg0: i32) -> (i32, i32) {
    %c0_i32 = arith.constant 0 : i32
    %c0_i32_0 = arith.constant 0 : i32
    %c0_i32_1 = arith.constant 0 : i32
    return %c0_i32, %c0_i32_0 : i32, i32
  }
  func.func @transform_2(%arg0: i32) -> (i32, i32) {
    %c0_i32 = arith.constant 0 : i32
    %c0_i32_0 = arith.constant 0 : i32
    %c0_i32_1 = arith.constant 0 : i32
    return %c0_i32, %c0_i32_0 : i32, i32
  }
  func.func @transform_3(%arg0: i32) -> (i32, i32) {
    %c0_i32 = arith.constant 0 : i32
    %c0_i32_0 = arith.constant 0 : i32
    %c0_i32_1 = arith.constant 0 : i32
    return %c0_i32, %c0_i32_0 : i32, i32
  }
  func.func @transform_4(%arg0: i32) -> (i32, i32) {
    %c0_i32 = arith.constant 0 : i32
    %c0_i32_0 = arith.constant 0 : i32
    %c0_i32_1 = arith.constant 0 : i32
    return %c0_i32, %c0_i32_0 : i32, i32
  }
  func.func @transform_5(%arg0: i32) -> (i32, i32, i32) {
    %c0_i32 = arith.constant 0 : i32
    %c0_i32_0 = arith.constant 0 : i32
    %c0_i32_1 = arith.constant 0 : i32
    return %arg0, %c0_i32, %c0_i32_0 : i32, i32, i32
  }
}

module attributes {stable_mosaic.version = 11 : i64} {
  func.func @_mm_kernel(%arg0: i32, %arg1: i32, %arg2: i32, %arg3: memref<128x128xbf16, #tpu.memory_space<vmem>>, %arg4: memref<128x128xbf16, #tpu.memory_space<vmem>>, %arg5: memref<1x128xf32, #tpu.memory_space<vmem>>, %arg6: memref<128x128xf32, #tpu.memory_space<vmem>>, %arg7: memref<128x128xf32, #tpu.memory_space<vmem>>) attributes {dimension_semantics = [#tpu.dimension_semantics<parallel>, #tpu.dimension_semantics<parallel>, #tpu.dimension_semantics<arbitrary>], iteration_bounds = array<i64: 1, 1, 5>, scalar_prefetch = 0 : i64, scratch_operands = 1 : i64, tpu.core_type = #tpu.core_type<tc>, window_params = [{transform_indices = @transform_0, window_bounds = array<i64: 128, 128>}, {transform_indices = @transform_1, window_bounds = array<i64: 128, 128>}, {transform_indices = @transform_2, window_bounds = array<i64: 1, 128>}, {transform_indices = @transform_3, window_bounds = array<i64: 128, 128>}]} {
    %c0_i32 = arith.constant 0 : i32
    %0 = arith.cmpi eq, %arg2, %c0_i32 : i32
    %1 = arith.extui %0 : i1 to i32
    %c0_i32_0 = arith.constant 0 : i32
    %2 = arith.cmpi ne, %1, %c0_i32_0 : i32
    scf.if %2 {
      %cst_9 = arith.constant 0.000000e+00 : f32
      %12 = vector.broadcast %cst_9 : f32 to vector<128x128xf32>
      %c0_10 = arith.constant 0 : index
      %c0_11 = arith.constant 0 : index
      %13 = vector.load %arg7[%c0_10, %c0_11] : memref<128x128xf32, #tpu.memory_space<vmem>>, vector<128x128xf32>
      tpu.vector_store %arg7[%c0_10, %c0_11], %12 {strides = array<i32>} : memref<128x128xf32, #tpu.memory_space<vmem>>, vector<128x128xf32>,
    } else {
    }
    %c0 = arith.constant 0 : index
    %c0_1 = arith.constant 0 : index
    %3 = vector.load %arg7[%c0, %c0_1] : memref<128x128xf32, #tpu.memory_space<vmem>>, vector<128x128xf32>
    %c0_2 = arith.constant 0 : index
    %c0_3 = arith.constant 0 : index
    %4 = vector.load %arg3[%c0_2, %c0_3] : memref<128x128xbf16, #tpu.memory_space<vmem>>, vector<128x128xbf16>
    %c0_4 = arith.constant 0 : index
    %c0_5 = arith.constant 0 : index
    %5 = vector.load %arg4[%c0_4, %c0_5] : memref<128x128xbf16, #tpu.memory_space<vmem>>, vector<128x128xbf16>
    %cst = arith.constant dense<0.000000e+00> : vector<128x128xf32>
    %6 = tpu.matmul %4, %5, %cst {dimension_numbers = #tpu.dot_dimension_numbers<[1], [0], [0], [1], [0, 0, 1, 1], [], []>} : vector<128x128xbf16>, vector<128x128xbf16>, vector<128x128xf32> -> vector<128x128xf32>
    %7 = arith.addf %3, %6 : vector<128x128xf32>
    %c0_6 = arith.constant 0 : index
    %c0_7 = arith.constant 0 : index
    %8 = vector.load %arg7[%c0_6, %c0_7] : memref<128x128xf32, #tpu.memory_space<vmem>>, vector<128x128xf32>
    tpu.vector_store %arg7[%c0_6, %c0_7], %7 {strides = array<i32>} : memref<128x128xf32, #tpu.memory_space<vmem>>, vector<128x128xf32>,
    %c4_i32 = arith.constant 4 : i32
    %9 = arith.cmpi eq, %arg2, %c4_i32 : i32
    %10 = arith.extui %9 : i1 to i32
    %c0_i32_8 = arith.constant 0 : i32
    %11 = arith.cmpi ne, %10, %c0_i32_8 : i32
    scf.if %11 {
      %c0_9 = arith.constant 0 : index
      %c0_10 = arith.constant 0 : index
      %12 = vector.load %arg7[%c0_9, %c0_10] : memref<128x128xf32, #tpu.memory_space<vmem>>, vector<128x128xf32>
      %c0_11 = arith.constant 0 : index
      %c0_12 = arith.constant 0 : index
      %13 = vector.load %arg5[%c0_11, %c0_12] : memref<1x128xf32, #tpu.memory_space<vmem>>, vector<1x128xf32>
      %14 = vector.broadcast %13 : vector<1x128xf32> to vector<128x128xf32>
      %15 = arith.addf %12, %14 : vector<128x128xf32>
      %c0_13 = arith.constant 0 : index
      %c0_14 = arith.constant 0 : index
      %16 = vector.load %arg6[%c0_13, %c0_14] : memref<128x128xf32, #tpu.memory_space<vmem>>, vector<128x128xf32>
      tpu.vector_store %arg6[%c0_13, %c0_14], %15 {strides = array<i32>} : memref<128x128xf32, #tpu.memory_space<vmem>>, vector<128x128xf32>,
    } else {
    }
    return
  }
  func.func @transform_0(%arg0: i32, %arg1: i32, %arg2: i32) -> (i32, i32) {
    %c0_i32 = arith.constant 0 : i32
    return %arg0, %arg2 : i32, i32
  }
  func.func @transform_1(%arg0: i32, %arg1: i32, %arg2: i32) -> (i32, i32) {
    %c0_i32 = arith.constant 0 : i32
    return %arg2, %arg1 : i32, i32
  }
  func.func @transform_2(%arg0: i32, %arg1: i32, %arg2: i32) -> (i32, i32) {
    %c0_i32 = arith.constant 0 : i32
    %c0_i32_0 = arith.constant 0 : i32
    return %c0_i32, %arg1 : i32, i32
  }
  func.func @transform_3(%arg0: i32, %arg1: i32, %arg2: i32) -> (i32, i32) {
    %c0_i32 = arith.constant 0 : i32
    return %arg0, %arg1 : i32, i32
  }
}

module attributes {stable_mosaic.version = 11 : i64} {
  func.func @_mm_kernel(%arg0: i32, %arg1: i32, %arg2: i32, %arg3: memref<128x128xbf16, #tpu.memory_space<vmem>>, %arg4: memref<128x128xbf16, #tpu.memory_space<vmem>>, %arg5: memref<1x128xf32, #tpu.memory_space<vmem>>, %arg6: memref<128x128xf32, #tpu.memory_space<vmem>>, %arg7: memref<128x128xf32, #tpu.memory_space<vmem>>) attributes {dimension_semantics = [#tpu.dimension_semantics<parallel>, #tpu.dimension_semantics<parallel>, #tpu.dimension_semantics<arbitrary>], iteration_bounds = array<i64: 1, 2, 1>, scalar_prefetch = 0 : i64, scratch_operands = 1 : i64, tpu.core_type = #tpu.core_type<tc>, window_params = [{transform_indices = @transform_0, window_bounds = array<i64: 128, 128>}, {transform_indices = @transform_1, window_bounds = array<i64: 128, 128>}, {transform_indices = @transform_2, window_bounds = array<i64: 1, 128>}, {transform_indices = @transform_3, window_bounds = array<i64: 128, 128>}]} {
    %c0_i32 = arith.constant 0 : i32
    %0 = arith.cmpi eq, %arg2, %c0_i32 : i32
    %1 = arith.extui %0 : i1 to i32
    %c0_i32_0 = arith.constant 0 : i32
    %2 = arith.cmpi ne, %1, %c0_i32_0 : i32
    scf.if %2 {
      %cst_10 = arith.constant 0.000000e+00 : f32
      %12 = vector.broadcast %cst_10 : f32 to vector<128x128xf32>
      %c0_11 = arith.constant 0 : index
      %c0_12 = arith.constant 0 : index
      %13 = vector.load %arg7[%c0_11, %c0_12] : memref<128x128xf32, #tpu.memory_space<vmem>>, vector<128x128xf32>
      tpu.vector_store %arg7[%c0_11, %c0_12], %12 {strides = array<i32>} : memref<128x128xf32, #tpu.memory_space<vmem>>, vector<128x128xf32>,
    } else {
    }
    %c0 = arith.constant 0 : index
    %c0_1 = arith.constant 0 : index
    %3 = vector.load %arg7[%c0, %c0_1] : memref<128x128xf32, #tpu.memory_space<vmem>>, vector<128x128xf32>
    %c0_2 = arith.constant 0 : index
    %c0_3 = arith.constant 0 : index
    %4 = vector.load %arg3[%c0_2, %c0_3] : memref<128x128xbf16, #tpu.memory_space<vmem>>, vector<128x128xbf16>
    %c0_4 = arith.constant 0 : index
    %c0_5 = arith.constant 0 : index
    %5 = vector.load %arg4[%c0_4, %c0_5] : memref<128x128xbf16, #tpu.memory_space<vmem>>, vector<128x128xbf16>
    %cst = arith.constant dense<0.000000e+00> : vector<128x128xf32>
    %6 = tpu.matmul %4, %5, %cst {dimension_numbers = #tpu.dot_dimension_numbers<[1], [0], [0], [1], [0, 0, 1, 1], [], []>} : vector<128x128xbf16>, vector<128x128xbf16>, vector<128x128xf32> -> vector<128x128xf32>
    %7 = arith.addf %3, %6 : vector<128x128xf32>
    %c0_6 = arith.constant 0 : index
    %c0_7 = arith.constant 0 : index
    %8 = vector.load %arg7[%c0_6, %c0_7] : memref<128x128xf32, #tpu.memory_space<vmem>>, vector<128x128xf32>
    tpu.vector_store %arg7[%c0_6, %c0_7], %7 {strides = array<i32>} : memref<128x128xf32, #tpu.memory_space<vmem>>, vector<128x128xf32>,
    %c0_i32_8 = arith.constant 0 : i32
    %9 = arith.cmpi eq, %arg2, %c0_i32_8 : i32
    %10 = arith.extui %9 : i1 to i32
    %c0_i32_9 = arith.constant 0 : i32
    %11 = arith.cmpi ne, %10, %c0_i32_9 : i32
    scf.if %11 {
      %c0_10 = arith.constant 0 : index
      %c0_11 = arith.constant 0 : index
      %12 = vector.load %arg7[%c0_10, %c0_11] : memref<128x128xf32, #tpu.memory_space<vmem>>, vector<128x128xf32>
      %c0_12 = arith.constant 0 : index
      %c0_13 = arith.constant 0 : index
      %13 = vector.load %arg5[%c0_12, %c0_13] : memref<1x128xf32, #tpu.memory_space<vmem>>, vector<1x128xf32>
      %14 = vector.broadcast %13 : vector<1x128xf32> to vector<128x128xf32>
      %15 = arith.addf %12, %14 : vector<128x128xf32>
      %c0_14 = arith.constant 0 : index
      %c0_15 = arith.constant 0 : index
      %16 = vector.load %arg6[%c0_14, %c0_15] : memref<128x128xf32, #tpu.memory_space<vmem>>, vector<128x128xf32>
      tpu.vector_store %arg6[%c0_14, %c0_15], %15 {strides = array<i32>} : memref<128x128xf32, #tpu.memory_space<vmem>>, vector<128x128xf32>,
    } else {
    }
    return
  }
  func.func @transform_0(%arg0: i32, %arg1: i32, %arg2: i32) -> (i32, i32) {
    %c0_i32 = arith.constant 0 : i32
    return %arg0, %arg2 : i32, i32
  }
  func.func @transform_1(%arg0: i32, %arg1: i32, %arg2: i32) -> (i32, i32) {
    %c0_i32 = arith.constant 0 : i32
    return %arg2, %arg1 : i32, i32
  }
  func.func @transform_2(%arg0: i32, %arg1: i32, %arg2: i32) -> (i32, i32) {
    %c0_i32 = arith.constant 0 : i32
    %c0_i32_0 = arith.constant 0 : i32
    return %c0_i32, %arg1 : i32, i32
  }
  func.func @transform_3(%arg0: i32, %arg1: i32, %arg2: i32) -> (i32, i32) {
    %c0_i32 = arith.constant 0 : i32
    return %arg0, %arg1 : i32, i32
  }
}

module attributes {stable_mosaic.version = 11 : i64} {
  func.func @_attention_kernel(%arg0: i32, %arg1: memref<1x64x64xf32, #tpu.memory_space<vmem>>, %arg2: memref<1x64x64xf32, #tpu.memory_space<vmem>>, %arg3: memref<1x64x64xf32, #tpu.memory_space<vmem>>, %arg4: memref<1x64x64xf32, #tpu.memory_space<vmem>>) attributes {dimension_semantics = [#tpu.dimension_semantics<parallel>], iteration_bounds = array<i64: 2>, scalar_prefetch = 0 : i64, scratch_operands = 0 : i64, tpu.core_type = #tpu.core_type<tc>, window_params = [{transform_indices = @transform_0, window_bounds = array<i64: 1, 64, 64>}, {transform_indices = @transform_1, window_bounds = array<i64: 1, 64, 64>}, {transform_indices = @transform_2, window_bounds = array<i64: 1, 64, 64>}, {transform_indices = @transform_3, window_bounds = array<i64: 1, 64, 64>}]} {
    %c0 = arith.constant 0 : index
    %c0_0 = arith.constant 0 : index
    %c0_1 = arith.constant 0 : index
    %0 = vector.load %arg1[%c0, %c0_0, %c0_1] : memref<1x64x64xf32, #tpu.memory_space<vmem>>, vector<1x64x64xf32>
    %1 = vector.shape_cast %0 : vector<1x64x64xf32> to vector<64x64xf32>
    %cst = arith.constant 1.250000e-01 : f32
    %2 = vector.broadcast %cst : f32 to vector<64x64xf32>
    %3 = arith.mulf %1, %2 : vector<64x64xf32>
    %4 = arith.truncf %3 : vector<64x64xf32> to vector<64x64xbf16>
    %c0_2 = arith.constant 0 : index
    %c0_3 = arith.constant 0 : index
    %c0_4 = arith.constant 0 : index
    %5 = vector.load %arg2[%c0_2, %c0_3, %c0_4] : memref<1x64x64xf32, #tpu.memory_space<vmem>>, vector<1x64x64xf32>
    %6 = vector.shape_cast %5 : vector<1x64x64xf32> to vector<64x64xf32>
    %7 = arith.truncf %6 : vector<64x64xf32> to vector<64x64xbf16>
    %c0_5 = arith.constant 0 : index
    %c0_6 = arith.constant 0 : index
    %c0_7 = arith.constant 0 : index
    %8 = vector.load %arg3[%c0_5, %c0_6, %c0_7] : memref<1x64x64xf32, #tpu.memory_space<vmem>>, vector<1x64x64xf32>
    %9 = vector.shape_cast %8 : vector<1x64x64xf32> to vector<64x64xf32>
    %10 = arith.truncf %9 : vector<64x64xf32> to vector<64x64xbf16>
    %cst_8 = arith.constant dense<0.000000e+00> : vector<64x64xf32>
    %11 = tpu.matmul %4, %7, %cst_8 {dimension_numbers = #tpu.dot_dimension_numbers<[1], [1], [0], [0], [0, 0, 1, 0], [], []>} : vector<64x64xbf16>, vector<64x64xbf16>, vector<64x64xf32> -> vector<64x64xf32>
    %cst_9 = arith.constant dense<0xFF800000> : vector<64xf32>
    %12 = vector.multi_reduction <maximumf>, %11, %cst_9 [1] : vector<64x64xf32> to vector<64xf32>
    %13 = vector.shape_cast %12 : vector<64xf32> to vector<64x1xf32>
    %14 = vector.broadcast %13 : vector<64x1xf32> to vector<64x64xf32>
    %15 = arith.subf %11, %14 : vector<64x64xf32>
    %16 = math.exp %15 : vector<64x64xf32>
    %cst_10 = arith.constant dense<0.000000e+00> : vector<64xf32>
    %17 = vector.multi_reduction <add>, %16, %cst_10 [1] : vector<64x64xf32> to vector<64xf32>
    %18 = vector.shape_cast %17 : vector<64xf32> to vector<64x1xf32>
    %19 = arith.truncf %16 : vector<64x64xf32> to vector<64x64xbf16>
    %cst_11 = arith.constant dense<0.000000e+00> : vector<64x64xf32>
    %20 = tpu.matmul %19, %10, %cst_11 {dimension_numbers = #tpu.dot_dimension_numbers<[1], [0], [0], [1], [0, 0, 1, 1], [], []>} : vector<64x64xbf16>, vector<64x64xbf16>, vector<64x64xf32> -> vector<64x64xf32>
    %21 = tpu.reciprocal %18 {approx = true} : vector<64x1xf32> -> vector<64x1xf32>
    %22 = vector.broadcast %21 : vector<64x1xf32> to vector<64x64xf32>
    %23 = arith.mulf %20, %22 : vector<64x64xf32>
    %c0_12 = arith.constant 0 : index
    %c0_13 = arith.constant 0 : index
    %c0_14 = arith.constant 0 : index
    %24 = vector.load %arg4[%c0_12, %c0_13, %c0_14] : memref<1x64x64xf32, #tpu.memory_space<vmem>>, vector<1x64x64xf32>
    %25 = vector.shape_cast %24 : vector<1x64x64xf32> to vector<64x64xf32>
    %26 = vector.shape_cast %23 : vector<64x64xf32> to vector<1x64x64xf32>
    tpu.vector_store %arg4[%c0_12, %c0_13, %c0_14], %26 {strides = array<i32>} : memref<1x64x64xf32, #tpu.memory_space<vmem>>, vector<1x64x64xf32>,
    return
  }
  func.func @transform_0(%arg0: i32) -> (i32, i32, i32) {
    %c0_i32 = arith.constant 0 : i32
    %c0_i32_0 = arith.constant 0 : i32
    %c0_i32_1 = arith.constant 0 : i32
    return %arg0, %c0_i32, %c0_i32_0 : i32, i32, i32
  }
  func.func @transform_1(%arg0: i32) -> (i32, i32, i32) {
    %c0_i32 = arith.constant 0 : i32
    %c0_i32_0 = arith.constant 0 : i32
    %c0_i32_1 = arith.constant 0 : i32
    return %arg0, %c0_i32, %c0_i32_0 : i32, i32, i32
  }
  func.func @transform_2(%arg0: i32) -> (i32, i32, i32) {
    %c0_i32 = arith.constant 0 : i32
    %c0_i32_0 = arith.constant 0 : i32
    %c0_i32_1 = arith.constant 0 : i32
    return %arg0, %c0_i32, %c0_i32_0 : i32, i32, i32
  }
  func.func @transform_3(%arg0: i32) -> (i32, i32, i32) {
    %c0_i32 = arith.constant 0 : i32
    %c0_i32_0 = arith.constant 0 : i32
    %c0_i32_1 = arith.constant 0 : i32
    return %arg0, %c0_i32, %c0_i32_0 : i32, i32, i32
  }
}

module attributes {stable_mosaic.version = 11 : i64} {
  func.func @_mm_res_kernel(%arg0: i32, %arg1: i32, %arg2: i32, %arg3: memref<128x128xbf16, #tpu.memory_space<vmem>>, %arg4: memref<128x128xbf16, #tpu.memory_space<vmem>>, %arg5: memref<1x128xf32, #tpu.memory_space<vmem>>, %arg6: memref<128x128xf32, #tpu.memory_space<vmem>>, %arg7: memref<128x128xf32, #tpu.memory_space<vmem>>, %arg8: memref<128x128xf32, #tpu.memory_space<vmem>>) attributes {dimension_semantics = [#tpu.dimension_semantics<parallel>, #tpu.dimension_semantics<parallel>, #tpu.dimension_semantics<arbitrary>], iteration_bounds = array<i64: 1, 1, 1>, scalar_prefetch = 0 : i64, scratch_operands = 1 : i64, tpu.core_type = #tpu.core_type<tc>, window_params = [{transform_indices = @transform_0, window_bounds = array<i64: 128, 128>}, {transform_indices = @transform_1, window_bounds = array<i64: 128, 128>}, {transform_indices = @transform_2, window_bounds = array<i64: 1, 128>}, {transform_indices = @transform_3, window_bounds = array<i64: 128, 128>}, {transform_indices = @transform_4, window_bounds = array<i64: 128, 128>}]} {
    %c0_i32 = arith.constant 0 : i32
    %0 = arith.cmpi eq, %arg2, %c0_i32 : i32
    %1 = arith.extui %0 : i1 to i32
    %c0_i32_0 = arith.constant 0 : i32
    %2 = arith.cmpi ne, %1, %c0_i32_0 : i32
    scf.if %2 {
      %cst_10 = arith.constant 0.000000e+00 : f32
      %12 = vector.broadcast %cst_10 : f32 to vector<128x128xf32>
      %c0_11 = arith.constant 0 : index
      %c0_12 = arith.constant 0 : index
      %13 = vector.load %arg8[%c0_11, %c0_12] : memref<128x128xf32, #tpu.memory_space<vmem>>, vector<128x128xf32>
      tpu.vector_store %arg8[%c0_11, %c0_12], %12 {strides = array<i32>} : memref<128x128xf32, #tpu.memory_space<vmem>>, vector<128x128xf32>,
    } else {
    }
    %c0 = arith.constant 0 : index
    %c0_1 = arith.constant 0 : index
    %3 = vector.load %arg8[%c0, %c0_1] : memref<128x128xf32, #tpu.memory_space<vmem>>, vector<128x128xf32>
    %c0_2 = arith.constant 0 : index
    %c0_3 = arith.constant 0 : index
    %4 = vector.load %arg3[%c0_2, %c0_3] : memref<128x128xbf16, #tpu.memory_space<vmem>>, vector<128x128xbf16>
    %c0_4 = arith.constant 0 : index
    %c0_5 = arith.constant 0 : index
    %5 = vector.load %arg4[%c0_4, %c0_5] : memref<128x128xbf16, #tpu.memory_space<vmem>>, vector<128x128xbf16>
    %cst = arith.constant dense<0.000000e+00> : vector<128x128xf32>
    %6 = tpu.matmul %4, %5, %cst {dimension_numbers = #tpu.dot_dimension_numbers<[1], [0], [0], [1], [0, 0, 1, 1], [], []>} : vector<128x128xbf16>, vector<128x128xbf16>, vector<128x128xf32> -> vector<128x128xf32>
    %7 = arith.addf %3, %6 : vector<128x128xf32>
    %c0_6 = arith.constant 0 : index
    %c0_7 = arith.constant 0 : index
    %8 = vector.load %arg8[%c0_6, %c0_7] : memref<128x128xf32, #tpu.memory_space<vmem>>, vector<128x128xf32>
    tpu.vector_store %arg8[%c0_6, %c0_7], %7 {strides = array<i32>} : memref<128x128xf32, #tpu.memory_space<vmem>>, vector<128x128xf32>,
    %c0_i32_8 = arith.constant 0 : i32
    %9 = arith.cmpi eq, %arg2, %c0_i32_8 : i32
    %10 = arith.extui %9 : i1 to i32
    %c0_i32_9 = arith.constant 0 : i32
    %11 = arith.cmpi ne, %10, %c0_i32_9 : i32
    scf.if %11 {
      %c0_10 = arith.constant 0 : index
      %c0_11 = arith.constant 0 : index
      %12 = vector.load %arg8[%c0_10, %c0_11] : memref<128x128xf32, #tpu.memory_space<vmem>>, vector<128x128xf32>
      %c0_12 = arith.constant 0 : index
      %c0_13 = arith.constant 0 : index
      %13 = vector.load %arg5[%c0_12, %c0_13] : memref<1x128xf32, #tpu.memory_space<vmem>>, vector<1x128xf32>
      %14 = vector.broadcast %13 : vector<1x128xf32> to vector<128x128xf32>
      %15 = arith.addf %12, %14 : vector<128x128xf32>
      %c0_14 = arith.constant 0 : index
      %c0_15 = arith.constant 0 : index
      %16 = vector.load %arg6[%c0_14, %c0_15] : memref<128x128xf32, #tpu.memory_space<vmem>>, vector<128x128xf32>
      %17 = arith.addf %15, %16 : vector<128x128xf32>
      %c0_16 = arith.constant 0 : index
      %c0_17 = arith.constant 0 : index
      %18 = vector.load %arg7[%c0_16, %c0_17] : memref<128x128xf32, #tpu.memory_space<vmem>>, vector<128x128xf32>
      tpu.vector_store %arg7[%c0_16, %c0_17], %17 {strides = array<i32>} : memref<128x128xf32, #tpu.memory_space<vmem>>, vector<128x128xf32>,
    } else {
    }
    return
  }
  func.func @transform_0(%arg0: i32, %arg1: i32, %arg2: i32) -> (i32, i32) {
    %c0_i32 = arith.constant 0 : i32
    return %arg0, %arg2 : i32, i32
  }
  func.func @transform_1(%arg0: i32, %arg1: i32, %arg2: i32) -> (i32, i32) {
    %c0_i32 = arith.constant 0 : i32
    return %arg2, %arg1 : i32, i32
  }
  func.func @transform_2(%arg0: i32, %arg1: i32, %arg2: i32) -> (i32, i32) {
    %c0_i32 = arith.constant 0 : i32
    %c0_i32_0 = arith.constant 0 : i32
    return %c0_i32, %arg1 : i32, i32
  }
  func.func @transform_3(%arg0: i32, %arg1: i32, %arg2: i32) -> (i32, i32) {
    %c0_i32 = arith.constant 0 : i32
    return %arg0, %arg1 : i32, i32
  }
  func.func @transform_4(%arg0: i32, %arg1: i32, %arg2: i32) -> (i32, i32) {
    %c0_i32 = arith.constant 0 : i32
    return %arg0, %arg1 : i32, i32
  }
}

</mosaic_0001>

<bundles_post_ra>
// kernel: encoder_forward.26
= control target key start
LH: loop header
LB: loop body
LE: loop exit
PB: predicated region body
PF: predicated region fallthrough
CT: control target
= control target key end

     0   :  { %s1482_s18 = smov 0   ;;  %s2319_s0 = inlined_call_operand.vmem [shape: f32[2,256,32], index: 0, kind: input, shape index: {}]   ;;  %s2320_s1 = inlined_call_operand.vmem [shape: f32[1,32], index: 1, kind: input, shape index: {}]   ;;  %s2321_s2 = inlined_call_operand.vmem [shape: f32[1,32], index: 2, kind: input, shape index: {}]   ;;  %s2322_s3 = inlined_call_operand.vmem [shape: f32[32,32], index: 3, kind: input, shape index: {}]   ;;  %s2323_s4 = inlined_call_operand.vmem [shape: f32[32,32], index: 4, kind: input, shape index: {}]   ;;  %s2324_s5 = inlined_call_operand.vmem [shape: f32[2,256,32], index: 5, kind: output, shape index: {}]  }
   0x1 LB: > { %s1193_s19 = sadd.s32 4294967295, %s1447_s18   ;;  %p1197_p0 = scmp.ge.s32.totalorder %s1447_s18, 1  ;;  %s1447_s18 = sphi %s1482_s18, %s15_s18  }
   0x2   : > { %p187_p1 = scmp.lt.s32.totalorder %s1447_s18, 3 }
   0x4   : > { %p188_p2 = pnand %p1197_p0, %p187_p1 }
   0x6   : > { %191 = sbr.rel (%p188_p2) target bundleno = 1142 (0x476), region = 40 }
   0xd   : > { %v257_v0 = vld [vmem:[%s2322_s3] sm:$0xff]  ;;  %v258_v1 = vld [vmem:[%s2322_s3 + $0x8] sm:$0xff]  ;;  %v259_v2 = vld [vmem:[%s2322_s3 + $0x10] sm:$0xff]  ;;  %v1449_v3 = vmov 0.0|0.0   ;;  %vm1450_vm0 = vmmov 0   ;;  %v1451_v6 = vmov 0.0  }
   0xe   : > { %1276 = vmatprep.subr.bf16.mxu0 %v1449_v3  ;;  %v1500_v4 = vpack.c.bf16 %v258_v1, %v257_v0  ;;  %v260_v5 = vld [vmem:[%s2322_s3 + $0x18] sm:$0xff]  ;;  %1240 = vmatprep.mubr.msk.f32.mxu0 %vm1450_vm0, %v1451_v6  ;;  %p215_p3 = scmp.lt.s32.totalorder %s1193_s19, 1  ;;  %v261_v7 = vld [vmem:[%s2323_s4] sm:$0xff]  ;;  %v262_v8 = vld [vmem:[%s2323_s4 + $0x8] sm:$0xff]  ;;  %vm265_vm1 = vcmask 261120  }
   0xf   : > { %1282 = vmatprep.subr.bf16.mxu1 %v1449_v3  ;;  %v1514_v9 = vpack.c.bf16 %v262_v8, %v261_v7  ;;  %1251 = vmatprep.mubr.msk.f32.mxu1 %vm1450_vm0, %v1451_v6  ;;  %v1519_v10 = vpack.c.bf16 %v260_v5, %v259_v2 }
  0x10   : > { %1278 = vmatpush3.bf16.msra.mxu0 %v1500_v4  ;;  %s2335_s19 = smov (!%p215_p3, %s1193_s19), 1 }
  0x11   : > { %1279 = vmatprep.subr.bf16.mxu0 %v1449_v3  ;;  %1284 = vmatpush3.bf16.msra.mxu1 %v1514_v9  ;;  %s1210_s7 = sshll.u32 %s2335_s19, 8 }
  0x12   : > { %1285 = vmatprep.subr.bf16.mxu1 %v1449_v3  ;;  %s1532_s10 = scalar_lea.vmem %s2319_s0, %s1210_s7  ;;  %s2206_s23 = scalar_lea.vmem %s2324_s5, %s1210_s7 }
  0x13   : > { %v1536_v11 = vld [vmem:[%s1532_s10] sm:$0xff]  ;;  %v1539_v12 = vld [vmem:[%s1532_s10 + $0x8] sm:$0xff]  ;;  %v1542_v13 = vld [vmem:[%s1532_s10 + $0x10] sm:$0xff] }
  0x14   : > { %1281 = vmatpush3.bf16.msra.mxu0 %v1519_v10  ;;  %v1545_v14 = vld [vmem:[%s1532_s10 + $0x18] sm:$0xff]  ;;  %v266_v15 = vsel %vm265_vm1, %v1536_v11, 0.0  ;;  %v267_v16 = vsel %vm265_vm1, %v1539_v12, 0.0  ;;  %v269_v17 = vsel %vm265_vm1, %v1542_v13, 0.0  ;;  %v1555_v18 = vld [vmem:[%s1532_s10 + $0x20] sm:$0xff]  ;;  %v1560_v21 = vld [vmem:[%s1532_s10 + $0x28] sm:$0xff] }
  0x15   : > { %1288 = vmatprep.subr.bf16.mxu0 %v1449_v3  ;;  %v268_v19 = vadd.f32 %v267_v16, %v266_v15  ;;  %v271_v20 = vsel %vm265_vm1, %v1545_v14, 0.0  ;;  %v273_v23 = vsel %vm265_vm1, %v1555_v18, 0.0  ;;  %v1565_v24 = vld [vmem:[%s1532_s10 + $0x30] sm:$0xff]  ;;  %v275_v26 = vsel %vm265_vm1, %v1560_v21, 0.0  ;;  %v1570_v27 = vld [vmem:[%s1532_s10 + $0x38] sm:$0xff]  ;;  %v1575_v30 = vld [vmem:[%s1532_s10 + $0x40] sm:$0xff] }
  0x16   : > { %v277_v29 = vsel %vm265_vm1, %v1565_v24, 0.0  ;;  %v279_v32 = vsel %vm265_vm1, %v1570_v27, 0.0  ;;  %v1580_v33 = vld [vmem:[%s1532_s10 + $0x48] sm:$0xff]  ;;  %v281_v35 = vsel %vm265_vm1, %v1575_v30, 0.0  ;;  %v1585_v36 = vld [vmem:[%s1532_s10 + $0x50] sm:$0xff]  ;;  %v1590_v39 = vld [vmem:[%s1532_s10 + $0x58] sm:$0xff] }
  0x17   : > { %v270_v22 = vadd.f32 %v269_v17, %v268_v19  ;;  %v283_v38 = vsel %vm265_vm1, %v1580_v33, 0.0  ;;  %v285_v41 = vsel %vm265_vm1, %v1585_v36, 0.0  ;;  %v1595_v42 = vld [vmem:[%s1532_s10 + $0x60] sm:$0xff]  ;;  %v287_v44 = vsel %vm265_vm1, %v1590_v39, 0.0  ;;  %v1600_v45 = vld [vmem:[%s1532_s10 + $0x68] sm:$0xff]  ;;  %v1605_v48 = vld [vmem:[%s1532_s10 + $0x70] sm:$0xff] }
  0x18   : > { %v289_v47 = vsel %vm265_vm1, %v1595_v42, 0.0  ;;  %v291_v50 = vsel %vm265_vm1, %v1600_v45, 0.0  ;;  %v1610_v51 = vld [vmem:[%s1532_s10 + $0x78] sm:$0xff]  ;;  %v293_v53 = vsel %vm265_vm1, %v1605_v48, 0.0  ;;  %v1615_v54 = vld [vmem:[%s1532_s10 + $0x80] sm:$0xff]  ;;  %v1620_v57 = vld [vmem:[%s1532_s10 + $0x88] sm:$0xff] }
  0x19   : > { %v272_v25 = vadd.f32 %v271_v20, %v270_v22  ;;  %v295_v56 = vsel %vm265_vm1, %v1610_v51, 0.0  ;;  %v297_v59 = vsel %vm265_vm1, %v1615_v54, 0.0  ;;  %v1625_v60 = vld [vmem:[%s1532_s10 + $0x90] sm:$0xff]  ;;  %v299_v62 = vsel %vm265_vm1, %v1620_v57, 0.0  ;;  %v1630_v63 = vld [vmem:[%s1532_s10 + $0x98] sm:$0xff]  ;;  %v1635_v2 = vld [vmem:[%s1532_s10 + $0xa0] sm:$0xff] }
  0x1a   : > { %v301_v1 = vsel %vm265_vm1, %v1625_v60, 0.0  ;;  %v303_v7 = vsel %vm265_vm1, %v1630_v63, 0.0  ;;  %v1640_v8 = vld [vmem:[%s1532_s10 + $0xa8] sm:$0xff]  ;;  %v305_v16 = vsel %vm265_vm1, %v1635_v2, 0.0  ;;  %v1645_v17 = vld [vmem:[%s1532_s10 + $0xb0] sm:$0xff]  ;;  %v1650_v22 = vld [vmem:[%s1532_s10 + $0xb8] sm:$0xff] }
  0x1b   : > { %v274_v28 = vadd.f32 %v273_v23, %v272_v25  ;;  %v307_v20 = vsel %vm265_vm1, %v1640_v8, 0.0  ;;  %v309_v25 = vsel %vm265_vm1, %v1645_v17, 0.0 }
  0x1d   : > { %v276_v31 = vadd.f32 %v275_v26, %v274_v28  ;;  %v1655_v26 = vld [vmem:[%s1532_s10 + $0xc0] sm:$0xff] }
  0x1f   : > { %v278_v34 = vadd.f32 %v277_v29, %v276_v31  ;;  %v311_v29 = vsel %vm265_vm1, %v1650_v22, 0.0  ;;  %v1660_v31 = vld [vmem:[%s1532_s10 + $0xc8] sm:$0xff] }
  0x21   : > { %v280_v37 = vadd.f32 %v279_v32, %v278_v34  ;;  %v313_v34 = vsel %vm265_vm1, %v1655_v26, 0.0 }
  0x23   : > { %v282_v40 = vadd.f32 %v281_v35, %v280_v37  ;;  %v1665_v35 = vld [vmem:[%s1532_s10 + $0xd0] sm:$0xff] }
  0x25   : > { %v284_v43 = vadd.f32 %v283_v38, %v282_v40  ;;  %v315_v38 = vsel %vm265_vm1, %v1660_v31, 0.0  ;;  %v1670_v40 = vld [vmem:[%s1532_s10 + $0xd8] sm:$0xff] }
  0x27   : > { %v286_v46 = vadd.f32 %v285_v41, %v284_v43  ;;  %v317_v43 = vsel %vm265_vm1, %v1665_v35, 0.0 }
  0x29   : > { %v288_v49 = vadd.f32 %v287_v44, %v286_v46  ;;  %v1675_v44 = vld [vmem:[%s1532_s10 + $0xe0] sm:$0xff] }
  0x2b   : > { %v290_v52 = vadd.f32 %v289_v47, %v288_v49  ;;  %v319_v47 = vsel %vm265_vm1, %v1670_v40, 0.0  ;;  %v1680_v49 = vld [vmem:[%s1532_s10 + $0xe8] sm:$0xff] }
  0x2d   : > { %v292_v55 = vadd.f32 %v291_v50, %v290_v52  ;;  %v321_v52 = vsel %vm265_vm1, %v1675_v44, 0.0 }
  0x2f   : > { %v294_v58 = vadd.f32 %v293_v53, %v292_v55  ;;  %v1685_v53 = vld [vmem:[%s1532_s10 + $0xf0] sm:$0xff] }
  0x31   : > { %v296_v61 = vadd.f32 %v295_v56, %v294_v58  ;;  %v323_v56 = vsel %vm265_vm1, %v1680_v49, 0.0  ;;  %v1690_v58 = vld [vmem:[%s1532_s10 + $0xf8] sm:$0xff] }
  0x33   : > { %v298_v0 = vadd.f32 %v297_v59, %v296_v61  ;;  %v325_v61 = vsel %vm265_vm1, %v1685_v53, 0.0 }
  0x35   : > { %v300_v5 = vadd.f32 %v299_v62, %v298_v0  ;;  %v327_v0 = vsel %vm265_vm1, %v1690_v58, 0.0 }
  0x37   : > { %v302_v15 = vadd.f32 %v301_v1, %v300_v5 }
  0x39   : > { %v304_v19 = vadd.f32 %v303_v7, %v302_v15 }
  0x3b   : > { %v306_v23 = vadd.f32 %v305_v16, %v304_v19 }
  0x3d   : > { %v308_v28 = vadd.f32 %v307_v20, %v306_v23 }
  0x3f   : > { %v310_v32 = vadd.f32 %v309_v25, %v308_v28  ;;  %v263_v25 = vld [vmem:[%s2323_s4 + $0x10] sm:$0xff]  ;;  %v264_v28 = vld [vmem:[%s2323_s4 + $0x18] sm:$0xff] }
  0x41   : > { %v312_v37 = vadd.f32 %v311_v29, %v310_v32  ;;  %v1286_v29 = vpack.c.bf16 %v264_v28, %v263_v25 }
  0x43   : > { %v314_v41 = vadd.f32 %v313_v34, %v312_v37  ;;  %1287 = vmatpush3.bf16.msra.mxu1 %v1286_v29 }
  0x44   : > { %1294 = vmatprep.subr.bf16.mxu1 %v1449_v3 }
  0x45   : > { %v316_v46 = vadd.f32 %v315_v38, %v314_v41 }
  0x47   : > { %v318_v50 = vadd.f32 %v317_v43, %v316_v46 }
  0x49   : > { %v320_v55 = vadd.f32 %v319_v47, %v318_v50 }
  0x4b   : > { %v322_v59 = vadd.f32 %v321_v52, %v320_v55 }
  0x4d   : > { %v324_v62 = vadd.f32 %v323_v56, %v322_v59 }
  0x4f   : > { %v326_v1 = vadd.f32 %v325_v61, %v324_v62 }
  0x51   : > { %v328_v5 = vadd.f32 %v327_v0, %v326_v1 }
  0x53   : > { %v329_v7 = vrot.slane %v328_v5, 4 }
  0x55   : > { %v330_v15 = vadd.f32 %v329_v7, %v328_v5 }
  0x57   : > { %v331_v16 = vrot.slane %v330_v15, 2 }
  0x59   : > { %v332_v19 = vadd.f32 %v331_v16, %v330_v15 }
  0x5b   : > { %v333_v20 = vrot.slane %v332_v19, 1 }
  0x5d   : > { %v334_v23 = vadd.f32 %v333_v20, %v332_v19 }
  0x5f   : > { %1241 = vmatmul.mubr.msk.f32.vlgmr.msra.gmra.mrb[0].mxu0 %vm265_vm1, %v334_v23 }
  0x60   : > { %1290 = vmatpush3.bf16.msra.mxu0 %v1500_v4  ;;  %1262 = vmatprep.mubr.msk.f32.mxu0 %vm1450_vm0, %v1451_v6 }
  0x61   : > { %1291 = vmatprep.subr.bf16.mxu0 %v1449_v3 }
  0x64   : > { %1293 = vmatpush3.bf16.msra.mxu0 %v1519_v10  ;;  %v483_v10 = vlaneseq }
  0x66   : > { %v1714_v37 = vshrl.u32 %v483_v10, 7 }
  0x68   : > { %v485_v43 = vsub.s32 0, %v1714_v37 }
 0x132   : > { %v404_v4 = vpop.f32.mrb[0].mxu0 }
 0x133   : > { %v409_v32 = vmul.f32 0.00390625, %v404_v4  ;;  %v1242_v34 = vpop.f32.mrb[1].mxu0 }
 0x135   : > { %1252 = vmatmul.mubr.msk.f32.vlgmr.msra.gmra.mrb[0].mxu1 %vm265_vm1, %v409_v32 }
 0x136   : > { %1296 = vmatpush3.bf16.msra.mxu1 %v1514_v9  ;;  %1273 = vmatprep.mubr.msk.f32.mxu1 %vm1450_vm0, %v1451_v6 }
 0x137   : > { %1297 = vmatprep.subr.bf16.mxu1 %v1449_v3 }
 0x13a   : > { %1299 = vmatpush3.bf16.msra.mxu1 %v1286_v29 }
 0x208   : > { %v479_v38 = vpop.f32.mrb[0].mxu1 }
 0x209   : > { %v1253_v41 = vpop.f32.mrb[1].mxu1  ;;  %v1719_v46 = vrot.slane %v479_v38, %v485_v43 }
 0x20b   : > { %v1723_v9 = vsub.f32 %v1536_v11, %v1719_v46  ;;  %v1727_v6 = vsub.f32 %v1539_v12, %v1719_v46  ;;  %v1731_v3 = vsub.f32 %v1542_v13, %v1719_v46  ;;  %v1735_v47 = vsub.f32 %v1545_v14, %v1719_v46 }
 0x20c   : > { %v1743_v11 = vsub.f32 %v1555_v18, %v1719_v46  ;;  %v1749_v13 = vsub.f32 %v1560_v21, %v1719_v46  ;;  %v1757_v61 = vsub.f32 %v1565_v24, %v1719_v46  ;;  %v1764_v21 = vsub.f32 %v1570_v27, %v1719_v46 }
 0x20d   : > { %v519_v50 = vmul.f32 %v1723_v9, %v1723_v9  ;;  %v520_v52 = vmul.f32 %v1727_v6, %v1727_v6  ;;  %v521_v12 = vmul.f32 %v1731_v3, %v1731_v3  ;;  %v522_v14 = vmul.f32 %v1735_v47, %v1735_v47 }
 0x20e   : > { %v523_v18 = vmul.f32 %v1743_v11, %v1743_v11  ;;  %v524_v1 = vmul.f32 %v1749_v13, %v1749_v13  ;;  %v1771_v24 = vsub.f32 %v1575_v30, %v1719_v46  ;;  %v525_v15 = vmul.f32 %v1757_v61, %v1757_v61 }
 0x20f   : > { %v551_v55 = vsel %vm265_vm1, %v519_v50, 0.0  ;;  %v552_v56 = vsel %vm265_vm1, %v520_v52, 0.0  ;;  %v554_v62 = vsel %vm265_vm1, %v521_v12, 0.0  ;;  %v556_v5 = vsel %vm265_vm1, %v522_v14, 0.0 }
 0x210   : > { %v553_v59 = vadd.f32 %v552_v56, %v551_v55  ;;  %v558_v16 = vsel %vm265_vm1, %v523_v18, 0.0  ;;  %v1778_v27 = vsub.f32 %v1580_v33, %v1719_v46  ;;  %v526_v20 = vmul.f32 %v1764_v21, %v1764_v21 }
 0x211   : > { %v560_v23 = vsel %vm265_vm1, %v524_v1, 0.0  ;;  %v1785_v30 = vsub.f32 %v1585_v36, %v1719_v46  ;;  %v527_v28 = vmul.f32 %v1771_v24, %v1771_v24  ;;  %v562_v29 = vsel %vm265_vm1, %v525_v15, 0.0 }
 0x212   : > { %v555_v0 = vadd.f32 %v554_v62, %v553_v59  ;;  %v1792_v33 = vsub.f32 %v1590_v39, %v1719_v46  ;;  %v528_v32 = vmul.f32 %v1778_v27, %v1778_v27  ;;  %v564_v34 = vsel %vm265_vm1, %v526_v20, 0.0 }
 0x213   : > { %v1799_v36 = vsub.f32 %v1595_v42, %v1719_v46  ;;  %v529_v38 = vmul.f32 %v1785_v30, %v1785_v30  ;;  %v566_v41 = vsel %vm265_vm1, %v527_v28, 0.0  ;;  %v1806_v39 = vsub.f32 %v1600_v45, %v1719_v46 }
 0x214   : > { %v557_v7 = vadd.f32 %v556_v5, %v555_v0  ;;  %v530_v52 = vmul.f32 %v1792_v33, %v1792_v33  ;;  %v568_v12 = vsel %vm265_vm1, %v528_v32, 0.0  ;;  %v1813_v42 = vsub.f32 %v1605_v48, %v1719_v46 }
 0x215   : > { %v531_v55 = vmul.f32 %v1799_v36, %v1799_v36  ;;  %v570_v56 = vsel %vm265_vm1, %v529_v38, 0.0  ;;  %v1820_v45 = vsub.f32 %v1610_v51, %v1719_v46  ;;  %v532_v18 = vmul.f32 %v1806_v39, %v1806_v39 }
 0x216   : > { %v559_v19 = vadd.f32 %v558_v16, %v557_v7  ;;  %v572_v62 = vsel %vm265_vm1, %v530_v52, 0.0  ;;  %v1827_v48 = vsub.f32 %v1615_v54, %v1719_v46  ;;  %v533_v1 = vmul.f32 %v1813_v42, %v1813_v42 }
 0x217   : > { %v574_v5 = vsel %vm265_vm1, %v531_v55, 0.0  ;;  %v1834_v51 = vsub.f32 %v1620_v57, %v1719_v46  ;;  %v534_v15 = vmul.f32 %v1820_v45, %v1820_v45  ;;  %v576_v16 = vsel %vm265_vm1, %v532_v18, 0.0 }
 0x218   : > { %v561_v25 = vadd.f32 %v560_v23, %v559_v19  ;;  %v1841_v54 = vsub.f32 %v1625_v60, %v1719_v46  ;;  %v535_v20 = vmul.f32 %v1827_v48, %v1827_v48  ;;  %v578_v23 = vsel %vm265_vm1, %v533_v1, 0.0 }
 0x219   : > { %v1848_v57 = vsub.f32 %v1630_v63, %v1719_v46  ;;  %v536_v28 = vmul.f32 %v1834_v51, %v1834_v51  ;;  %v1855_v60 = vsub.f32 %v1635_v2, %v1719_v46  ;;  %v1862_v63 = vsub.f32 %v1640_v8, %v1719_v46 }
 0x21a   : > { %v563_v4 = vadd.f32 %v562_v29, %v561_v25  ;;  %v580_v29 = vsel %vm265_vm1, %v534_v15, 0.0  ;;  %v537_v32 = vmul.f32 %v1841_v54, %v1841_v54  ;;  %v1869_v2 = vsub.f32 %v1645_v17, %v1719_v46 }
 0x21b   : > { %v538_v38 = vmul.f32 %v1848_v57, %v1848_v57  ;;  %v539_v52 = vmul.f32 %v1855_v60, %v1855_v60  ;;  %v1876_v8 = vsub.f32 %v1650_v22, %v1719_v46  ;;  %v540_v55 = vmul.f32 %v1862_v63, %v1862_v63 }
 0x21c   : > { %v565_v10 = vadd.f32 %v564_v34, %v563_v4  ;;  %v582_v34 = vsel %vm265_vm1, %v535_v20, 0.0  ;;  %v1883_v17 = vsub.f32 %v1655_v26, %v1719_v46  ;;  %v541_v18 = vmul.f32 %v1869_v2, %v1869_v2 }
 0x21d   : > { %v1890_v22 = vsub.f32 %v1660_v31, %v1719_v46  ;;  %v542_v1 = vmul.f32 %v1876_v8, %v1876_v8  ;;  %v1897_v26 = vsub.f32 %v1665_v35, %v1719_v46  ;;  %v1904_v31 = vsub.f32 %v1670_v40, %v1719_v46 }
 0x21e   : > { %v567_v50 = vadd.f32 %v566_v41, %v565_v10  ;;  %v584_v41 = vsel %vm265_vm1, %v536_v28, 0.0  ;;  %v543_v15 = vmul.f32 %v1883_v17, %v1883_v17  ;;  %v1911_v35 = vsub.f32 %v1675_v44, %v1719_v46 }
 0x21f   : > { %v544_v20 = vmul.f32 %v1890_v22, %v1890_v22  ;;  %v545_v28 = vmul.f32 %v1897_v26, %v1897_v26  ;;  %v1918_v40 = vsub.f32 %v1680_v49, %v1719_v46  ;;  %v1925_v44 = vsub.f32 %v1685_v53, %v1719_v46 }
 0x220   : > { %v569_v14 = vadd.f32 %v568_v12, %v567_v50  ;;  %v586_v12 = vsel %vm265_vm1, %v537_v32, 0.0  ;;  %v546_v32 = vmul.f32 %v1904_v31, %v1904_v31  ;;  %v1932_v49 = vsub.f32 %v1690_v58, %v1719_v46 }
 0x221   : > { %v549_v53 = vmul.f32 %v1925_v44, %v1925_v44 }
 0x222   : > { %v571_v59 = vadd.f32 %v570_v56, %v569_v14  ;;  %v588_v56 = vsel %vm265_vm1, %v538_v38, 0.0  ;;  %v547_v38 = vmul.f32 %v1911_v35, %v1911_v35 }
 0x223   : > { %v610_v58 = vsel %vm265_vm1, %v549_v53, 0.0 }
 0x224   : > { %v573_v0 = vadd.f32 %v572_v62, %v571_v59  ;;  %v590_v62 = vsel %vm265_vm1, %v539_v52, 0.0  ;;  %v548_v52 = vmul.f32 %v1918_v40, %v1918_v40 }
 0x226   : > { %v575_v7 = vadd.f32 %v574_v5, %v573_v0  ;;  %v592_v5 = vsel %vm265_vm1, %v540_v55, 0.0  ;;  %v606_v55 = vsel %vm265_vm1, %v547_v38, 0.0 }
 0x228   : > { %v577_v19 = vadd.f32 %v576_v16, %v575_v7  ;;  %v594_v16 = vsel %vm265_vm1, %v541_v18, 0.0  ;;  %v608_v18 = vsel %vm265_vm1, %v548_v52, 0.0 }
 0x22a   : > { %v579_v25 = vadd.f32 %v578_v23, %v577_v19  ;;  %v596_v23 = vsel %vm265_vm1, %v542_v1, 0.0 }
 0x22c   : > { %v581_v4 = vadd.f32 %v580_v29, %v579_v25  ;;  %v598_v29 = vsel %vm265_vm1, %v543_v15, 0.0 }
 0x22e   : > { %v583_v10 = vadd.f32 %v582_v34, %v581_v4  ;;  %v600_v34 = vsel %vm265_vm1, %v544_v20, 0.0 }
 0x230   : > { %v585_v50 = vadd.f32 %v584_v41, %v583_v10  ;;  %v602_v41 = vsel %vm265_vm1, %v545_v28, 0.0 }
 0x232   : > { %v587_v14 = vadd.f32 %v586_v12, %v585_v50  ;;  %v604_v12 = vsel %vm265_vm1, %v546_v32, 0.0 }
 0x234   : > { %v589_v59 = vadd.f32 %v588_v56, %v587_v14 }
 0x236   : > { %v591_v0 = vadd.f32 %v590_v62, %v589_v59  ;;  %v550_v59 = vmul.f32 %v1932_v49, %v1932_v49 }
 0x238   : > { %v593_v7 = vadd.f32 %v592_v5, %v591_v0  ;;  %v612_v0 = vsel %vm265_vm1, %v550_v59, 0.0 }
 0x23a   : > { %v595_v19 = vadd.f32 %v594_v16, %v593_v7 }
 0x23c   : > { %v597_v25 = vadd.f32 %v596_v23, %v595_v19 }
 0x23e   : > { %v599_v4 = vadd.f32 %v598_v29, %v597_v25 }
 0x240   : > { %v601_v10 = vadd.f32 %v600_v34, %v599_v4 }
 0x242   : > { %v603_v50 = vadd.f32 %v602_v41, %v601_v10 }
 0x244   : > { %v605_v14 = vadd.f32 %v604_v12, %v603_v50 }
 0x246   : > { %v607_v56 = vadd.f32 %v606_v55, %v605_v14 }
 0x248   : > { %v609_v62 = vadd.f32 %v608_v18, %v607_v56 }
 0x24a   : > { %v611_v46 = vadd.f32 %v610_v58, %v609_v62 }
 0x24c   : > { %v613_v1 = vadd.f32 %v612_v0, %v611_v46 }
 0x24e   : > { %v614_v5 = vrot.slane %v613_v1, 4 }
 0x250   : > { %v615_v7 = vadd.f32 %v614_v5, %v613_v1 }
 0x252   : > { %v616_v15 = vrot.slane %v615_v7, 2 }
 0x254   : > { %v617_v16 = vadd.f32 %v616_v15, %v615_v7 }
 0x256   : > { %v618_v19 = vrot.slane %v617_v16, 1 }
 0x258   : > { %v619_v20 = vadd.f32 %v618_v19, %v617_v16 }
 0x25a   : > { %1263 = vmatmul.mubr.msk.f32.vlgmr.msra.gmra.mrb[2].mxu0 %vm265_vm1, %v619_v20 }
 0x32d   : > { %v689_v23 = vpop.f32.mrb[2].mxu0 }
 0x32e   : > { %v693_v25 = vmul.f32 0.00390625, %v689_v23  ;;  %v1264_v28 = vpop.f32.mrb[3].mxu0 }
 0x330   : > { %1274 = vmatmul.mubr.msk.f32.vlgmr.msra.gmra.mrb[2].mxu1 %vm265_vm1, %v693_v25 }
 0x403   : > { %v763_v29 = vpop.f32.mrb[2].mxu1 }
 0x404   : > { %v1275_v4 = vpop.f32.mrb[3].mxu1  ;;  %v764_v32 = vadd.f32 1e-06, %v763_v29 }
 0x406   : > { %1311 = vrsqrt.f32 %v764_v32 }
 0x410   : > { %v1312_v34 = vpop.eup %1311 }
 0x411   : > { %v771_v10 = vrot.slane %v1312_v34, %v485_v43 }
 0x413   : > { %v772_v38 = vmul.f32 %v771_v10, %v1723_v9  ;;  %v773_v41 = vmul.f32 %v771_v10, %v1727_v6  ;;  %v774_v50 = vmul.f32 %v771_v10, %v1731_v3  ;;  %v775_v52 = vmul.f32 %v771_v10, %v1735_v47 }
 0x414   : > { %v776_v12 = vmul.f32 %v771_v10, %v1743_v11  ;;  %v777_v14 = vmul.f32 %v771_v10, %v1749_v13  ;;  %v778_v53 = vmul.f32 %v771_v10, %v1757_v61  ;;  %v779_v55 = vmul.f32 %v771_v10, %v1764_v21 }
 0x415   : > { %v780_v56 = vmul.f32 %v771_v10, %v1771_v24  ;;  %v781_v37 = vmul.f32 %v771_v10, %v1778_v27  ;;  %v782_v43 = vmul.f32 %v771_v10, %v1785_v30  ;;  %v783_v9 = vmul.f32 %v771_v10, %v1792_v33 }
 0x416   : > { %v784_v6 = vmul.f32 %v771_v10, %v1799_v36  ;;  %v785_v3 = vmul.f32 %v771_v10, %v1806_v39  ;;  %v786_v47 = vmul.f32 %v771_v10, %v1813_v42  ;;  %v787_v11 = vmul.f32 %v771_v10, %v1820_v45  ;;  %v1206_v39 = vld [vmem:[%s2320_s1] ss:$0 sm:$0xff] }
 0x417   : > { %v788_v13 = vmul.f32 %v771_v10, %v1827_v48  ;;  %v789_v61 = vmul.f32 %v771_v10, %v1834_v51  ;;  %v790_v21 = vmul.f32 %v771_v10, %v1841_v54  ;;  %v791_v24 = vmul.f32 %v771_v10, %v1848_v57 }
 0x418   : > { %v792_v27 = vmul.f32 %v771_v10, %v1855_v60  ;;  %v793_v30 = vmul.f32 %v771_v10, %v1862_v63  ;;  %v794_v33 = vmul.f32 %v771_v10, %v1869_v2  ;;  %v795_v36 = vmul.f32 %v771_v10, %v1876_v8 }
 0x419   : > { %v796_v42 = vmul.f32 %v771_v10, %v1883_v17  ;;  %v797_v45 = vmul.f32 %v771_v10, %v1890_v22  ;;  %v798_v48 = vmul.f32 %v771_v10, %v1897_v26  ;;  %v799_v51 = vmul.f32 %v771_v10, %v1904_v31  ;;  %v1987_v26 = vld [vmem:[%s2321_s2] ss:$0 sm:$0xff] }
 0x41a   : > { %v800_v54 = vmul.f32 %v771_v10, %v1911_v35  ;;  %v801_v57 = vmul.f32 %v771_v10, %v1918_v40  ;;  %v802_v60 = vmul.f32 %v771_v10, %v1925_v44  ;;  %v803_v63 = vmul.f32 %v771_v10, %v1932_v49 }
 0x41b   : > { %v811_v2 = vmul.f32 %v1206_v39, %v772_v38  ;;  %v812_v8 = vmul.f32 %v1206_v39, %v773_v41  ;;  %v813_v59 = vmul.f32 %v1206_v39, %v774_v50  ;;  %v814_v18 = vmul.f32 %v1206_v39, %v775_v52 }
 0x41c   : > { %v815_v62 = vmul.f32 %v1206_v39, %v776_v12  ;;  %v816_v17 = vmul.f32 %v1206_v39, %v777_v14  ;;  %v817_v58 = vmul.f32 %v1206_v39, %v778_v53  ;;  %v818_v22 = vmul.f32 %v1206_v39, %v779_v55 }
 0x41d   : > { %v819_v31 = vmul.f32 %v1206_v39, %v780_v56  ;;  %v820_v35 = vmul.f32 %v1206_v39, %v781_v37  ;;  %v821_v40 = vmul.f32 %v1206_v39, %v782_v43  ;;  %v822_v46 = vmul.f32 %v1206_v39, %v783_v9 }
 0x41e   : > { %v823_v44 = vmul.f32 %v1206_v39, %v784_v6  ;;  %v824_v0 = vmul.f32 %v1206_v39, %v785_v3  ;;  %v825_v49 = vmul.f32 %v1206_v39, %v786_v47  ;;  %v826_v1 = vmul.f32 %v1206_v39, %v787_v11 }
 0x41f   : > { %v827_v5 = vmul.f32 %v1206_v39, %v788_v13  ;;  %v1990_v7 = vadd.f32 %v1987_v26, %v811_v2  ;;  %v1993_v15 = vadd.f32 %v1987_v26, %v812_v8  ;;  %v1996_v16 = vadd.f32 %v1987_v26, %v813_v59 }
 0x420   : > { %v828_v19 = vmul.f32 %v1206_v39, %v789_v61  ;;  %v829_v20 = vmul.f32 %v1206_v39, %v790_v21  ;;  %v830_v23 = vmul.f32 %v1206_v39, %v791_v24  ;;  %v1999_v25 = vadd.f32 %v1987_v26, %v814_v18 }
 0x421   : > { %v2001_v28 = vmul.f32 %v1206_v39, %v792_v27  ;;  %v2003_v29 = vmul.f32 %v1206_v39, %v793_v30  ;;  %v2005_v4 = vmul.f32 %v1206_v39, %v794_v33  ;;  %v2008_v32 = vadd.f32 %v1987_v26, %v815_v62 }
 0x422   : > { %v2010_v34 = vmul.f32 %v1206_v39, %v795_v36  ;;  %v2012_v10 = vmul.f32 %v1206_v39, %v796_v42  ;;  %v2015_v38 = vadd.f32 %v1987_v26, %v816_v17  ;;  %v2018_v41 = vadd.f32 %v1987_v26, %v817_v58 }
 0x423   : > { %v2020_v50 = vmul.f32 %v1206_v39, %v797_v45  ;;  %v882_v52 = vsub.f32 0.0, %v1990_v7  ;;  %v883_v12 = vsub.f32 0.0, %v1993_v15  ;;  %v884_v14 = vsub.f32 0.0, %v1996_v16 }
 0x424   : > { %v2025_v53 = vmul.f32 %v1206_v39, %v798_v48  ;;  %v2027_v55 = vmul.f32 %v1206_v39, %v799_v51  ;;  %v2030_v56 = vadd.f32 %v1987_v26, %v818_v22  ;;  %v885_v37 = vsub.f32 0.0, %v1999_v25 }
 0x425   : > { %v2033_v43 = vmul.f32 %v1206_v39, %v800_v54  ;;  %v2035_v9 = vmul.f32 %v1206_v39, %v801_v57  ;;  %v2038_v6 = vadd.f32 %v1987_v26, %v819_v31  ;;  %v886_v3 = vsub.f32 0.0, %v2008_v32 }
 0x426   : > { %v2041_v47 = vmul.f32 %v1206_v39, %v802_v60  ;;  %v2044_v11 = vadd.f32 %v1987_v26, %v820_v35  ;;  %v887_v13 = vsub.f32 0.0, %v2015_v38  ;;  %v888_v61 = vsub.f32 0.0, %v2018_v41 }
 0x427   : > { %v2049_v21 = vadd.f32 %v1987_v26, %v821_v40  ;;  %v914_v24 = vmul.f32 1.442695, %v882_v52  ;;  %v916_v27 = vmul.f32 1.442695, %v883_v12  ;;  %v918_v30 = vmul.f32 1.442695, %v884_v14 }
 0x428   : > { %v2051_v33 = vmul.f32 %v1206_v39, %v803_v63  ;;  %v2054_v36 = vadd.f32 %v1987_v26, %v822_v46  ;;  %v889_v42 = vsub.f32 0.0, %v2030_v56  ;;  %v920_v45 = vmul.f32 1.442695, %v885_v37 }
 0x429   : > { %v2058_v48 = vadd.f32 %v1987_v26, %v823_v44  ;;  %v890_v51 = vsub.f32 0.0, %v2038_v6  ;;  %1313 = vpow2.f32 %v914_v24  ;;  %v922_v54 = vmul.f32 1.442695, %v886_v3 }
 0x42a   : > { %v2062_v57 = vadd.f32 %v1987_v26, %v824_v0  ;;  %v891_v60 = vsub.f32 0.0, %v2044_v11  ;;  %1315 = vpow2.f32 %v916_v27  ;;  %v924_v39 = vmul.f32 1.442695, %v887_v13 }
 0x42b   : > { %v2066_v63 = vadd.f32 %v1987_v26, %v825_v49  ;;  %v892_v2 = vsub.f32 0.0, %v2049_v21  ;;  %1317 = vpow2.f32 %v918_v30  ;;  %v926_v8 = vmul.f32 1.442695, %v888_v61 }
 0x42c   : > { %v2070_v59 = vadd.f32 %v1987_v26, %v826_v1  ;;  %v893_v18 = vsub.f32 0.0, %v2054_v36  ;;  %1319 = vpow2.f32 %v920_v45  ;;  %v928_v62 = vmul.f32 1.442695, %v889_v42 }
 0x42d   : > { %v2074_v17 = vadd.f32 %v1987_v26, %v827_v5  ;;  %v894_v58 = vsub.f32 0.0, %v2058_v48  ;;  %1321 = vpow2.f32 %v922_v54  ;;  %v930_v22 = vmul.f32 1.442695, %v890_v51 }
 0x42e   : > { %v2078_v31 = vadd.f32 %v1987_v26, %v828_v19  ;;  %v895_v35 = vsub.f32 0.0, %v2062_v57  ;;  %1323 = vpow2.f32 %v924_v39  ;;  %v932_v40 = vmul.f32 1.442695, %v891_v60 }
 0x42f   : > { %v2082_v46 = vadd.f32 %v1987_v26, %v829_v20  ;;  %v896_v44 = vsub.f32 0.0, %v2066_v63  ;;  %1325 = vpow2.f32 %v926_v8  ;;  %v934_v0 = vmul.f32 1.442695, %v892_v2 }
 0x430   : > { %v2086_v49 = vadd.f32 %v1987_v26, %v830_v23  ;;  %v897_v1 = vsub.f32 0.0, %v2070_v59  ;;  %1327 = vpow2.f32 %v928_v62  ;;  %v936_v5 = vmul.f32 1.442695, %v893_v18 }
 0x431   : > { %v2091_v19 = vadd.f32 %v1987_v26, %v2001_v28  ;;  %v898_v52 = vsub.f32 0.0, %v2074_v17  ;;  %1329 = vpow2.f32 %v930_v22  ;;  %v938_v20 = vmul.f32 1.442695, %v894_v58 }
 0x432   : > { %v2096_v12 = vadd.f32 %v1987_v26, %v2003_v29  ;;  %v899_v14 = vsub.f32 0.0, %v2078_v31  ;;  %1331 = vpow2.f32 %v932_v40  ;;  %v940_v23 = vmul.f32 1.442695, %v895_v35 }
 0x433   : > { %v2099_v37 = vpop.eup %1313  ;;  %v2103_v3 = vadd.f32 %v1987_v26, %v2005_v4  ;;  %v900_v28 = vsub.f32 0.0, %v2082_v46  ;;  %1333 = vpow2.f32 %v934_v0  ;;  %v942_v13 = vmul.f32 1.442695, %v896_v44 }
 0x434   : > { %v2106_v61 = vpop.eup %1315  ;;  %v2110_v29 = vadd.f32 %v1987_v26, %v2010_v34  ;;  %v901_v24 = vsub.f32 0.0, %v2086_v49  ;;  %1335 = vpow2.f32 %v936_v5  ;;  %v944_v27 = vmul.f32 1.442695, %v897_v1 }
 0x435   : > { %v2113_v30 = vpop.eup %1317  ;;  %v2117_v4 = vadd.f32 %v1987_v26, %v2012_v10  ;;  %v902_v42 = vsub.f32 0.0, %v2091_v19  ;;  %1337 = vpow2.f32 %v938_v20  ;;  %v946_v45 = vmul.f32 1.442695, %v898_v52 }
 0x436   : > { %v2120_v51 = vpop.eup %1319  ;;  %v2124_v34 = vadd.f32 %v1987_v26, %v2020_v50  ;;  %v903_v54 = vsub.f32 0.0, %v2096_v12  ;;  %1339 = vpow2.f32 %v940_v23  ;;  %v948_v60 = vmul.f32 1.442695, %v899_v14 }
 0x437   : > { %v2127_v39 = vpop.eup %1321  ;;  %v2131_v10 = vadd.f32 %v1987_v26, %v2025_v53  ;;  %v904_v2 = vsub.f32 0.0, %v2103_v3  ;;  %1341 = vpow2.f32 %v942_v13  ;;  %v950_v8 = vmul.f32 1.442695, %v900_v28 }
 0x438   : > { %v2134_v18 = vpop.eup %1323  ;;  %v2138_v50 = vadd.f32 %v1987_v26, %v2027_v55  ;;  %v905_v62 = vsub.f32 0.0, %v2110_v29  ;;  %1343 = vpow2.f32 %v944_v27  ;;  %v952_v58 = vmul.f32 1.442695, %v901_v24 }
 0x439   : > { %v2141_v22 = vpop.eup %1325  ;;  %v2145_v53 = vadd.f32 %v1987_v26, %v2033_v43  ;;  %v906_v35 = vsub.f32 0.0, %v2117_v4  ;;  %1345 = vpow2.f32 %v946_v45  ;;  %v954_v40 = vmul.f32 1.442695, %v902_v42 }
 0x43a   : > { %v2148_v44 = vpop.eup %1327  ;;  %v2152_v55 = vadd.f32 %v1987_v26, %v2035_v9  ;;  %v907_v0 = vsub.f32 0.0, %v2124_v34  ;;  %1347 = vpow2.f32 %v948_v60  ;;  %v956_v1 = vmul.f32 1.442695, %v903_v54 }
 0x43b   : > { %2328 = vst [vmem:[#allocation2_spill] sm:$0xff] %v2145_v53  ;;  %v1330_v5 = vpop.eup %1329  ;;  %v2157_v52 = vadd.f32 %v1987_v26, %v2041_v47  ;;  %v908_v43 = vsub.f32 0.0, %v2131_v10  ;;  %1349 = vpow2.f32 %v950_v8  ;;  %v958_v20 = vmul.f32 1.442695, %v904_v2 }
 0x43c   : > { %2329 = vst [vmem:[#allocation3_spill] sm:$0xff] %v2152_v55  ;;  %v1332_v14 = vpop.eup %1331  ;;  %v2162_v23 = vadd.f32 %v1987_v26, %v2051_v33  ;;  %v909_v9 = vsub.f32 0.0, %v2138_v50  ;;  %1351 = vpow2.f32 %v952_v58  ;;  %v960_v28 = vmul.f32 1.442695, %v905_v62 }
 0x43d   : > { %2330 = vst [vmem:[#allocation4_spill] sm:$0xff] %v2157_v52  ;;  %v1334_v13 = vpop.eup %1333  ;;  %v910_v24 = vsub.f32 0.0, %v2145_v53  ;;  %1353 = vpow2.f32 %v954_v40  ;;  %v962_v27 = vmul.f32 1.442695, %v906_v35  ;;  %v911_v42 = vsub.f32 0.0, %v2152_v55 }
 0x43e   : > { %v1336_v47 = vpop.eup %1335  ;;  %1355 = vpow2.f32 %v956_v1  ;;  %v964_v45 = vmul.f32 1.442695, %v907_v0  ;;  %v912_v60 = vsub.f32 0.0, %v2157_v52  ;;  %v966_v26 = vmul.f32 1.442695, %v908_v43 }
 0x43f   : > { %v1338_v54 = vpop.eup %1337  ;;  %1357 = vpow2.f32 %v958_v20  ;;  %v913_v2 = vsub.f32 0.0, %v2162_v23  ;;  %v968_v8 = vmul.f32 1.442695, %v909_v9  ;;  %v970_v58 = vmul.f32 1.442695, %v910_v24 }
 0x440   : > { %v1340_v33 = vpop.eup %1339  ;;  %1359 = vpow2.f32 %v960_v28  ;;  %v972_v35 = vmul.f32 1.442695, %v911_v42  ;;  %v974_v1 = vmul.f32 1.442695, %v912_v60  ;;  %v978_v43 = vadd.f32 1.0, %v2099_v37 }
 0x441   : > { %v1342_v62 = vpop.eup %1341  ;;  %1361 = vpow2.f32 %v962_v27  ;;  %v976_v55 = vmul.f32 1.442695, %v913_v2  ;;  %v979_v9 = vadd.f32 1.0, %v2106_v61  ;;  %v980_v24 = vadd.f32 1.0, %v2113_v30 }
 0x442   : > { %v1344_v40 = vpop.eup %1343  ;;  %1363 = vpow2.f32 %v964_v45  ;;  %v981_v42 = vadd.f32 1.0, %v2120_v51  ;;  %v982_v60 = vadd.f32 1.0, %v2127_v39  ;;  %v984_v2 = vadd.f32 1.0, %v2141_v22 }
 0x443   : > { %v1346_v53 = vpop.eup %1345  ;;  %1365 = vpow2.f32 %v966_v26  ;;  %v983_v26 = vadd.f32 1.0, %v2134_v18 }
 0x444   : > { %v1348_v0 = vpop.eup %1347  ;;  %1367 = vpow2.f32 %v968_v8  ;;  %v986_v8 = vadd.f32 1.0, %v1330_v5  ;;  %v991_v5 = vadd.f32 1.0, %v1340_v33 }
 0x445   : > { %v1350_v52 = vpop.eup %1349  ;;  %1369 = vpow2.f32 %v970_v58  ;;  %v987_v58 = vadd.f32 1.0, %v1332_v14  ;;  %v992_v14 = vadd.f32 1.0, %v1342_v62 }
 0x446   : > { %v1352_v20 = vpop.eup %1351  ;;  %1371 = vpow2.f32 %v972_v35  ;;  %v988_v35 = vadd.f32 1.0, %v1334_v13 }
 0x447   : > { %v2171_v28 = vpop.eup %1353  ;;  %1373 = vpow2.f32 %v974_v1  ;;  %v989_v1 = vadd.f32 1.0, %v1336_v47  ;;  %v993_v47 = vadd.f32 1.0, %v1344_v40  ;;  %v996_v40 = vadd.f32 1.0, %v1350_v52 }
 0x448   : > { %v2174_v27 = vpop.eup %1355  ;;  %1375 = vpow2.f32 %v976_v55  ;;  %v985_v55 = vadd.f32 1.0, %v2148_v44  ;;  %v990_v44 = vadd.f32 1.0, %v1338_v54 }
 0x449   : > { %v2177_v45 = vpop.eup %1357  ;;  %1377 = vrcp.f32 %v978_v43 }
 0x44a   : > { %v2180_v37 = vpop.eup %1359  ;;  %1379 = vrcp.f32 %v979_v9 }
 0x44b   : > { %v2183_v61 = vpop.eup %1361  ;;  %1381 = vrcp.f32 %v980_v24 }
 0x44c   : > { %v2186_v30 = vpop.eup %1363  ;;  %1383 = vrcp.f32 %v981_v42 }
 0x44d   : > { %v2189_v51 = vpop.eup %1365  ;;  %1385 = vrcp.f32 %v982_v60  ;;  %v994_v60 = vadd.f32 1.0, %v1346_v53  ;;  %v997_v53 = vadd.f32 1.0, %v1352_v20 }
 0x44e   : > { %v2191_v39 = vpop.eup %1367  ;;  %1387 = vrcp.f32 %v983_v26 }
 0x44f   : > { %v2193_v18 = vpop.eup %1369  ;;  %1389 = vrcp.f32 %v984_v2  ;;  %v995_v2 = vadd.f32 1.0, %v1348_v0  ;;  %v998_v0 = vadd.f32 1.0, %v2171_v28 }
 0x450   : > { %v2195_v22 = vpop.eup %1371  ;;  %1391 = vrcp.f32 %v985_v55 }
 0x451   : > { %v2197_v43 = vpop.eup %1373  ;;  %1393 = vrcp.f32 %v986_v8 }
 0x452   : > { %v2199_v9 = vpop.eup %1375  ;;  %1395 = vrcp.f32 %v987_v58  ;;  %v999_v58 = vadd.f32 1.0, %v2174_v27 }
 0x453   : > { %v1378_v24 = vpop.eup %1377  ;;  %1397 = vrcp.f32 %v988_v35  ;;  %v1000_v35 = vadd.f32 1.0, %v2177_v45 }
 0x454   : > { %v1380_v13 = vpop.eup %1379  ;;  %1399 = vrcp.f32 %v989_v1  ;;  %v1074_v54 = vmul.f32 %v1378_v24, %v1990_v7  ;;  %v1001_v1 = vadd.f32 1.0, %v2180_v37  ;;  %v1004_v24 = vadd.f32 1.0, %v2189_v51 }
 0x455   : > { %v1382_v42 = vpop.eup %1381  ;;  %1401 = vrcp.f32 %v990_v44  ;;  %v1075_v33 = vmul.f32 %v1380_v13, %v1993_v15  ;;  %v1002_v44 = vadd.f32 1.0, %v2183_v61  ;;  %v1006_v13 = vadd.f32 1.0, %v2193_v18 }
 0x456   : > { %v1384_v26 = vpop.eup %1383  ;;  %1403 = vrcp.f32 %v991_v5  ;;  %v1076_v55 = vmul.f32 %v1382_v42, %v1996_v16  ;;  %1106 = vst.msk [vmem:[%s2206_s23] sm:$0xff] %vm265_vm1, %v1074_v54  ;;  %v1003_v5 = vadd.f32 1.0, %v2186_v30  ;;  %v1008_v54 = vadd.f32 1.0, %v2197_v43 }
 0x457   : > { %v1386_v62 = vpop.eup %1385  ;;  %1405 = vrcp.f32 %v992_v14  ;;  %v1077_v8 = vmul.f32 %v1384_v26, %v1999_v25  ;;  %1107 = vst.msk [vmem:[%s2206_s23 + $0x8] sm:$0xff] %vm265_vm1, %v1075_v33  ;;  %v1005_v14 = vadd.f32 1.0, %v2191_v39  ;;  %v1009_v42 = vadd.f32 1.0, %v2199_v9 }
 0x458   : > { %v1388_v7 = vpop.eup %1387  ;;  %1407 = vrcp.f32 %v993_v47  ;;  %v1078_v15 = vmul.f32 %v1386_v62, %v2008_v32  ;;  %1108 = vst.msk [vmem:[%s2206_s23 + $0x10] sm:$0xff] %vm265_vm1, %v1076_v55  ;;  %v1007_v47 = vadd.f32 1.0, %v2195_v22 }
 0x459   : > { %v1390_v16 = vpop.eup %1389  ;;  %1409 = vrcp.f32 %v994_v60  ;;  %v1079_v52 = vmul.f32 %v1388_v7, %v2015_v38  ;;  %1109 = vst.msk [vmem:[%s2206_s23 + $0x18] sm:$0xff] %vm265_vm1, %v1077_v8 }
 0x45a   : > { %v1392_v25 = vpop.eup %1391  ;;  %1411 = vrcp.f32 %v995_v2  ;;  %v1080_v20 = vmul.f32 %v1390_v16, %v2018_v41  ;;  %1110 = vst.msk [vmem:[%s2206_s23 + $0x20] sm:$0xff] %vm265_vm1, %v1078_v15  ;;  %v2331_v15 = vld [vmem:[#allocation2_spill] sm:$0xff] }
 0x45b   : > { %v1394_v32 = vpop.eup %1393  ;;  %1413 = vrcp.f32 %v996_v40  ;;  %v1081_v28 = vmul.f32 %v1392_v25, %v2030_v56  ;;  %1111 = vst.msk [vmem:[%s2206_s23 + $0x28] sm:$0xff] %vm265_vm1, %v1079_v52  ;;  %v2333_v25 = vld [vmem:[#allocation4_spill] sm:$0xff] }
 0x45c   : > { %v1396_v38 = vpop.eup %1395  ;;  %1415 = vrcp.f32 %v997_v53  ;;  %v1082_v27 = vmul.f32 %v1394_v32, %v2038_v6  ;;  %1112 = vst.msk [vmem:[%s2206_s23 + $0x30] sm:$0xff] %vm265_vm1, %v1080_v20 }
 0x45d   : > { %v1398_v41 = vpop.eup %1397  ;;  %1417 = vrcp.f32 %v998_v0  ;;  %v1083_v45 = vmul.f32 %v1396_v38, %v2044_v11  ;;  %1113 = vst.msk [vmem:[%s2206_s23 + $0x38] sm:$0xff] %vm265_vm1, %v1081_v28  ;;  %v2332_v0 = vld [vmem:[#allocation3_spill] sm:$0xff] }
 0x45e   : > { %v1400_v56 = vpop.eup %1399  ;;  %1419 = vrcp.f32 %v999_v58  ;;  %v1084_v37 = vmul.f32 %v1398_v41, %v2049_v21  ;;  %1114 = vst.msk [vmem:[%s2206_s23 + $0x40] sm:$0xff] %vm265_vm1, %v1082_v27 }
 0x45f   : > { %v1402_v6 = vpop.eup %1401  ;;  %1421 = vrcp.f32 %v1000_v35  ;;  %v1085_v61 = vmul.f32 %v1400_v56, %v2054_v36  ;;  %1115 = vst.msk [vmem:[%s2206_s23 + $0x48] sm:$0xff] %vm265_vm1, %v1083_v45 }
 0x460   : > { %v1404_v11 = vpop.eup %1403  ;;  %1423 = vrcp.f32 %v1001_v1  ;;  %v1086_v30 = vmul.f32 %v1402_v6, %v2058_v48  ;;  %1116 = vst.msk [vmem:[%s2206_s23 + $0x50] sm:$0xff] %vm265_vm1, %v1084_v37 }
 0x461   : > { %v1406_v21 = vpop.eup %1405  ;;  %1425 = vrcp.f32 %v1002_v44  ;;  %v1087_v51 = vmul.f32 %v1404_v11, %v2062_v57  ;;  %1117 = vst.msk [vmem:[%s2206_s23 + $0x58] sm:$0xff] %vm265_vm1, %v1085_v61 }
 0x462   : > { %v1408_v36 = vpop.eup %1407  ;;  %1427 = vrcp.f32 %v1003_v5  ;;  %v1088_v39 = vmul.f32 %v1406_v21, %v2066_v63  ;;  %1118 = vst.msk [vmem:[%s2206_s23 + $0x60] sm:$0xff] %vm265_vm1, %v1086_v30 }
 0x463   : > { %v1410_v48 = vpop.eup %1409  ;;  %1429 = vrcp.f32 %v1004_v24  ;;  %v1089_v18 = vmul.f32 %v1408_v36, %v2070_v59  ;;  %1119 = vst.msk [vmem:[%s2206_s23 + $0x68] sm:$0xff] %vm265_vm1, %v1087_v51 }
 0x464   : > { %v1412_v57 = vpop.eup %1411  ;;  %1431 = vrcp.f32 %v1005_v14  ;;  %v1090_v22 = vmul.f32 %v1410_v48, %v2074_v17  ;;  %1120 = vst.msk [vmem:[%s2206_s23 + $0x70] sm:$0xff] %vm265_vm1, %v1088_v39 }
 0x465   : > { %v1414_v63 = vpop.eup %1413  ;;  %1433 = vrcp.f32 %v1006_v13  ;;  %v1091_v43 = vmul.f32 %v1412_v57, %v2078_v31  ;;  %1121 = vst.msk [vmem:[%s2206_s23 + $0x78] sm:$0xff] %vm265_vm1, %v1089_v18 }
 0x466   : > { %v1416_v59 = vpop.eup %1415  ;;  %1435 = vrcp.f32 %v1007_v47  ;;  %v1092_v60 = vmul.f32 %v1414_v63, %v2082_v46  ;;  %1122 = vst.msk [vmem:[%s2206_s23 + $0x80] sm:$0xff] %vm265_vm1, %v1090_v22 }
 0x467   : > { %v1418_v9 = vpop.eup %1417  ;;  %1437 = vrcp.f32 %v1008_v54  ;;  %v1093_v17 = vmul.f32 %v1416_v59, %v2086_v49  ;;  %1123 = vst.msk [vmem:[%s2206_s23 + $0x88] sm:$0xff] %vm265_vm1, %v1091_v43 }
 0x468   : > { %v1420_v33 = vpop.eup %1419  ;;  %1439 = vrcp.f32 %v1009_v42  ;;  %v1094_v31 = vmul.f32 %v1418_v9, %v2091_v19  ;;  %1124 = vst.msk [vmem:[%s2206_s23 + $0x90] sm:$0xff] %vm265_vm1, %v1092_v60 }
 0x469   : > { %v1422_v26 = vpop.eup %1421  ;;  %v1095_v46 = vmul.f32 %v1420_v33, %v2096_v12  ;;  %1125 = vst.msk [vmem:[%s2206_s23 + $0x98] sm:$0xff] %vm265_vm1, %v1093_v17 }
 0x46a   : > { %v1424_v2 = vpop.eup %1423  ;;  %v1096_v55 = vmul.f32 %v1422_v26, %v2103_v3  ;;  %1126 = vst.msk [vmem:[%s2206_s23 + $0xa0] sm:$0xff] %vm265_vm1, %v1094_v31 }
 0x46b   : > { %v1426_v49 = vpop.eup %1425  ;;  %v1097_v62 = vmul.f32 %v1424_v2, %v2110_v29  ;;  %1127 = vst.msk [vmem:[%s2206_s23 + $0xa8] sm:$0xff] %vm265_vm1, %v1095_v46 }
 0x46c   : > { %v1428_v19 = vpop.eup %1427  ;;  %v1098_v40 = vmul.f32 %v1426_v49, %v2117_v4  ;;  %1128 = vst.msk [vmem:[%s2206_s23 + $0xb0] sm:$0xff] %vm265_vm1, %v1096_v55 }
 0x46d   : > { %v1430_v12 = vpop.eup %1429  ;;  %v1099_v8 = vmul.f32 %v1428_v19, %v2124_v34  ;;  %1129 = vst.msk [vmem:[%s2206_s23 + $0xb8] sm:$0xff] %vm265_vm1, %v1097_v62 }
 0x46e   : > { %v1432_v3 = vpop.eup %1431  ;;  %v1100_v7 = vmul.f32 %v1430_v12, %v2131_v10  ;;  %1130 = vst.msk [vmem:[%s2206_s23 + $0xc0] sm:$0xff] %vm265_vm1, %v1098_v40 }
 0x46f   : > { %v1434_v29 = vpop.eup %1433  ;;  %v1101_v4 = vmul.f32 %v1432_v3, %v2138_v50  ;;  %1131 = vst.msk [vmem:[%s2206_s23 + $0xc8] sm:$0xff] %vm265_vm1, %v1099_v8 }
 0x470   : > { %v1436_v53 = vpop.eup %1435  ;;  %v1102_v16 = vmul.f32 %v1434_v29, %v2331_v15  ;;  %1132 = vst.msk [vmem:[%s2206_s23 + $0xd0] sm:$0xff] %vm265_vm1, %v1100_v7 }
 0x471   : > { %v1438_v34 = vpop.eup %1437  ;;  %v1103_v52 = vmul.f32 %v1436_v53, %v2332_v0  ;;  %1133 = vst.msk [vmem:[%s2206_s23 + $0xd8] sm:$0xff] %vm265_vm1, %v1101_v4 }
 0x472   : > { %v1440_v10 = vpop.eup %1439  ;;  %v1104_v58 = vmul.f32 %v1438_v34, %v2333_v25  ;;  %1134 = vst.msk [vmem:[%s2206_s23 + $0xe0] sm:$0xff] %vm265_vm1, %v1102_v16 }
 0x473   : > { %v1105_v20 = vmul.f32 %v1440_v10, %v2162_v23  ;;  %1135 = vst.msk [vmem:[%s2206_s23 + $0xe8] sm:$0xff] %vm265_vm1, %v1103_v52 }
 0x474   : > { %1136 = vst.msk [vmem:[%s2206_s23 + $0xf0] sm:$0xff] %vm265_vm1, %v1104_v58 }
 0x475   : > { %1137 = vst.msk [vmem:[%s2206_s23 + $0xf8] sm:$0xff] %vm265_vm1, %v1105_v20 }
 0x476 PF: > { %s15_s18 = sadd.s32 1, %s1447_s18  }
 0x477   : > { %p12_p4 = scmp.ge.s32.totalorder %s15_s18, 4  }
 0x479   :  { %14 = sbr.rel (!%p12_p4) target bundleno = 1 (0x1), region = 70 }

// kernel: encoder_forward.25
= control target key start
LH: loop header
LB: loop body
LE: loop exit
PB: predicated region body
PF: predicated region fallthrough
CT: control target
= control target key end

     0   :  { %s1180_s12 = smov 0   ;;  %s1182_s13 = smov 0   ;;  %s1330_s0 = inlined_call_operand.vmem [shape: bf16[512,128], index: 0, kind: input, shape index: {}]   ;;  %s1331_s1 = inlined_call_operand.vmem [shape: bf16[128,128], index: 1, kind: input, shape index: {}]   ;;  %s1332_s2 = inlined_call_operand.vmem [shape: f32[1,128], index: 2, kind: input, shape index: {}]   ;;  %s1333_s3 = inlined_call_operand.vmem [shape: f32[512,128], index: 3, kind: output, shape index: {}]  }
   0x1   :  { %s1184_s14 = smov 0  }
   0x2 LB: > { %s32_s15 = sadd.s32 1, %s1154_s13  ;;  %p968_p0 = scmp.ge.s32.totalorder %s1158_s14, 1  ;;  %s1158_s14 = sphi %s1184_s14, %s13_s14   ;;  %s1154_s13 = sphi %s1182_s13, %s1335_s13   ;;  %s1150_s12 = sphi %s1180_s12, %s1334_s12  }
   0x3   : > { %p34_p1 = scmp.ge.s32.totalorder %s32_s15, 2  ;;  %p188_p2 = scmp.lt.s32.totalorder %s1158_s14, 3 }
   0x5   : > { %s1337_s15 = smov (%p34_p1, %s32_s15), 0  ;;  %p189_p3 = pnand %p968_p0, %p188_p2 }
   0x6   : > { %v1112_v0 = vld [vmem:[%s1331_s1] sm:$0xff] (!%p189_p3)   ;;  %s969_s18 = sshll.u32 (!%p189_p3), %s1150_s12, 5  ;;  %v1113_v1 = vld [vmem:[%s1331_s1 + $0x8] sm:$0xff] (!%p189_p3)   ;;  %v1114_v2 = vld [vmem:[%s1331_s1 + $0x10] sm:$0xff] (!%p189_p3)  }
   0x7   : > { %192 = sbr.rel (%p189_p3) target bundleno = 281 (0x119), region = 32  ;;  %p230_p4 = scmp.lt.s32.totalorder (!%p189_p3), %s969_s18, 63  ;;  %1024 = vmatprep.subr.bf16.mxu0 (!%p189_p3), %v1112_v0  ;;  %1072 = vmatprep.subr.bf16.mxu1 (!%p189_p3), %v1112_v0  ;;  %v1115_v3 = vld [vmem:[%s1331_s1 + $0x18] sm:$0xff] (!%p189_p3)   ;;  %v1116_v6 = vld [vmem:[%s1331_s1 + $0x20] sm:$0xff] (!%p189_p3)   ;;  %v1117_v7 = vld [vmem:[%s1331_s1 + $0x28] sm:$0xff] (!%p189_p3)  }
   0x8   : > { %1025 = vmatpush3.bf16.msra.mxu0 (!%p189_p3), %v1112_v0  ;;  %1080 = vmatpush3.bf16.msra.mxu1 (!%p189_p3), %v1112_v0  ;;  %v1118_v8 = vld [vmem:[%s1331_s1 + $0x30] sm:$0xff] (!%p189_p3)   ;;  %v1119_v9 = vld [vmem:[%s1331_s1 + $0x38] sm:$0xff] (!%p189_p3)   ;;  %v1250_v24 = vld [vmem:[%s1332_s2] ss:$0 sm:$0xff] (!%p189_p3) }
   0x9   : > { %1026 = vmatprep.subr.bf16.mxu0 (!%p189_p3), %v1113_v1  ;;  %1073 = vmatprep.subr.bf16.mxu1 (!%p189_p3), %v1113_v1 }
   0xc   : > { %1027 = vmatpush3.bf16.msra.mxu0 (!%p189_p3), %v1113_v1  ;;  %1081 = vmatpush3.bf16.msra.mxu1 (!%p189_p3), %v1113_v1 }
   0xd   : > { %1028 = vmatprep.subr.bf16.mxu0 (!%p189_p3), %v1114_v2  ;;  %1074 = vmatprep.subr.bf16.mxu1 (!%p189_p3), %v1114_v2 }
   0xe   : > { %s1339_s18 = smov (!%p230_p4, %s969_s18), 63 }
   0xf   : > { %s970_s23 = sshll.u32 %s1339_s18, 2  ;;  %s972_s10 = sshll.u32 %s1339_s18, 3 }
  0x10   : > { %s1213_s26 = scalar_lea.vmem %s1330_s0, %s970_s23  ;;  %1029 = vmatpush3.bf16.msra.mxu0 %v1114_v2  ;;  %1082 = vmatpush3.bf16.msra.mxu1 %v1114_v2  ;;  %s1255_s19 = scalar_lea.vmem %s1333_s3, %s972_s10 }
  0x11   : > { %v1120_v4 = vld [vmem:[%s1213_s26] sm:$0xff]   ;;  %1030 = vmatprep.subr.bf16.mxu0 %v1115_v3  ;;  %1075 = vmatprep.subr.bf16.mxu1 %v1115_v3  ;;  %v1122_v10 = vld [vmem:[%s1213_s26 + $0x8] sm:$0xff]   ;;  %v1124_v12 = vld [vmem:[%s1213_s26 + $0x10] sm:$0xff]  }
  0x12   : > { %v1121_v5 = vld [vmem:[%s1213_s26 + $0x40] sm:$0xff]   ;;  %1040 = vmatprep.mubr.bf16.mxu0 %v1120_v4  ;;  %v1123_v11 = vld [vmem:[%s1213_s26 + $0x48] sm:$0xff]   ;;  %v1125_v13 = vld [vmem:[%s1213_s26 + $0x50] sm:$0xff]  }
  0x13   : > { %1056 = vmatprep.mubr.bf16.mxu1 %v1121_v5  ;;  %v1126_v14 = vld [vmem:[%s1213_s26 + $0x18] sm:$0xff]   ;;  %v1128_v16 = vld [vmem:[%s1213_s26 + $0x20] sm:$0xff]   ;;  %v1130_v18 = vld [vmem:[%s1213_s26 + $0x28] sm:$0xff]  }
  0x14   : > { %1031 = vmatpush3.bf16.msra.mxu0 %v1115_v3  ;;  %1083 = vmatpush3.bf16.msra.mxu1 %v1115_v3  ;;  %v1127_v15 = vld [vmem:[%s1213_s26 + $0x58] sm:$0xff]   ;;  %v1129_v17 = vld [vmem:[%s1213_s26 + $0x60] sm:$0xff]   ;;  %v1131_v19 = vld [vmem:[%s1213_s26 + $0x68] sm:$0xff]  }
  0x15   : > { %1032 = vmatprep.subr.bf16.mxu0 %v1116_v6  ;;  %1076 = vmatprep.subr.bf16.mxu1 %v1116_v6  ;;  %v1132_v20 = vld [vmem:[%s1213_s26 + $0x30] sm:$0xff]   ;;  %v1134_v22 = vld [vmem:[%s1213_s26 + $0x38] sm:$0xff]  }
  0x16   : > { %v1133_v21 = vld [vmem:[%s1213_s26 + $0x70] sm:$0xff]   ;;  %v1135_v23 = vld [vmem:[%s1213_s26 + $0x78] sm:$0xff]  }
  0x18   : > { %1033 = vmatpush3.bf16.msra.mxu0 %v1116_v6  ;;  %1084 = vmatpush3.bf16.msra.mxu1 %v1116_v6 }
  0x19   : > { %1034 = vmatprep.subr.bf16.mxu0 %v1117_v7  ;;  %1077 = vmatprep.subr.bf16.mxu1 %v1117_v7 }
  0x1c   : > { %1035 = vmatpush3.bf16.msra.mxu0 %v1117_v7  ;;  %1085 = vmatpush3.bf16.msra.mxu1 %v1117_v7 }
  0x1d   : > { %1036 = vmatprep.subr.bf16.mxu0 %v1118_v8  ;;  %1078 = vmatprep.subr.bf16.mxu1 %v1118_v8 }
  0x20   : > { %1037 = vmatpush3.bf16.msra.mxu0 %v1118_v8  ;;  %1086 = vmatpush3.bf16.msra.mxu1 %v1118_v8 }
  0x21   : > { %1038 = vmatprep.subr.bf16.mxu0 %v1119_v9  ;;  %1079 = vmatprep.subr.bf16.mxu1 %v1119_v9 }
  0x24   : > { %1039 = vmatpush3.bf16.msra.mxu0 %v1119_v9  ;;  %1087 = vmatpush3.bf16.msra.mxu1 %v1119_v9 }
  0x27   : > { %1041 = vmatmul.mubr.bf16.vlgmr.msra.gmra.mrb[0].mxu0 %v1122_v10  ;;  %1057 = vmatmul.mubr.bf16.vlgmr.msra.gmra.mrb[0].mxu1 %v1123_v11 }
  0x28   : > { %1044 = vmatprep.mubr.bf16.mxu0 %v1124_v12  ;;  %1060 = vmatprep.mubr.bf16.mxu1 %v1125_v13 }
  0x2f   : > { %1045 = vmatmul.mubr.bf16.gmra.mrb[4].mxu0 %v1126_v14  ;;  %1061 = vmatmul.mubr.bf16.gmra.mrb[4].mxu1 %v1127_v15 }
  0x30   : > { %1048 = vmatprep.mubr.bf16.mxu0 %v1128_v16  ;;  %1064 = vmatprep.mubr.bf16.mxu1 %v1129_v17 }
  0x37   : > { %1049 = vmatmul.mubr.bf16.gmra.mrb[8].mxu0 %v1130_v18  ;;  %1065 = vmatmul.mubr.bf16.gmra.mrb[8].mxu1 %v1131_v19 }
  0x38   : > { %1052 = vmatprep.mubr.bf16.mxu0 %v1132_v20  ;;  %1068 = vmatprep.mubr.bf16.mxu1 %v1133_v21 }
  0x3f   : > { %1053 = vmatmul.mubr.bf16.gmra.mrb[12].mxu0 %v1134_v22  ;;  %1069 = vmatmul.mubr.bf16.gmra.mrb[12].mxu1 %v1135_v23 }
  0xfa   : > { %v1042_v25 = vpop.f32.mrb[0].mxu0  ;;  %v1058_v26 = vpop.f32.mrb[0].mxu1 }
  0xfb   : > { %v789_v27 = vadd.f32 %v1042_v25, %v1250_v24  ;;  %v805_v28 = vadd.f32 %v1058_v26, %v1250_v24  ;;  %v554_v29 = vpop.f32.mrb[1].mxu0  ;;  %v618_v30 = vpop.f32.mrb[1].mxu1 }
  0xfc   : > { %v787_v31 = vadd.f32 %v1250_v24, %v554_v29  ;;  %v803_v32 = vadd.f32 %v1250_v24, %v618_v30  ;;  %v1043_v33 = vpop.f32.mrb[2].mxu0  ;;  %v1059_v34 = vpop.f32.mrb[2].mxu1 }
  0xfd   : > { %821 = vst [vmem:[%s1255_s19 + $0x10] sm:$0xff] %v789_v27  ;;  %837 = vst [vmem:[%s1255_s19 + $0x90] sm:$0xff] %v805_v28  ;;  %v790_v35 = vadd.f32 %v1043_v33, %v1250_v24  ;;  %v806_v36 = vadd.f32 %v1059_v34, %v1250_v24  ;;  %v557_v37 = vpop.f32.mrb[3].mxu0  ;;  %v621_v38 = vpop.f32.mrb[3].mxu1 }
  0xfe   : > { %819 = vst [vmem:[%s1255_s19] sm:$0xff] %v787_v31  ;;  %835 = vst [vmem:[%s1255_s19 + $0x80] sm:$0xff] %v803_v32  ;;  %v788_v39 = vadd.f32 %v1250_v24, %v557_v37  ;;  %v804_v40 = vadd.f32 %v1250_v24, %v621_v38 }
  0xff   : > { %822 = vst [vmem:[%s1255_s19 + $0x18] sm:$0xff] %v790_v35  ;;  %838 = vst [vmem:[%s1255_s19 + $0x98] sm:$0xff] %v806_v36 }
 0x100   : > { %820 = vst [vmem:[%s1255_s19 + $0x8] sm:$0xff] %v788_v39  ;;  %836 = vst [vmem:[%s1255_s19 + $0x88] sm:$0xff] %v804_v40 }
 0x102   : > { %v1046_v41 = vpop.f32.mrb[4].mxu0  ;;  %v1062_v42 = vpop.f32.mrb[4].mxu1 }
 0x103   : > { %v793_v43 = vadd.f32 %v1046_v41, %v1250_v24  ;;  %v809_v44 = vadd.f32 %v1062_v42, %v1250_v24  ;;  %v570_v45 = vpop.f32.mrb[5].mxu0  ;;  %v634_v46 = vpop.f32.mrb[5].mxu1 }
 0x104   : > { %v791_v47 = vadd.f32 %v1250_v24, %v570_v45  ;;  %v807_v48 = vadd.f32 %v1250_v24, %v634_v46  ;;  %v1047_v49 = vpop.f32.mrb[6].mxu0  ;;  %v1063_v50 = vpop.f32.mrb[6].mxu1 }
 0x105   : > { %825 = vst [vmem:[%s1255_s19 + $0x30] sm:$0xff] %v793_v43  ;;  %841 = vst [vmem:[%s1255_s19 + $0xb0] sm:$0xff] %v809_v44  ;;  %v794_v51 = vadd.f32 %v1047_v49, %v1250_v24  ;;  %v810_v52 = vadd.f32 %v1063_v50, %v1250_v24  ;;  %v573_v53 = vpop.f32.mrb[7].mxu0  ;;  %v637_v54 = vpop.f32.mrb[7].mxu1 }
 0x106   : > { %823 = vst [vmem:[%s1255_s19 + $0x20] sm:$0xff] %v791_v47  ;;  %839 = vst [vmem:[%s1255_s19 + $0xa0] sm:$0xff] %v807_v48  ;;  %v792_v55 = vadd.f32 %v1250_v24, %v573_v53  ;;  %v808_v56 = vadd.f32 %v1250_v24, %v637_v54 }
 0x107   : > { %826 = vst [vmem:[%s1255_s19 + $0x38] sm:$0xff] %v794_v51  ;;  %842 = vst [vmem:[%s1255_s19 + $0xb8] sm:$0xff] %v810_v52 }
 0x108   : > { %824 = vst [vmem:[%s1255_s19 + $0x28] sm:$0xff] %v792_v55  ;;  %840 = vst [vmem:[%s1255_s19 + $0xa8] sm:$0xff] %v808_v56 }
 0x10a   : > { %v1050_v57 = vpop.f32.mrb[8].mxu0  ;;  %v1066_v58 = vpop.f32.mrb[8].mxu1 }
 0x10b   : > { %v797_v59 = vadd.f32 %v1050_v57, %v1250_v24  ;;  %v813_v60 = vadd.f32 %v1066_v58, %v1250_v24  ;;  %v586_v61 = vpop.f32.mrb[9].mxu0  ;;  %v650_v62 = vpop.f32.mrb[9].mxu1 }
 0x10c   : > { %v795_v63 = vadd.f32 %v1250_v24, %v586_v61  ;;  %v811_v0 = vadd.f32 %v1250_v24, %v650_v62  ;;  %v1051_v1 = vpop.f32.mrb[10].mxu0  ;;  %v1067_v2 = vpop.f32.mrb[10].mxu1 }
 0x10d   : > { %829 = vst [vmem:[%s1255_s19 + $0x50] sm:$0xff] %v797_v59  ;;  %845 = vst [vmem:[%s1255_s19 + $0xd0] sm:$0xff] %v813_v60  ;;  %v798_v3 = vadd.f32 %v1051_v1, %v1250_v24  ;;  %v814_v4 = vadd.f32 %v1067_v2, %v1250_v24  ;;  %v589_v5 = vpop.f32.mrb[11].mxu0  ;;  %v653_v6 = vpop.f32.mrb[11].mxu1 }
 0x10e   : > { %827 = vst [vmem:[%s1255_s19 + $0x40] sm:$0xff] %v795_v63  ;;  %843 = vst [vmem:[%s1255_s19 + $0xc0] sm:$0xff] %v811_v0  ;;  %v796_v7 = vadd.f32 %v1250_v24, %v589_v5  ;;  %v812_v8 = vadd.f32 %v1250_v24, %v653_v6 }
 0x10f   : > { %830 = vst [vmem:[%s1255_s19 + $0x58] sm:$0xff] %v798_v3  ;;  %846 = vst [vmem:[%s1255_s19 + $0xd8] sm:$0xff] %v814_v4 }
 0x110   : > { %828 = vst [vmem:[%s1255_s19 + $0x48] sm:$0xff] %v796_v7  ;;  %844 = vst [vmem:[%s1255_s19 + $0xc8] sm:$0xff] %v812_v8 }
 0x112   : > { %v1054_v9 = vpop.f32.mrb[12].mxu0  ;;  %v1070_v10 = vpop.f32.mrb[12].mxu1 }
 0x113   : > { %v801_v11 = vadd.f32 %v1054_v9, %v1250_v24  ;;  %v817_v12 = vadd.f32 %v1070_v10, %v1250_v24  ;;  %v602_v13 = vpop.f32.mrb[13].mxu0  ;;  %v666_v14 = vpop.f32.mrb[13].mxu1 }
 0x114   : > { %v799_v15 = vadd.f32 %v1250_v24, %v602_v13  ;;  %v815_v16 = vadd.f32 %v1250_v24, %v666_v14  ;;  %v1055_v17 = vpop.f32.mrb[14].mxu0  ;;  %v1071_v18 = vpop.f32.mrb[14].mxu1 }
 0x115   : > { %833 = vst [vmem:[%s1255_s19 + $0x70] sm:$0xff] %v801_v11  ;;  %849 = vst [vmem:[%s1255_s19 + $0xf0] sm:$0xff] %v817_v12  ;;  %v802_v19 = vadd.f32 %v1055_v17, %v1250_v24  ;;  %v818_v20 = vadd.f32 %v1071_v18, %v1250_v24  ;;  %v605_v21 = vpop.f32.mrb[15].mxu0  ;;  %v669_v22 = vpop.f32.mrb[15].mxu1 }
 0x116   : > { %831 = vst [vmem:[%s1255_s19 + $0x60] sm:$0xff] %v799_v15  ;;  %847 = vst [vmem:[%s1255_s19 + $0xe0] sm:$0xff] %v815_v16  ;;  %v800_v23 = vadd.f32 %v1250_v24, %v605_v21  ;;  %v816_v25 = vadd.f32 %v1250_v24, %v669_v22 }
 0x117   : > { %834 = vst [vmem:[%s1255_s19 + $0x78] sm:$0xff] %v802_v19  ;;  %850 = vst [vmem:[%s1255_s19 + $0xf8] sm:$0xff] %v818_v20 }
 0x118   : > { %832 = vst [vmem:[%s1255_s19 + $0x68] sm:$0xff] %v800_v23  ;;  %848 = vst [vmem:[%s1255_s19 + $0xe8] sm:$0xff] %v816_v25 }
 0x119 PF: > { %s13_s14 = sadd.s32 1, %s1158_s14   ;;  %s1334_s12 = smov %s1154_s13 }
 0x11a   : > { %p10_p5 = scmp.ge.s32.totalorder %s13_s14, 4   ;;  %s1335_s13 = smov %s1337_s15 }
 0x11c   :  { %12 = sbr.rel (!%p10_p5) target bundleno = 2 (0x2), region = 76 }

// kernel: encoder_forward.27
= control target key start
LH: loop header
LB: loop body
LE: loop exit
PB: predicated region body
PF: predicated region fallthrough
CT: control target
= control target key end

     0   :  { %s1897_s12 = smov 0   ;;  %s1899_s13 = smov 0   ;;  %s2151_s0 = inlined_call_operand.vmem [shape: bf16[512,384], index: 0, kind: input, shape index: {}]   ;;  %s2152_s1 = inlined_call_operand.vmem [shape: bf16[384,128], index: 1, kind: input, shape index: {}]   ;;  %s2153_s2 = inlined_call_operand.vmem [shape: f32[1,128], index: 2, kind: input, shape index: {}]   ;;  %s2154_s3 = inlined_call_operand.vmem [shape: f32[512,128], index: 3, kind: output, shape index: {}]  }
   0x1   :  { %s1901_s14 = smov 0  }
   0x2 LB: > { %s32_s15 = sadd.s32 1, %s1871_s13  ;;  %p1460_p0 = scmp.ge.s32.totalorder %s1875_s14, 1  ;;  %s1875_s14 = sphi %s1901_s14, %s13_s14   ;;  %s1871_s13 = sphi %s1899_s13, %s2156_s13   ;;  %s1867_s12 = sphi %s1897_s12, %s2155_s12  }
   0x3   : > { %p34_p1 = scmp.ge.s32.totalorder %s32_s15, 2  ;;  %p191_p2 = scmp.lt.s32.totalorder %s1875_s14, 3 }
   0x5   : > { %s2158_s15 = smov (%p34_p1, %s32_s15), 0  ;;  %p192_p3 = pnand %p1460_p0, %p191_p2 }
   0x6   : > { %v1765_v0 = vld [vmem:[%s2152_s1 + $0x40] sm:$0xff] (!%p192_p3)   ;;  %s1461_s18 = sshll.u32 (!%p192_p3), %s1867_s12, 5  ;;  %v1767_v2 = vld [vmem:[%s2152_s1 + $0x48] sm:$0xff] (!%p192_p3)   ;;  %v1769_v4 = vld [vmem:[%s2152_s1 + $0x50] sm:$0xff] (!%p192_p3)  }
   0x7   : > { %195 = sbr.rel (%p192_p3) target bundleno = 349 (0x15d), region = 32  ;;  %v1766_v1 = vld [vmem:[%s2152_s1] sm:$0xff] (!%p192_p3)   ;;  %1540 = vmatprep.subr.bf16.mxu0 (!%p192_p3), %v1765_v0  ;;  %1724 = vmatprep.subr.bf16.mxu1 (!%p192_p3), %v1765_v0  ;;  %p236_p4 = scmp.lt.s32.totalorder (!%p192_p3), %s1461_s18, 63  ;;  %v1768_v3 = vld [vmem:[%s2152_s1 + $0x8] sm:$0xff] (!%p192_p3)   ;;  %v1770_v5 = vld [vmem:[%s2152_s1 + $0x10] sm:$0xff] (!%p192_p3)  }
   0x8   : > { %1541 = vmatpush3.bf16.msra.mxu0 (!%p192_p3), %v1766_v1  ;;  %1732 = vmatpush3.bf16.msra.mxu1 (!%p192_p3), %v1766_v1  ;;  %v1771_v6 = vld [vmem:[%s2152_s1 + $0x58] sm:$0xff] (!%p192_p3)   ;;  %v1773_v8 = vld [vmem:[%s2152_s1 + $0x60] sm:$0xff] (!%p192_p3)   ;;  %v1775_v10 = vld [vmem:[%s2152_s1 + $0x68] sm:$0xff] (!%p192_p3)  }
   0x9   : > { %1542 = vmatprep.subr.bf16.mxu0 (!%p192_p3), %v1767_v2  ;;  %1725 = vmatprep.subr.bf16.mxu1 (!%p192_p3), %v1767_v2  ;;  %v1772_v7 = vld [vmem:[%s2152_s1 + $0x18] sm:$0xff] (!%p192_p3)   ;;  %v1774_v9 = vld [vmem:[%s2152_s1 + $0x20] sm:$0xff] (!%p192_p3)   ;;  %v1776_v13 = vld [vmem:[%s2152_s1 + $0x28] sm:$0xff] (!%p192_p3)  }
   0xa   : > { %v1777_v14 = vld [vmem:[%s2152_s1 + $0x70] sm:$0xff] (!%p192_p3)   ;;  %v1779_v16 = vld [vmem:[%s2152_s1 + $0x78] sm:$0xff] (!%p192_p3)   ;;  %v1787_v18 = vld [vmem:[%s2152_s1 + $0x80] sm:$0xff] (!%p192_p3)  }
   0xb   : > { %v1778_v15 = vld [vmem:[%s2152_s1 + $0x30] sm:$0xff] (!%p192_p3)   ;;  %v1780_v17 = vld [vmem:[%s2152_s1 + $0x38] sm:$0xff] (!%p192_p3)   ;;  %v1788_v22 = vld [vmem:[%s2152_s1 + $0x88] sm:$0xff] (!%p192_p3)  }
   0xc   : > { %1543 = vmatpush3.bf16.msra.mxu0 (!%p192_p3), %v1768_v3  ;;  %1733 = vmatpush3.bf16.msra.mxu1 (!%p192_p3), %v1768_v3  ;;  %v1795_v25 = vld [vmem:[%s2152_s1 + $0x90] sm:$0xff] (!%p192_p3)   ;;  %v1796_v27 = vld [vmem:[%s2152_s1 + $0x98] sm:$0xff] (!%p192_p3)   ;;  %v1803_v30 = vld [vmem:[%s2152_s1 + $0xa0] sm:$0xff] (!%p192_p3)  }
   0xd   : > { %1544 = vmatprep.subr.bf16.mxu0 (!%p192_p3), %v1769_v4  ;;  %1726 = vmatprep.subr.bf16.mxu1 (!%p192_p3), %v1769_v4  ;;  %v1804_v33 = vld [vmem:[%s2152_s1 + $0xa8] sm:$0xff] (!%p192_p3)   ;;  %v1811_v36 = vld [vmem:[%s2152_s1 + $0xb0] sm:$0xff] (!%p192_p3)   ;;  %v1812_v40 = vld [vmem:[%s2152_s1 + $0xb8] sm:$0xff] (!%p192_p3)  }
   0xe   : > { %s2160_s18 = smov (!%p236_p4, %s1461_s18), 63 }
   0xf   : > { %s1740_s4 = smul.u32 12, %s2160_s18 }
  0x10   : > { %1545 = vmatpush3.bf16.msra.mxu0 %v1770_v5  ;;  %1734 = vmatpush3.bf16.msra.mxu1 %v1770_v5 }
  0x11   : > { %1546 = vmatprep.subr.bf16.mxu0 %v1771_v6  ;;  %1727 = vmatprep.subr.bf16.mxu1 %v1771_v6  ;;  %s1948_s11 = scalar_lea.vmem %s2151_s0, %s1740_s4 }
  0x12   : > { %v1783_v11 = vld [vmem:[%s1948_s11 + $0x4] ss:$12 sps:$4 sm:$0xff]   ;;  %v1781_v19 = vld [vmem:[%s1948_s11] ss:$12 sps:$4 sm:$0xff]   ;;  %v1789_v21 = vld [vmem:[%s1948_s11 + $0x1c] ss:$12 sps:$4 sm:$0xff]  }
  0x13   : > { %v1786_v12 = vld [vmem:[%s1948_s11 + $0x124] ss:$12 sps:$4 sm:$0xff]   ;;  %880 = vmatprep.mubr.bf16.mxu0 %v1783_v11  ;;  %v1784_v20 = vld [vmem:[%s1948_s11 + $0x120] ss:$12 sps:$4 sm:$0xff]   ;;  %v1791_v23 = vld [vmem:[%s1948_s11 + $0x13c] ss:$12 sps:$4 sm:$0xff]  }
  0x14   : > { %1547 = vmatpush3.bf16.msra.mxu0 %v1772_v7  ;;  %1735 = vmatpush3.bf16.msra.mxu1 %v1772_v7  ;;  %v1793_v24 = vld [vmem:[%s1948_s11 + $0x18] ss:$12 sps:$4 sm:$0xff]   ;;  %v1797_v28 = vld [vmem:[%s1948_s11 + $0x34] ss:$12 sps:$4 sm:$0xff]   ;;  %v1801_v31 = vld [vmem:[%s1948_s11 + $0x30] ss:$12 sps:$4 sm:$0xff]  }
  0x15   : > { %1548 = vmatprep.subr.bf16.mxu0 %v1773_v8  ;;  %1728 = vmatprep.subr.bf16.mxu1 %v1773_v8  ;;  %v1794_v26 = vld [vmem:[%s1948_s11 + $0x138] ss:$12 sps:$4 sm:$0xff]   ;;  %v1799_v29 = vld [vmem:[%s1948_s11 + $0x154] ss:$12 sps:$4 sm:$0xff]   ;;  %v1802_v32 = vld [vmem:[%s1948_s11 + $0x150] ss:$12 sps:$4 sm:$0xff]  }
  0x16   : > { %976 = vmatprep.mubr.bf16.mxu1 %v1786_v12  ;;  %v1805_v34 = vld [vmem:[%s1948_s11 + $0x4c] ss:$12 sps:$4 sm:$0xff]   ;;  %v1809_v37 = vld [vmem:[%s1948_s11 + $0x48] ss:$12 sps:$4 sm:$0xff]   ;;  %v1813_v39 = vld [vmem:[%s1948_s11 + $0x64] ss:$12 sps:$4 sm:$0xff]  }
  0x17   : > { %v1807_v35 = vld [vmem:[%s1948_s11 + $0x16c] ss:$12 sps:$4 sm:$0xff]   ;;  %v1810_v38 = vld [vmem:[%s1948_s11 + $0x168] ss:$12 sps:$4 sm:$0xff]   ;;  %v1822_v47 = vld [vmem:[%s1948_s11 + $0x50] ss:$12 sps:$4 sm:$0xff]  }
  0x18   : > { %1549 = vmatpush3.bf16.msra.mxu0 %v1774_v9  ;;  %1736 = vmatpush3.bf16.msra.mxu1 %v1774_v9  ;;  %v1815_v41 = vld [vmem:[%s1948_s11 + $0x8] ss:$12 sps:$4 sm:$0xff]   ;;  %v1816_v42 = vld [vmem:[%s1948_s11 + $0x60] ss:$12 sps:$4 sm:$0xff]   ;;  %v1820_v45 = vld [vmem:[%s1948_s11 + $0x38] ss:$12 sps:$4 sm:$0xff]  }
  0x19   : > { %1550 = vmatprep.subr.bf16.mxu0 %v1775_v10  ;;  %1729 = vmatprep.subr.bf16.mxu1 %v1775_v10  ;;  %v1817_v43 = vld [vmem:[%s1948_s11 + $0x20] ss:$12 sps:$4 sm:$0xff]   ;;  %v1818_v44 = vld [vmem:[%s1948_s11 + $0x7c] ss:$12 sps:$4 sm:$0xff]   ;;  %v1821_v46 = vld [vmem:[%s1948_s11 + $0x78] ss:$12 sps:$4 sm:$0xff]  }
  0x1a   : > { %v1823_v48 = vld [vmem:[%s1948_s11 + $0x94] ss:$12 sps:$4 sm:$0xff]   ;;  %v1826_v50 = vld [vmem:[%s1948_s11 + $0x90] ss:$12 sps:$4 sm:$0xff]   ;;  %v1828_v52 = vld [vmem:[%s1948_s11 + $0xac] ss:$12 sps:$4 sm:$0xff]  }
  0x1b   : > { %v1825_v49 = vld [vmem:[%s1948_s11 + $0x68] ss:$12 sps:$4 sm:$0xff]   ;;  %v1827_v51 = vld [vmem:[%s1948_s11 + $0x80] ss:$12 sps:$4 sm:$0xff]   ;;  %v1830_v53 = vld [vmem:[%s1948_s11 + $0x98] ss:$12 sps:$4 sm:$0xff]  }
  0x1c   : > { %1551 = vmatpush3.bf16.msra.mxu0 %v1776_v13  ;;  %1737 = vmatpush3.bf16.msra.mxu1 %v1776_v13  ;;  %v1831_v54 = vld [vmem:[%s1948_s11 + $0xa8] ss:$12 sps:$4 sm:$0xff]   ;;  %v1832_v55 = vld [vmem:[%s1948_s11 + $0xb0] ss:$12 sps:$4 sm:$0xff]   ;;  %v1836_v58 = vld [vmem:[%s1948_s11 + $0xc0] ss:$12 sps:$4 sm:$0xff]  }
  0x1d   : > { %1552 = vmatprep.subr.bf16.mxu0 %v1777_v14  ;;  %1730 = vmatprep.subr.bf16.mxu1 %v1777_v14  ;;  %v1833_v56 = vld [vmem:[%s1948_s11 + $0xc4] ss:$12 sps:$4 sm:$0xff]   ;;  %v1835_v57 = vld [vmem:[%s1948_s11 + $0xc8] ss:$12 sps:$4 sm:$0xff]   ;;  %v1837_v59 = vld [vmem:[%s1948_s11 + $0xe0] ss:$12 sps:$4 sm:$0xff]  }
  0x1e   : > { %v1838_v60 = vld [vmem:[%s1948_s11 + $0xdc] ss:$12 sps:$4 sm:$0xff]   ;;  %v1840_v61 = vld [vmem:[%s1948_s11 + $0xf8] ss:$12 sps:$4 sm:$0xff]   ;;  %v1843_v0 = vld [vmem:[%s1948_s11 + $0xf4] ss:$12 sps:$4 sm:$0xff]  }
  0x1f   : > { %v1841_v62 = vld [vmem:[%s1948_s11 + $0xd8] ss:$12 sps:$4 sm:$0xff]   ;;  %v1842_v63 = vld [vmem:[%s1948_s11 + $0x110] ss:$12 sps:$4 sm:$0xff]   ;;  %v1845_v1 = vld [vmem:[%s1948_s11 + $0x128] ss:$12 sps:$4 sm:$0xff]  }
  0x20   : > { %1553 = vmatpush3.bf16.msra.mxu0 %v1778_v15  ;;  %1738 = vmatpush3.bf16.msra.mxu1 %v1778_v15  ;;  %v1846_v2 = vld [vmem:[%s1948_s11 + $0xf0] ss:$12 sps:$4 sm:$0xff]   ;;  %v1847_v3 = vld [vmem:[%s1948_s11 + $0x140] ss:$12 sps:$4 sm:$0xff]   ;;  %v1850_v5 = vld [vmem:[%s1948_s11 + $0x158] ss:$12 sps:$4 sm:$0xff]  }
  0x21   : > { %1554 = vmatprep.subr.bf16.mxu0 %v1779_v16  ;;  %1731 = vmatprep.subr.bf16.mxu1 %v1779_v16  ;;  %v1848_v4 = vld [vmem:[%s1948_s11 + $0x10c] ss:$12 sps:$4 sm:$0xff]   ;;  %v1851_v6 = vld [vmem:[%s1948_s11 + $0x108] ss:$12 sps:$4 sm:$0xff]   ;;  %v1852_v7 = vld [vmem:[%s1948_s11 + $0x170] ss:$12 sps:$4 sm:$0xff]  }
  0x22   : > { %s1464_s11 = sshll.u32 %s2160_s18, 3 }
  0x23   : > { %s2068_s28 = scalar_lea.vmem %s2154_s3, %s1464_s11 }
  0x24   : > { %1555 = vmatpush3.bf16.msra.mxu0 %v1780_v17  ;;  %1739 = vmatpush3.bf16.msra.mxu1 %v1780_v17 }
  0x25   : > { %1676 = vmatprep.subr.bf16.mxu1 %v1787_v18 }
  0x27   : > { %881 = vmatmul.mubr.bf16.vlgmr.msra.gmra.mrb[0].mxu0 %v1781_v19  ;;  %977 = vmatmul.mubr.bf16.vlgmr.msra.gmra.mrb[0].mxu1 %v1784_v20 }
  0x28   : > { %1677 = vmatpush3.bf16.msra.mxu1 %v1787_v18  ;;  %888 = vmatprep.mubr.bf16.mxu0 %v1789_v21 }
  0x29   : > { %1678 = vmatprep.subr.bf16.mxu1 %v1788_v22  ;;  %984 = vmatprep.mubr.bf16.mxu1 %v1791_v23 }
  0x2c   : > { %1679 = vmatpush3.bf16.msra.mxu1 %v1788_v22 }
  0x2d   : > { %1680 = vmatprep.subr.bf16.mxu1 %v1795_v25 }
  0x2f   : > { %889 = vmatmul.mubr.bf16.gmra.mrb[4].mxu0 %v1793_v24  ;;  %985 = vmatmul.mubr.bf16.gmra.mrb[4].mxu1 %v1794_v26 }
  0x30   : > { %1681 = vmatpush3.bf16.msra.mxu1 %v1795_v25  ;;  %896 = vmatprep.mubr.bf16.mxu0 %v1797_v28 }
  0x31   : > { %1682 = vmatprep.subr.bf16.mxu1 %v1796_v27  ;;  %992 = vmatprep.mubr.bf16.mxu1 %v1799_v29 }
  0x34   : > { %1683 = vmatpush3.bf16.msra.mxu1 %v1796_v27 }
  0x35   : > { %1684 = vmatprep.subr.bf16.mxu1 %v1803_v30 }
  0x37   : > { %897 = vmatmul.mubr.bf16.gmra.mrb[8].mxu0 %v1801_v31  ;;  %993 = vmatmul.mubr.bf16.gmra.mrb[8].mxu1 %v1802_v32 }
  0x38   : > { %1685 = vmatpush3.bf16.msra.mxu1 %v1803_v30  ;;  %904 = vmatprep.mubr.bf16.mxu0 %v1805_v34 }
  0x39   : > { %1686 = vmatprep.subr.bf16.mxu1 %v1804_v33  ;;  %1000 = vmatprep.mubr.bf16.mxu1 %v1807_v35 }
  0x3c   : > { %1687 = vmatpush3.bf16.msra.mxu1 %v1804_v33 }
  0x3d   : > { %1688 = vmatprep.subr.bf16.mxu1 %v1811_v36 }
  0x3f   : > { %905 = vmatmul.mubr.bf16.gmra.mrb[12].mxu0 %v1809_v37  ;;  %1001 = vmatmul.mubr.bf16.gmra.mrb[12].mxu1 %v1810_v38 }
  0x40   : > { %1689 = vmatpush3.bf16.msra.mxu1 %v1811_v36  ;;  %912 = vmatprep.mubr.bf16.mxu0 %v1813_v39 }
  0x41   : > { %1690 = vmatprep.subr.bf16.mxu1 %v1812_v40  ;;  %1692 = vmatprep.mubr.bf16.mxu1 %v1815_v41 }
  0x44   : > { %1691 = vmatpush3.bf16.msra.mxu1 %v1812_v40 }
  0x47   : > { %913 = vmatmul.mubr.bf16.gmra.mrb[16].mxu0 %v1816_v42  ;;  %1693 = vmatmul.mubr.bf16.vlgmr.msra.gmra.mrb[16].mxu1 %v1817_v43 }
  0x48   : > { %920 = vmatprep.mubr.bf16.mxu0 %v1818_v44  ;;  %1696 = vmatprep.mubr.bf16.mxu1 %v1820_v45 }
  0x4f   : > { %921 = vmatmul.mubr.bf16.gmra.mrb[20].mxu0 %v1821_v46  ;;  %1697 = vmatmul.mubr.bf16.gmra.mrb[20].mxu1 %v1822_v47 }
  0x50   : > { %928 = vmatprep.mubr.bf16.mxu0 %v1823_v48  ;;  %1700 = vmatprep.mubr.bf16.mxu1 %v1825_v49 }
  0x57   : > { %929 = vmatmul.mubr.bf16.gmra.mrb[24].mxu0 %v1826_v50  ;;  %1701 = vmatmul.mubr.bf16.gmra.mrb[24].mxu1 %v1827_v51 }
  0x58   : > { %936 = vmatprep.mubr.bf16.mxu0 %v1828_v52  ;;  %1704 = vmatprep.mubr.bf16.mxu1 %v1830_v53 }
  0x5f   : > { %937 = vmatmul.mubr.bf16.gmra.mrb[28].mxu0 %v1831_v54  ;;  %1705 = vmatmul.mubr.bf16.gmra.mrb[28].mxu1 %v1832_v55 }
  0x60   : > { %944 = vmatprep.mubr.bf16.mxu0 %v1833_v56  ;;  %1708 = vmatprep.mubr.bf16.mxu1 %v1835_v57 }
  0x67   : > { %945 = vmatmul.mubr.bf16.gmra.mrb[32].mxu0 %v1836_v58  ;;  %1709 = vmatmul.mubr.bf16.gmra.mrb[32].mxu1 %v1837_v59  ;;  %v2063_v58 = vld [vmem:[%s2153_s2] ss:$0 sm:$0xff] }
  0x68   : > { %952 = vmatprep.mubr.bf16.mxu0 %v1838_v60  ;;  %1712 = vmatprep.mubr.bf16.mxu1 %v1840_v61 }
  0x6f   : > { %953 = vmatmul.mubr.bf16.gmra.mrb[36].mxu0 %v1841_v62  ;;  %1713 = vmatmul.mubr.bf16.gmra.mrb[36].mxu1 %v1842_v63 }
  0x70   : > { %960 = vmatprep.mubr.bf16.mxu0 %v1843_v0  ;;  %1716 = vmatprep.mubr.bf16.mxu1 %v1845_v1 }
  0x77   : > { %961 = vmatmul.mubr.bf16.gmra.mrb[40].mxu0 %v1846_v2  ;;  %1717 = vmatmul.mubr.bf16.gmra.mrb[40].mxu1 %v1847_v3 }
  0x78   : > { %968 = vmatprep.mubr.bf16.mxu0 %v1848_v4  ;;  %1720 = vmatprep.mubr.bf16.mxu1 %v1850_v5 }
  0x7f   : > { %969 = vmatmul.mubr.bf16.gmra.mrb[44].mxu0 %v1851_v6  ;;  %1721 = vmatmul.mubr.bf16.gmra.mrb[44].mxu1 %v1852_v7 }
  0xfa   : > { %v1556_v8 = vpop.f32.mrb[0].mxu0  ;;  %v1628_v9 = vpop.f32.mrb[0].mxu1 }
  0xfb   : > { %v1557_v10 = vpop.f32.mrb[1].mxu0  ;;  %v1629_v11 = vpop.f32.mrb[1].mxu1 }
  0xfc   : > { %v1558_v12 = vadd.f32 %v1557_v10, %v1556_v8  ;;  %v2043_v13 = vadd.f32 %v1629_v11, %v1628_v9  ;;  %v1559_v14 = vpop.f32.mrb[2].mxu0  ;;  %v1631_v15 = vpop.f32.mrb[2].mxu1 }
  0xfd   : > { %v1560_v16 = vpop.f32.mrb[3].mxu0  ;;  %v1632_v17 = vpop.f32.mrb[3].mxu1 }
  0xfe   : > { %v1561_v18 = vadd.f32 %v1560_v16, %v1559_v14  ;;  %v2045_v19 = vadd.f32 %v1632_v17, %v1631_v15 }
 0x102   : > { %v1562_v20 = vpop.f32.mrb[4].mxu0  ;;  %v1634_v21 = vpop.f32.mrb[4].mxu1 }
 0x103   : > { %v1563_v22 = vpop.f32.mrb[5].mxu0  ;;  %v1635_v23 = vpop.f32.mrb[5].mxu1 }
 0x104   : > { %v1564_v24 = vadd.f32 %v1563_v22, %v1562_v20  ;;  %v2047_v25 = vadd.f32 %v1635_v23, %v1634_v21  ;;  %v1565_v26 = vpop.f32.mrb[6].mxu0  ;;  %v1637_v27 = vpop.f32.mrb[6].mxu1 }
 0x105   : > { %v1566_v28 = vpop.f32.mrb[7].mxu0  ;;  %v1638_v29 = vpop.f32.mrb[7].mxu1 }
 0x106   : > { %v1567_v30 = vadd.f32 %v1566_v28, %v1565_v26  ;;  %v2049_v31 = vadd.f32 %v1638_v29, %v1637_v27 }
 0x10a   : > { %v1568_v32 = vpop.f32.mrb[8].mxu0  ;;  %v1640_v33 = vpop.f32.mrb[8].mxu1 }
 0x10b   : > { %v1569_v34 = vpop.f32.mrb[9].mxu0  ;;  %v1641_v35 = vpop.f32.mrb[9].mxu1 }
 0x10c   : > { %v1570_v36 = vadd.f32 %v1569_v34, %v1568_v32  ;;  %v2051_v37 = vadd.f32 %v1641_v35, %v1640_v33  ;;  %v1571_v38 = vpop.f32.mrb[10].mxu0  ;;  %v1643_v39 = vpop.f32.mrb[10].mxu1 }
 0x10d   : > { %v1572_v40 = vpop.f32.mrb[11].mxu0  ;;  %v1644_v41 = vpop.f32.mrb[11].mxu1 }
 0x10e   : > { %v1573_v42 = vadd.f32 %v1572_v40, %v1571_v38  ;;  %v2053_v43 = vadd.f32 %v1644_v41, %v1643_v39 }
 0x112   : > { %v1574_v44 = vpop.f32.mrb[12].mxu0  ;;  %v1646_v45 = vpop.f32.mrb[12].mxu1 }
 0x113   : > { %v1575_v46 = vpop.f32.mrb[13].mxu0  ;;  %v1647_v47 = vpop.f32.mrb[13].mxu1 }
 0x114   : > { %v1576_v48 = vadd.f32 %v1575_v46, %v1574_v44  ;;  %v2055_v49 = vadd.f32 %v1647_v47, %v1646_v45  ;;  %v1577_v50 = vpop.f32.mrb[14].mxu0  ;;  %v1649_v51 = vpop.f32.mrb[14].mxu1 }
 0x115   : > { %v1578_v52 = vpop.f32.mrb[15].mxu0  ;;  %v1650_v53 = vpop.f32.mrb[15].mxu1 }
 0x116   : > { %v1579_v54 = vadd.f32 %v1578_v52, %v1577_v50  ;;  %v2057_v55 = vadd.f32 %v1650_v53, %v1649_v51 }
 0x11a   : > { %v1580_v56 = vpop.f32.mrb[16].mxu0  ;;  %v1694_v57 = vpop.f32.mrb[16].mxu1 }
 0x11b   : > { %v1052_v59 = vadd.f32 %v1694_v57, %v1564_v24  ;;  %v1581_v60 = vpop.f32.mrb[17].mxu0  ;;  %v1043_v61 = vpop.f32.mrb[17].mxu1 }
 0x11c   : > { %v1582_v62 = vadd.f32 %v1581_v60, %v1580_v56  ;;  %v1044_v63 = vadd.f32 %v1558_v12, %v1043_v61  ;;  %v1583_v0 = vpop.f32.mrb[18].mxu0  ;;  %v1695_v1 = vpop.f32.mrb[18].mxu1 }
 0x11d   : > { %v1278_v2 = vadd.f32 %v2063_v58, %v1052_v59  ;;  %v1055_v3 = vadd.f32 %v1695_v1, %v1567_v30  ;;  %v1584_v4 = vpop.f32.mrb[19].mxu0  ;;  %v1046_v5 = vpop.f32.mrb[19].mxu1 }
 0x11e   : > { %v1276_v6 = vadd.f32 %v2063_v58, %v1044_v63  ;;  %v1585_v7 = vadd.f32 %v1584_v4, %v1583_v0  ;;  %v1047_v8 = vadd.f32 %v1561_v18, %v1046_v5 }
 0x11f   : > { %1310 = vst [vmem:[%s2068_s28 + $0x10] sm:$0xff] %v1278_v2  ;;  %v1279_v9 = vadd.f32 %v2063_v58, %v1055_v3 }
 0x120   : > { %1308 = vst [vmem:[%s2068_s28] sm:$0xff] %v1276_v6  ;;  %v1277_v10 = vadd.f32 %v2063_v58, %v1047_v8 }
 0x121   : > { %1311 = vst [vmem:[%s2068_s28 + $0x18] sm:$0xff] %v1279_v9 }
 0x122   : > { %1309 = vst [vmem:[%s2068_s28 + $0x8] sm:$0xff] %v1277_v10  ;;  %v1586_v11 = vpop.f32.mrb[20].mxu0  ;;  %v1698_v12 = vpop.f32.mrb[20].mxu1 }
 0x123   : > { %v1068_v14 = vadd.f32 %v1698_v12, %v1576_v48  ;;  %v1587_v15 = vpop.f32.mrb[21].mxu0  ;;  %v1059_v16 = vpop.f32.mrb[21].mxu1 }
 0x124   : > { %v1588_v17 = vadd.f32 %v1587_v15, %v1586_v11  ;;  %v1060_v20 = vadd.f32 %v1570_v36, %v1059_v16  ;;  %v1589_v18 = vpop.f32.mrb[22].mxu0  ;;  %v1699_v21 = vpop.f32.mrb[22].mxu1 }
 0x125   : > { %v1282_v22 = vadd.f32 %v2063_v58, %v1068_v14  ;;  %v1071_v23 = vadd.f32 %v1699_v21, %v1579_v54  ;;  %v1590_v24 = vpop.f32.mrb[23].mxu0  ;;  %v1062_v26 = vpop.f32.mrb[23].mxu1 }
 0x126   : > { %v1280_v27 = vadd.f32 %v2063_v58, %v1060_v20  ;;  %v1591_v28 = vadd.f32 %v1590_v24, %v1589_v18  ;;  %v1063_v29 = vadd.f32 %v1573_v42, %v1062_v26 }
 0x127   : > { %1314 = vst [vmem:[%s2068_s28 + $0x30] sm:$0xff] %v1282_v22  ;;  %v1283_v30 = vadd.f32 %v2063_v58, %v1071_v23 }
 0x128   : > { %1312 = vst [vmem:[%s2068_s28 + $0x20] sm:$0xff] %v1280_v27  ;;  %v1281_v32 = vadd.f32 %v2063_v58, %v1063_v29 }
 0x129   : > { %1315 = vst [vmem:[%s2068_s28 + $0x38] sm:$0xff] %v1283_v30 }
 0x12a   : > { %1313 = vst [vmem:[%s2068_s28 + $0x28] sm:$0xff] %v1281_v32  ;;  %v1592_v33 = vpop.f32.mrb[24].mxu0  ;;  %v1702_v34 = vpop.f32.mrb[24].mxu1 }
 0x12b   : > { %v1084_v35 = vadd.f32 %v1702_v34, %v1588_v17  ;;  %v1593_v36 = vpop.f32.mrb[25].mxu0  ;;  %v1075_v38 = vpop.f32.mrb[25].mxu1 }
 0x12c   : > { %v1594_v39 = vadd.f32 %v1593_v36, %v1592_v33  ;;  %v1076_v40 = vadd.f32 %v1582_v62, %v1075_v38  ;;  %v1595_v41 = vpop.f32.mrb[26].mxu0  ;;  %v1703_v42 = vpop.f32.mrb[26].mxu1 }
 0x12d   : > { %v1286_v44 = vadd.f32 %v2063_v58, %v1084_v35  ;;  %v1087_v45 = vadd.f32 %v1703_v42, %v1591_v28  ;;  %v1596_v46 = vpop.f32.mrb[27].mxu0  ;;  %v1078_v47 = vpop.f32.mrb[27].mxu1 }
 0x12e   : > { %v1284_v48 = vadd.f32 %v2063_v58, %v1076_v40  ;;  %v1597_v50 = vadd.f32 %v1596_v46, %v1595_v41  ;;  %v1079_v51 = vadd.f32 %v1585_v7, %v1078_v47 }
 0x12f   : > { %1318 = vst [vmem:[%s2068_s28 + $0x50] sm:$0xff] %v1286_v44  ;;  %v1287_v52 = vadd.f32 %v2063_v58, %v1087_v45 }
 0x130   : > { %1316 = vst [vmem:[%s2068_s28 + $0x40] sm:$0xff] %v1284_v48  ;;  %v1285_v53 = vadd.f32 %v2063_v58, %v1079_v51 }
 0x131   : > { %1319 = vst [vmem:[%s2068_s28 + $0x58] sm:$0xff] %v1287_v52 }
 0x132   : > { %1317 = vst [vmem:[%s2068_s28 + $0x48] sm:$0xff] %v1285_v53  ;;  %v1598_v54 = vpop.f32.mrb[28].mxu0  ;;  %v1706_v56 = vpop.f32.mrb[28].mxu1 }
 0x133   : > { %v1599_v57 = vpop.f32.mrb[29].mxu0  ;;  %v1091_v59 = vpop.f32.mrb[29].mxu1 }
 0x134   : > { %v1600_v60 = vadd.f32 %v1599_v57, %v1598_v54  ;;  %v1092_v61 = vadd.f32 %v1594_v39, %v1091_v59  ;;  %v1601_v62 = vpop.f32.mrb[30].mxu0  ;;  %v1707_v63 = vpop.f32.mrb[30].mxu1 }
 0x135   : > { %v1602_v0 = vpop.f32.mrb[31].mxu0  ;;  %v1094_v1 = vpop.f32.mrb[31].mxu1 }
 0x136   : > { %v1100_v2 = vadd.f32 %v1706_v56, %v1600_v60  ;;  %v1288_v3 = vadd.f32 %v2063_v58, %v1092_v61  ;;  %v1603_v4 = vadd.f32 %v1602_v0, %v1601_v62  ;;  %v1095_v5 = vadd.f32 %v1597_v50, %v1094_v1 }
 0x138   : > { %v1290_v6 = vadd.f32 %v2063_v58, %v1100_v2  ;;  %1320 = vst [vmem:[%s2068_s28 + $0x60] sm:$0xff] %v1288_v3  ;;  %v1103_v7 = vadd.f32 %v1707_v63, %v1603_v4  ;;  %v1289_v8 = vadd.f32 %v2063_v58, %v1095_v5 }
 0x13a   : > { %1322 = vst [vmem:[%s2068_s28 + $0x70] sm:$0xff] %v1290_v6  ;;  %v1291_v9 = vadd.f32 %v2063_v58, %v1103_v7  ;;  %1321 = vst [vmem:[%s2068_s28 + $0x68] sm:$0xff] %v1289_v8  ;;  %v1604_v10 = vpop.f32.mrb[32].mxu0  ;;  %v1710_v11 = vpop.f32.mrb[32].mxu1 }
 0x13b   : > { %v1605_v12 = vpop.f32.mrb[33].mxu0  ;;  %v1107_v14 = vpop.f32.mrb[33].mxu1 }
 0x13c   : > { %1323 = vst [vmem:[%s2068_s28 + $0x78] sm:$0xff] %v1291_v9  ;;  %v1606_v15 = vadd.f32 %v1605_v12, %v1604_v10  ;;  %v1607_v16 = vpop.f32.mrb[34].mxu0  ;;  %v1711_v17 = vpop.f32.mrb[34].mxu1 }
 0x13d   : > { %v1608_v20 = vpop.f32.mrb[35].mxu0  ;;  %v1110_v18 = vpop.f32.mrb[35].mxu1 }
 0x13e   : > { %v1108_v21 = vadd.f32 %v1606_v15, %v1107_v14  ;;  %v1609_v22 = vadd.f32 %v1608_v20, %v1607_v16 }
 0x140   : > { %v1292_v23 = vadd.f32 %v2063_v58, %v1108_v21  ;;  %v1111_v24 = vadd.f32 %v1609_v22, %v1110_v18 }
 0x142   : > { %1324 = vst [vmem:[%s2068_s28 + $0x80] sm:$0xff] %v1292_v23  ;;  %v1293_v26 = vadd.f32 %v2063_v58, %v1111_v24  ;;  %v1610_v27 = vpop.f32.mrb[36].mxu0  ;;  %v1714_v28 = vpop.f32.mrb[36].mxu1 }
 0x143   : > { %v1611_v29 = vpop.f32.mrb[37].mxu0  ;;  %v1123_v30 = vpop.f32.mrb[37].mxu1 }
 0x144   : > { %1325 = vst [vmem:[%s2068_s28 + $0x88] sm:$0xff] %v1293_v26  ;;  %v1612_v32 = vadd.f32 %v1611_v29, %v1610_v27  ;;  %v1613_v33 = vpop.f32.mrb[38].mxu0  ;;  %v1715_v34 = vpop.f32.mrb[38].mxu1 }
 0x145   : > { %v1614_v35 = vpop.f32.mrb[39].mxu0  ;;  %v1126_v36 = vpop.f32.mrb[39].mxu1 }
 0x146   : > { %v1116_v38 = vadd.f32 %v1710_v11, %v1612_v32  ;;  %v1615_v39 = vadd.f32 %v1614_v35, %v1613_v33 }
 0x148   : > { %v1294_v40 = vadd.f32 %v2063_v58, %v1116_v38  ;;  %v1119_v41 = vadd.f32 %v1711_v17, %v1615_v39 }
 0x14a   : > { %1326 = vst [vmem:[%s2068_s28 + $0x90] sm:$0xff] %v1294_v40  ;;  %v1295_v42 = vadd.f32 %v2063_v58, %v1119_v41  ;;  %v1616_v44 = vpop.f32.mrb[40].mxu0  ;;  %v1718_v45 = vpop.f32.mrb[40].mxu1 }
 0x14b   : > { %v1148_v46 = vadd.f32 %v1718_v45, %v2047_v25  ;;  %v1617_v47 = vpop.f32.mrb[41].mxu0  ;;  %v1139_v48 = vpop.f32.mrb[41].mxu1 }
 0x14c   : > { %1327 = vst [vmem:[%s2068_s28 + $0x98] sm:$0xff] %v1295_v42  ;;  %v1618_v50 = vadd.f32 %v1617_v47, %v1616_v44  ;;  %v1140_v51 = vadd.f32 %v2043_v13, %v1139_v48  ;;  %v1619_v52 = vpop.f32.mrb[42].mxu0  ;;  %v1719_v53 = vpop.f32.mrb[42].mxu1 }
 0x14d   : > { %v1302_v54 = vadd.f32 %v2063_v58, %v1148_v46  ;;  %v1151_v56 = vadd.f32 %v1719_v53, %v2049_v31  ;;  %v1620_v57 = vpop.f32.mrb[43].mxu0  ;;  %v1142_v59 = vpop.f32.mrb[43].mxu1 }
 0x14e   : > { %v1124_v25 = vadd.f32 %v1618_v50, %v1123_v30  ;;  %v1300_v60 = vadd.f32 %v2063_v58, %v1140_v51  ;;  %v1621_v61 = vadd.f32 %v1620_v57, %v1619_v52  ;;  %v1143_v62 = vadd.f32 %v2045_v19, %v1142_v59 }
 0x14f   : > { %1334 = vst [vmem:[%s2068_s28 + $0xd0] sm:$0xff] %v1302_v54  ;;  %v1303_v13 = vadd.f32 %v2063_v58, %v1151_v56 }
 0x150   : > { %v1296_v63 = vadd.f32 %v2063_v58, %v1124_v25  ;;  %1332 = vst [vmem:[%s2068_s28 + $0xc0] sm:$0xff] %v1300_v60  ;;  %v1127_v0 = vadd.f32 %v1621_v61, %v1126_v36  ;;  %v1301_v1 = vadd.f32 %v2063_v58, %v1143_v62 }
 0x151   : > { %1335 = vst [vmem:[%s2068_s28 + $0xd8] sm:$0xff] %v1303_v13 }
 0x152   : > { %1328 = vst [vmem:[%s2068_s28 + $0xa0] sm:$0xff] %v1296_v63  ;;  %v1297_v31 = vadd.f32 %v2063_v58, %v1127_v0  ;;  %1333 = vst [vmem:[%s2068_s28 + $0xc8] sm:$0xff] %v1301_v1  ;;  %v1622_v2 = vpop.f32.mrb[44].mxu0  ;;  %v1722_v3 = vpop.f32.mrb[44].mxu1 }
 0x153   : > { %v1164_v4 = vadd.f32 %v1722_v3, %v2055_v49  ;;  %v1623_v19 = vpop.f32.mrb[45].mxu0  ;;  %v1155_v5 = vpop.f32.mrb[45].mxu1 }
 0x154   : > { %1329 = vst [vmem:[%s2068_s28 + $0xa8] sm:$0xff] %v1297_v31  ;;  %v1624_v6 = vadd.f32 %v1623_v19, %v1622_v2  ;;  %v1156_v7 = vadd.f32 %v2051_v37, %v1155_v5  ;;  %v1625_v8 = vpop.f32.mrb[46].mxu0  ;;  %v1723_v9 = vpop.f32.mrb[46].mxu1 }
 0x155   : > { %v1306_v10 = vadd.f32 %v2063_v58, %v1164_v4  ;;  %v1167_v11 = vadd.f32 %v1723_v9, %v2057_v55  ;;  %v1626_v12 = vpop.f32.mrb[47].mxu0  ;;  %v1158_v49 = vpop.f32.mrb[47].mxu1 }
 0x156   : > { %v1132_v14 = vadd.f32 %v1714_v28, %v1624_v6  ;;  %v1304_v15 = vadd.f32 %v2063_v58, %v1156_v7  ;;  %v1627_v16 = vadd.f32 %v1626_v12, %v1625_v8  ;;  %v1159_v17 = vadd.f32 %v2053_v43, %v1158_v49 }
 0x157   : > { %1338 = vst [vmem:[%s2068_s28 + $0xf0] sm:$0xff] %v1306_v10  ;;  %v1307_v37 = vadd.f32 %v2063_v58, %v1167_v11 }
 0x158   : > { %v1298_v20 = vadd.f32 %v2063_v58, %v1132_v14  ;;  %1336 = vst [vmem:[%s2068_s28 + $0xe0] sm:$0xff] %v1304_v15  ;;  %v1135_v18 = vadd.f32 %v1715_v34, %v1627_v16  ;;  %v1305_v21 = vadd.f32 %v2063_v58, %v1159_v17 }
 0x159   : > { %1339 = vst [vmem:[%s2068_s28 + $0xf8] sm:$0xff] %v1307_v37 }
 0x15a   : > { %1330 = vst [vmem:[%s2068_s28 + $0xb0] sm:$0xff] %v1298_v20  ;;  %v1299_v55 = vadd.f32 %v2063_v58, %v1135_v18  ;;  %1337 = vst [vmem:[%s2068_s28 + $0xe8] sm:$0xff] %v1305_v21 }
 0x15c   : > { %1331 = vst [vmem:[%s2068_s28 + $0xb8] sm:$0xff] %v1299_v55 }
 0x15d PF: > { %s13_s14 = sadd.s32 1, %s1875_s14   ;;  %s2155_s12 = smov %s1871_s13 }
 0x15e   : > { %p10_p5 = scmp.ge.s32.totalorder %s13_s14, 4   ;;  %s2156_s13 = smov %s2158_s15 }
 0x160   :  { %12 = sbr.rel (!%p10_p5) target bundleno = 2 (0x2), region = 76 }

// kernel: encoder_forward.29
= control target key start
LH: loop header
LB: loop body
LE: loop exit
PB: predicated region body
PF: predicated region fallthrough
CT: control target
= control target key end

     0   :  { %s2043_s15 = smov 0   ;;  %s2045_s16 = smov 0   ;;  %s2343_s0 = inlined_call_operand.vmem [shape: bf16[512,384], index: 0, kind: input, shape index: {}]   ;;  %s2344_s1 = inlined_call_operand.vmem [shape: bf16[384,128], index: 1, kind: input, shape index: {}]   ;;  %s2345_s2 = inlined_call_operand.vmem [shape: f32[1,128], index: 2, kind: input, shape index: {}]   ;;  %s2346_s3 = inlined_call_operand.vmem [shape: f32[512,128], index: 3, kind: input, shape index: {}]   ;;  %s2347_s4 = inlined_call_operand.vmem [shape: f32[512,128], index: 4, kind: output, shape index: {}]  }
   0x1   :  { %s2047_s17 = smov 0  }
   0x2 LB: > { %s33_s18 = sadd.s32 1, %s2012_s16  ;;  %p1599_p0 = scmp.ge.s32.totalorder %s2016_s17, 1  ;;  %s2016_s17 = sphi %s2047_s17, %s14_s17   ;;  %s2012_s16 = sphi %s2045_s16, %s2349_s16   ;;  %s2008_s15 = sphi %s2043_s15, %s2348_s15  }
   0x3   : > { %p35_p1 = scmp.ge.s32.totalorder %s33_s18, 2  ;;  %p232_p2 = scmp.lt.s32.totalorder %s2016_s17, 3 }
   0x5   : > { %s2351_s18 = smov (%p35_p1, %s33_s18), 0  ;;  %p233_p3 = pnand %p1599_p0, %p232_p2 }
   0x6   : > { %v1906_v0 = vld [vmem:[%s2344_s1 + $0x40] sm:$0xff] (!%p233_p3)   ;;  %s1600_s21 = sshll.u32 (!%p233_p3), %s2008_s15, 5  ;;  %v1908_v2 = vld [vmem:[%s2344_s1 + $0x48] sm:$0xff] (!%p233_p3)   ;;  %v1910_v4 = vld [vmem:[%s2344_s1 + $0x50] sm:$0xff] (!%p233_p3)  }
   0x7   : > { %236 = sbr.rel (%p233_p3) target bundleno = 351 (0x15f), region = 36  ;;  %v1907_v1 = vld [vmem:[%s2344_s1] sm:$0xff] (!%p233_p3)   ;;  %1681 = vmatprep.subr.bf16.mxu0 (!%p233_p3), %v1906_v0  ;;  %1865 = vmatprep.subr.bf16.mxu1 (!%p233_p3), %v1906_v0  ;;  %p287_p4 = scmp.lt.s32.totalorder (!%p233_p3), %s1600_s21, 63  ;;  %v1909_v3 = vld [vmem:[%s2344_s1 + $0x8] sm:$0xff] (!%p233_p3)   ;;  %v1911_v5 = vld [vmem:[%s2344_s1 + $0x10] sm:$0xff] (!%p233_p3)  }
   0x8   : > { %1682 = vmatpush3.bf16.msra.mxu0 (!%p233_p3), %v1907_v1  ;;  %1873 = vmatpush3.bf16.msra.mxu1 (!%p233_p3), %v1907_v1  ;;  %v1912_v6 = vld [vmem:[%s2344_s1 + $0x58] sm:$0xff] (!%p233_p3)   ;;  %v1914_v8 = vld [vmem:[%s2344_s1 + $0x60] sm:$0xff] (!%p233_p3)   ;;  %v1916_v10 = vld [vmem:[%s2344_s1 + $0x68] sm:$0xff] (!%p233_p3)  }
   0x9   : > { %1683 = vmatprep.subr.bf16.mxu0 (!%p233_p3), %v1908_v2  ;;  %1866 = vmatprep.subr.bf16.mxu1 (!%p233_p3), %v1908_v2  ;;  %v1913_v7 = vld [vmem:[%s2344_s1 + $0x18] sm:$0xff] (!%p233_p3)   ;;  %v1915_v9 = vld [vmem:[%s2344_s1 + $0x20] sm:$0xff] (!%p233_p3)   ;;  %v1917_v13 = vld [vmem:[%s2344_s1 + $0x28] sm:$0xff] (!%p233_p3)  }
   0xa   : > { %v1918_v14 = vld [vmem:[%s2344_s1 + $0x70] sm:$0xff] (!%p233_p3)   ;;  %v1920_v16 = vld [vmem:[%s2344_s1 + $0x78] sm:$0xff] (!%p233_p3)   ;;  %v1928_v18 = vld [vmem:[%s2344_s1 + $0x80] sm:$0xff] (!%p233_p3)  }
   0xb   : > { %v1919_v15 = vld [vmem:[%s2344_s1 + $0x30] sm:$0xff] (!%p233_p3)   ;;  %v1921_v17 = vld [vmem:[%s2344_s1 + $0x38] sm:$0xff] (!%p233_p3)   ;;  %v1929_v22 = vld [vmem:[%s2344_s1 + $0x88] sm:$0xff] (!%p233_p3)  }
   0xc   : > { %1684 = vmatpush3.bf16.msra.mxu0 (!%p233_p3), %v1909_v3  ;;  %1874 = vmatpush3.bf16.msra.mxu1 (!%p233_p3), %v1909_v3  ;;  %v1936_v25 = vld [vmem:[%s2344_s1 + $0x90] sm:$0xff] (!%p233_p3)   ;;  %v1937_v27 = vld [vmem:[%s2344_s1 + $0x98] sm:$0xff] (!%p233_p3)   ;;  %v1944_v30 = vld [vmem:[%s2344_s1 + $0xa0] sm:$0xff] (!%p233_p3)  }
   0xd   : > { %1685 = vmatprep.subr.bf16.mxu0 (!%p233_p3), %v1910_v4  ;;  %1867 = vmatprep.subr.bf16.mxu1 (!%p233_p3), %v1910_v4  ;;  %v1945_v33 = vld [vmem:[%s2344_s1 + $0xa8] sm:$0xff] (!%p233_p3)   ;;  %v1952_v36 = vld [vmem:[%s2344_s1 + $0xb0] sm:$0xff] (!%p233_p3)   ;;  %v1953_v40 = vld [vmem:[%s2344_s1 + $0xb8] sm:$0xff] (!%p233_p3)  }
   0xe   : > { %s2353_s21 = smov (!%p287_p4, %s1600_s21), 63 }
   0xf   : > { %s1881_s8 = smul.u32 12, %s2353_s21 }
  0x10   : > { %1686 = vmatpush3.bf16.msra.mxu0 %v1911_v5  ;;  %1875 = vmatpush3.bf16.msra.mxu1 %v1911_v5 }
  0x11   : > { %1687 = vmatprep.subr.bf16.mxu0 %v1912_v6  ;;  %1868 = vmatprep.subr.bf16.mxu1 %v1912_v6  ;;  %s2094_s15 = scalar_lea.vmem %s2343_s0, %s1881_s8 }
  0x12   : > { %v1924_v11 = vld [vmem:[%s2094_s15 + $0x4] ss:$12 sps:$4 sm:$0xff]   ;;  %v1922_v19 = vld [vmem:[%s2094_s15] ss:$12 sps:$4 sm:$0xff]   ;;  %v1930_v21 = vld [vmem:[%s2094_s15 + $0x1c] ss:$12 sps:$4 sm:$0xff]  }
  0x13   : > { %v1927_v12 = vld [vmem:[%s2094_s15 + $0x124] ss:$12 sps:$4 sm:$0xff]   ;;  %940 = vmatprep.mubr.bf16.mxu0 %v1924_v11  ;;  %v1925_v20 = vld [vmem:[%s2094_s15 + $0x120] ss:$12 sps:$4 sm:$0xff]   ;;  %v1932_v23 = vld [vmem:[%s2094_s15 + $0x13c] ss:$12 sps:$4 sm:$0xff]  }
  0x14   : > { %1688 = vmatpush3.bf16.msra.mxu0 %v1913_v7  ;;  %1876 = vmatpush3.bf16.msra.mxu1 %v1913_v7  ;;  %v1934_v24 = vld [vmem:[%s2094_s15 + $0x18] ss:$12 sps:$4 sm:$0xff]   ;;  %v1938_v28 = vld [vmem:[%s2094_s15 + $0x34] ss:$12 sps:$4 sm:$0xff]   ;;  %v1942_v31 = vld [vmem:[%s2094_s15 + $0x30] ss:$12 sps:$4 sm:$0xff]  }
  0x15   : > { %1689 = vmatprep.subr.bf16.mxu0 %v1914_v8  ;;  %1869 = vmatprep.subr.bf16.mxu1 %v1914_v8  ;;  %v1935_v26 = vld [vmem:[%s2094_s15 + $0x138] ss:$12 sps:$4 sm:$0xff]   ;;  %v1940_v29 = vld [vmem:[%s2094_s15 + $0x154] ss:$12 sps:$4 sm:$0xff]   ;;  %v1943_v32 = vld [vmem:[%s2094_s15 + $0x150] ss:$12 sps:$4 sm:$0xff]  }
  0x16   : > { %1036 = vmatprep.mubr.bf16.mxu1 %v1927_v12  ;;  %v1946_v34 = vld [vmem:[%s2094_s15 + $0x4c] ss:$12 sps:$4 sm:$0xff]   ;;  %v1950_v37 = vld [vmem:[%s2094_s15 + $0x48] ss:$12 sps:$4 sm:$0xff]   ;;  %v1954_v39 = vld [vmem:[%s2094_s15 + $0x64] ss:$12 sps:$4 sm:$0xff]  }
  0x17   : > { %v1948_v35 = vld [vmem:[%s2094_s15 + $0x16c] ss:$12 sps:$4 sm:$0xff]   ;;  %v1951_v38 = vld [vmem:[%s2094_s15 + $0x168] ss:$12 sps:$4 sm:$0xff]   ;;  %v1963_v47 = vld [vmem:[%s2094_s15 + $0x50] ss:$12 sps:$4 sm:$0xff]  }
  0x18   : > { %1690 = vmatpush3.bf16.msra.mxu0 %v1915_v9  ;;  %1877 = vmatpush3.bf16.msra.mxu1 %v1915_v9  ;;  %v1956_v41 = vld [vmem:[%s2094_s15 + $0x8] ss:$12 sps:$4 sm:$0xff]   ;;  %v1957_v42 = vld [vmem:[%s2094_s15 + $0x60] ss:$12 sps:$4 sm:$0xff]   ;;  %v1961_v45 = vld [vmem:[%s2094_s15 + $0x38] ss:$12 sps:$4 sm:$0xff]  }
  0x19   : > { %1691 = vmatprep.subr.bf16.mxu0 %v1916_v10  ;;  %1870 = vmatprep.subr.bf16.mxu1 %v1916_v10  ;;  %v1958_v43 = vld [vmem:[%s2094_s15 + $0x20] ss:$12 sps:$4 sm:$0xff]   ;;  %v1959_v44 = vld [vmem:[%s2094_s15 + $0x7c] ss:$12 sps:$4 sm:$0xff]   ;;  %v1962_v46 = vld [vmem:[%s2094_s15 + $0x78] ss:$12 sps:$4 sm:$0xff]  }
  0x1a   : > { %v1964_v48 = vld [vmem:[%s2094_s15 + $0x94] ss:$12 sps:$4 sm:$0xff]   ;;  %v1967_v50 = vld [vmem:[%s2094_s15 + $0x90] ss:$12 sps:$4 sm:$0xff]   ;;  %v1969_v52 = vld [vmem:[%s2094_s15 + $0xac] ss:$12 sps:$4 sm:$0xff]  }
  0x1b   : > { %v1966_v49 = vld [vmem:[%s2094_s15 + $0x68] ss:$12 sps:$4 sm:$0xff]   ;;  %v1968_v51 = vld [vmem:[%s2094_s15 + $0x80] ss:$12 sps:$4 sm:$0xff]   ;;  %v1971_v53 = vld [vmem:[%s2094_s15 + $0x98] ss:$12 sps:$4 sm:$0xff]  }
  0x1c   : > { %1692 = vmatpush3.bf16.msra.mxu0 %v1917_v13  ;;  %1878 = vmatpush3.bf16.msra.mxu1 %v1917_v13  ;;  %v1972_v54 = vld [vmem:[%s2094_s15 + $0xa8] ss:$12 sps:$4 sm:$0xff]   ;;  %v1973_v55 = vld [vmem:[%s2094_s15 + $0xb0] ss:$12 sps:$4 sm:$0xff]   ;;  %v1977_v58 = vld [vmem:[%s2094_s15 + $0xc0] ss:$12 sps:$4 sm:$0xff]  }
  0x1d   : > { %1693 = vmatprep.subr.bf16.mxu0 %v1918_v14  ;;  %1871 = vmatprep.subr.bf16.mxu1 %v1918_v14  ;;  %v1974_v56 = vld [vmem:[%s2094_s15 + $0xc4] ss:$12 sps:$4 sm:$0xff]   ;;  %v1976_v57 = vld [vmem:[%s2094_s15 + $0xc8] ss:$12 sps:$4 sm:$0xff]   ;;  %v1978_v59 = vld [vmem:[%s2094_s15 + $0xe0] ss:$12 sps:$4 sm:$0xff]  }
  0x1e   : > { %v1979_v60 = vld [vmem:[%s2094_s15 + $0xdc] ss:$12 sps:$4 sm:$0xff]   ;;  %v1981_v61 = vld [vmem:[%s2094_s15 + $0xf8] ss:$12 sps:$4 sm:$0xff]   ;;  %v1984_v0 = vld [vmem:[%s2094_s15 + $0xf4] ss:$12 sps:$4 sm:$0xff]  }
  0x1f   : > { %v1982_v62 = vld [vmem:[%s2094_s15 + $0xd8] ss:$12 sps:$4 sm:$0xff]   ;;  %v1983_v63 = vld [vmem:[%s2094_s15 + $0x110] ss:$12 sps:$4 sm:$0xff]   ;;  %v1986_v1 = vld [vmem:[%s2094_s15 + $0x128] ss:$12 sps:$4 sm:$0xff]  }
  0x20   : > { %1694 = vmatpush3.bf16.msra.mxu0 %v1919_v15  ;;  %1879 = vmatpush3.bf16.msra.mxu1 %v1919_v15  ;;  %v1987_v2 = vld [vmem:[%s2094_s15 + $0xf0] ss:$12 sps:$4 sm:$0xff]   ;;  %v1988_v3 = vld [vmem:[%s2094_s15 + $0x140] ss:$12 sps:$4 sm:$0xff]   ;;  %v1991_v5 = vld [vmem:[%s2094_s15 + $0x158] ss:$12 sps:$4 sm:$0xff]  }
  0x21   : > { %1695 = vmatprep.subr.bf16.mxu0 %v1920_v16  ;;  %1872 = vmatprep.subr.bf16.mxu1 %v1920_v16  ;;  %v1989_v4 = vld [vmem:[%s2094_s15 + $0x10c] ss:$12 sps:$4 sm:$0xff]   ;;  %v1992_v6 = vld [vmem:[%s2094_s15 + $0x108] ss:$12 sps:$4 sm:$0xff]   ;;  %v1993_v7 = vld [vmem:[%s2094_s15 + $0x170] ss:$12 sps:$4 sm:$0xff]  }
  0x22   : > { %s1603_s15 = sshll.u32 %s2353_s21, 3 }
  0x23   : > { %s2211_s5 = scalar_lea.vmem %s2346_s3, %s1603_s15  ;;  %s2224_s9 = scalar_lea.vmem %s2347_s4, %s1603_s15 }
  0x24   : > { %1696 = vmatpush3.bf16.msra.mxu0 %v1921_v17  ;;  %1880 = vmatpush3.bf16.msra.mxu1 %v1921_v17 }
  0x25   : > { %1817 = vmatprep.subr.bf16.mxu1 %v1928_v18 }
  0x27   : > { %941 = vmatmul.mubr.bf16.vlgmr.msra.gmra.mrb[0].mxu0 %v1922_v19  ;;  %1037 = vmatmul.mubr.bf16.vlgmr.msra.gmra.mrb[0].mxu1 %v1925_v20 }
  0x28   : > { %1818 = vmatpush3.bf16.msra.mxu1 %v1928_v18  ;;  %948 = vmatprep.mubr.bf16.mxu0 %v1930_v21 }
  0x29   : > { %1819 = vmatprep.subr.bf16.mxu1 %v1929_v22  ;;  %1044 = vmatprep.mubr.bf16.mxu1 %v1932_v23 }
  0x2c   : > { %1820 = vmatpush3.bf16.msra.mxu1 %v1929_v22 }
  0x2d   : > { %1821 = vmatprep.subr.bf16.mxu1 %v1936_v25 }
  0x2f   : > { %949 = vmatmul.mubr.bf16.gmra.mrb[4].mxu0 %v1934_v24  ;;  %1045 = vmatmul.mubr.bf16.gmra.mrb[4].mxu1 %v1935_v26 }
  0x30   : > { %1822 = vmatpush3.bf16.msra.mxu1 %v1936_v25  ;;  %956 = vmatprep.mubr.bf16.mxu0 %v1938_v28 }
  0x31   : > { %1823 = vmatprep.subr.bf16.mxu1 %v1937_v27  ;;  %1052 = vmatprep.mubr.bf16.mxu1 %v1940_v29 }
  0x34   : > { %1824 = vmatpush3.bf16.msra.mxu1 %v1937_v27 }
  0x35   : > { %1825 = vmatprep.subr.bf16.mxu1 %v1944_v30 }
  0x37   : > { %957 = vmatmul.mubr.bf16.gmra.mrb[8].mxu0 %v1942_v31  ;;  %1053 = vmatmul.mubr.bf16.gmra.mrb[8].mxu1 %v1943_v32 }
  0x38   : > { %1826 = vmatpush3.bf16.msra.mxu1 %v1944_v30  ;;  %964 = vmatprep.mubr.bf16.mxu0 %v1946_v34 }
  0x39   : > { %1827 = vmatprep.subr.bf16.mxu1 %v1945_v33  ;;  %1060 = vmatprep.mubr.bf16.mxu1 %v1948_v35 }
  0x3c   : > { %1828 = vmatpush3.bf16.msra.mxu1 %v1945_v33 }
  0x3d   : > { %1829 = vmatprep.subr.bf16.mxu1 %v1952_v36 }
  0x3f   : > { %965 = vmatmul.mubr.bf16.gmra.mrb[12].mxu0 %v1950_v37  ;;  %1061 = vmatmul.mubr.bf16.gmra.mrb[12].mxu1 %v1951_v38 }
  0x40   : > { %1830 = vmatpush3.bf16.msra.mxu1 %v1952_v36  ;;  %972 = vmatprep.mubr.bf16.mxu0 %v1954_v39 }
  0x41   : > { %1831 = vmatprep.subr.bf16.mxu1 %v1953_v40  ;;  %1833 = vmatprep.mubr.bf16.mxu1 %v1956_v41 }
  0x44   : > { %1832 = vmatpush3.bf16.msra.mxu1 %v1953_v40 }
  0x47   : > { %973 = vmatmul.mubr.bf16.gmra.mrb[16].mxu0 %v1957_v42  ;;  %1834 = vmatmul.mubr.bf16.vlgmr.msra.gmra.mrb[16].mxu1 %v1958_v43 }
  0x48   : > { %980 = vmatprep.mubr.bf16.mxu0 %v1959_v44  ;;  %1837 = vmatprep.mubr.bf16.mxu1 %v1961_v45 }
  0x4f   : > { %981 = vmatmul.mubr.bf16.gmra.mrb[20].mxu0 %v1962_v46  ;;  %1838 = vmatmul.mubr.bf16.gmra.mrb[20].mxu1 %v1963_v47 }
  0x50   : > { %988 = vmatprep.mubr.bf16.mxu0 %v1964_v48  ;;  %1841 = vmatprep.mubr.bf16.mxu1 %v1966_v49 }
  0x57   : > { %989 = vmatmul.mubr.bf16.gmra.mrb[24].mxu0 %v1967_v50  ;;  %1842 = vmatmul.mubr.bf16.gmra.mrb[24].mxu1 %v1968_v51 }
  0x58   : > { %996 = vmatprep.mubr.bf16.mxu0 %v1969_v52  ;;  %1845 = vmatprep.mubr.bf16.mxu1 %v1971_v53 }
  0x5f   : > { %997 = vmatmul.mubr.bf16.gmra.mrb[28].mxu0 %v1972_v54  ;;  %1846 = vmatmul.mubr.bf16.gmra.mrb[28].mxu1 %v1973_v55 }
  0x60   : > { %1004 = vmatprep.mubr.bf16.mxu0 %v1974_v56  ;;  %1849 = vmatprep.mubr.bf16.mxu1 %v1976_v57 }
  0x67   : > { %1005 = vmatmul.mubr.bf16.gmra.mrb[32].mxu0 %v1977_v58  ;;  %1850 = vmatmul.mubr.bf16.gmra.mrb[32].mxu1 %v1978_v59  ;;  %v2216_v58 = vld [vmem:[%s2345_s2] ss:$0 sm:$0xff] }
  0x68   : > { %1012 = vmatprep.mubr.bf16.mxu0 %v1979_v60  ;;  %1853 = vmatprep.mubr.bf16.mxu1 %v1981_v61 }
  0x6f   : > { %1013 = vmatmul.mubr.bf16.gmra.mrb[36].mxu0 %v1982_v62  ;;  %1854 = vmatmul.mubr.bf16.gmra.mrb[36].mxu1 %v1983_v63  ;;  %v1370_v62 = vld [vmem:[%s2211_s5 + $0x10] sm:$0xff] }
  0x70   : > { %1020 = vmatprep.mubr.bf16.mxu0 %v1984_v0  ;;  %1857 = vmatprep.mubr.bf16.mxu1 %v1986_v1 }
  0x77   : > { %1021 = vmatmul.mubr.bf16.gmra.mrb[40].mxu0 %v1987_v2  ;;  %1858 = vmatmul.mubr.bf16.gmra.mrb[40].mxu1 %v1988_v3 }
  0x78   : > { %1028 = vmatprep.mubr.bf16.mxu0 %v1989_v4  ;;  %1861 = vmatprep.mubr.bf16.mxu1 %v1991_v5  ;;  %v1368_v4 = vld [vmem:[%s2211_s5] sm:$0xff] }
  0x7f   : > { %1029 = vmatmul.mubr.bf16.gmra.mrb[44].mxu0 %v1992_v6  ;;  %1862 = vmatmul.mubr.bf16.gmra.mrb[44].mxu1 %v1993_v7 }
  0xfa   : > { %v1697_v8 = vpop.f32.mrb[0].mxu0  ;;  %v1769_v9 = vpop.f32.mrb[0].mxu1 }
  0xfb   : > { %v1698_v10 = vpop.f32.mrb[1].mxu0  ;;  %v1770_v11 = vpop.f32.mrb[1].mxu1 }
  0xfc   : > { %v1699_v12 = vadd.f32 %v1698_v10, %v1697_v8  ;;  %v2189_v13 = vadd.f32 %v1770_v11, %v1769_v9  ;;  %v1700_v14 = vpop.f32.mrb[2].mxu0  ;;  %v1772_v15 = vpop.f32.mrb[2].mxu1  ;;  %v1371_v9 = vld [vmem:[%s2211_s5 + $0x18] sm:$0xff] }
  0xfd   : > { %v1701_v16 = vpop.f32.mrb[3].mxu0  ;;  %v1773_v17 = vpop.f32.mrb[3].mxu1 }
  0xfe   : > { %v1702_v18 = vadd.f32 %v1701_v16, %v1700_v14  ;;  %v2191_v19 = vadd.f32 %v1773_v17, %v1772_v15  ;;  %v1369_v15 = vld [vmem:[%s2211_s5 + $0x8] sm:$0xff] }
 0x102   : > { %v1703_v20 = vpop.f32.mrb[4].mxu0  ;;  %v1775_v21 = vpop.f32.mrb[4].mxu1 }
 0x103   : > { %v1704_v22 = vpop.f32.mrb[5].mxu0  ;;  %v1776_v23 = vpop.f32.mrb[5].mxu1 }
 0x104   : > { %v1705_v24 = vadd.f32 %v1704_v22, %v1703_v20  ;;  %v2193_v25 = vadd.f32 %v1776_v23, %v1775_v21  ;;  %v1706_v26 = vpop.f32.mrb[6].mxu0  ;;  %v1778_v27 = vpop.f32.mrb[6].mxu1 }
 0x105   : > { %v1707_v28 = vpop.f32.mrb[7].mxu0  ;;  %v1779_v29 = vpop.f32.mrb[7].mxu1 }
 0x106   : > { %v1708_v30 = vadd.f32 %v1707_v28, %v1706_v26  ;;  %v2195_v31 = vadd.f32 %v1779_v29, %v1778_v27  ;;  %v1374_v27 = vld [vmem:[%s2211_s5 + $0x30] sm:$0xff] }
 0x10a   : > { %v1709_v32 = vpop.f32.mrb[8].mxu0  ;;  %v1781_v33 = vpop.f32.mrb[8].mxu1 }
 0x10b   : > { %v1710_v34 = vpop.f32.mrb[9].mxu0  ;;  %v1782_v35 = vpop.f32.mrb[9].mxu1 }
 0x10c   : > { %v1711_v36 = vadd.f32 %v1710_v34, %v1709_v32  ;;  %v2197_v37 = vadd.f32 %v1782_v35, %v1781_v33  ;;  %v1712_v38 = vpop.f32.mrb[10].mxu0  ;;  %v1784_v39 = vpop.f32.mrb[10].mxu1  ;;  %v1372_v34 = vld [vmem:[%s2211_s5 + $0x20] sm:$0xff] }
 0x10d   : > { %v1713_v40 = vpop.f32.mrb[11].mxu0  ;;  %v1785_v41 = vpop.f32.mrb[11].mxu1 }
 0x10e   : > { %v2199_v42 = vadd.f32 %v1713_v40, %v1712_v38  ;;  %v2201_v43 = vadd.f32 %v1785_v41, %v1784_v39  ;;  %v1375_v41 = vld [vmem:[%s2211_s5 + $0x38] sm:$0xff] }
 0x112   : > { %v1715_v44 = vpop.f32.mrb[12].mxu0  ;;  %v1787_v45 = vpop.f32.mrb[12].mxu1 }
 0x113   : > { %v1716_v46 = vpop.f32.mrb[13].mxu0  ;;  %v1788_v47 = vpop.f32.mrb[13].mxu1 }
 0x114   : > { %v1717_v48 = vadd.f32 %v1716_v46, %v1715_v44  ;;  %v2203_v49 = vadd.f32 %v1788_v47, %v1787_v45  ;;  %v1718_v50 = vpop.f32.mrb[14].mxu0  ;;  %v1790_v51 = vpop.f32.mrb[14].mxu1  ;;  %v1373_v47 = vld [vmem:[%s2211_s5 + $0x28] sm:$0xff] }
 0x115   : > { %v1719_v52 = vpop.f32.mrb[15].mxu0  ;;  %v1791_v53 = vpop.f32.mrb[15].mxu1 }
 0x116   : > { %v1720_v54 = vadd.f32 %v1719_v52, %v1718_v50  ;;  %v2205_v55 = vadd.f32 %v1791_v53, %v1790_v51 }
 0x11a   : > { %v1721_v56 = vpop.f32.mrb[16].mxu0  ;;  %v1835_v57 = vpop.f32.mrb[16].mxu1 }
 0x11b   : > { %v1112_v59 = vadd.f32 %v1835_v57, %v1705_v24  ;;  %v1722_v60 = vpop.f32.mrb[17].mxu0  ;;  %v1103_v61 = vpop.f32.mrb[17].mxu1 }
 0x11c   : > { %v1723_v63 = vadd.f32 %v1722_v60, %v1721_v56  ;;  %v1104_v0 = vadd.f32 %v1699_v12, %v1103_v61  ;;  %v1724_v1 = vpop.f32.mrb[18].mxu0  ;;  %v1836_v2 = vpop.f32.mrb[18].mxu1 }
 0x11d   : > { %v1338_v3 = vadd.f32 %v2216_v58, %v1112_v59  ;;  %v1115_v5 = vadd.f32 %v1836_v2, %v1708_v30  ;;  %v1725_v6 = vpop.f32.mrb[19].mxu0  ;;  %v1106_v7 = vpop.f32.mrb[19].mxu1  ;;  %v1378_v59 = vld [vmem:[%s2211_s5 + $0x50] sm:$0xff]  ;;  %v1376_v2 = vld [vmem:[%s2211_s5 + $0x40] sm:$0xff] }
 0x11e   : > { %v1336_v8 = vadd.f32 %v2216_v58, %v1104_v0  ;;  %v1726_v10 = vadd.f32 %v1725_v6, %v1724_v1  ;;  %v1107_v11 = vadd.f32 %v1702_v18, %v1106_v7  ;;  %v1379_v7 = vld [vmem:[%s2211_s5 + $0x58] sm:$0xff] }
 0x11f   : > { %v1402_v12 = vadd.f32 %v1370_v62, %v1338_v3  ;;  %v1339_v14 = vadd.f32 %v2216_v58, %v1115_v5 }
 0x120   : > { %v1400_v16 = vadd.f32 %v1368_v4, %v1336_v8  ;;  %v1337_v17 = vadd.f32 %v2216_v58, %v1107_v11 }
 0x121   : > { %1434 = vst [vmem:[%s2224_s9 + $0x10] sm:$0xff] %v1402_v12  ;;  %v1403_v20 = vadd.f32 %v1371_v9, %v1339_v14  ;;  %v1377_v12 = vld [vmem:[%s2211_s5 + $0x48] sm:$0xff] }
 0x122   : > { %1432 = vst [vmem:[%s2224_s9] sm:$0xff] %v1400_v16  ;;  %v1401_v21 = vadd.f32 %v1369_v15, %v1337_v17  ;;  %v1727_v22 = vpop.f32.mrb[20].mxu0  ;;  %v1839_v23 = vpop.f32.mrb[20].mxu1 }
 0x123   : > { %1435 = vst [vmem:[%s2224_s9 + $0x18] sm:$0xff] %v1403_v20  ;;  %v1128_v24 = vadd.f32 %v1839_v23, %v1717_v48  ;;  %v1728_v18 = vpop.f32.mrb[21].mxu0  ;;  %v1119_v26 = vpop.f32.mrb[21].mxu1 }
 0x124   : > { %1433 = vst [vmem:[%s2224_s9 + $0x8] sm:$0xff] %v1401_v21  ;;  %v1729_v28 = vadd.f32 %v1728_v18, %v1727_v22  ;;  %v1120_v29 = vadd.f32 %v1711_v36, %v1119_v26  ;;  %v1730_v30 = vpop.f32.mrb[22].mxu0  ;;  %v1840_v32 = vpop.f32.mrb[22].mxu1 }
 0x125   : > { %v1342_v33 = vadd.f32 %v2216_v58, %v1128_v24  ;;  %v1131_v35 = vadd.f32 %v1840_v32, %v1720_v54  ;;  %v1731_v38 = vpop.f32.mrb[23].mxu0  ;;  %v1122_v39 = vpop.f32.mrb[23].mxu1 }
 0x126   : > { %v1340_v40 = vadd.f32 %v2216_v58, %v1120_v29  ;;  %v1732_v44 = vadd.f32 %v1731_v38, %v1730_v30  ;;  %v1123_v45 = vadd.f32 %v2199_v42, %v1122_v39  ;;  %v1381_v38 = vld [vmem:[%s2211_s5 + $0x68] sm:$0xff] }
 0x127   : > { %v1406_v46 = vadd.f32 %v1374_v27, %v1342_v33  ;;  %v1343_v36 = vadd.f32 %v2216_v58, %v1131_v35  ;;  %v1380_v27 = vld [vmem:[%s2211_s5 + $0x60] sm:$0xff]  ;;  %v1382_v35 = vld [vmem:[%s2211_s5 + $0x70] sm:$0xff] }
 0x128   : > { %v1404_v48 = vadd.f32 %v1372_v34, %v1340_v40  ;;  %v1341_v50 = vadd.f32 %v2216_v58, %v1123_v45  ;;  %v1383_v45 = vld [vmem:[%s2211_s5 + $0x78] sm:$0xff] }
 0x129   : > { %1438 = vst [vmem:[%s2224_s9 + $0x30] sm:$0xff] %v1406_v46  ;;  %v1407_v51 = vadd.f32 %v1375_v41, %v1343_v36 }
 0x12a   : > { %1436 = vst [vmem:[%s2224_s9 + $0x20] sm:$0xff] %v1404_v48  ;;  %v1405_v52 = vadd.f32 %v1373_v47, %v1341_v50  ;;  %v1733_v53 = vpop.f32.mrb[24].mxu0  ;;  %v1843_v54 = vpop.f32.mrb[24].mxu1 }
 0x12b   : > { %1439 = vst [vmem:[%s2224_s9 + $0x38] sm:$0xff] %v1407_v51  ;;  %v1144_v56 = vadd.f32 %v1843_v54, %v1729_v28  ;;  %v1734_v42 = vpop.f32.mrb[25].mxu0  ;;  %v1135_v57 = vpop.f32.mrb[25].mxu1 }
 0x12c   : > { %1437 = vst [vmem:[%s2224_s9 + $0x28] sm:$0xff] %v1405_v52  ;;  %v1735_v60 = vadd.f32 %v1734_v42, %v1733_v53  ;;  %v1136_v61 = vadd.f32 %v1723_v63, %v1135_v57  ;;  %v1736_v62 = vpop.f32.mrb[26].mxu0  ;;  %v1844_v0 = vpop.f32.mrb[26].mxu1 }
 0x12d   : > { %v1346_v1 = vadd.f32 %v2216_v58, %v1144_v56  ;;  %v1147_v3 = vadd.f32 %v1844_v0, %v1732_v44  ;;  %v1737_v4 = vpop.f32.mrb[27].mxu0  ;;  %v1138_v5 = vpop.f32.mrb[27].mxu1 }
 0x12e   : > { %v1344_v6 = vadd.f32 %v2216_v58, %v1136_v61  ;;  %v1738_v8 = vadd.f32 %v1737_v4, %v1736_v62  ;;  %v1139_v9 = vadd.f32 %v1726_v10, %v1138_v5  ;;  %v1384_v62 = vld [vmem:[%s2211_s5 + $0x80] sm:$0xff] }
 0x12f   : > { %v1410_v11 = vadd.f32 %v1378_v59, %v1346_v1  ;;  %v1347_v63 = vadd.f32 %v2216_v58, %v1147_v3 }
 0x130   : > { %v1408_v14 = vadd.f32 %v1376_v2, %v1344_v6  ;;  %v1345_v15 = vadd.f32 %v2216_v58, %v1139_v9  ;;  %v1385_v2 = vld [vmem:[%s2211_s5 + $0x88] sm:$0xff] }
 0x131   : > { %1442 = vst [vmem:[%s2224_s9 + $0x50] sm:$0xff] %v1410_v11  ;;  %v1411_v16 = vadd.f32 %v1379_v7, %v1347_v63 }
 0x132   : > { %1440 = vst [vmem:[%s2224_s9 + $0x40] sm:$0xff] %v1408_v14  ;;  %v1409_v17 = vadd.f32 %v1377_v12, %v1345_v15  ;;  %v1739_v20 = vpop.f32.mrb[28].mxu0  ;;  %v1847_v21 = vpop.f32.mrb[28].mxu1 }
 0x133   : > { %1443 = vst [vmem:[%s2224_s9 + $0x58] sm:$0xff] %v1411_v16  ;;  %v1740_v22 = vpop.f32.mrb[29].mxu0  ;;  %v1151_v23 = vpop.f32.mrb[29].mxu1 }
 0x134   : > { %1441 = vst [vmem:[%s2224_s9 + $0x48] sm:$0xff] %v1409_v17  ;;  %v1741_v10 = vadd.f32 %v1740_v22, %v1739_v20  ;;  %v1152_v24 = vadd.f32 %v1735_v60, %v1151_v23  ;;  %v1742_v18 = vpop.f32.mrb[30].mxu0  ;;  %v1848_v26 = vpop.f32.mrb[30].mxu1  ;;  %v1386_v20 = vld [vmem:[%s2211_s5 + $0x90] sm:$0xff]  ;;  %v1387_v23 = vld [vmem:[%s2211_s5 + $0x98] sm:$0xff] }
 0x135   : > { %v1743_v28 = vpop.f32.mrb[31].mxu0  ;;  %v1154_v29 = vpop.f32.mrb[31].mxu1 }
 0x136   : > { %v1160_v30 = vadd.f32 %v1847_v21, %v1741_v10  ;;  %v1348_v32 = vadd.f32 %v2216_v58, %v1152_v24  ;;  %v1744_v33 = vadd.f32 %v1743_v28, %v1742_v18  ;;  %v1155_v34 = vadd.f32 %v1738_v8, %v1154_v29 }
 0x138   : > { %v1350_v39 = vadd.f32 %v2216_v58, %v1160_v30  ;;  %v1412_v40 = vadd.f32 %v1380_v27, %v1348_v32  ;;  %v1163_v41 = vadd.f32 %v1848_v26, %v1744_v33  ;;  %v1349_v44 = vadd.f32 %v2216_v58, %v1155_v34  ;;  %v1394_v32 = vld [vmem:[%s2211_s5 + $0xd0] sm:$0xff] }
 0x13a   : > { %v1414_v46 = vadd.f32 %v1382_v35, %v1350_v39  ;;  %1444 = vst [vmem:[%s2224_s9 + $0x60] sm:$0xff] %v1412_v40  ;;  %v1351_v36 = vadd.f32 %v2216_v58, %v1163_v41  ;;  %v1413_v47 = vadd.f32 %v1381_v38, %v1349_v44  ;;  %v1745_v48 = vpop.f32.mrb[32].mxu0  ;;  %v1851_v50 = vpop.f32.mrb[32].mxu1  ;;  %v1392_v40 = vld [vmem:[%s2211_s5 + $0xc0] sm:$0xff] }
 0x13b   : > { %v1746_v51 = vpop.f32.mrb[33].mxu0  ;;  %v1167_v52 = vpop.f32.mrb[33].mxu1 }
 0x13c   : > { %1446 = vst [vmem:[%s2224_s9 + $0x70] sm:$0xff] %v1414_v46  ;;  %v1415_v53 = vadd.f32 %v1383_v45, %v1351_v36  ;;  %1445 = vst [vmem:[%s2224_s9 + $0x68] sm:$0xff] %v1413_v47  ;;  %v1747_v54 = vadd.f32 %v1746_v51, %v1745_v48  ;;  %v1748_v56 = vpop.f32.mrb[34].mxu0  ;;  %v1852_v42 = vpop.f32.mrb[34].mxu1  ;;  %v1395_v36 = vld [vmem:[%s2211_s5 + $0xd8] sm:$0xff] }
 0x13d   : > { %v1749_v57 = vpop.f32.mrb[35].mxu0  ;;  %v1170_v59 = vpop.f32.mrb[35].mxu1 }
 0x13e   : > { %1447 = vst [vmem:[%s2224_s9 + $0x78] sm:$0xff] %v1415_v53  ;;  %v1168_v60 = vadd.f32 %v1747_v54, %v1167_v52  ;;  %v1750_v61 = vadd.f32 %v1749_v57, %v1748_v56  ;;  %v1393_v52 = vld [vmem:[%s2211_s5 + $0xc8] sm:$0xff] }
 0x13f   : > { %v1389_v57 = vld [vmem:[%s2211_s5 + $0xa8] sm:$0xff] }
 0x140   : > { %v1352_v0 = vadd.f32 %v2216_v58, %v1168_v60  ;;  %v1171_v1 = vadd.f32 %v1750_v61, %v1170_v59 }
 0x142   : > { %v1416_v3 = vadd.f32 %v1384_v62, %v1352_v0  ;;  %v1353_v4 = vadd.f32 %v2216_v58, %v1171_v1  ;;  %v1751_v5 = vpop.f32.mrb[36].mxu0  ;;  %v2276_v6 = vpop.f32.mrb[36].mxu1 }
 0x143   : > { %v1752_v7 = vpop.f32.mrb[37].mxu0  ;;  %v1183_v8 = vpop.f32.mrb[37].mxu1 }
 0x144   : > { %1448 = vst [vmem:[%s2224_s9 + $0x80] sm:$0xff] %v1416_v3  ;;  %v1417_v9 = vadd.f32 %v1385_v2, %v1353_v4  ;;  %v1753_v11 = vadd.f32 %v1752_v7, %v1751_v5  ;;  %v1754_v63 = vpop.f32.mrb[38].mxu0  ;;  %v2279_v12 = vpop.f32.mrb[38].mxu1  ;;  %v1398_v4 = vld [vmem:[%s2211_s5 + $0xf0] sm:$0xff] }
 0x145   : > { %v1755_v14 = vpop.f32.mrb[39].mxu0  ;;  %v1186_v15 = vpop.f32.mrb[39].mxu1 }
 0x146   : > { %1449 = vst [vmem:[%s2224_s9 + $0x88] sm:$0xff] %v1417_v9  ;;  %v1176_v16 = vadd.f32 %v1851_v50, %v1753_v11  ;;  %v1756_v17 = vadd.f32 %v1755_v14, %v1754_v63  ;;  %v1388_v50 = vld [vmem:[%s2211_s5 + $0xa0] sm:$0xff] }
 0x147   : > { %v1396_v63 = vld [vmem:[%s2211_s5 + $0xe0] sm:$0xff] }
 0x148   : > { %v1354_v21 = vadd.f32 %v2216_v58, %v1176_v16  ;;  %v1179_v22 = vadd.f32 %v1852_v42, %v1756_v17 }
 0x14a   : > { %v1418_v10 = vadd.f32 %v1386_v20, %v1354_v21  ;;  %v1355_v24 = vadd.f32 %v2216_v58, %v1179_v22  ;;  %v1757_v18 = vpop.f32.mrb[40].mxu0  ;;  %v1859_v26 = vpop.f32.mrb[40].mxu1  ;;  %v1399_v20 = vld [vmem:[%s2211_s5 + $0xf8] sm:$0xff] }
 0x14b   : > { %v1208_v27 = vadd.f32 %v1859_v26, %v2193_v25  ;;  %v1758_v28 = vpop.f32.mrb[41].mxu0  ;;  %v1199_v29 = vpop.f32.mrb[41].mxu1 }
 0x14c   : > { %1450 = vst [vmem:[%s2224_s9 + $0x90] sm:$0xff] %v1418_v10  ;;  %v1419_v30 = vadd.f32 %v1387_v23, %v1355_v24  ;;  %v1759_v33 = vadd.f32 %v1758_v28, %v1757_v18  ;;  %v1200_v34 = vadd.f32 %v2189_v13, %v1199_v29  ;;  %v1760_v35 = vpop.f32.mrb[42].mxu0  ;;  %v1860_v38 = vpop.f32.mrb[42].mxu1  ;;  %v1390_v23 = vld [vmem:[%s2211_s5 + $0xb0] sm:$0xff]  ;;  %v1397_v10 = vld [vmem:[%s2211_s5 + $0xe8] sm:$0xff]  ;;  %v1391_v28 = vld [vmem:[%s2211_s5 + $0xb8] sm:$0xff] }
 0x14d   : > { %v1362_v39 = vadd.f32 %v2216_v58, %v1208_v27  ;;  %v1211_v41 = vadd.f32 %v1860_v38, %v2195_v31  ;;  %v1761_v44 = vpop.f32.mrb[43].mxu0  ;;  %v1202_v25 = vpop.f32.mrb[43].mxu1 }
 0x14e   : > { %1451 = vst [vmem:[%s2224_s9 + $0x98] sm:$0xff] %v1419_v30  ;;  %v1184_v45 = vadd.f32 %v1759_v33, %v1183_v8  ;;  %v1360_v46 = vadd.f32 %v2216_v58, %v1200_v34  ;;  %v1762_v47 = vadd.f32 %v1761_v44, %v1760_v35  ;;  %v1203_v13 = vadd.f32 %v2191_v19, %v1202_v25 }
 0x14f   : > { %v1426_v48 = vadd.f32 %v1394_v32, %v1362_v39  ;;  %v1363_v51 = vadd.f32 %v2216_v58, %v1211_v41 }
 0x150   : > { %v1356_v31 = vadd.f32 %v2216_v58, %v1184_v45  ;;  %v1424_v53 = vadd.f32 %v1392_v40, %v1360_v46  ;;  %v1187_v54 = vadd.f32 %v1762_v47, %v1186_v15  ;;  %v1361_v56 = vadd.f32 %v2216_v58, %v1203_v13 }
 0x151   : > { %1458 = vst [vmem:[%s2224_s9 + $0xd0] sm:$0xff] %v1426_v48  ;;  %v1427_v42 = vadd.f32 %v1395_v36, %v1363_v51 }
 0x152   : > { %v1420_v59 = vadd.f32 %v1388_v50, %v1356_v31  ;;  %1456 = vst [vmem:[%s2224_s9 + $0xc0] sm:$0xff] %v1424_v53  ;;  %v1357_v19 = vadd.f32 %v2216_v58, %v1187_v54  ;;  %v1425_v60 = vadd.f32 %v1393_v52, %v1361_v56  ;;  %v1763_v61 = vpop.f32.mrb[44].mxu0  ;;  %v1863_v62 = vpop.f32.mrb[44].mxu1 }
 0x153   : > { %1459 = vst [vmem:[%s2224_s9 + $0xd8] sm:$0xff] %v1427_v42  ;;  %v1224_v0 = vadd.f32 %v1863_v62, %v2203_v49  ;;  %v1764_v1 = vpop.f32.mrb[45].mxu0  ;;  %v1215_v2 = vpop.f32.mrb[45].mxu1 }
 0x154   : > { %1452 = vst [vmem:[%s2224_s9 + $0xa0] sm:$0xff] %v1420_v59  ;;  %v1421_v3 = vadd.f32 %v1389_v57, %v1357_v19  ;;  %1457 = vst [vmem:[%s2224_s9 + $0xc8] sm:$0xff] %v1425_v60  ;;  %v1765_v5 = vadd.f32 %v1764_v1, %v1763_v61  ;;  %v1216_v7 = vadd.f32 %v2197_v37, %v1215_v2  ;;  %v1766_v8 = vpop.f32.mrb[46].mxu0  ;;  %v1864_v9 = vpop.f32.mrb[46].mxu1 }
 0x155   : > { %v1366_v11 = vadd.f32 %v2216_v58, %v1224_v0  ;;  %v1227_v49 = vadd.f32 %v1864_v9, %v2205_v55  ;;  %v1767_v14 = vpop.f32.mrb[47].mxu0  ;;  %v1218_v15 = vpop.f32.mrb[47].mxu1 }
 0x156   : > { %1453 = vst [vmem:[%s2224_s9 + $0xa8] sm:$0xff] %v1421_v3  ;;  %v1192_v16 = vadd.f32 %v2276_v6, %v1765_v5  ;;  %v1364_v17 = vadd.f32 %v2216_v58, %v1216_v7  ;;  %v1768_v37 = vadd.f32 %v1767_v14, %v1766_v8  ;;  %v1219_v21 = vadd.f32 %v2201_v43, %v1218_v15 }
 0x157   : > { %v1430_v22 = vadd.f32 %v1398_v4, %v1366_v11  ;;  %v1367_v55 = vadd.f32 %v2216_v58, %v1227_v49 }
 0x158   : > { %v1358_v24 = vadd.f32 %v2216_v58, %v1192_v16  ;;  %v1428_v18 = vadd.f32 %v1396_v63, %v1364_v17  ;;  %v1195_v6 = vadd.f32 %v2279_v12, %v1768_v37  ;;  %v1365_v26 = vadd.f32 %v2216_v58, %v1219_v21 }
 0x159   : > { %1462 = vst [vmem:[%s2224_s9 + $0xf0] sm:$0xff] %v1430_v22  ;;  %v1431_v27 = vadd.f32 %v1399_v20, %v1367_v55 }
 0x15a   : > { %v1422_v43 = vadd.f32 %v1390_v23, %v1358_v24  ;;  %1460 = vst [vmem:[%s2224_s9 + $0xe0] sm:$0xff] %v1428_v18  ;;  %v1359_v29 = vadd.f32 %v2216_v58, %v1195_v6  ;;  %v1429_v30 = vadd.f32 %v1397_v10, %v1365_v26 }
 0x15b   : > { %1463 = vst [vmem:[%s2224_s9 + $0xf8] sm:$0xff] %v1431_v27 }
 0x15c   : > { %1454 = vst [vmem:[%s2224_s9 + $0xb0] sm:$0xff] %v1422_v43  ;;  %v1423_v32 = vadd.f32 %v1391_v28, %v1359_v29  ;;  %1461 = vst [vmem:[%s2224_s9 + $0xe8] sm:$0xff] %v1429_v30 }
 0x15e   : > { %1455 = vst [vmem:[%s2224_s9 + $0xb8] sm:$0xff] %v1423_v32 }
 0x15f PF: > { %s14_s17 = sadd.s32 1, %s2016_s17   ;;  %s2348_s15 = smov %s2012_s16 }
 0x160   : > { %p11_p5 = scmp.ge.s32.totalorder %s14_s17, 4   ;;  %s2349_s16 = smov %s2351_s18 }
 0x162   :  { %13 = sbr.rel (!%p11_p5) target bundleno = 2 (0x2), region = 83 }

// kernel: encoder_forward.31
= control target key start
LH: loop header
LB: loop body
LE: loop exit
PB: predicated region body
PF: predicated region fallthrough
CT: control target
= control target key end

     0   :  { %s954_s18 = smov 0   ;;  %s1072_s0 = inlined_call_operand.vmem [shape: f32[2,64,32], index: 0, kind: input, shape index: {}]   ;;  %s1073_s1 = inlined_call_operand.vmem [shape: f32[1,32], index: 1, kind: input, shape index: {}]   ;;  %s1074_s2 = inlined_call_operand.vmem [shape: f32[1,32], index: 2, kind: input, shape index: {}]   ;;  %s1075_s3 = inlined_call_operand.vmem [shape: f32[32,32], index: 3, kind: input, shape index: {}]   ;;  %s1076_s4 = inlined_call_operand.vmem [shape: f32[32,32], index: 4, kind: input, shape index: {}]   ;;  %s1077_s5 = inlined_call_operand.vmem [shape: f32[2,64,32], index: 5, kind: output, shape index: {}]  }
   0x1 LB: > { %s761_s19 = sadd.s32 4294967295, %s919_s18   ;;  %p765_p0 = scmp.ge.s32.totalorder %s919_s18, 1  ;;  %s919_s18 = sphi %s954_s18, %s15_s18  }
   0x2   : > { %p187_p1 = scmp.lt.s32.totalorder %s919_s18, 3 }
   0x4   : > { %p188_p2 = pnand %p765_p0, %p187_p1 }
   0x5   : > { %v233_v0 = vld [vmem:[%s1075_s3] sm:$0xff] (!%p188_p2)  ;;  %v234_v1 = vld [vmem:[%s1075_s3 + $0x8] sm:$0xff] (!%p188_p2)  ;;  %v235_v2 = vld [vmem:[%s1075_s3 + $0x10] sm:$0xff] (!%p188_p2)  ;;  %v921_v3 = vmov (!%p188_p2), 0.0|0.0   ;;  %vm922_vm0 = vmmov (!%p188_p2), 0   ;;  %v923_v6 = vmov (!%p188_p2), 0.0   ;;  %v411_v46 = vlaneseq (!%p188_p2) }
   0x6   : > { %191 = sbr.rel (%p188_p2) target bundleno = 988 (0x3dc), region = 40  ;;  %844 = vmatprep.subr.bf16.mxu0 (!%p188_p2), %v921_v3  ;;  %v845_v4 = vpack.c.bf16 (!%p188_p2), %v234_v1, %v233_v0  ;;  %v236_v5 = vld [vmem:[%s1075_s3 + $0x18] sm:$0xff] (!%p188_p2)  ;;  %808 = vmatprep.mubr.msk.f32.mxu0 (!%p188_p2), %vm922_vm0, %v923_v6  ;;  %p215_p3 = scmp.lt.s32.totalorder (!%p188_p2), %s761_s19, 1  ;;  %v237_v7 = vld [vmem:[%s1076_s4] sm:$0xff] (!%p188_p2)  ;;  %v238_v8 = vld [vmem:[%s1076_s4 + $0x8] sm:$0xff] (!%p188_p2)  ;;  %vm241_vm1 = vcmask (!%p188_p2), 261120  }
   0x7   : > { %850 = vmatprep.subr.bf16.mxu1 (!%p188_p2), %v921_v3  ;;  %v851_v9 = vpack.c.bf16 (!%p188_p2), %v238_v8, %v237_v7  ;;  %819 = vmatprep.mubr.msk.f32.mxu1 (!%p188_p2), %vm922_vm0, %v923_v6  ;;  %v848_v10 = vpack.c.bf16 (!%p188_p2), %v236_v5, %v235_v2  ;;  %v239_v40 = vld [vmem:[%s1076_s4 + $0x10] sm:$0xff] (!%p188_p2)  ;;  %v240_v41 = vld [vmem:[%s1076_s4 + $0x18] sm:$0xff] (!%p188_p2)  ;;  %v412_v47 = vshrl.u32 (!%p188_p2), %v411_v46, 7 }
   0x8   : > { %846 = vmatpush3.bf16.msra.mxu0 (!%p188_p2), %v845_v4  ;;  %v854_v42 = vpack.c.bf16 (!%p188_p2), %v240_v41, %v239_v40 }
   0x9   : > { %847 = vmatprep.subr.bf16.mxu0 (!%p188_p2), %v921_v3  ;;  %852 = vmatpush3.bf16.msra.mxu1 (!%p188_p2), %v851_v9  ;;  %v413_v48 = vsub.s32 (!%p188_p2), 0, %v412_v47 }
   0xa   : > { %853 = vmatprep.subr.bf16.mxu1 (!%p188_p2), %v921_v3 }
   0xc   : > { %849 = vmatpush3.bf16.msra.mxu0 (!%p188_p2), %v848_v10 }
   0xd   : > { %s1079_s19 = smov (!%p215_p3, %s761_s19), 1  ;;  %856 = vmatprep.subr.bf16.mxu0 %v921_v3  ;;  %855 = vmatpush3.bf16.msra.mxu1 %v854_v42 }
   0xe   : > { %s778_s7 = sshll.u32 %s1079_s19, 6  ;;  %862 = vmatprep.subr.bf16.mxu1 %v921_v3 }
   0xf   : > { %s219_s10 = scalar_lea.vmem %s1072_s0, %s778_s7  ;;  %s224_s23 = scalar_lea.vmem %s1077_s5, %s778_s7 }
  0x10   : > { %v225_v11 = vld [vmem:[%s219_s10] sm:$0xff]  ;;  %v226_v12 = vld [vmem:[%s219_s10 + $0x8] sm:$0xff]  ;;  %v227_v13 = vld [vmem:[%s219_s10 + $0x10] sm:$0xff] }
  0x11   : > { %v228_v14 = vld [vmem:[%s219_s10 + $0x18] sm:$0xff]  ;;  %v242_v15 = vsel %vm241_vm1, %v225_v11, 0.0  ;;  %v243_v16 = vsel %vm241_vm1, %v226_v12, 0.0  ;;  %v245_v17 = vsel %vm241_vm1, %v227_v13, 0.0  ;;  %v229_v18 = vld [vmem:[%s219_s10 + $0x20] sm:$0xff]  ;;  %v230_v21 = vld [vmem:[%s219_s10 + $0x28] sm:$0xff] }
  0x12   : > { %v244_v19 = vadd.f32 %v243_v16, %v242_v15  ;;  %v247_v20 = vsel %vm241_vm1, %v228_v14, 0.0  ;;  %v249_v23 = vsel %vm241_vm1, %v229_v18, 0.0  ;;  %v231_v24 = vld [vmem:[%s219_s10 + $0x30] sm:$0xff]  ;;  %v251_v26 = vsel %vm241_vm1, %v230_v21, 0.0  ;;  %v232_v27 = vld [vmem:[%s219_s10 + $0x38] sm:$0xff] }
  0x13   : > { %v253_v29 = vsel %vm241_vm1, %v231_v24, 0.0  ;;  %v255_v31 = vsel %vm241_vm1, %v232_v27, 0.0 }
  0x14   : > { %v246_v22 = vadd.f32 %v245_v17, %v244_v19 }
  0x16   : > { %v248_v25 = vadd.f32 %v247_v20, %v246_v22 }
  0x18   : > { %v250_v28 = vadd.f32 %v249_v23, %v248_v25 }
  0x1a   : > { %v252_v30 = vadd.f32 %v251_v26, %v250_v28 }
  0x1c   : > { %v254_v32 = vadd.f32 %v253_v29, %v252_v30 }
  0x1e   : > { %v256_v33 = vadd.f32 %v255_v31, %v254_v32 }
  0x20   : > { %v257_v34 = vrot.slane %v256_v33, 4 }
  0x22   : > { %v258_v35 = vadd.f32 %v257_v34, %v256_v33  ;;  %v774_v33 = vld [vmem:[%s1073_s1] ss:$0 sm:$0xff] }
  0x24   : > { %v259_v36 = vrot.slane %v258_v35, 2 }
  0x26   : > { %v260_v37 = vadd.f32 %v259_v36, %v258_v35 }
  0x28   : > { %v261_v38 = vrot.slane %v260_v37, 1 }
  0x2a   : > { %v262_v39 = vadd.f32 %v261_v38, %v260_v37 }
  0x2c   : > { %809 = vmatmul.mubr.msk.f32.vlgmr.msra.gmra.mrb[0].mxu0 %vm241_vm1, %v262_v39 }
  0x2d   : > { %858 = vmatpush3.bf16.msra.mxu0 %v845_v4  ;;  %830 = vmatprep.mubr.msk.f32.mxu0 %vm922_vm0, %v923_v6 }
  0x2e   : > { %859 = vmatprep.subr.bf16.mxu0 %v921_v3 }
  0x31   : > { %861 = vmatpush3.bf16.msra.mxu0 %v848_v10 }
  0xff   : > { %v332_v43 = vpop.f32.mrb[0].mxu0 }
 0x100   : > { %v337_v44 = vmul.f32 0.015625, %v332_v43  ;;  %v810_v45 = vpop.f32.mrb[1].mxu0 }
 0x102   : > { %820 = vmatmul.mubr.msk.f32.vlgmr.msra.gmra.mrb[0].mxu1 %vm241_vm1, %v337_v44 }
 0x103   : > { %864 = vmatpush3.bf16.msra.mxu1 %v851_v9  ;;  %841 = vmatprep.mubr.msk.f32.mxu1 %vm922_vm0, %v923_v6 }
 0x104   : > { %865 = vmatprep.subr.bf16.mxu1 %v921_v3 }
 0x107   : > { %867 = vmatpush3.bf16.msra.mxu1 %v854_v42  ;;  %v775_v42 = vld [vmem:[%s1074_s2] ss:$0 sm:$0xff] }
 0x1d5   : > { %v407_v49 = vpop.f32.mrb[0].mxu1 }
 0x1d6   : > { %v414_v50 = vrot.slane %v407_v49, %v413_v48  ;;  %v821_v51 = vpop.f32.mrb[1].mxu1 }
 0x1d8   : > { %v415_v52 = vsub.f32 %v225_v11, %v414_v50  ;;  %v416_v53 = vsub.f32 %v226_v12, %v414_v50  ;;  %v417_v54 = vsub.f32 %v227_v13, %v414_v50  ;;  %v418_v55 = vsub.f32 %v228_v14, %v414_v50 }
 0x1d9   : > { %v419_v56 = vsub.f32 %v229_v18, %v414_v50  ;;  %v420_v60 = vsub.f32 %v230_v21, %v414_v50  ;;  %v421_v1 = vsub.f32 %v231_v24, %v414_v50  ;;  %v422_v5 = vsub.f32 %v232_v27, %v414_v50 }
 0x1da   : > { %v423_v57 = vmul.f32 %v415_v52, %v415_v52  ;;  %v424_v58 = vmul.f32 %v416_v53, %v416_v53  ;;  %v425_v59 = vmul.f32 %v417_v54, %v417_v54  ;;  %v426_v61 = vmul.f32 %v418_v55, %v418_v55 }
 0x1db   : > { %v427_v2 = vmul.f32 %v419_v56, %v419_v56  ;;  %v428_v6 = vmul.f32 %v420_v60, %v420_v60  ;;  %v429_v9 = vmul.f32 %v421_v1, %v421_v1  ;;  %v430_v12 = vmul.f32 %v422_v5, %v422_v5 }
 0x1dc   : > { %v431_v62 = vsel %vm241_vm1, %v423_v57, 0.0  ;;  %v432_v63 = vsel %vm241_vm1, %v424_v58, 0.0  ;;  %v434_v3 = vsel %vm241_vm1, %v425_v59, 0.0  ;;  %v436_v7 = vsel %vm241_vm1, %v426_v61, 0.0 }
 0x1dd   : > { %v433_v0 = vadd.f32 %v432_v63, %v431_v62  ;;  %v438_v10 = vsel %vm241_vm1, %v427_v2, 0.0  ;;  %v440_v13 = vsel %vm241_vm1, %v428_v6, 0.0  ;;  %v442_v15 = vsel %vm241_vm1, %v429_v9, 0.0 }
 0x1de   : > { %v444_v17 = vsel %vm241_vm1, %v430_v12, 0.0 }
 0x1df   : > { %v435_v4 = vadd.f32 %v434_v3, %v433_v0 }
 0x1e1   : > { %v437_v8 = vadd.f32 %v436_v7, %v435_v4 }
 0x1e3   : > { %v439_v11 = vadd.f32 %v438_v10, %v437_v8 }
 0x1e5   : > { %v441_v14 = vadd.f32 %v440_v13, %v439_v11 }
 0x1e7   : > { %v443_v16 = vadd.f32 %v442_v15, %v441_v14 }
 0x1e9   : > { %v445_v18 = vadd.f32 %v444_v17, %v443_v16 }
 0x1eb   : > { %v446_v19 = vrot.slane %v445_v18, 4 }
 0x1ed   : > { %v447_v20 = vadd.f32 %v446_v19, %v445_v18 }
 0x1ef   : > { %v448_v21 = vrot.slane %v447_v20, 2 }
 0x1f1   : > { %v449_v22 = vadd.f32 %v448_v21, %v447_v20 }
 0x1f3   : > { %v450_v23 = vrot.slane %v449_v22, 1 }
 0x1f5   : > { %v451_v24 = vadd.f32 %v450_v23, %v449_v22 }
 0x1f7   : > { %831 = vmatmul.mubr.msk.f32.vlgmr.msra.gmra.mrb[2].mxu0 %vm241_vm1, %v451_v24 }
 0x2ca   : > { %v521_v25 = vpop.f32.mrb[2].mxu0 }
 0x2cb   : > { %v525_v26 = vmul.f32 0.015625, %v521_v25  ;;  %v832_v27 = vpop.f32.mrb[3].mxu0 }
 0x2cd   : > { %842 = vmatmul.mubr.msk.f32.vlgmr.msra.gmra.mrb[2].mxu1 %vm241_vm1, %v525_v26 }
 0x3a0   : > { %v595_v28 = vpop.f32.mrb[2].mxu1 }
 0x3a1   : > { %v596_v29 = vadd.f32 1e-06, %v595_v28  ;;  %v843_v30 = vpop.f32.mrb[3].mxu1 }
 0x3a3   : > { %879 = vrsqrt.f32 %v596_v29 }
 0x3ad   : > { %v880_v31 = vpop.eup %879 }
 0x3ae   : > { %v603_v32 = vrot.slane %v880_v31, %v413_v48 }
 0x3b0   : > { %v604_v34 = vmul.f32 %v603_v32, %v415_v52  ;;  %v605_v35 = vmul.f32 %v603_v32, %v416_v53  ;;  %v606_v36 = vmul.f32 %v603_v32, %v417_v54  ;;  %v607_v37 = vmul.f32 %v603_v32, %v418_v55 }
 0x3b1   : > { %v608_v38 = vmul.f32 %v603_v32, %v419_v56  ;;  %v609_v39 = vmul.f32 %v603_v32, %v420_v60  ;;  %v610_v40 = vmul.f32 %v603_v32, %v421_v1  ;;  %v611_v41 = vmul.f32 %v603_v32, %v422_v5 }
 0x3b2   : > { %v619_v43 = vmul.f32 %v774_v33, %v604_v34  ;;  %v620_v44 = vmul.f32 %v774_v33, %v605_v35  ;;  %v621_v45 = vmul.f32 %v774_v33, %v606_v36  ;;  %v622_v46 = vmul.f32 %v774_v33, %v607_v37 }
 0x3b3   : > { %v623_v47 = vmul.f32 %v774_v33, %v608_v38  ;;  %v624_v48 = vmul.f32 %v774_v33, %v609_v39  ;;  %v625_v49 = vmul.f32 %v774_v33, %v610_v40  ;;  %v626_v50 = vmul.f32 %v774_v33, %v611_v41 }
 0x3b4   : > { %v634_v51 = vadd.f32 %v775_v42, %v619_v43  ;;  %v635_v52 = vadd.f32 %v775_v42, %v620_v44  ;;  %v636_v53 = vadd.f32 %v775_v42, %v621_v45  ;;  %v1036_v54 = vadd.f32 %v775_v42, %v622_v46 }
 0x3b5   : > { %v1038_v55 = vadd.f32 %v775_v42, %v623_v47  ;;  %v1040_v56 = vadd.f32 %v775_v42, %v624_v48  ;;  %v1042_v57 = vadd.f32 %v775_v42, %v625_v49  ;;  %v1044_v58 = vadd.f32 %v775_v42, %v626_v50 }
 0x3b6   : > { %v642_v59 = vsub.f32 0.0, %v634_v51  ;;  %v643_v60 = vsub.f32 0.0, %v635_v52  ;;  %v644_v61 = vsub.f32 0.0, %v636_v53  ;;  %v645_v62 = vsub.f32 0.0, %v1036_v54 }
 0x3b7   : > { %v646_v63 = vsub.f32 0.0, %v1038_v55  ;;  %v647_v0 = vsub.f32 0.0, %v1040_v56  ;;  %v648_v1 = vsub.f32 0.0, %v1042_v57  ;;  %v649_v5 = vsub.f32 0.0, %v1044_v58 }
 0x3b8   : > { %v650_v2 = vmul.f32 1.442695, %v642_v59  ;;  %v652_v3 = vmul.f32 1.442695, %v643_v60  ;;  %v654_v4 = vmul.f32 1.442695, %v644_v61 }
 0x3b9   : > { %v656_v6 = vmul.f32 1.442695, %v645_v62  ;;  %v658_v7 = vmul.f32 1.442695, %v646_v63  ;;  %v660_v8 = vmul.f32 1.442695, %v647_v0 }
 0x3ba   : > { %881 = vpow2.f32 %v650_v2  ;;  %v662_v9 = vmul.f32 1.442695, %v648_v1  ;;  %v664_v10 = vmul.f32 1.442695, %v649_v5 }
 0x3bb   : > { %883 = vpow2.f32 %v652_v3 }
 0x3bc   : > { %885 = vpow2.f32 %v654_v4 }
 0x3bd   : > { %887 = vpow2.f32 %v656_v6 }
 0x3be   : > { %889 = vpow2.f32 %v658_v7 }
 0x3bf   : > { %891 = vpow2.f32 %v660_v8 }
 0x3c0   : > { %893 = vpow2.f32 %v662_v9 }
 0x3c1   : > { %895 = vpow2.f32 %v664_v10 }
 0x3c4   : > { %v882_v11 = vpop.eup %881 }
 0x3c5   : > { %v884_v12 = vpop.eup %883  ;;  %v666_v13 = vadd.f32 1.0, %v882_v11 }
 0x3c6   : > { %v886_v14 = vpop.eup %885  ;;  %v667_v15 = vadd.f32 1.0, %v884_v12 }
 0x3c7   : > { %v888_v16 = vpop.eup %887  ;;  %v668_v17 = vadd.f32 1.0, %v886_v14  ;;  %897 = vrcp.f32 %v666_v13 }
 0x3c8   : > { %v890_v18 = vpop.eup %889  ;;  %v669_v19 = vadd.f32 1.0, %v888_v16  ;;  %899 = vrcp.f32 %v667_v15 }
 0x3c9   : > { %v892_v20 = vpop.eup %891  ;;  %v670_v21 = vadd.f32 1.0, %v890_v18  ;;  %901 = vrcp.f32 %v668_v17 }
 0x3ca   : > { %v894_v22 = vpop.eup %893  ;;  %v671_v23 = vadd.f32 1.0, %v892_v20  ;;  %903 = vrcp.f32 %v669_v19 }
 0x3cb   : > { %v896_v24 = vpop.eup %895  ;;  %v672_v25 = vadd.f32 1.0, %v894_v22  ;;  %905 = vrcp.f32 %v670_v21 }
 0x3cc   : > { %v673_v26 = vadd.f32 1.0, %v896_v24  ;;  %907 = vrcp.f32 %v671_v23 }
 0x3cd   : > { %909 = vrcp.f32 %v672_v25 }
 0x3ce   : > { %911 = vrcp.f32 %v673_v26 }
 0x3d1   : > { %v898_v27 = vpop.eup %897 }
 0x3d2   : > { %v900_v28 = vpop.eup %899  ;;  %v690_v29 = vmul.f32 %v898_v27, %v634_v51 }
 0x3d3   : > { %v902_v30 = vpop.eup %901  ;;  %v691_v31 = vmul.f32 %v900_v28, %v635_v52 }
 0x3d4   : > { %v904_v32 = vpop.eup %903  ;;  %v692_v33 = vmul.f32 %v902_v30, %v636_v53  ;;  %698 = vst.msk [vmem:[%s224_s23] sm:$0xff] %vm241_vm1, %v690_v29 }
 0x3d5   : > { %v906_v34 = vpop.eup %905  ;;  %v693_v35 = vmul.f32 %v904_v32, %v1036_v54  ;;  %699 = vst.msk [vmem:[%s224_s23 + $0x8] sm:$0xff] %vm241_vm1, %v691_v31 }
 0x3d6   : > { %v908_v36 = vpop.eup %907  ;;  %v694_v37 = vmul.f32 %v906_v34, %v1038_v55  ;;  %700 = vst.msk [vmem:[%s224_s23 + $0x10] sm:$0xff] %vm241_vm1, %v692_v33 }
 0x3d7   : > { %v910_v38 = vpop.eup %909  ;;  %v695_v39 = vmul.f32 %v908_v36, %v1040_v56  ;;  %701 = vst.msk [vmem:[%s224_s23 + $0x18] sm:$0xff] %vm241_vm1, %v693_v35 }
 0x3d8   : > { %v912_v40 = vpop.eup %911  ;;  %v696_v41 = vmul.f32 %v910_v38, %v1042_v57  ;;  %702 = vst.msk [vmem:[%s224_s23 + $0x20] sm:$0xff] %vm241_vm1, %v694_v37 }
 0x3d9   : > { %v697_v42 = vmul.f32 %v912_v40, %v1044_v58  ;;  %703 = vst.msk [vmem:[%s224_s23 + $0x28] sm:$0xff] %vm241_vm1, %v695_v39 }
 0x3da   : > { %704 = vst.msk [vmem:[%s224_s23 + $0x30] sm:$0xff] %vm241_vm1, %v696_v41 }
 0x3db   : > { %705 = vst.msk [vmem:[%s224_s23 + $0x38] sm:$0xff] %vm241_vm1, %v697_v42 }
 0x3dc PF: > { %s15_s18 = sadd.s32 1, %s919_s18  }
 0x3dd   : > { %p12_p4 = scmp.ge.s32.totalorder %s15_s18, 4  }
 0x3df   :  { %14 = sbr.rel (!%p12_p4) target bundleno = 1 (0x1), region = 70 }

// kernel: encoder_forward.30
= control target key start
LH: loop header
LB: loop body
LE: loop exit
PB: predicated region body
PF: predicated region fallthrough
CT: control target
= control target key end

     0   :  { %s1141_s1 = inlined_call_operand.vmem [shape: bf16[384,128], index: 1, kind: input, shape index: {}]   ;;  %s1142_s0 = inlined_call_operand.vmem [shape: bf16[128,384], index: 0, kind: input, shape index: {}]   ;;  %s1143_s2 = inlined_call_operand.vmem [shape: f32[1,128], index: 2, kind: input, shape index: {}]   ;;  %s1144_s3 = inlined_call_operand.vmem [shape: f32[128,128], index: 3, kind: output, shape index: {}]  }
   0x1   :  { %v852_v0 = vld [vmem:[%s1141_s1 + $0x40] sm:$0xff]   ;;  %v855_v3 = vld [vmem:[%s1141_s1 + $0x48] sm:$0xff]   ;;  %v858_v6 = vld [vmem:[%s1141_s1 + $0x50] sm:$0xff]  }
   0x2   :  { %v853_v1 = vld [vmem:[%s1141_s1] sm:$0xff]   ;;  %740 = vmatprep.subr.bf16.mxu0 %v852_v0  ;;  %v856_v4 = vld [vmem:[%s1141_s1 + $0x8] sm:$0xff]   ;;  %v859_v7 = vld [vmem:[%s1141_s1 + $0x10] sm:$0xff]  }
   0x3   :  { %v854_v2 = vld [vmem:[%s1141_s1 + $0x80] sm:$0xff]   ;;  %741 = vmatpush3.bf16.msra.mxu0 %v853_v1  ;;  %v857_v5 = vld [vmem:[%s1141_s1 + $0x88] sm:$0xff]   ;;  %v860_v8 = vld [vmem:[%s1141_s1 + $0x90] sm:$0xff]  }
   0x4   :  { %820 = vmatprep.subr.bf16.mxu1 %v854_v2  ;;  %742 = vmatprep.subr.bf16.mxu0 %v855_v3  ;;  %v861_v9 = vld [vmem:[%s1141_s1 + $0x58] sm:$0xff]   ;;  %v864_v12 = vld [vmem:[%s1141_s1 + $0x60] sm:$0xff]   ;;  %v867_v15 = vld [vmem:[%s1141_s1 + $0x68] sm:$0xff]  }
   0x5   :  { %821 = vmatpush3.bf16.msra.mxu1 %v854_v2  ;;  %v862_v10 = vld [vmem:[%s1141_s1 + $0x18] sm:$0xff]   ;;  %v866_v13 = vld [vmem:[%s1141_s1 + $0xa0] sm:$0xff]   ;;  %v869_v16 = vld [vmem:[%s1141_s1 + $0xa8] sm:$0xff]  }
   0x6   :  { %822 = vmatprep.subr.bf16.mxu1 %v857_v5  ;;  %v863_v11 = vld [vmem:[%s1141_s1 + $0x98] sm:$0xff]   ;;  %v865_v14 = vld [vmem:[%s1141_s1 + $0x20] sm:$0xff]   ;;  %v868_v17 = vld [vmem:[%s1141_s1 + $0x28] sm:$0xff]  }
   0x7   :  { %743 = vmatpush3.bf16.msra.mxu0 %v856_v4  ;;  %v870_v18 = vld [vmem:[%s1141_s1 + $0x70] sm:$0xff]   ;;  %v873_v21 = vld [vmem:[%s1141_s1 + $0x78] sm:$0xff]   ;;  %v876_v26 = vld [vmem:[%s1142_s0] ss:$12 sps:$4 sm:$0xff]  }
   0x8   :  { %744 = vmatprep.subr.bf16.mxu0 %v858_v6  ;;  %v871_v19 = vld [vmem:[%s1141_s1 + $0x30] sm:$0xff]   ;;  %v875_v22 = vld [vmem:[%s1141_s1 + $0xb8] sm:$0xff]   ;;  %v880_v28 = vld [vmem:[%s1142_s0 + $0x20] ss:$12 sps:$4 sm:$0xff]  }
   0x9   :  { %823 = vmatpush3.bf16.msra.mxu1 %v857_v5  ;;  %v872_v20 = vld [vmem:[%s1141_s1 + $0xb0] sm:$0xff]   ;;  %v874_v25 = vld [vmem:[%s1141_s1 + $0x38] sm:$0xff]   ;;  %v896_v36 = vld [vmem:[%s1142_s0 + $0x80] ss:$12 sps:$4 sm:$0xff]  }
   0xa   :  { %824 = vmatprep.subr.bf16.mxu1 %v860_v8  ;;  %v878_v23 = vld [vmem:[%s1142_s0 + $0x4] ss:$12 sps:$4 sm:$0xff]   ;;  %v879_v24 = vld [vmem:[%s1142_s0 + $0x8] ss:$12 sps:$4 sm:$0xff]   ;;  %v889_v35 = vld [vmem:[%s1142_s0 + $0x4c] ss:$12 sps:$4 sm:$0xff]  }
   0xb   :  { %745 = vmatpush3.bf16.msra.mxu0 %v859_v7  ;;  %435 = vmatprep.mubr.bf16.mxu0 %v878_v23  ;;  %v881_v27 = vld [vmem:[%s1142_s0 + $0x1c] ss:$12 sps:$4 sm:$0xff]   ;;  %v887_v29 = vld [vmem:[%s1142_s0 + $0x38] ss:$12 sps:$4 sm:$0xff]   ;;  %v884_v31 = vld [vmem:[%s1142_s0 + $0x34] ss:$12 sps:$4 sm:$0xff]  }
   0xc   :  { %746 = vmatprep.subr.bf16.mxu0 %v861_v9  ;;  %836 = vmatprep.mubr.bf16.mxu1 %v879_v24  ;;  %v883_v30 = vld [vmem:[%s1142_s0 + $0x18] ss:$12 sps:$4 sm:$0xff]   ;;  %v888_v32 = vld [vmem:[%s1142_s0 + $0x50] ss:$12 sps:$4 sm:$0xff]   ;;  %v895_v33 = vld [vmem:[%s1142_s0 + $0x68] ss:$12 sps:$4 sm:$0xff]  }
   0xd   :  { %825 = vmatpush3.bf16.msra.mxu1 %v860_v8  ;;  %v886_v34 = vld [vmem:[%s1142_s0 + $0x30] ss:$12 sps:$4 sm:$0xff]   ;;  %v903_v37 = vld [vmem:[%s1142_s0 + $0x98] ss:$12 sps:$4 sm:$0xff]   ;;  %v891_v38 = vld [vmem:[%s1142_s0 + $0x48] ss:$12 sps:$4 sm:$0xff]  }
   0xe   :  { %826 = vmatprep.subr.bf16.mxu1 %v863_v11  ;;  %v892_v39 = vld [vmem:[%s1142_s0 + $0x64] ss:$12 sps:$4 sm:$0xff]   ;;  %v894_v41 = vld [vmem:[%s1142_s0 + $0x60] ss:$12 sps:$4 sm:$0xff]   ;;  %v897_v42 = vld [vmem:[%s1142_s0 + $0x7c] ss:$12 sps:$4 sm:$0xff]  }
   0xf   :  { %747 = vmatpush3.bf16.msra.mxu0 %v862_v10  ;;  %v904_v40 = vld [vmem:[%s1142_s0 + $0xb0] ss:$12 sps:$4 sm:$0xff]   ;;  %v899_v43 = vld [vmem:[%s1142_s0 + $0x78] ss:$12 sps:$4 sm:$0xff]   ;;  %v900_v44 = vld [vmem:[%s1142_s0 + $0x94] ss:$12 sps:$4 sm:$0xff]  }
  0x10   :  { %748 = vmatprep.subr.bf16.mxu0 %v864_v12  ;;  %v902_v45 = vld [vmem:[%s1142_s0 + $0x90] ss:$12 sps:$4 sm:$0xff]   ;;  %v905_v46 = vld [vmem:[%s1142_s0 + $0xac] ss:$12 sps:$4 sm:$0xff]   ;;  %v907_v47 = vld [vmem:[%s1142_s0 + $0xa8] ss:$12 sps:$4 sm:$0xff]  }
  0x11   :  { %827 = vmatpush3.bf16.msra.mxu1 %v863_v11  ;;  %v1075_v55 = vld [vmem:[%s1143_s2] ss:$0 sm:$0xff] }
  0x12   :  { %828 = vmatprep.subr.bf16.mxu1 %v866_v13 }
  0x13   :  { %749 = vmatpush3.bf16.msra.mxu0 %v865_v14 }
  0x14   :  { %750 = vmatprep.subr.bf16.mxu0 %v867_v15 }
  0x15   :  { %829 = vmatpush3.bf16.msra.mxu1 %v866_v13 }
  0x16   :  { %830 = vmatprep.subr.bf16.mxu1 %v869_v16 }
  0x17   :  { %751 = vmatpush3.bf16.msra.mxu0 %v868_v17 }
  0x18   :  { %752 = vmatprep.subr.bf16.mxu0 %v870_v18 }
  0x19   :  { %831 = vmatpush3.bf16.msra.mxu1 %v869_v16 }
  0x1a   :  { %832 = vmatprep.subr.bf16.mxu1 %v872_v20 }
  0x1b   :  { %753 = vmatpush3.bf16.msra.mxu0 %v871_v19 }
  0x1c   :  { %754 = vmatprep.subr.bf16.mxu0 %v873_v21 }
  0x1d   :  { %833 = vmatpush3.bf16.msra.mxu1 %v872_v20 }
  0x1e   :  { %834 = vmatprep.subr.bf16.mxu1 %v875_v22 }
  0x1f   :  { %755 = vmatpush3.bf16.msra.mxu0 %v874_v25 }
  0x21   :  { %835 = vmatpush3.bf16.msra.mxu1 %v875_v22 }
  0x22   :  { %436 = vmatmul.mubr.bf16.vlgmr.msra.gmra.mrb[0].mxu0 %v876_v26 }
  0x23   :  { %443 = vmatprep.mubr.bf16.mxu0 %v881_v27 }
  0x24   :  { %837 = vmatmul.mubr.bf16.vlgmr.msra.gmra.mrb[0].mxu1 %v880_v28 }
  0x25   :  { %840 = vmatprep.mubr.bf16.mxu1 %v887_v29 }
  0x2a   :  { %444 = vmatmul.mubr.bf16.gmra.mrb[4].mxu0 %v883_v30 }
  0x2b   :  { %451 = vmatprep.mubr.bf16.mxu0 %v884_v31 }
  0x2c   :  { %841 = vmatmul.mubr.bf16.gmra.mrb[4].mxu1 %v888_v32 }
  0x2d   :  { %844 = vmatprep.mubr.bf16.mxu1 %v895_v33 }
  0x32   :  { %452 = vmatmul.mubr.bf16.gmra.mrb[8].mxu0 %v886_v34 }
  0x33   :  { %459 = vmatprep.mubr.bf16.mxu0 %v889_v35 }
  0x34   :  { %845 = vmatmul.mubr.bf16.gmra.mrb[8].mxu1 %v896_v36 }
  0x35   :  { %848 = vmatprep.mubr.bf16.mxu1 %v903_v37 }
  0x3a   :  { %460 = vmatmul.mubr.bf16.gmra.mrb[12].mxu0 %v891_v38 }
  0x3b   :  { %467 = vmatprep.mubr.bf16.mxu0 %v892_v39 }
  0x3c   :  { %849 = vmatmul.mubr.bf16.gmra.mrb[12].mxu1 %v904_v40 }
  0x42   :  { %468 = vmatmul.mubr.bf16.gmra.mrb[16].mxu0 %v894_v41 }
  0x43   :  { %475 = vmatprep.mubr.bf16.mxu0 %v897_v42 }
  0x4a   :  { %476 = vmatmul.mubr.bf16.gmra.mrb[20].mxu0 %v899_v43 }
  0x4b   :  { %483 = vmatprep.mubr.bf16.mxu0 %v900_v44 }
  0x52   :  { %484 = vmatmul.mubr.bf16.gmra.mrb[24].mxu0 %v902_v45 }
  0x53   :  { %491 = vmatprep.mubr.bf16.mxu0 %v905_v46 }
  0x5a   :  { %492 = vmatmul.mubr.bf16.gmra.mrb[28].mxu0 %v907_v47 }
  0xf5   :  { %v756_v48 = vpop.f32.mrb[0].mxu0 }
  0xf6   :  { %v757_v49 = vpop.f32.mrb[1].mxu0 }
  0xf7   :  { %v758_v50 = vadd.f32 %v757_v49, %v756_v48  ;;  %v759_v51 = vpop.f32.mrb[2].mxu0  ;;  %v838_v52 = vpop.f32.mrb[0].mxu1 }
  0xf8   :  { %v760_v53 = vpop.f32.mrb[3].mxu0  ;;  %v534_v54 = vpop.f32.mrb[1].mxu1 }
  0xf9   :  { %v761_v56 = vadd.f32 %v760_v53, %v759_v51  ;;  %v535_v57 = vadd.f32 %v758_v50, %v534_v54  ;;  %v839_v58 = vpop.f32.mrb[2].mxu1 }
  0xfa   :  { %v537_v59 = vpop.f32.mrb[3].mxu1 }
  0xfb   :  { %v655_v60 = vadd.f32 %v1075_v55, %v535_v57  ;;  %v538_v61 = vadd.f32 %v761_v56, %v537_v59 }
  0xfd   :  { %671 = vst [vmem:[%s1144_s3] sm:$0xff] %v655_v60  ;;  %v656_v62 = vadd.f32 %v1075_v55, %v538_v61  ;;  %v762_v63 = vpop.f32.mrb[4].mxu0 }
  0xfe   :  { %v763_v0 = vpop.f32.mrb[5].mxu0 }
  0xff   :  { %672 = vst [vmem:[%s1144_s3 + $0x8] sm:$0xff] %v656_v62  ;;  %v764_v1 = vadd.f32 %v763_v0, %v762_v63  ;;  %v765_v2 = vpop.f32.mrb[6].mxu0  ;;  %v842_v3 = vpop.f32.mrb[4].mxu1 }
 0x100   :  { %v766_v4 = vpop.f32.mrb[7].mxu0  ;;  %v550_v5 = vpop.f32.mrb[5].mxu1 }
 0x101   :  { %v543_v6 = vadd.f32 %v838_v52, %v764_v1  ;;  %v767_v7 = vadd.f32 %v766_v4, %v765_v2  ;;  %v843_v8 = vpop.f32.mrb[6].mxu1 }
 0x102   :  { %v553_v9 = vpop.f32.mrb[7].mxu1 }
 0x103   :  { %v657_v10 = vadd.f32 %v1075_v55, %v543_v6  ;;  %v546_v11 = vadd.f32 %v839_v58, %v767_v7 }
 0x105   :  { %673 = vst [vmem:[%s1144_s3 + $0x10] sm:$0xff] %v657_v10  ;;  %v658_v12 = vadd.f32 %v1075_v55, %v546_v11  ;;  %v768_v13 = vpop.f32.mrb[8].mxu0 }
 0x106   :  { %v769_v14 = vpop.f32.mrb[9].mxu0 }
 0x107   :  { %674 = vst [vmem:[%s1144_s3 + $0x18] sm:$0xff] %v658_v12  ;;  %v770_v15 = vadd.f32 %v769_v14, %v768_v13  ;;  %v771_v16 = vpop.f32.mrb[10].mxu0  ;;  %v846_v17 = vpop.f32.mrb[8].mxu1 }
 0x108   :  { %v772_v18 = vpop.f32.mrb[11].mxu0  ;;  %v566_v19 = vpop.f32.mrb[9].mxu1 }
 0x109   :  { %v773_v20 = vadd.f32 %v772_v18, %v771_v16  ;;  %v551_v21 = vadd.f32 %v770_v15, %v550_v5  ;;  %v847_v22 = vpop.f32.mrb[10].mxu1 }
 0x10a   :  { %v569_v23 = vpop.f32.mrb[11].mxu1 }
 0x10b   :  { %v659_v24 = vadd.f32 %v1075_v55, %v551_v21  ;;  %v554_v25 = vadd.f32 %v773_v20, %v553_v9 }
 0x10d   :  { %675 = vst [vmem:[%s1144_s3 + $0x20] sm:$0xff] %v659_v24  ;;  %v660_v26 = vadd.f32 %v1075_v55, %v554_v25  ;;  %v774_v27 = vpop.f32.mrb[12].mxu0 }
 0x10e   :  { %v775_v28 = vpop.f32.mrb[13].mxu0 }
 0x10f   :  { %676 = vst [vmem:[%s1144_s3 + $0x28] sm:$0xff] %v660_v26  ;;  %v776_v29 = vadd.f32 %v775_v28, %v774_v27  ;;  %v777_v30 = vpop.f32.mrb[14].mxu0  ;;  %v850_v31 = vpop.f32.mrb[12].mxu1 }
 0x110   :  { %v778_v32 = vpop.f32.mrb[15].mxu0  ;;  %v582_v33 = vpop.f32.mrb[13].mxu1 }
 0x111   :  { %v559_v34 = vadd.f32 %v842_v3, %v776_v29  ;;  %v779_v35 = vadd.f32 %v778_v32, %v777_v30  ;;  %v851_v36 = vpop.f32.mrb[14].mxu1 }
 0x112   :  { %v585_v37 = vpop.f32.mrb[15].mxu1 }
 0x113   :  { %v661_v38 = vadd.f32 %v1075_v55, %v559_v34  ;;  %v562_v39 = vadd.f32 %v843_v8, %v779_v35 }
 0x115   :  { %677 = vst [vmem:[%s1144_s3 + $0x30] sm:$0xff] %v661_v38  ;;  %v662_v40 = vadd.f32 %v1075_v55, %v562_v39  ;;  %v780_v41 = vpop.f32.mrb[16].mxu0 }
 0x116   :  { %v781_v42 = vpop.f32.mrb[17].mxu0 }
 0x117   :  { %678 = vst [vmem:[%s1144_s3 + $0x38] sm:$0xff] %v662_v40  ;;  %v782_v43 = vadd.f32 %v781_v42, %v780_v41  ;;  %v783_v44 = vpop.f32.mrb[18].mxu0 }
 0x118   :  { %v784_v45 = vpop.f32.mrb[19].mxu0 }
 0x119   :  { %v785_v46 = vadd.f32 %v784_v45, %v783_v44  ;;  %v567_v47 = vadd.f32 %v782_v43, %v566_v19 }
 0x11b   :  { %v663_v48 = vadd.f32 %v1075_v55, %v567_v47  ;;  %v570_v49 = vadd.f32 %v785_v46, %v569_v23 }
 0x11d   :  { %679 = vst [vmem:[%s1144_s3 + $0x40] sm:$0xff] %v663_v48  ;;  %v664_v50 = vadd.f32 %v1075_v55, %v570_v49  ;;  %v786_v51 = vpop.f32.mrb[20].mxu0 }
 0x11e   :  { %v787_v52 = vpop.f32.mrb[21].mxu0 }
 0x11f   :  { %680 = vst [vmem:[%s1144_s3 + $0x48] sm:$0xff] %v664_v50  ;;  %v788_v53 = vadd.f32 %v787_v52, %v786_v51  ;;  %v789_v54 = vpop.f32.mrb[22].mxu0 }
 0x120   :  { %v790_v56 = vpop.f32.mrb[23].mxu0 }
 0x121   :  { %v575_v57 = vadd.f32 %v846_v17, %v788_v53  ;;  %v791_v58 = vadd.f32 %v790_v56, %v789_v54 }
 0x123   :  { %v665_v59 = vadd.f32 %v1075_v55, %v575_v57  ;;  %v578_v60 = vadd.f32 %v847_v22, %v791_v58 }
 0x125   :  { %681 = vst [vmem:[%s1144_s3 + $0x50] sm:$0xff] %v665_v59  ;;  %v666_v61 = vadd.f32 %v1075_v55, %v578_v60  ;;  %v792_v62 = vpop.f32.mrb[24].mxu0 }
 0x126   :  { %v793_v63 = vpop.f32.mrb[25].mxu0 }
 0x127   :  { %682 = vst [vmem:[%s1144_s3 + $0x58] sm:$0xff] %v666_v61  ;;  %v794_v0 = vadd.f32 %v793_v63, %v792_v62  ;;  %v795_v1 = vpop.f32.mrb[26].mxu0 }
 0x128   :  { %v796_v2 = vpop.f32.mrb[27].mxu0 }
 0x129   :  { %v797_v3 = vadd.f32 %v796_v2, %v795_v1  ;;  %v583_v4 = vadd.f32 %v794_v0, %v582_v33 }
 0x12b   :  { %v667_v5 = vadd.f32 %v1075_v55, %v583_v4  ;;  %v586_v6 = vadd.f32 %v797_v3, %v585_v37 }
 0x12d   :  { %683 = vst [vmem:[%s1144_s3 + $0x60] sm:$0xff] %v667_v5  ;;  %v668_v7 = vadd.f32 %v1075_v55, %v586_v6  ;;  %v798_v8 = vpop.f32.mrb[28].mxu0 }
 0x12e   :  { %v799_v9 = vpop.f32.mrb[29].mxu0 }
 0x12f   :  { %684 = vst [vmem:[%s1144_s3 + $0x68] sm:$0xff] %v668_v7  ;;  %v800_v10 = vadd.f32 %v799_v9, %v798_v8  ;;  %v801_v11 = vpop.f32.mrb[30].mxu0 }
 0x130   :  { %v802_v12 = vpop.f32.mrb[31].mxu0 }
 0x131   :  { %v591_v13 = vadd.f32 %v850_v31, %v800_v10  ;;  %v803_v14 = vadd.f32 %v802_v12, %v801_v11 }
 0x133   :  { %v669_v15 = vadd.f32 %v1075_v55, %v591_v13  ;;  %v594_v16 = vadd.f32 %v851_v36, %v803_v14 }
 0x135   :  { %685 = vst [vmem:[%s1144_s3 + $0x70] sm:$0xff] %v669_v15  ;;  %v670_v17 = vadd.f32 %v1075_v55, %v594_v16 }
 0x137   :  { %686 = vst [vmem:[%s1144_s3 + $0x78] sm:$0xff] %v670_v17 }

// kernel: encoder_forward.33
= control target key start
LH: loop header
LB: loop body
LE: loop exit
PB: predicated region body
PF: predicated region fallthrough
CT: control target
= control target key end

     0   :  { %s995_s18 = smov 0   ;;  %s1153_s0 = inlined_call_operand.vmem [shape: f32[2,64,64], index: 0, kind: input, shape index: {}]   ;;  %s1154_s1 = inlined_call_operand.vmem [shape: f32[1,64], index: 1, kind: input, shape index: {}]   ;;  %s1155_s2 = inlined_call_operand.vmem [shape: f32[1,64], index: 2, kind: input, shape index: {}]   ;;  %s1156_s3 = inlined_call_operand.vmem [shape: f32[64,32], index: 3, kind: input, shape index: {}]   ;;  %s1157_s4 = inlined_call_operand.vmem [shape: f32[32,64], index: 4, kind: input, shape index: {}]   ;;  %s1158_s5 = inlined_call_operand.vmem [shape: f32[2,64,64], index: 5, kind: output, shape index: {}]  }
   0x1 LB: > { %s766_s19 = sadd.s32 4294967295, %s960_s18   ;;  %p770_p0 = scmp.ge.s32.totalorder %s960_s18, 1  ;;  %s960_s18 = sphi %s995_s18, %s15_s18  }
   0x2   : > { %p187_p1 = scmp.lt.s32.totalorder %s960_s18, 3 }
   0x4   : > { %p188_p2 = pnand %p770_p0, %p187_p1 }
   0x5   : > { %v233_v0 = vld [vmem:[%s1156_s3] sm:$0xff] (!%p188_p2)  ;;  %v234_v1 = vld [vmem:[%s1156_s3 + $0x8] sm:$0xff] (!%p188_p2)  ;;  %v235_v2 = vld [vmem:[%s1156_s3 + $0x10] sm:$0xff] (!%p188_p2)  ;;  %v962_v3 = vmov (!%p188_p2), 0.0|0.0   ;;  %vm963_vm0 = vmmov (!%p188_p2), 0   ;;  %v964_v6 = vmov (!%p188_p2), 0.0   ;;  %v416_v52 = vlaneseq (!%p188_p2) }
   0x6   : > { %191 = sbr.rel (%p188_p2) target bundleno = 988 (0x3dc), region = 40  ;;  %873 = vmatprep.subr.bf16.mxu0 (!%p188_p2), %v962_v3  ;;  %v1013_v4 = vpack.c.bf16 (!%p188_p2), %v234_v1, %v233_v0  ;;  %v236_v5 = vld [vmem:[%s1156_s3 + $0x18] sm:$0xff] (!%p188_p2)  ;;  %829 = vmatprep.mubr.msk.f32.mxu0 (!%p188_p2), %vm963_vm0, %v964_v6  ;;  %p215_p3 = scmp.lt.s32.totalorder (!%p188_p2), %s766_s19, 1  ;;  %v241_v7 = vld [vmem:[%s1157_s4] sm:$0xff] (!%p188_p2)  ;;  %v242_v9 = vld [vmem:[%s1157_s4 + $0x8] sm:$0xff] (!%p188_p2)  ;;  %vm245_vm1 = vcmask (!%p188_p2), 523264  }
   0x7   : > { %885 = vmatprep.subr.bf16.mxu1 (!%p188_p2), %v962_v3  ;;  %840 = vmatprep.mubr.msk.f32.mxu1 (!%p188_p2), %vm963_vm0, %v964_v6  ;;  %v1027_v8 = vpack.c.bf16 (!%p188_p2), %v236_v5, %v235_v2  ;;  %v237_v10 = vld [vmem:[%s1156_s3 + $0x20] sm:$0xff] (!%p188_p2)  ;;  %v238_v11 = vld [vmem:[%s1156_s3 + $0x28] sm:$0xff] (!%p188_p2)  ;;  %v886_v12 = vpack.c.bf16 (!%p188_p2), %v242_v9, %v241_v7  ;;  %v239_v17 = vld [vmem:[%s1156_s3 + $0x30] sm:$0xff] (!%p188_p2)  ;;  %vm342_vm2 = vcmask (!%p188_p2), 261120   ;;  %v417_v53 = vshrl.u32 (!%p188_p2), %v416_v52, 7 }
   0x8   : > { %875 = vmatpush3.bf16.msra.mxu0 (!%p188_p2), %v1013_v4  ;;  %v880_v13 = vpack.c.bf16 (!%p188_p2), %v238_v11, %v237_v10  ;;  %v240_v18 = vld [vmem:[%s1156_s3 + $0x38] sm:$0xff] (!%p188_p2)  ;;  %v243_v46 = vld [vmem:[%s1157_s4 + $0x10] sm:$0xff] (!%p188_p2) }
   0x9   : > { %876 = vmatprep.subr.bf16.mxu0 (!%p188_p2), %v962_v3  ;;  %887 = vmatpush3.bf16.msra.mxu1 (!%p188_p2), %v886_v12  ;;  %v883_v26 = vpack.c.bf16 (!%p188_p2), %v240_v18, %v239_v17  ;;  %v244_v47 = vld [vmem:[%s1157_s4 + $0x18] sm:$0xff] (!%p188_p2)  ;;  %v418_v54 = vsub.s32 (!%p188_p2), 0, %v417_v53 }
   0xa   : > { %888 = vmatprep.subr.bf16.mxu1 (!%p188_p2), %v962_v3  ;;  %v889_v48 = vpack.c.bf16 (!%p188_p2), %v244_v47, %v243_v46 }
   0xc   : > { %878 = vmatpush3.bf16.msra.mxu0 (!%p188_p2), %v1027_v8 }
   0xd   : > { %s1160_s19 = smov (!%p215_p3, %s766_s19), 1  ;;  %879 = vmatprep.subr.bf16.mxu0 %v962_v3  ;;  %890 = vmatpush3.bf16.msra.mxu1 %v889_v48 }
   0xe   : > { %s783_s11 = sshll.u32 %s1160_s19, 6  ;;  %891 = vmatprep.subr.bf16.mxu1 %v962_v3 }
   0xf   : > { %s219_s14 = scalar_lea.vmem %s1153_s0, %s783_s11  ;;  %s224_s6 = scalar_lea.vmem %s1158_s5, %s783_s11 }
  0x10   : > { %v1048_v14 = vld [vmem:[%s219_s14] sm:$0xff]  ;;  %v1050_v15 = vld [vmem:[%s219_s14 + $0x8] sm:$0xff]  ;;  %v1052_v16 = vld [vmem:[%s219_s14 + $0x10] sm:$0xff]  ;;  %881 = vmatpush3.bf16.msra.mxu0 %v880_v13 }
  0x11   : > { %v1062_v19 = vld [vmem:[%s219_s14 + $0x18] sm:$0xff]  ;;  %v246_v20 = vsel %vm245_vm1, %v1048_v14, 0.0  ;;  %v247_v21 = vsel %vm245_vm1, %v1050_v15, 0.0  ;;  %v249_v22 = vsel %vm245_vm1, %v1052_v16, 0.0  ;;  %v229_v23 = vld [vmem:[%s219_s14 + $0x20] sm:$0xff]  ;;  %v230_v27 = vld [vmem:[%s219_s14 + $0x28] sm:$0xff]  ;;  %882 = vmatprep.subr.bf16.mxu0 %v962_v3 }
  0x12   : > { %v248_v24 = vadd.f32 %v247_v21, %v246_v20  ;;  %v251_v25 = vsel %vm245_vm1, %v1062_v19, 0.0  ;;  %v253_v29 = vsel %vm245_vm1, %v229_v23, 0.0  ;;  %v231_v30 = vld [vmem:[%s219_s14 + $0x30] sm:$0xff]  ;;  %v255_v32 = vsel %vm245_vm1, %v230_v27, 0.0  ;;  %v232_v33 = vld [vmem:[%s219_s14 + $0x38] sm:$0xff] }
  0x13   : > { %v257_v35 = vsel %vm245_vm1, %v231_v30, 0.0  ;;  %v259_v37 = vsel %vm245_vm1, %v232_v33, 0.0 }
  0x14   : > { %v250_v28 = vadd.f32 %v249_v22, %v248_v24  ;;  %884 = vmatpush3.bf16.msra.mxu0 %v883_v26 }
  0x15   : > { %903 = vmatprep.subr.bf16.mxu0 %v962_v3 }
  0x16   : > { %v252_v31 = vadd.f32 %v251_v25, %v250_v28 }
  0x18   : > { %v254_v34 = vadd.f32 %v253_v29, %v252_v31 }
  0x1a   : > { %v256_v36 = vadd.f32 %v255_v32, %v254_v34 }
  0x1c   : > { %v258_v38 = vadd.f32 %v257_v35, %v256_v36 }
  0x1e   : > { %v260_v39 = vadd.f32 %v259_v37, %v258_v38 }
  0x20   : > { %v261_v40 = vrot.slane %v260_v39, 4 }
  0x22   : > { %v262_v41 = vadd.f32 %v261_v40, %v260_v39  ;;  %v779_v39 = vld [vmem:[%s1154_s1] ss:$0 sm:$0xff] }
  0x24   : > { %v263_v42 = vrot.slane %v262_v41, 2 }
  0x26   : > { %v264_v43 = vadd.f32 %v263_v42, %v262_v41 }
  0x28   : > { %v265_v44 = vrot.slane %v264_v43, 1 }
  0x2a   : > { %v266_v45 = vadd.f32 %v265_v44, %v264_v43 }
  0x2c   : > { %830 = vmatmul.mubr.msk.f32.vlgmr.msra.gmra.mrb[0].mxu0 %vm245_vm1, %v266_v45 }
  0x2d   : > { %905 = vmatpush3.bf16.msra.mxu0 %v886_v12  ;;  %870 = vmatprep.mubr.msk.f32.mxu0 %vm963_vm0, %v964_v6 }
  0x2e   : > { %906 = vmatprep.subr.bf16.mxu0 %v962_v3 }
  0x31   : > { %908 = vmatpush3.bf16.msra.mxu0 %v889_v48  ;;  %v780_v48 = vld [vmem:[%s1155_s2] ss:$0 sm:$0xff] }
  0xff   : > { %v336_v49 = vpop.f32.mrb[0].mxu0 }
 0x100   : > { %v341_v50 = vmul.f32 0.0078125, %v336_v49  ;;  %v831_v51 = vpop.f32.mrb[1].mxu0 }
 0x102   : > { %841 = vmatmul.mubr.msk.f32.vlgmr.msra.gmra.mrb[0].mxu1 %vm342_vm2, %v341_v50 }
 0x103   : > { %893 = vmatpush3.bf16.msra.mxu1 %v1013_v4  ;;  %859 = vmatprep.mubr.msk.f32.mxu1 %vm963_vm0, %v964_v6 }
 0x104   : > { %894 = vmatprep.subr.bf16.mxu1 %v962_v3 }
 0x107   : > { %896 = vmatpush3.bf16.msra.mxu1 %v1027_v8 }
 0x108   : > { %897 = vmatprep.subr.bf16.mxu1 %v962_v3 }
 0x10b   : > { %899 = vmatpush3.bf16.msra.mxu1 %v880_v13 }
 0x10c   : > { %900 = vmatprep.subr.bf16.mxu1 %v962_v3 }
 0x10f   : > { %902 = vmatpush3.bf16.msra.mxu1 %v883_v26 }
 0x1d5   : > { %v412_v55 = vpop.f32.mrb[0].mxu1 }
 0x1d6   : > { %v419_v56 = vrot.slane %v412_v55, %v418_v54  ;;  %v842_v57 = vpop.f32.mrb[1].mxu1 }
 0x1d8   : > { %v420_v58 = vsub.f32 %v1048_v14, %v419_v56  ;;  %v421_v59 = vsub.f32 %v1050_v15, %v419_v56  ;;  %v422_v60 = vsub.f32 %v1052_v16, %v419_v56  ;;  %v423_v61 = vsub.f32 %v1062_v19, %v419_v56 }
 0x1d9   : > { %v424_v62 = vsub.f32 %v229_v23, %v419_v56  ;;  %v425_v2 = vsub.f32 %v230_v27, %v419_v56  ;;  %v426_v7 = vsub.f32 %v231_v30, %v419_v56  ;;  %v427_v11 = vsub.f32 %v232_v33, %v419_v56 }
 0x1da   : > { %v428_v63 = vmul.f32 %v420_v58, %v420_v58  ;;  %v429_v0 = vmul.f32 %v421_v59, %v421_v59  ;;  %v430_v1 = vmul.f32 %v422_v60, %v422_v60  ;;  %v431_v3 = vmul.f32 %v423_v61, %v423_v61 }
 0x1db   : > { %v432_v8 = vmul.f32 %v424_v62, %v424_v62  ;;  %v433_v12 = vmul.f32 %v425_v2, %v425_v2  ;;  %v434_v15 = vmul.f32 %v426_v7, %v426_v7  ;;  %v435_v18 = vmul.f32 %v427_v11, %v427_v11 }
 0x1dc   : > { %v436_v4 = vsel %vm245_vm1, %v428_v63, 0.0  ;;  %v437_v5 = vsel %vm245_vm1, %v429_v0, 0.0  ;;  %v439_v9 = vsel %vm245_vm1, %v430_v1, 0.0  ;;  %v441_v13 = vsel %vm245_vm1, %v431_v3, 0.0 }
 0x1dd   : > { %v438_v6 = vadd.f32 %v437_v5, %v436_v4  ;;  %v443_v16 = vsel %vm245_vm1, %v432_v8, 0.0  ;;  %v445_v19 = vsel %vm245_vm1, %v433_v12, 0.0  ;;  %v447_v21 = vsel %vm245_vm1, %v434_v15, 0.0 }
 0x1de   : > { %v449_v23 = vsel %vm245_vm1, %v435_v18, 0.0 }
 0x1df   : > { %v440_v10 = vadd.f32 %v439_v9, %v438_v6 }
 0x1e1   : > { %v442_v14 = vadd.f32 %v441_v13, %v440_v10 }
 0x1e3   : > { %v444_v17 = vadd.f32 %v443_v16, %v442_v14 }
 0x1e5   : > { %v446_v20 = vadd.f32 %v445_v19, %v444_v17 }
 0x1e7   : > { %v448_v22 = vadd.f32 %v447_v21, %v446_v20 }
 0x1e9   : > { %v450_v24 = vadd.f32 %v449_v23, %v448_v22 }
 0x1eb   : > { %v451_v25 = vrot.slane %v450_v24, 4 }
 0x1ed   : > { %v452_v26 = vadd.f32 %v451_v25, %v450_v24 }
 0x1ef   : > { %v453_v27 = vrot.slane %v452_v26, 2 }
 0x1f1   : > { %v454_v28 = vadd.f32 %v453_v27, %v452_v26 }
 0x1f3   : > { %v455_v29 = vrot.slane %v454_v28, 1 }
 0x1f5   : > { %v456_v30 = vadd.f32 %v455_v29, %v454_v28 }
 0x1f7   : > { %860 = vmatmul.mubr.msk.f32.vlgmr.msra.gmra.mrb[2].mxu1 %vm245_vm1, %v456_v30 }
 0x2ca   : > { %v526_v31 = vpop.f32.mrb[2].mxu1 }
 0x2cb   : > { %v530_v32 = vmul.f32 0.0078125, %v526_v31  ;;  %v861_v33 = vpop.f32.mrb[3].mxu1 }
 0x2cd   : > { %871 = vmatmul.mubr.msk.f32.vlgmr.msra.gmra.mrb[2].mxu0 %vm342_vm2, %v530_v32 }
 0x3a0   : > { %v600_v34 = vpop.f32.mrb[2].mxu0 }
 0x3a1   : > { %v601_v35 = vadd.f32 1e-06, %v600_v34  ;;  %v872_v36 = vpop.f32.mrb[3].mxu0 }
 0x3a3   : > { %920 = vrsqrt.f32 %v601_v35 }
 0x3ad   : > { %v921_v37 = vpop.eup %920 }
 0x3ae   : > { %v608_v38 = vrot.slane %v921_v37, %v418_v54 }
 0x3b0   : > { %v609_v40 = vmul.f32 %v608_v38, %v420_v58  ;;  %v610_v41 = vmul.f32 %v608_v38, %v421_v59  ;;  %v611_v42 = vmul.f32 %v608_v38, %v422_v60  ;;  %v612_v43 = vmul.f32 %v608_v38, %v423_v61 }
 0x3b1   : > { %v613_v44 = vmul.f32 %v608_v38, %v424_v62  ;;  %v614_v45 = vmul.f32 %v608_v38, %v425_v2  ;;  %v615_v46 = vmul.f32 %v608_v38, %v426_v7  ;;  %v616_v47 = vmul.f32 %v608_v38, %v427_v11 }
 0x3b2   : > { %v624_v49 = vmul.f32 %v779_v39, %v609_v40  ;;  %v625_v50 = vmul.f32 %v779_v39, %v610_v41  ;;  %v626_v51 = vmul.f32 %v779_v39, %v611_v42  ;;  %v627_v52 = vmul.f32 %v779_v39, %v612_v43 }
 0x3b3   : > { %v628_v53 = vmul.f32 %v779_v39, %v613_v44  ;;  %v629_v54 = vmul.f32 %v779_v39, %v614_v45  ;;  %v630_v55 = vmul.f32 %v779_v39, %v615_v46  ;;  %v631_v56 = vmul.f32 %v779_v39, %v616_v47 }
 0x3b4   : > { %v639_v57 = vadd.f32 %v780_v48, %v624_v49  ;;  %v640_v58 = vadd.f32 %v780_v48, %v625_v50  ;;  %v641_v59 = vadd.f32 %v780_v48, %v626_v51  ;;  %v1117_v60 = vadd.f32 %v780_v48, %v627_v52 }
 0x3b5   : > { %v1119_v61 = vadd.f32 %v780_v48, %v628_v53  ;;  %v1121_v62 = vadd.f32 %v780_v48, %v629_v54  ;;  %v1123_v63 = vadd.f32 %v780_v48, %v630_v55  ;;  %v1125_v0 = vadd.f32 %v780_v48, %v631_v56 }
 0x3b6   : > { %v647_v1 = vsub.f32 0.0, %v639_v57  ;;  %v648_v2 = vsub.f32 0.0, %v640_v58  ;;  %v649_v3 = vsub.f32 0.0, %v641_v59  ;;  %v650_v4 = vsub.f32 0.0, %v1117_v60 }
 0x3b7   : > { %v651_v5 = vsub.f32 0.0, %v1119_v61  ;;  %v652_v6 = vsub.f32 0.0, %v1121_v62  ;;  %v653_v7 = vsub.f32 0.0, %v1123_v63  ;;  %v654_v11 = vsub.f32 0.0, %v1125_v0 }
 0x3b8   : > { %v655_v8 = vmul.f32 1.442695, %v647_v1  ;;  %v657_v9 = vmul.f32 1.442695, %v648_v2  ;;  %v659_v10 = vmul.f32 1.442695, %v649_v3 }
 0x3b9   : > { %v661_v12 = vmul.f32 1.442695, %v650_v4  ;;  %v663_v13 = vmul.f32 1.442695, %v651_v5  ;;  %v665_v14 = vmul.f32 1.442695, %v652_v6 }
 0x3ba   : > { %922 = vpow2.f32 %v655_v8  ;;  %v667_v15 = vmul.f32 1.442695, %v653_v7  ;;  %v669_v16 = vmul.f32 1.442695, %v654_v11 }
 0x3bb   : > { %924 = vpow2.f32 %v657_v9 }
 0x3bc   : > { %926 = vpow2.f32 %v659_v10 }
 0x3bd   : > { %928 = vpow2.f32 %v661_v12 }
 0x3be   : > { %930 = vpow2.f32 %v663_v13 }
 0x3bf   : > { %932 = vpow2.f32 %v665_v14 }
 0x3c0   : > { %934 = vpow2.f32 %v667_v15 }
 0x3c1   : > { %936 = vpow2.f32 %v669_v16 }
 0x3c4   : > { %v923_v17 = vpop.eup %922 }
 0x3c5   : > { %v925_v18 = vpop.eup %924  ;;  %v671_v19 = vadd.f32 1.0, %v923_v17 }
 0x3c6   : > { %v927_v20 = vpop.eup %926  ;;  %v672_v21 = vadd.f32 1.0, %v925_v18 }
 0x3c7   : > { %v929_v22 = vpop.eup %928  ;;  %v673_v23 = vadd.f32 1.0, %v927_v20  ;;  %938 = vrcp.f32 %v671_v19 }
 0x3c8   : > { %v931_v24 = vpop.eup %930  ;;  %v674_v25 = vadd.f32 1.0, %v929_v22  ;;  %940 = vrcp.f32 %v672_v21 }
 0x3c9   : > { %v933_v26 = vpop.eup %932  ;;  %v675_v27 = vadd.f32 1.0, %v931_v24  ;;  %942 = vrcp.f32 %v673_v23 }
 0x3ca   : > { %v935_v28 = vpop.eup %934  ;;  %v676_v29 = vadd.f32 1.0, %v933_v26  ;;  %944 = vrcp.f32 %v674_v25 }
 0x3cb   : > { %v937_v30 = vpop.eup %936  ;;  %v677_v31 = vadd.f32 1.0, %v935_v28  ;;  %946 = vrcp.f32 %v675_v27 }
 0x3cc   : > { %v678_v32 = vadd.f32 1.0, %v937_v30  ;;  %948 = vrcp.f32 %v676_v29 }
 0x3cd   : > { %950 = vrcp.f32 %v677_v31 }
 0x3ce   : > { %952 = vrcp.f32 %v678_v32 }
 0x3d1   : > { %v939_v33 = vpop.eup %938 }
 0x3d2   : > { %v941_v34 = vpop.eup %940  ;;  %v695_v35 = vmul.f32 %v939_v33, %v639_v57 }
 0x3d3   : > { %v943_v36 = vpop.eup %942  ;;  %v696_v37 = vmul.f32 %v941_v34, %v640_v58 }
 0x3d4   : > { %v945_v38 = vpop.eup %944  ;;  %v697_v39 = vmul.f32 %v943_v36, %v641_v59  ;;  %703 = vst.msk [vmem:[%s224_s6] sm:$0xff] %vm245_vm1, %v695_v35 }
 0x3d5   : > { %v947_v40 = vpop.eup %946  ;;  %v698_v41 = vmul.f32 %v945_v38, %v1117_v60  ;;  %704 = vst.msk [vmem:[%s224_s6 + $0x8] sm:$0xff] %vm245_vm1, %v696_v37 }
 0x3d6   : > { %v949_v42 = vpop.eup %948  ;;  %v699_v43 = vmul.f32 %v947_v40, %v1119_v61  ;;  %705 = vst.msk [vmem:[%s224_s6 + $0x10] sm:$0xff] %vm245_vm1, %v697_v39 }
 0x3d7   : > { %v951_v44 = vpop.eup %950  ;;  %v700_v45 = vmul.f32 %v949_v42, %v1121_v62  ;;  %706 = vst.msk [vmem:[%s224_s6 + $0x18] sm:$0xff] %vm245_vm1, %v698_v41 }
 0x3d8   : > { %v953_v46 = vpop.eup %952  ;;  %v701_v47 = vmul.f32 %v951_v44, %v1123_v63  ;;  %707 = vst.msk [vmem:[%s224_s6 + $0x20] sm:$0xff] %vm245_vm1, %v699_v43 }
 0x3d9   : > { %v702_v48 = vmul.f32 %v953_v46, %v1125_v0  ;;  %708 = vst.msk [vmem:[%s224_s6 + $0x28] sm:$0xff] %vm245_vm1, %v700_v45 }
 0x3da   : > { %709 = vst.msk [vmem:[%s224_s6 + $0x30] sm:$0xff] %vm245_vm1, %v701_v47 }
 0x3db   : > { %710 = vst.msk [vmem:[%s224_s6 + $0x38] sm:$0xff] %vm245_vm1, %v702_v48 }
 0x3dc PF: > { %s15_s18 = sadd.s32 1, %s960_s18  }
 0x3dd   : > { %p12_p4 = scmp.ge.s32.totalorder %s15_s18, 4  }
 0x3df   :  { %14 = sbr.rel (!%p12_p4) target bundleno = 1 (0x1), region = 70 }

// kernel: encoder_forward.34
= control target key start
LH: loop header
LB: loop body
LE: loop exit
PB: predicated region body
PF: predicated region fallthrough
CT: control target
= control target key end

     0   :  { %s586_s1 = inlined_call_operand.vmem [shape: bf16[128,128], index: 1, kind: input, shape index: {}]   ;;  %s587_s0 = inlined_call_operand.vmem [shape: bf16[128,128], index: 0, kind: input, shape index: {}]   ;;  %s588_s2 = inlined_call_operand.vmem [shape: f32[1,128], index: 2, kind: input, shape index: {}]   ;;  %s589_s3 = inlined_call_operand.vmem [shape: f32[128,128], index: 3, kind: output, shape index: {}]  }
   0x1   :  { %v451_v0 = vld [vmem:[%s586_s1] sm:$0xff]   ;;  %v452_v1 = vld [vmem:[%s586_s1 + $0x8] sm:$0xff]   ;;  %v453_v2 = vld [vmem:[%s586_s1 + $0x10] sm:$0xff]  }
   0x2   :  { %403 = vmatprep.subr.bf16.mxu0 %v451_v0  ;;  %435 = vmatprep.subr.bf16.mxu1 %v451_v0  ;;  %v454_v3 = vld [vmem:[%s586_s1 + $0x18] sm:$0xff]   ;;  %v459_v4 = vld [vmem:[%s587_s0] sm:$0xff]   ;;  %v456_v7 = vld [vmem:[%s586_s1 + $0x28] sm:$0xff]  }
   0x3   :  { %404 = vmatpush3.bf16.msra.mxu0 %v451_v0  ;;  %443 = vmatpush3.bf16.msra.mxu1 %v451_v0  ;;  %v460_v5 = vld [vmem:[%s587_s0 + $0x20] sm:$0xff]   ;;  %v457_v8 = vld [vmem:[%s586_s1 + $0x30] sm:$0xff]   ;;  %v458_v9 = vld [vmem:[%s586_s1 + $0x38] sm:$0xff]  }
   0x4   :  { %405 = vmatprep.subr.bf16.mxu0 %v452_v1  ;;  %436 = vmatprep.subr.bf16.mxu1 %v452_v1  ;;  %v455_v6 = vld [vmem:[%s586_s1 + $0x20] sm:$0xff]   ;;  %v461_v10 = vld [vmem:[%s587_s0 + $0x8] sm:$0xff]   ;;  %v463_v12 = vld [vmem:[%s587_s0 + $0x10] sm:$0xff]  }
   0x5   :  { %419 = vmatprep.mubr.bf16.mxu0 %v459_v4  ;;  %427 = vmatprep.mubr.bf16.mxu1 %v460_v5  ;;  %v462_v11 = vld [vmem:[%s587_s0 + $0x28] sm:$0xff]   ;;  %v464_v13 = vld [vmem:[%s587_s0 + $0x30] sm:$0xff]   ;;  %v465_v14 = vld [vmem:[%s587_s0 + $0x18] sm:$0xff]  }
   0x6   :  { %v466_v15 = vld [vmem:[%s587_s0 + $0x38] sm:$0xff]   ;;  %v386_v16 = vld [vmem:[%s588_s2] ss:$0 sm:$0xff] }
   0x7   :  { %406 = vmatpush3.bf16.msra.mxu0 %v452_v1  ;;  %444 = vmatpush3.bf16.msra.mxu1 %v452_v1 }
   0x8   :  { %407 = vmatprep.subr.bf16.mxu0 %v453_v2  ;;  %437 = vmatprep.subr.bf16.mxu1 %v453_v2 }
   0xb   :  { %408 = vmatpush3.bf16.msra.mxu0 %v453_v2  ;;  %445 = vmatpush3.bf16.msra.mxu1 %v453_v2 }
   0xc   :  { %409 = vmatprep.subr.bf16.mxu0 %v454_v3  ;;  %438 = vmatprep.subr.bf16.mxu1 %v454_v3 }
   0xf   :  { %410 = vmatpush3.bf16.msra.mxu0 %v454_v3  ;;  %446 = vmatpush3.bf16.msra.mxu1 %v454_v3 }
  0x10   :  { %411 = vmatprep.subr.bf16.mxu0 %v455_v6  ;;  %439 = vmatprep.subr.bf16.mxu1 %v455_v6 }
  0x13   :  { %412 = vmatpush3.bf16.msra.mxu0 %v455_v6  ;;  %447 = vmatpush3.bf16.msra.mxu1 %v455_v6 }
  0x14   :  { %413 = vmatprep.subr.bf16.mxu0 %v456_v7  ;;  %440 = vmatprep.subr.bf16.mxu1 %v456_v7 }
  0x17   :  { %414 = vmatpush3.bf16.msra.mxu0 %v456_v7  ;;  %448 = vmatpush3.bf16.msra.mxu1 %v456_v7 }
  0x18   :  { %415 = vmatprep.subr.bf16.mxu0 %v457_v8  ;;  %441 = vmatprep.subr.bf16.mxu1 %v457_v8 }
  0x1b   :  { %416 = vmatpush3.bf16.msra.mxu0 %v457_v8  ;;  %449 = vmatpush3.bf16.msra.mxu1 %v457_v8 }
  0x1c   :  { %417 = vmatprep.subr.bf16.mxu0 %v458_v9  ;;  %442 = vmatprep.subr.bf16.mxu1 %v458_v9 }
  0x1f   :  { %418 = vmatpush3.bf16.msra.mxu0 %v458_v9  ;;  %450 = vmatpush3.bf16.msra.mxu1 %v458_v9 }
  0x22   :  { %420 = vmatmul.mubr.bf16.vlgmr.msra.gmra.mrb[0].mxu0 %v461_v10  ;;  %428 = vmatmul.mubr.bf16.vlgmr.msra.gmra.mrb[0].mxu1 %v462_v11 }
  0x23   :  { %423 = vmatprep.mubr.bf16.mxu0 %v463_v12  ;;  %431 = vmatprep.mubr.bf16.mxu1 %v464_v13 }
  0x2a   :  { %424 = vmatmul.mubr.bf16.gmra.mrb[4].mxu0 %v465_v14  ;;  %432 = vmatmul.mubr.bf16.gmra.mrb[4].mxu1 %v466_v15 }
  0xf5   :  { %v421_v17 = vpop.f32.mrb[0].mxu0  ;;  %v429_v18 = vpop.f32.mrb[0].mxu1 }
  0xf6   :  { %v336_v19 = vadd.f32 %v421_v17, %v386_v16  ;;  %v344_v20 = vadd.f32 %v429_v18, %v386_v16  ;;  %v213_v21 = vpop.f32.mrb[1].mxu0  ;;  %v245_v22 = vpop.f32.mrb[1].mxu1 }
  0xf7   :  { %v334_v23 = vadd.f32 %v386_v16, %v213_v21  ;;  %v342_v24 = vadd.f32 %v386_v16, %v245_v22  ;;  %v422_v25 = vpop.f32.mrb[2].mxu0  ;;  %v430_v26 = vpop.f32.mrb[2].mxu1 }
  0xf8   :  { %352 = vst [vmem:[%s589_s3 + $0x10] sm:$0xff] %v336_v19  ;;  %360 = vst [vmem:[%s589_s3 + $0x50] sm:$0xff] %v344_v20  ;;  %v337_v27 = vadd.f32 %v422_v25, %v386_v16  ;;  %v345_v28 = vadd.f32 %v430_v26, %v386_v16  ;;  %v216_v29 = vpop.f32.mrb[3].mxu0  ;;  %v248_v30 = vpop.f32.mrb[3].mxu1 }
  0xf9   :  { %350 = vst [vmem:[%s589_s3] sm:$0xff] %v334_v23  ;;  %358 = vst [vmem:[%s589_s3 + $0x40] sm:$0xff] %v342_v24  ;;  %v335_v31 = vadd.f32 %v386_v16, %v216_v29  ;;  %v343_v32 = vadd.f32 %v386_v16, %v248_v30 }
  0xfa   :  { %353 = vst [vmem:[%s589_s3 + $0x18] sm:$0xff] %v337_v27  ;;  %361 = vst [vmem:[%s589_s3 + $0x58] sm:$0xff] %v345_v28 }
  0xfb   :  { %351 = vst [vmem:[%s589_s3 + $0x8] sm:$0xff] %v335_v31  ;;  %359 = vst [vmem:[%s589_s3 + $0x48] sm:$0xff] %v343_v32 }
  0xfd   :  { %v425_v33 = vpop.f32.mrb[4].mxu0  ;;  %v433_v34 = vpop.f32.mrb[4].mxu1 }
  0xfe   :  { %v340_v35 = vadd.f32 %v425_v33, %v386_v16  ;;  %v348_v36 = vadd.f32 %v433_v34, %v386_v16  ;;  %v229_v37 = vpop.f32.mrb[5].mxu0  ;;  %v261_v38 = vpop.f32.mrb[5].mxu1 }
  0xff   :  { %v338_v39 = vadd.f32 %v386_v16, %v229_v37  ;;  %v346_v40 = vadd.f32 %v386_v16, %v261_v38  ;;  %v426_v41 = vpop.f32.mrb[6].mxu0  ;;  %v434_v42 = vpop.f32.mrb[6].mxu1 }
 0x100   :  { %356 = vst [vmem:[%s589_s3 + $0x30] sm:$0xff] %v340_v35  ;;  %364 = vst [vmem:[%s589_s3 + $0x70] sm:$0xff] %v348_v36  ;;  %v341_v43 = vadd.f32 %v426_v41, %v386_v16  ;;  %v349_v44 = vadd.f32 %v434_v42, %v386_v16  ;;  %v232_v45 = vpop.f32.mrb[7].mxu0  ;;  %v264_v46 = vpop.f32.mrb[7].mxu1 }
 0x101   :  { %354 = vst [vmem:[%s589_s3 + $0x20] sm:$0xff] %v338_v39  ;;  %362 = vst [vmem:[%s589_s3 + $0x60] sm:$0xff] %v346_v40  ;;  %v339_v47 = vadd.f32 %v386_v16, %v232_v45  ;;  %v347_v48 = vadd.f32 %v386_v16, %v264_v46 }
 0x102   :  { %357 = vst [vmem:[%s589_s3 + $0x38] sm:$0xff] %v341_v43  ;;  %365 = vst [vmem:[%s589_s3 + $0x78] sm:$0xff] %v349_v44 }
 0x103   :  { %355 = vst [vmem:[%s589_s3 + $0x28] sm:$0xff] %v339_v47  ;;  %363 = vst [vmem:[%s589_s3 + $0x68] sm:$0xff] %v347_v48 }

// kernel: encoder_forward.40
= control target key start
LH: loop header
LB: loop body
LE: loop exit
PB: predicated region body
PF: predicated region fallthrough
CT: control target
= control target key end

     0   :  { %s907_s18 = smov 0   ;;  %s1045_s0 = inlined_call_operand.vmem [shape: f32[2,64,64], index: 0, kind: input, shape index: {}]   ;;  %s1046_s1 = inlined_call_operand.vmem [shape: f32[1,64], index: 1, kind: input, shape index: {}]   ;;  %s1047_s2 = inlined_call_operand.vmem [shape: f32[1,64], index: 2, kind: input, shape index: {}]   ;;  %s1048_s3 = inlined_call_operand.vmem [shape: f32[64,32], index: 3, kind: input, shape index: {}]   ;;  %s1049_s4 = inlined_call_operand.vmem [shape: f32[32,64], index: 4, kind: input, shape index: {}]   ;;  %s1050_s5 = inlined_call_operand.vmem [shape: f32[2,64,64], index: 5, kind: output, shape index: {}]  }
   0x1 LB: > { %s710_s19 = sadd.s32 4294967295, %s872_s18   ;;  %p714_p0 = scmp.ge.s32.totalorder %s872_s18, 1  ;;  %s872_s18 = sphi %s907_s18, %s15_s18  }
   0x2   : > { %p187_p1 = scmp.lt.s32.totalorder %s872_s18, 3 }
   0x4   : > { %p188_p2 = pnand %p714_p0, %p187_p1 }
   0x5   : > { %v233_v0 = vld [vmem:[%s1048_s3] sm:$0xff] (!%p188_p2)  ;;  %v234_v1 = vld [vmem:[%s1048_s3 + $0x8] sm:$0xff] (!%p188_p2)  ;;  %v235_v2 = vld [vmem:[%s1048_s3 + $0x10] sm:$0xff] (!%p188_p2)  ;;  %v874_v3 = vmov (!%p188_p2), 0.0|0.0   ;;  %vm875_vm0 = vmmov (!%p188_p2), 0   ;;  %v876_v6 = vmov (!%p188_p2), 0.0   ;;  %v416_v52 = vlaneseq (!%p188_p2) }
   0x6   : > { %191 = sbr.rel (%p188_p2) target bundleno = 954 (0x3ba), region = 40  ;;  %817 = vmatprep.subr.bf16.mxu0 (!%p188_p2), %v874_v3  ;;  %v925_v4 = vpack.c.bf16 (!%p188_p2), %v234_v1, %v233_v0  ;;  %v236_v5 = vld [vmem:[%s1048_s3 + $0x18] sm:$0xff] (!%p188_p2)  ;;  %773 = vmatprep.mubr.msk.f32.mxu0 (!%p188_p2), %vm875_vm0, %v876_v6  ;;  %p215_p3 = scmp.lt.s32.totalorder (!%p188_p2), %s710_s19, 1  ;;  %v241_v7 = vld [vmem:[%s1049_s4] sm:$0xff] (!%p188_p2)  ;;  %v242_v9 = vld [vmem:[%s1049_s4 + $0x8] sm:$0xff] (!%p188_p2)  ;;  %vm245_vm1 = vcmask (!%p188_p2), 523264  }
   0x7   : > { %829 = vmatprep.subr.bf16.mxu1 (!%p188_p2), %v874_v3  ;;  %784 = vmatprep.mubr.msk.f32.mxu1 (!%p188_p2), %vm875_vm0, %v876_v6  ;;  %v939_v8 = vpack.c.bf16 (!%p188_p2), %v236_v5, %v235_v2  ;;  %v237_v10 = vld [vmem:[%s1048_s3 + $0x20] sm:$0xff] (!%p188_p2)  ;;  %v238_v11 = vld [vmem:[%s1048_s3 + $0x28] sm:$0xff] (!%p188_p2)  ;;  %v830_v12 = vpack.c.bf16 (!%p188_p2), %v242_v9, %v241_v7  ;;  %v239_v17 = vld [vmem:[%s1048_s3 + $0x30] sm:$0xff] (!%p188_p2)  ;;  %vm342_vm2 = vcmask (!%p188_p2), 261120   ;;  %v417_v53 = vshrl.u32 (!%p188_p2), %v416_v52, 7 }
   0x8   : > { %819 = vmatpush3.bf16.msra.mxu0 (!%p188_p2), %v925_v4  ;;  %v824_v13 = vpack.c.bf16 (!%p188_p2), %v238_v11, %v237_v10  ;;  %v240_v18 = vld [vmem:[%s1048_s3 + $0x38] sm:$0xff] (!%p188_p2)  ;;  %v243_v46 = vld [vmem:[%s1049_s4 + $0x10] sm:$0xff] (!%p188_p2) }
   0x9   : > { %820 = vmatprep.subr.bf16.mxu0 (!%p188_p2), %v874_v3  ;;  %831 = vmatpush3.bf16.msra.mxu1 (!%p188_p2), %v830_v12  ;;  %v827_v26 = vpack.c.bf16 (!%p188_p2), %v240_v18, %v239_v17  ;;  %v244_v47 = vld [vmem:[%s1049_s4 + $0x18] sm:$0xff] (!%p188_p2)  ;;  %v418_v54 = vsub.s32 (!%p188_p2), 0, %v417_v53 }
   0xa   : > { %832 = vmatprep.subr.bf16.mxu1 (!%p188_p2), %v874_v3  ;;  %v833_v48 = vpack.c.bf16 (!%p188_p2), %v244_v47, %v243_v46 }
   0xc   : > { %822 = vmatpush3.bf16.msra.mxu0 (!%p188_p2), %v939_v8 }
   0xd   : > { %s1052_s19 = smov (!%p215_p3, %s710_s19), 1  ;;  %823 = vmatprep.subr.bf16.mxu0 %v874_v3  ;;  %834 = vmatpush3.bf16.msra.mxu1 %v833_v48 }
   0xe   : > { %s727_s11 = sshll.u32 %s1052_s19, 6  ;;  %835 = vmatprep.subr.bf16.mxu1 %v874_v3 }
   0xf   : > { %s219_s14 = scalar_lea.vmem %s1045_s0, %s727_s11  ;;  %s224_s6 = scalar_lea.vmem %s1050_s5, %s727_s11 }
  0x10   : > { %v960_v14 = vld [vmem:[%s219_s14] sm:$0xff]  ;;  %v962_v15 = vld [vmem:[%s219_s14 + $0x8] sm:$0xff]  ;;  %v964_v16 = vld [vmem:[%s219_s14 + $0x10] sm:$0xff]  ;;  %825 = vmatpush3.bf16.msra.mxu0 %v824_v13 }
  0x11   : > { %v974_v19 = vld [vmem:[%s219_s14 + $0x18] sm:$0xff]  ;;  %v246_v20 = vsel %vm245_vm1, %v960_v14, 0.0  ;;  %v247_v21 = vsel %vm245_vm1, %v962_v15, 0.0  ;;  %v249_v22 = vsel %vm245_vm1, %v964_v16, 0.0  ;;  %v229_v23 = vld [vmem:[%s219_s14 + $0x20] sm:$0xff]  ;;  %v230_v27 = vld [vmem:[%s219_s14 + $0x28] sm:$0xff]  ;;  %826 = vmatprep.subr.bf16.mxu0 %v874_v3 }
  0x12   : > { %v248_v24 = vadd.f32 %v247_v21, %v246_v20  ;;  %v251_v25 = vsel %vm245_vm1, %v974_v19, 0.0  ;;  %v253_v29 = vsel %vm245_vm1, %v229_v23, 0.0  ;;  %v231_v30 = vld [vmem:[%s219_s14 + $0x30] sm:$0xff]  ;;  %v255_v32 = vsel %vm245_vm1, %v230_v27, 0.0  ;;  %v232_v33 = vld [vmem:[%s219_s14 + $0x38] sm:$0xff] }
  0x13   : > { %v257_v35 = vsel %vm245_vm1, %v231_v30, 0.0  ;;  %v259_v37 = vsel %vm245_vm1, %v232_v33, 0.0 }
  0x14   : > { %v250_v28 = vadd.f32 %v249_v22, %v248_v24  ;;  %828 = vmatpush3.bf16.msra.mxu0 %v827_v26 }
  0x15   : > { %847 = vmatprep.subr.bf16.mxu0 %v874_v3 }
  0x16   : > { %v252_v31 = vadd.f32 %v251_v25, %v250_v28 }
  0x18   : > { %v254_v34 = vadd.f32 %v253_v29, %v252_v31 }
  0x1a   : > { %v256_v36 = vadd.f32 %v255_v32, %v254_v34 }
  0x1c   : > { %v258_v38 = vadd.f32 %v257_v35, %v256_v36 }
  0x1e   : > { %v260_v39 = vadd.f32 %v259_v37, %v258_v38 }
  0x20   : > { %v261_v40 = vrot.slane %v260_v39, 4 }
  0x22   : > { %v262_v41 = vadd.f32 %v261_v40, %v260_v39  ;;  %v723_v39 = vld [vmem:[%s1046_s1] ss:$0 sm:$0xff] }
  0x24   : > { %v263_v42 = vrot.slane %v262_v41, 2 }
  0x26   : > { %v264_v43 = vadd.f32 %v263_v42, %v262_v41 }
  0x28   : > { %v265_v44 = vrot.slane %v264_v43, 1 }
  0x2a   : > { %v266_v45 = vadd.f32 %v265_v44, %v264_v43 }
  0x2c   : > { %774 = vmatmul.mubr.msk.f32.vlgmr.msra.gmra.mrb[0].mxu0 %vm245_vm1, %v266_v45 }
  0x2d   : > { %849 = vmatpush3.bf16.msra.mxu0 %v830_v12  ;;  %814 = vmatprep.mubr.msk.f32.mxu0 %vm875_vm0, %v876_v6 }
  0x2e   : > { %850 = vmatprep.subr.bf16.mxu0 %v874_v3 }
  0x31   : > { %852 = vmatpush3.bf16.msra.mxu0 %v833_v48  ;;  %v724_v48 = vld [vmem:[%s1047_s2] ss:$0 sm:$0xff] }
  0xff   : > { %v336_v49 = vpop.f32.mrb[0].mxu0 }
 0x100   : > { %v341_v50 = vmul.f32 0.0078125, %v336_v49  ;;  %v775_v51 = vpop.f32.mrb[1].mxu0 }
 0x102   : > { %785 = vmatmul.mubr.msk.f32.vlgmr.msra.gmra.mrb[0].mxu1 %vm342_vm2, %v341_v50 }
 0x103   : > { %837 = vmatpush3.bf16.msra.mxu1 %v925_v4  ;;  %803 = vmatprep.mubr.msk.f32.mxu1 %vm875_vm0, %v876_v6 }
 0x104   : > { %838 = vmatprep.subr.bf16.mxu1 %v874_v3 }
 0x107   : > { %840 = vmatpush3.bf16.msra.mxu1 %v939_v8 }
 0x108   : > { %841 = vmatprep.subr.bf16.mxu1 %v874_v3 }
 0x10b   : > { %843 = vmatpush3.bf16.msra.mxu1 %v824_v13 }
 0x10c   : > { %844 = vmatprep.subr.bf16.mxu1 %v874_v3 }
 0x10f   : > { %846 = vmatpush3.bf16.msra.mxu1 %v827_v26 }
 0x1d5   : > { %v412_v55 = vpop.f32.mrb[0].mxu1 }
 0x1d6   : > { %v419_v56 = vrot.slane %v412_v55, %v418_v54  ;;  %v786_v57 = vpop.f32.mrb[1].mxu1 }
 0x1d8   : > { %v420_v58 = vsub.f32 %v960_v14, %v419_v56  ;;  %v421_v59 = vsub.f32 %v962_v15, %v419_v56  ;;  %v422_v60 = vsub.f32 %v964_v16, %v419_v56  ;;  %v423_v61 = vsub.f32 %v974_v19, %v419_v56 }
 0x1d9   : > { %v424_v62 = vsub.f32 %v229_v23, %v419_v56  ;;  %v425_v2 = vsub.f32 %v230_v27, %v419_v56  ;;  %v426_v7 = vsub.f32 %v231_v30, %v419_v56  ;;  %v427_v11 = vsub.f32 %v232_v33, %v419_v56 }
 0x1da   : > { %v428_v63 = vmul.f32 %v420_v58, %v420_v58  ;;  %v429_v0 = vmul.f32 %v421_v59, %v421_v59  ;;  %v430_v1 = vmul.f32 %v422_v60, %v422_v60  ;;  %v431_v3 = vmul.f32 %v423_v61, %v423_v61 }
 0x1db   : > { %v432_v8 = vmul.f32 %v424_v62, %v424_v62  ;;  %v433_v12 = vmul.f32 %v425_v2, %v425_v2  ;;  %v434_v15 = vmul.f32 %v426_v7, %v426_v7  ;;  %v435_v18 = vmul.f32 %v427_v11, %v427_v11 }
 0x1dc   : > { %v436_v4 = vsel %vm245_vm1, %v428_v63, 0.0  ;;  %v437_v5 = vsel %vm245_vm1, %v429_v0, 0.0  ;;  %v439_v9 = vsel %vm245_vm1, %v430_v1, 0.0  ;;  %v441_v13 = vsel %vm245_vm1, %v431_v3, 0.0 }
 0x1dd   : > { %v438_v6 = vadd.f32 %v437_v5, %v436_v4  ;;  %v443_v16 = vsel %vm245_vm1, %v432_v8, 0.0  ;;  %v445_v19 = vsel %vm245_vm1, %v433_v12, 0.0  ;;  %v447_v21 = vsel %vm245_vm1, %v434_v15, 0.0 }
 0x1de   : > { %v449_v23 = vsel %vm245_vm1, %v435_v18, 0.0 }
 0x1df   : > { %v440_v10 = vadd.f32 %v439_v9, %v438_v6 }
 0x1e1   : > { %v442_v14 = vadd.f32 %v441_v13, %v440_v10 }
 0x1e3   : > { %v444_v17 = vadd.f32 %v443_v16, %v442_v14 }
 0x1e5   : > { %v446_v20 = vadd.f32 %v445_v19, %v444_v17 }
 0x1e7   : > { %v448_v22 = vadd.f32 %v447_v21, %v446_v20 }
 0x1e9   : > { %v450_v24 = vadd.f32 %v449_v23, %v448_v22 }
 0x1eb   : > { %v451_v25 = vrot.slane %v450_v24, 4 }
 0x1ed   : > { %v452_v26 = vadd.f32 %v451_v25, %v450_v24 }
 0x1ef   : > { %v453_v27 = vrot.slane %v452_v26, 2 }
 0x1f1   : > { %v454_v28 = vadd.f32 %v453_v27, %v452_v26 }
 0x1f3   : > { %v455_v29 = vrot.slane %v454_v28, 1 }
 0x1f5   : > { %v456_v30 = vadd.f32 %v455_v29, %v454_v28 }
 0x1f7   : > { %804 = vmatmul.mubr.msk.f32.vlgmr.msra.gmra.mrb[2].mxu1 %vm245_vm1, %v456_v30 }
 0x2ca   : > { %v526_v31 = vpop.f32.mrb[2].mxu1 }
 0x2cb   : > { %v530_v32 = vmul.f32 0.0078125, %v526_v31  ;;  %v805_v33 = vpop.f32.mrb[3].mxu1 }
 0x2cd   : > { %815 = vmatmul.mubr.msk.f32.vlgmr.msra.gmra.mrb[2].mxu0 %vm342_vm2, %v530_v32 }
 0x3a0   : > { %v600_v34 = vpop.f32.mrb[2].mxu0 }
 0x3a1   : > { %v601_v35 = vadd.f32 1e-06, %v600_v34  ;;  %v816_v36 = vpop.f32.mrb[3].mxu0 }
 0x3a3   : > { %864 = vrsqrt.f32 %v601_v35 }
 0x3ad   : > { %v865_v37 = vpop.eup %864 }
 0x3ae   : > { %v608_v38 = vrot.slane %v865_v37, %v418_v54 }
 0x3b0   : > { %v609_v40 = vmul.f32 %v608_v38, %v420_v58  ;;  %v610_v41 = vmul.f32 %v608_v38, %v421_v59  ;;  %v611_v42 = vmul.f32 %v608_v38, %v422_v60  ;;  %v612_v43 = vmul.f32 %v608_v38, %v423_v61 }
 0x3b1   : > { %v613_v44 = vmul.f32 %v608_v38, %v424_v62  ;;  %v614_v45 = vmul.f32 %v608_v38, %v425_v2  ;;  %v615_v46 = vmul.f32 %v608_v38, %v426_v7  ;;  %v616_v47 = vmul.f32 %v608_v38, %v427_v11 }
 0x3b2   : > { %v624_v49 = vmul.f32 %v723_v39, %v609_v40  ;;  %v625_v50 = vmul.f32 %v723_v39, %v610_v41  ;;  %v626_v51 = vmul.f32 %v723_v39, %v611_v42  ;;  %v627_v52 = vmul.f32 %v723_v39, %v612_v43 }
 0x3b3   : > { %v628_v53 = vmul.f32 %v723_v39, %v613_v44  ;;  %v629_v54 = vmul.f32 %v723_v39, %v614_v45  ;;  %v630_v55 = vmul.f32 %v723_v39, %v615_v46  ;;  %v631_v56 = vmul.f32 %v723_v39, %v616_v47 }
 0x3b4   : > { %v639_v57 = vadd.f32 %v724_v48, %v624_v49  ;;  %v640_v58 = vadd.f32 %v724_v48, %v625_v50  ;;  %v641_v59 = vadd.f32 %v724_v48, %v626_v51  ;;  %v642_v60 = vadd.f32 %v724_v48, %v627_v52 }
 0x3b5   : > { %v643_v61 = vadd.f32 %v724_v48, %v628_v53  ;;  %v644_v62 = vadd.f32 %v724_v48, %v629_v54  ;;  %v645_v63 = vadd.f32 %v724_v48, %v630_v55  ;;  %v646_v0 = vadd.f32 %v724_v48, %v631_v56 }
 0x3b6   : > { %647 = vst.msk [vmem:[%s224_s6] sm:$0xff] %vm245_vm1, %v639_v57  ;;  %648 = vst.msk [vmem:[%s224_s6 + $0x8] sm:$0xff] %vm245_vm1, %v640_v58 }
 0x3b7   : > { %649 = vst.msk [vmem:[%s224_s6 + $0x10] sm:$0xff] %vm245_vm1, %v641_v59  ;;  %650 = vst.msk [vmem:[%s224_s6 + $0x18] sm:$0xff] %vm245_vm1, %v642_v60 }
 0x3b8   : > { %651 = vst.msk [vmem:[%s224_s6 + $0x20] sm:$0xff] %vm245_vm1, %v643_v61  ;;  %652 = vst.msk [vmem:[%s224_s6 + $0x28] sm:$0xff] %vm245_vm1, %v644_v62 }
 0x3b9   : > { %653 = vst.msk [vmem:[%s224_s6 + $0x30] sm:$0xff] %vm245_vm1, %v645_v63  ;;  %654 = vst.msk [vmem:[%s224_s6 + $0x38] sm:$0xff] %vm245_vm1, %v646_v0 }
 0x3ba PF: > { %s15_s18 = sadd.s32 1, %s872_s18  }
 0x3bb   : > { %p12_p4 = scmp.ge.s32.totalorder %s15_s18, 4  }
 0x3bd   :  { %14 = sbr.rel (!%p12_p4) target bundleno = 1 (0x1), region = 70 }

// kernel: encoder_forward.35
= control target key start
LH: loop header
LB: loop body
LE: loop exit
PB: predicated region body
PF: predicated region fallthrough
CT: control target
= control target key end

     0   :  { %s1147_s15 = smov 0   ;;  %s1149_s16 = smov 0   ;;  %s1369_s0 = inlined_call_operand.vmem [shape: bf16[128,640], index: 0, kind: input, shape index: {}]   ;;  %s1370_s1 = inlined_call_operand.vmem [shape: bf16[640,128], index: 1, kind: input, shape index: {}]   ;;  %s1371_s2 = inlined_call_operand.vmem [shape: f32[1,128], index: 2, kind: input, shape index: {}]   ;;  %s1372_s3 = inlined_call_operand.vmem [shape: f32[128,128], index: 3, kind: input, shape index: {}]   ;;  %s1373_s4 = inlined_call_operand.vmem [shape: f32[128,128], index: 4, kind: output, shape index: {}]  }
   0x1   :  { %s1151_s17 = smov 0   ;;  %s1153_s18 = smov 0  }
   0x2   :  { %s1155_s19 = smov 0  }
   0x3 LB: > { %s26_s20 = sadd.s32 1, %s1115_s18  ;;  %p49_p1 = scmp.ne.s32.totalorder %s1107_s16, %s1103_s15  ;;  %s1119_s19 = sphi %s1155_s19, %s14_s19   ;;  %s1115_s18 = sphi %s1153_s18, %s1377_s18   ;;  %s1111_s17 = sphi %s1151_s17, %s1376_s17   ;;  %s1107_s16 = sphi %s1149_s16, %s1375_s16   ;;  %s1103_s15 = sphi %s1147_s15, %s1374_s15  }
   0x4   : > { %p27_p0 = scmp.ge.s32.totalorder %s26_s20, 5  ;;  %p50_p2 = scmp.eq.s32.totalorder %s1119_s19, 0 }
   0x5   : > { %s42_s22 = sadd.s32 1, %s1107_s16  ;;  %p930_p5 = scmp.ge.s32.totalorder %s1119_s19, 5 }
   0x6   : > { %s1379_s20 = smov (%p27_p0, %s26_s20), 0  ;;  %p51_p3 = por %p50_p2, %p49_p1 }
   0x7   : > { %s38_s21 = ssub.s32 %s1115_s18, %s1379_s20  ;;  %203 = sbr.rel (%p930_p5) target bundleno = 28 (0x1c), region = 24 }
   0x8   : > { %p40_p4 = scmp.eq.s32.totalorder %s38_s21, 0 }
   0xa   : > { %s1182_s23 = scalar_select %p40_p4, %s1107_s16, %s42_s22  }
   0xe   : > { %206 = sbr.rel (!%p51_p3) target bundleno = 28 (0x1c), region = 28  ;;  %s208_s24 = sand.u32 (%p51_p3), 1, %s1107_s16  }
   0xf   : > { %s932_s25 = sshll.u32 (%p51_p3), %s1115_s18, 2  ;;  %s931_s26 = sshll.u32 (%p51_p3), %s208_s24, 6 }
  0x10   : > { %s1190_s29 = scalar_lea.vmem (%p51_p3), %s1369_s0, %s932_s25  ;;  %s210_s30 = scalar_lea.vmem (%p51_p3), [#allocation3], %s931_s26 }
  0x11   : > { %v231_v0 = vld [vmem:[%s1190_s29] sm:$0xf] (%p51_p3)  ;;  %v233_v1 = vld [vmem:[%s1190_s29 + $0x14] sm:$0xf] (%p51_p3)  ;;  %v235_v2 = vld [vmem:[%s1190_s29 + $0x28] sm:$0xf] (%p51_p3) }
  0x12   : > { %232 = vst [vmem:[%s210_s30] sm:$0xf] (%p51_p3), %v231_v0  ;;  %234 = vst [vmem:[%s210_s30 + $0x4] sm:$0xf] (%p51_p3), %v233_v1  ;;  %v237_v3 = vld [vmem:[%s1190_s29 + $0x3c] sm:$0xf] (%p51_p3) }
  0x13   : > { %v239_v4 = vld [vmem:[%s1190_s29 + $0x50] sm:$0xf] (%p51_p3)  ;;  %236 = vst [vmem:[%s210_s30 + $0x8] sm:$0xf] (%p51_p3), %v235_v2  ;;  %238 = vst [vmem:[%s210_s30 + $0xc] sm:$0xf] (%p51_p3), %v237_v3 }
  0x14   : > { %240 = vst [vmem:[%s210_s30 + $0x10] sm:$0xf] (%p51_p3), %v239_v4  ;;  %v241_v5 = vld [vmem:[%s1190_s29 + $0x64] sm:$0xf] (%p51_p3)  ;;  %v243_v6 = vld [vmem:[%s1190_s29 + $0x78] sm:$0xf] (%p51_p3) }
  0x15   : > { %v245_v7 = vld [vmem:[%s1190_s29 + $0x8c] sm:$0xf]  ;;  %242 = vst [vmem:[%s210_s30 + $0x14] sm:$0xf] %v241_v5  ;;  %244 = vst [vmem:[%s210_s30 + $0x18] sm:$0xf] %v243_v6 }
  0x16   : > { %246 = vst [vmem:[%s210_s30 + $0x1c] sm:$0xf] %v245_v7  ;;  %v247_v8 = vld [vmem:[%s1190_s29 + $0xa0] sm:$0xf]  ;;  %v249_v9 = vld [vmem:[%s1190_s29 + $0xb4] sm:$0xf] }
  0x17   : > { %v251_v10 = vld [vmem:[%s1190_s29 + $0xc8] sm:$0xf]  ;;  %248 = vst [vmem:[%s210_s30 + $0x20] sm:$0xf] %v247_v8  ;;  %250 = vst [vmem:[%s210_s30 + $0x24] sm:$0xf] %v249_v9 }
  0x18   : > { %252 = vst [vmem:[%s210_s30 + $0x28] sm:$0xf] %v251_v10  ;;  %v253_v11 = vld [vmem:[%s1190_s29 + $0xdc] sm:$0xf]  ;;  %v255_v12 = vld [vmem:[%s1190_s29 + $0xf0] sm:$0xf] }
  0x19   : > { %v257_v13 = vld [vmem:[%s1190_s29 + $0x104] sm:$0xf]  ;;  %254 = vst [vmem:[%s210_s30 + $0x2c] sm:$0xf] %v253_v11  ;;  %256 = vst [vmem:[%s210_s30 + $0x30] sm:$0xf] %v255_v12 }
  0x1a   : > { %258 = vst [vmem:[%s210_s30 + $0x34] sm:$0xf] %v257_v13  ;;  %v259_v14 = vld [vmem:[%s1190_s29 + $0x118] sm:$0xf]  ;;  %v261_v15 = vld [vmem:[%s1190_s29 + $0x12c] sm:$0xf] }
  0x1b   : > { %260 = vst [vmem:[%s210_s30 + $0x38] sm:$0xf] %v259_v14  ;;  %262 = vst [vmem:[%s210_s30 + $0x3c] sm:$0xf] %v261_v15 }
  0x1c PF: > { %p933_p6 = scmp.ge.s32.totalorder %s1119_s19, 1  ;;  %p328_p7 = scmp.lt.s32.totalorder %s1119_s19, 6 }
  0x1e   : > { %p329_p8 = pnand %p933_p6, %p328_p7 }
  0x1f   : > { %s335_s5 = sand.u32 (!%p329_p8), 1, %s1103_s15   ;;  %s935_s6 = sshll.u32 (!%p329_p8), %s1111_s17, 4 }
  0x20   : > { %332 = sbr.rel (%p329_p8) target bundleno = 321 (0x141), region = 73  ;;  %s934_s7 = sshll.u32 (!%p329_p8), %s335_s5, 6 }
  0x21   : > { %p384_p9 = scmp.lt.s32.totalorder (!%p329_p8), %s935_s6, 79  ;;  %s1217_s12 = scalar_lea.vmem (!%p329_p8), [#allocation3], %s934_s7 }
  0x22   : > { %p937_p10 = scmp.ne.s32.totalorder (!%p329_p8), %s1111_s17, 0 }
  0x27   : > { %s1381_s6 = smov (!%p384_p9, %s935_s6), 79  ;;  %417 = sbr.rel (%p937_p10) target bundleno = 49 (0x31), region = 81 }
  0x28   : > { %s936_s8 = sshll.u32 %s1381_s6, 2  ;;  %v1121_v16 = vmov (!%p937_p10), 0.0  }
  0x29   : > { %s1215_s11 = scalar_lea.vmem %s1370_s1, %s936_s8  ;;  %418 = vst [vmem:[#allocation2] sm:$0xff] (!%p937_p10), %v1121_v16  ;;  %419 = vst [vmem:[#allocation2 + $0x8] sm:$0xff] (!%p937_p10), %v1121_v16 }
  0x2a   : > { %420 = vst [vmem:[#allocation2 + $0x10] sm:$0xff] (!%p937_p10), %v1121_v16  ;;  %421 = vst [vmem:[#allocation2 + $0x18] sm:$0xff] (!%p937_p10), %v1121_v16 }
  0x2b   : > { %422 = vst [vmem:[#allocation2 + $0x20] sm:$0xff] (!%p937_p10), %v1121_v16  ;;  %423 = vst [vmem:[#allocation2 + $0x28] sm:$0xff] (!%p937_p10), %v1121_v16 }
  0x2c   : > { %424 = vst [vmem:[#allocation2 + $0x30] sm:$0xff] (!%p937_p10), %v1121_v16  ;;  %425 = vst [vmem:[#allocation2 + $0x38] sm:$0xff] (!%p937_p10), %v1121_v16 }
  0x2d   : > { %426 = vst [vmem:[#allocation2 + $0x40] sm:$0xff] (!%p937_p10), %v1121_v16  ;;  %427 = vst [vmem:[#allocation2 + $0x48] sm:$0xff] (!%p937_p10), %v1121_v16 }
  0x2e   : > { %428 = vst [vmem:[#allocation2 + $0x50] sm:$0xff] %v1121_v16  ;;  %429 = vst [vmem:[#allocation2 + $0x58] sm:$0xff] %v1121_v16 }
  0x2f   : > { %430 = vst [vmem:[#allocation2 + $0x60] sm:$0xff] %v1121_v16  ;;  %431 = vst [vmem:[#allocation2 + $0x68] sm:$0xff] %v1121_v16 }
  0x30   : > { %432 = vst [vmem:[#allocation2 + $0x70] sm:$0xff] %v1121_v16  ;;  %433 = vst [vmem:[#allocation2 + $0x78] sm:$0xff] %v1121_v16 }
  0x31 PF: > { %v1065_v17 = vld [vmem:[%s1215_s11] sm:$0xff]   ;;  %v1066_v18 = vld [vmem:[%s1215_s11 + $0x8] sm:$0xff]   ;;  %v1067_v19 = vld [vmem:[%s1215_s11 + $0x10] sm:$0xff]   ;;  %p954_p11 = scmp.ne.s32.totalorder %s1111_s17, 4 }
  0x32   : > { %976 = vmatprep.subr.bf16.mxu0 %v1065_v17  ;;  %1008 = vmatprep.subr.bf16.mxu1 %v1065_v17  ;;  %v1068_v20 = vld [vmem:[%s1215_s11 + $0x18] sm:$0xff]   ;;  %v1073_v21 = vld [vmem:[%s1217_s12] sm:$0xff]   ;;  %v1070_v24 = vld [vmem:[%s1215_s11 + $0x28] sm:$0xff]  }
  0x33   : > { %977 = vmatpush3.bf16.msra.mxu0 %v1065_v17  ;;  %1016 = vmatpush3.bf16.msra.mxu1 %v1065_v17  ;;  %v1074_v22 = vld [vmem:[%s1217_s12 + $0x20] sm:$0xff]   ;;  %v1071_v25 = vld [vmem:[%s1215_s11 + $0x30] sm:$0xff]   ;;  %v1072_v26 = vld [vmem:[%s1215_s11 + $0x38] sm:$0xff]  }
  0x34   : > { %978 = vmatprep.subr.bf16.mxu0 %v1066_v18  ;;  %1009 = vmatprep.subr.bf16.mxu1 %v1066_v18  ;;  %v1069_v23 = vld [vmem:[%s1215_s11 + $0x20] sm:$0xff]   ;;  %v1075_v27 = vld [vmem:[%s1217_s12 + $0x8] sm:$0xff]   ;;  %v1077_v29 = vld [vmem:[%s1217_s12 + $0x10] sm:$0xff]  }
  0x35   : > { %992 = vmatprep.mubr.bf16.mxu0 %v1073_v21  ;;  %1000 = vmatprep.mubr.bf16.mxu1 %v1074_v22  ;;  %v1076_v28 = vld [vmem:[%s1217_s12 + $0x28] sm:$0xff]   ;;  %v1078_v30 = vld [vmem:[%s1217_s12 + $0x30] sm:$0xff]   ;;  %v1079_v31 = vld [vmem:[%s1217_s12 + $0x18] sm:$0xff]  }
  0x36   : > { %v1080_v32 = vld [vmem:[%s1217_s12 + $0x38] sm:$0xff]   ;;  %v436_v33 = vld [vmem:[#allocation2 + $0x10] sm:$0xff]  ;;  %v434_v35 = vld [vmem:[#allocation2] sm:$0xff] }
  0x37   : > { %979 = vmatpush3.bf16.msra.mxu0 %v1066_v18  ;;  %1017 = vmatpush3.bf16.msra.mxu1 %v1066_v18  ;;  %v444_v34 = vld [vmem:[#allocation2 + $0x50] sm:$0xff]  ;;  %v442_v36 = vld [vmem:[#allocation2 + $0x40] sm:$0xff]  ;;  %v437_v39 = vld [vmem:[#allocation2 + $0x18] sm:$0xff] }
  0x38   : > { %980 = vmatprep.subr.bf16.mxu0 %v1067_v19  ;;  %1010 = vmatprep.subr.bf16.mxu1 %v1067_v19  ;;  %v445_v40 = vld [vmem:[#allocation2 + $0x58] sm:$0xff]  ;;  %v435_v45 = vld [vmem:[#allocation2 + $0x8] sm:$0xff]  ;;  %v440_v57 = vld [vmem:[#allocation2 + $0x30] sm:$0xff] }
  0x39   : > { %v443_v46 = vld [vmem:[#allocation2 + $0x48] sm:$0xff]  ;;  %v448_v58 = vld [vmem:[#allocation2 + $0x70] sm:$0xff]  ;;  %v438_v59 = vld [vmem:[#allocation2 + $0x20] sm:$0xff] }
  0x3a   : > { %v446_v60 = vld [vmem:[#allocation2 + $0x60] sm:$0xff]  ;;  %v441_v63 = vld [vmem:[#allocation2 + $0x38] sm:$0xff]  ;;  %v439_v5 = vld [vmem:[#allocation2 + $0x28] sm:$0xff] }
  0x3b   : > { %981 = vmatpush3.bf16.msra.mxu0 %v1067_v19  ;;  %1018 = vmatpush3.bf16.msra.mxu1 %v1067_v19  ;;  %v449_v0 = vld [vmem:[#allocation2 + $0x78] sm:$0xff]  ;;  %v447_v6 = vld [vmem:[#allocation2 + $0x68] sm:$0xff]  ;;  %v1240_v18 = vld [vmem:[%s1371_s2] ss:$0 sm:$0xff] (!%p954_p11) }
  0x3c   : > { %982 = vmatprep.subr.bf16.mxu0 %v1068_v20  ;;  %1011 = vmatprep.subr.bf16.mxu1 %v1068_v20  ;;  %v750_v19 = vld [vmem:[%s1372_s3] sm:$0xff] (!%p954_p11)  ;;  %v751_v22 = vld [vmem:[%s1372_s3 + $0x8] sm:$0xff] (!%p954_p11) }
  0x3f   : > { %983 = vmatpush3.bf16.msra.mxu0 %v1068_v20  ;;  %1019 = vmatpush3.bf16.msra.mxu1 %v1068_v20 }
  0x40   : > { %984 = vmatprep.subr.bf16.mxu0 %v1069_v23  ;;  %1012 = vmatprep.subr.bf16.mxu1 %v1069_v23 }
  0x43   : > { %985 = vmatpush3.bf16.msra.mxu0 %v1069_v23  ;;  %1020 = vmatpush3.bf16.msra.mxu1 %v1069_v23 }
  0x44   : > { %986 = vmatprep.subr.bf16.mxu0 %v1070_v24  ;;  %1013 = vmatprep.subr.bf16.mxu1 %v1070_v24 }
  0x47   : > { %987 = vmatpush3.bf16.msra.mxu0 %v1070_v24  ;;  %1021 = vmatpush3.bf16.msra.mxu1 %v1070_v24 }
  0x48   : > { %988 = vmatprep.subr.bf16.mxu0 %v1071_v25  ;;  %1014 = vmatprep.subr.bf16.mxu1 %v1071_v25 }
  0x4b   : > { %989 = vmatpush3.bf16.msra.mxu0 %v1071_v25  ;;  %1022 = vmatpush3.bf16.msra.mxu1 %v1071_v25 }
  0x4c   : > { %990 = vmatprep.subr.bf16.mxu0 %v1072_v26  ;;  %1015 = vmatprep.subr.bf16.mxu1 %v1072_v26 }
  0x4f   : > { %991 = vmatpush3.bf16.msra.mxu0 %v1072_v26  ;;  %1023 = vmatpush3.bf16.msra.mxu1 %v1072_v26  ;;  %v752_v26 = vld [vmem:[%s1372_s3 + $0x10] sm:$0xff] (!%p954_p11) }
  0x52   : > { %993 = vmatmul.mubr.bf16.vlgmr.msra.gmra.mrb[0].mxu0 %v1075_v27  ;;  %1001 = vmatmul.mubr.bf16.vlgmr.msra.gmra.mrb[0].mxu1 %v1076_v28  ;;  %v753_v28 = vld [vmem:[%s1372_s3 + $0x18] sm:$0xff] (!%p954_p11) }
  0x53   : > { %996 = vmatprep.mubr.bf16.mxu0 %v1077_v29  ;;  %1004 = vmatprep.mubr.bf16.mxu1 %v1078_v30 }
  0x5a   : > { %997 = vmatmul.mubr.bf16.gmra.mrb[4].mxu0 %v1079_v31  ;;  %1005 = vmatmul.mubr.bf16.gmra.mrb[4].mxu1 %v1080_v32  ;;  %v754_v32 = vld [vmem:[%s1372_s3 + $0x20] sm:$0xff] (!%p954_p11) }
 0x125   : > { %v994_v37 = vpop.f32.mrb[0].mxu0  ;;  %v1002_v38 = vpop.f32.mrb[0].mxu1 }
 0x126   : > { %v677_v41 = vadd.f32 %v994_v37, %v436_v33  ;;  %v685_v42 = vadd.f32 %v1002_v38, %v444_v34  ;;  %v612_v43 = vpop.f32.mrb[1].mxu0  ;;  %v644_v44 = vpop.f32.mrb[1].mxu1  ;;  %v755_v38 = vld [vmem:[%s1372_s3 + $0x28] sm:$0xff] (!%p954_p11) }
 0x127   : > { %v675_v47 = vadd.f32 %v612_v43, %v434_v35  ;;  %v683_v48 = vadd.f32 %v644_v44, %v442_v36  ;;  %v995_v49 = vpop.f32.mrb[2].mxu0  ;;  %v1003_v50 = vpop.f32.mrb[2].mxu1  ;;  %v757_v44 = vld [vmem:[%s1372_s3 + $0x38] sm:$0xff] (!%p954_p11) }
 0x128   : > { %693 = vst [vmem:[#allocation2 + $0x10] sm:$0xff] %v677_v41  ;;  %701 = vst [vmem:[#allocation2 + $0x50] sm:$0xff] %v685_v42  ;;  %v678_v51 = vadd.f32 %v995_v49, %v437_v39  ;;  %v686_v52 = vadd.f32 %v1003_v50, %v445_v40  ;;  %v615_v53 = vpop.f32.mrb[3].mxu0  ;;  %v647_v54 = vpop.f32.mrb[3].mxu1  ;;  %v756_v40 = vld [vmem:[%s1372_s3 + $0x30] sm:$0xff] (!%p954_p11)  ;;  %v758_v50 = vld [vmem:[%s1372_s3 + $0x40] sm:$0xff] (!%p954_p11) }
 0x129   : > { %691 = vst [vmem:[#allocation2] sm:$0xff] %v675_v47  ;;  %699 = vst [vmem:[#allocation2 + $0x40] sm:$0xff] %v683_v48  ;;  %v676_v55 = vadd.f32 %v615_v53, %v435_v45  ;;  %v684_v56 = vadd.f32 %v647_v54, %v443_v46 }
 0x12a   : > { %694 = vst [vmem:[#allocation2 + $0x18] sm:$0xff] %v678_v51  ;;  %702 = vst [vmem:[#allocation2 + $0x58] sm:$0xff] %v686_v52  ;;  %v759_v52 = vld [vmem:[%s1372_s3 + $0x48] sm:$0xff] (!%p954_p11) }
 0x12b   : > { %692 = vst [vmem:[#allocation2 + $0x8] sm:$0xff] %v676_v55  ;;  %700 = vst [vmem:[#allocation2 + $0x48] sm:$0xff] %v684_v56  ;;  %v760_v56 = vld [vmem:[%s1372_s3 + $0x50] sm:$0xff] (!%p954_p11) }
 0x12d   : > { %v998_v61 = vpop.f32.mrb[4].mxu0  ;;  %v1006_v62 = vpop.f32.mrb[4].mxu1  ;;  %710 = sbr.rel (%p954_p11) target bundleno = 321 (0x141), region = 85 }
 0x12e   : > { %v681_v1 = vadd.f32 %v998_v61, %v440_v57  ;;  %v689_v2 = vadd.f32 %v1006_v62, %v448_v58  ;;  %v628_v3 = vpop.f32.mrb[5].mxu0  ;;  %v660_v4 = vpop.f32.mrb[5].mxu1  ;;  %v761_v62 = vld [vmem:[%s1372_s3 + $0x58] sm:$0xff] (!%p954_p11) }
 0x12f   : > { %v679_v7 = vadd.f32 %v628_v3, %v438_v59  ;;  %v687_v8 = vadd.f32 %v660_v4, %v446_v60  ;;  %v999_v9 = vpop.f32.mrb[6].mxu0  ;;  %v1007_v10 = vpop.f32.mrb[6].mxu1  ;;  %v713_v23 = vld [vmem:[#allocation2 + $0x10] sm:$0xff] (!%p954_p11)  ;;  %v763_v4 = vld [vmem:[%s1372_s3 + $0x68] sm:$0xff] (!%p954_p11) }
 0x130   : > { %697 = vst [vmem:[#allocation2 + $0x30] sm:$0xff] %v681_v1  ;;  %705 = vst [vmem:[#allocation2 + $0x70] sm:$0xff] %v689_v2  ;;  %v682_v11 = vadd.f32 %v999_v9, %v441_v63  ;;  %v690_v12 = vadd.f32 %v1007_v10, %v449_v0  ;;  %v631_v13 = vpop.f32.mrb[7].mxu0  ;;  %v663_v14 = vpop.f32.mrb[7].mxu1  ;;  %v711_v17 = vld [vmem:[#allocation2] sm:$0xff] (!%p954_p11)  ;;  %v736_v25 = vadd.f32 (!%p954_p11), %v1240_v18, %v713_v23  ;;  %v721_v55 = vld [vmem:[#allocation2 + $0x50] sm:$0xff] (!%p954_p11) }
 0x131   : > { %695 = vst [vmem:[#allocation2 + $0x20] sm:$0xff] %v679_v7  ;;  %703 = vst [vmem:[#allocation2 + $0x60] sm:$0xff] %v687_v8  ;;  %v680_v15 = vadd.f32 %v631_v13, %v439_v5  ;;  %v688_v16 = vadd.f32 %v663_v14, %v447_v6  ;;  %v734_v20 = vadd.f32 (!%p954_p11), %v1240_v18, %v711_v17  ;;  %v714_v27 = vld [vmem:[#allocation2 + $0x18] sm:$0xff] (!%p954_p11)  ;;  %v719_v45 = vld [vmem:[#allocation2 + $0x40] sm:$0xff] (!%p954_p11) }
 0x132   : > { %698 = vst [vmem:[#allocation2 + $0x38] sm:$0xff] %v682_v11  ;;  %706 = vst [vmem:[#allocation2 + $0x78] sm:$0xff] %v690_v12  ;;  %v712_v21 = vld [vmem:[#allocation2 + $0x8] sm:$0xff] (!%p954_p11)  ;;  %v737_v30 = vadd.f32 (!%p954_p11), %v1240_v18, %v714_v27  ;;  %v768_v35 = vadd.f32 (!%p954_p11), %v752_v26, %v736_v25  ;;  %v742_v49 = vadd.f32 (!%p954_p11), %v1240_v18, %v719_v45  ;;  %v722_v57 = vld [vmem:[#allocation2 + $0x58] sm:$0xff] (!%p954_p11) }
 0x133   : > { %696 = vst [vmem:[#allocation2 + $0x28] sm:$0xff] %v680_v15  ;;  %704 = vst [vmem:[#allocation2 + $0x68] sm:$0xff] %v688_v16  ;;  %v735_v24 = vadd.f32 (!%p954_p11), %v1240_v18, %v712_v21  ;;  %v766_v29 = vadd.f32 (!%p954_p11), %v750_v19, %v734_v20  ;;  %v720_v51 = vld [vmem:[#allocation2 + $0x48] sm:$0xff] (!%p954_p11)  ;;  %v744_v60 = vadd.f32 (!%p954_p11), %v1240_v18, %v721_v55  ;;  %v762_v0 = vld [vmem:[%s1372_s3 + $0x60] sm:$0xff] (!%p954_p11) }
 0x134   : > { %v769_v41 = vadd.f32 %v753_v28, %v737_v30  ;;  %784 = vst [vmem:[%s1373_s4 + $0x10] sm:$0xff] %v768_v35  ;;  %v743_v54 = vadd.f32 %v1240_v18, %v720_v51  ;;  %v774_v59 = vadd.f32 %v758_v50, %v742_v49  ;;  %v745_v61 = vadd.f32 %v1240_v18, %v722_v57  ;;  %v764_v10 = vld [vmem:[%s1372_s3 + $0x70] sm:$0xff]  ;;  %v765_v12 = vld [vmem:[%s1372_s3 + $0x78] sm:$0xff] }
 0x135   : > { %v767_v34 = vadd.f32 %v751_v22, %v735_v24  ;;  %782 = vst [vmem:[%s1373_s4] sm:$0xff] %v766_v29  ;;  %v776_v6 = vadd.f32 %v760_v56, %v744_v60 }
 0x136   : > { %785 = vst [vmem:[%s1373_s4 + $0x18] sm:$0xff] %v769_v41  ;;  %v775_v1 = vadd.f32 %v759_v52, %v743_v54  ;;  %790 = vst [vmem:[%s1373_s4 + $0x40] sm:$0xff] %v774_v59  ;;  %v777_v7 = vadd.f32 %v761_v62, %v745_v61 }
 0x137   : > { %v717_v39 = vld [vmem:[#allocation2 + $0x30] sm:$0xff]  ;;  %783 = vst [vmem:[%s1373_s4 + $0x8] sm:$0xff] %v767_v34  ;;  %792 = vst [vmem:[%s1373_s4 + $0x50] sm:$0xff] %v776_v6 }
 0x138   : > { %v715_v31 = vld [vmem:[#allocation2 + $0x20] sm:$0xff]  ;;  %v740_v42 = vadd.f32 %v1240_v18, %v717_v39  ;;  %v725_v5 = vld [vmem:[#allocation2 + $0x70] sm:$0xff]  ;;  %791 = vst [vmem:[%s1373_s4 + $0x48] sm:$0xff] %v775_v1  ;;  %793 = vst [vmem:[%s1373_s4 + $0x58] sm:$0xff] %v777_v7 }
 0x139   : > { %v738_v36 = vadd.f32 %v1240_v18, %v715_v31  ;;  %v718_v43 = vld [vmem:[#allocation2 + $0x38] sm:$0xff]  ;;  %v723_v63 = vld [vmem:[#allocation2 + $0x60] sm:$0xff]  ;;  %v748_v9 = vadd.f32 %v1240_v18, %v725_v5 }
 0x13a   : > { %v716_v33 = vld [vmem:[#allocation2 + $0x28] sm:$0xff]  ;;  %v741_v48 = vadd.f32 %v1240_v18, %v718_v43  ;;  %v772_v53 = vadd.f32 %v756_v40, %v740_v42  ;;  %v746_v2 = vadd.f32 %v1240_v18, %v723_v63  ;;  %v726_v11 = vld [vmem:[#allocation2 + $0x78] sm:$0xff] }
 0x13b   : > { %v739_v37 = vadd.f32 %v1240_v18, %v716_v33  ;;  %v770_v46 = vadd.f32 %v754_v32, %v738_v36  ;;  %v724_v3 = vld [vmem:[#allocation2 + $0x68] sm:$0xff]  ;;  %v749_v14 = vadd.f32 %v1240_v18, %v726_v11  ;;  %v780_v16 = vadd.f32 %v764_v10, %v748_v9 }
 0x13c   : > { %v773_v58 = vadd.f32 %v757_v44, %v741_v48  ;;  %788 = vst [vmem:[%s1373_s4 + $0x30] sm:$0xff] %v772_v53  ;;  %v747_v8 = vadd.f32 %v1240_v18, %v724_v3  ;;  %v778_v13 = vadd.f32 %v762_v0, %v746_v2 }
 0x13d   : > { %v771_v47 = vadd.f32 %v755_v38, %v739_v37  ;;  %786 = vst [vmem:[%s1373_s4 + $0x20] sm:$0xff] %v770_v46  ;;  %v781_v17 = vadd.f32 %v765_v12, %v749_v14  ;;  %796 = vst [vmem:[%s1373_s4 + $0x70] sm:$0xff] %v780_v16 }
 0x13e   : > { %789 = vst [vmem:[%s1373_s4 + $0x38] sm:$0xff] %v773_v58  ;;  %v779_v15 = vadd.f32 %v763_v4, %v747_v8  ;;  %794 = vst [vmem:[%s1373_s4 + $0x60] sm:$0xff] %v778_v13 }
 0x13f   : > { %787 = vst [vmem:[%s1373_s4 + $0x28] sm:$0xff] %v771_v47  ;;  %797 = vst [vmem:[%s1373_s4 + $0x78] sm:$0xff] %v781_v17 }
 0x140   : > { %795 = vst [vmem:[%s1373_s4 + $0x68] sm:$0xff] %v779_v15 }
 0x141 PF: > { %s14_s19 = sadd.s32 1, %s1119_s19   ;;  %s1374_s15 = smov %s1107_s16 }
 0x142   : > { %p11_p12 = scmp.ge.s32.totalorder %s14_s19, 7   ;;  %s1375_s16 = smov %s1182_s23 }
 0x143   : > { %s1376_s17 = smov %s1115_s18  ;;  %s1377_s18 = smov %s1379_s20 }
 0x144   :  { %13 = sbr.rel (!%p11_p12) target bundleno = 3 (0x3), region = 129 }

// kernel: encoder_forward.37
= control target key start
LH: loop header
LB: loop body
LE: loop exit
PB: predicated region body
PF: predicated region fallthrough
CT: control target
= control target key end

     0   :  { %s1031_s12 = smov 0   ;;  %s1033_s13 = smov 0   ;;  %s1187_s0 = inlined_call_operand.vmem [shape: bf16[128,640], index: 0, kind: input, shape index: {}]   ;;  %s1188_s1 = inlined_call_operand.vmem [shape: bf16[640,128], index: 1, kind: input, shape index: {}]   ;;  %s1189_s2 = inlined_call_operand.vmem [shape: f32[1,128], index: 2, kind: input, shape index: {}]   ;;  %s1190_s3 = inlined_call_operand.vmem [shape: f32[128,128], index: 3, kind: output, shape index: {}]  }
   0x1   :  { %s1035_s14 = smov 0   ;;  %s1037_s15 = smov 0  }
   0x2   :  { %s1039_s16 = smov 0  }
   0x3 LB: > { %s25_s17 = sadd.s32 1, %s1004_s15  ;;  %p48_p1 = scmp.ne.s32.totalorder %s996_s13, %s992_s12  ;;  %s1008_s16 = sphi %s1039_s16, %s13_s16   ;;  %s1004_s15 = sphi %s1037_s15, %s1194_s15   ;;  %s1000_s14 = sphi %s1035_s14, %s1193_s14   ;;  %s996_s13 = sphi %s1033_s13, %s1192_s13   ;;  %s992_s12 = sphi %s1031_s12, %s1191_s12  }
   0x4   : > { %p26_p0 = scmp.ge.s32.totalorder %s25_s17, 5  ;;  %p49_p2 = scmp.eq.s32.totalorder %s1008_s16, 0 }
   0x5   : > { %s41_s19 = sadd.s32 1, %s996_s13  ;;  %p819_p5 = scmp.ge.s32.totalorder %s1008_s16, 5 }
   0x6   : > { %s1196_s17 = smov (%p26_p0, %s25_s17), 0  ;;  %p50_p3 = por %p49_p2, %p48_p1 }
   0x7   : > { %s37_s18 = ssub.s32 %s1004_s15, %s1196_s17  ;;  %162 = sbr.rel (%p819_p5) target bundleno = 28 (0x1c), region = 20 }
   0x8   : > { %p39_p4 = scmp.eq.s32.totalorder %s37_s18, 0 }
   0xa   : > { %s1066_s20 = scalar_select %p39_p4, %s996_s13, %s41_s19  }
   0xe   : > { %165 = sbr.rel (!%p50_p3) target bundleno = 28 (0x1c), region = 24  ;;  %s167_s21 = sand.u32 (%p50_p3), 1, %s996_s13  }
   0xf   : > { %s821_s22 = sshll.u32 (%p50_p3), %s1004_s15, 2  ;;  %s820_s23 = sshll.u32 (%p50_p3), %s167_s21, 6 }
  0x10   : > { %s1074_s26 = scalar_lea.vmem (%p50_p3), %s1187_s0, %s821_s22  ;;  %s169_s27 = scalar_lea.vmem (%p50_p3), [#allocation3], %s820_s23 }
  0x11   : > { %v190_v0 = vld [vmem:[%s1074_s26] sm:$0xf] (%p50_p3)  ;;  %v192_v1 = vld [vmem:[%s1074_s26 + $0x14] sm:$0xf] (%p50_p3)  ;;  %v194_v2 = vld [vmem:[%s1074_s26 + $0x28] sm:$0xf] (%p50_p3) }
  0x12   : > { %191 = vst [vmem:[%s169_s27] sm:$0xf] (%p50_p3), %v190_v0  ;;  %193 = vst [vmem:[%s169_s27 + $0x4] sm:$0xf] (%p50_p3), %v192_v1  ;;  %v196_v3 = vld [vmem:[%s1074_s26 + $0x3c] sm:$0xf] (%p50_p3) }
  0x13   : > { %v198_v4 = vld [vmem:[%s1074_s26 + $0x50] sm:$0xf] (%p50_p3)  ;;  %195 = vst [vmem:[%s169_s27 + $0x8] sm:$0xf] (%p50_p3), %v194_v2  ;;  %197 = vst [vmem:[%s169_s27 + $0xc] sm:$0xf] (%p50_p3), %v196_v3 }
  0x14   : > { %199 = vst [vmem:[%s169_s27 + $0x10] sm:$0xf] (%p50_p3), %v198_v4  ;;  %v200_v5 = vld [vmem:[%s1074_s26 + $0x64] sm:$0xf] (%p50_p3)  ;;  %v202_v6 = vld [vmem:[%s1074_s26 + $0x78] sm:$0xf] (%p50_p3) }
  0x15   : > { %v204_v7 = vld [vmem:[%s1074_s26 + $0x8c] sm:$0xf]  ;;  %201 = vst [vmem:[%s169_s27 + $0x14] sm:$0xf] %v200_v5  ;;  %203 = vst [vmem:[%s169_s27 + $0x18] sm:$0xf] %v202_v6 }
  0x16   : > { %205 = vst [vmem:[%s169_s27 + $0x1c] sm:$0xf] %v204_v7  ;;  %v206_v8 = vld [vmem:[%s1074_s26 + $0xa0] sm:$0xf]  ;;  %v208_v9 = vld [vmem:[%s1074_s26 + $0xb4] sm:$0xf] }
  0x17   : > { %v210_v10 = vld [vmem:[%s1074_s26 + $0xc8] sm:$0xf]  ;;  %207 = vst [vmem:[%s169_s27 + $0x20] sm:$0xf] %v206_v8  ;;  %209 = vst [vmem:[%s169_s27 + $0x24] sm:$0xf] %v208_v9 }
  0x18   : > { %211 = vst [vmem:[%s169_s27 + $0x28] sm:$0xf] %v210_v10  ;;  %v212_v11 = vld [vmem:[%s1074_s26 + $0xdc] sm:$0xf]  ;;  %v214_v12 = vld [vmem:[%s1074_s26 + $0xf0] sm:$0xf] }
  0x19   : > { %v216_v13 = vld [vmem:[%s1074_s26 + $0x104] sm:$0xf]  ;;  %213 = vst [vmem:[%s169_s27 + $0x2c] sm:$0xf] %v212_v11  ;;  %215 = vst [vmem:[%s169_s27 + $0x30] sm:$0xf] %v214_v12 }
  0x1a   : > { %217 = vst [vmem:[%s169_s27 + $0x34] sm:$0xf] %v216_v13  ;;  %v218_v14 = vld [vmem:[%s1074_s26 + $0x118] sm:$0xf]  ;;  %v220_v15 = vld [vmem:[%s1074_s26 + $0x12c] sm:$0xf] }
  0x1b   : > { %219 = vst [vmem:[%s169_s27 + $0x38] sm:$0xf] %v218_v14  ;;  %221 = vst [vmem:[%s169_s27 + $0x3c] sm:$0xf] %v220_v15 }
  0x1c PF: > { %p822_p6 = scmp.ge.s32.totalorder %s1008_s16, 1  ;;  %p287_p7 = scmp.lt.s32.totalorder %s1008_s16, 6 }
  0x1e   : > { %p288_p8 = pnand %p822_p6, %p287_p7 }
  0x1f   : > { %s294_s28 = sand.u32 (!%p288_p8), 1, %s992_s12   ;;  %s824_s29 = sshll.u32 (!%p288_p8), %s1000_s14, 4 }
  0x20   : > { %291 = sbr.rel (%p288_p8) target bundleno = 319 (0x13f), region = 69  ;;  %s823_s30 = sshll.u32 (!%p288_p8), %s294_s28, 6 }
  0x21   : > { %p333_p9 = scmp.lt.s32.totalorder (!%p288_p8), %s824_s29, 79  ;;  %s1101_s8 = scalar_lea.vmem (!%p288_p8), [#allocation3], %s823_s30 }
  0x22   : > { %p826_p10 = scmp.ne.s32.totalorder (!%p288_p8), %s1000_s14, 0 }
  0x27   : > { %s1198_s29 = smov (!%p333_p9, %s824_s29), 79  ;;  %357 = sbr.rel (%p826_p10) target bundleno = 49 (0x31), region = 77 }
  0x28   : > { %s825_s4 = sshll.u32 %s1198_s29, 2  ;;  %v1010_v16 = vmov (!%p826_p10), 0.0  }
  0x29   : > { %s1099_s7 = scalar_lea.vmem %s1188_s1, %s825_s4  ;;  %358 = vst [vmem:[#allocation2] sm:$0xff] (!%p826_p10), %v1010_v16  ;;  %359 = vst [vmem:[#allocation2 + $0x8] sm:$0xff] (!%p826_p10), %v1010_v16 }
  0x2a   : > { %360 = vst [vmem:[#allocation2 + $0x10] sm:$0xff] (!%p826_p10), %v1010_v16  ;;  %361 = vst [vmem:[#allocation2 + $0x18] sm:$0xff] (!%p826_p10), %v1010_v16 }
  0x2b   : > { %362 = vst [vmem:[#allocation2 + $0x20] sm:$0xff] (!%p826_p10), %v1010_v16  ;;  %363 = vst [vmem:[#allocation2 + $0x28] sm:$0xff] (!%p826_p10), %v1010_v16 }
  0x2c   : > { %364 = vst [vmem:[#allocation2 + $0x30] sm:$0xff] (!%p826_p10), %v1010_v16  ;;  %365 = vst [vmem:[#allocation2 + $0x38] sm:$0xff] (!%p826_p10), %v1010_v16 }
  0x2d   : > { %366 = vst [vmem:[#allocation2 + $0x40] sm:$0xff] (!%p826_p10), %v1010_v16  ;;  %367 = vst [vmem:[#allocation2 + $0x48] sm:$0xff] (!%p826_p10), %v1010_v16 }
  0x2e   : > { %368 = vst [vmem:[#allocation2 + $0x50] sm:$0xff] %v1010_v16  ;;  %369 = vst [vmem:[#allocation2 + $0x58] sm:$0xff] %v1010_v16 }
  0x2f   : > { %370 = vst [vmem:[#allocation2 + $0x60] sm:$0xff] %v1010_v16  ;;  %371 = vst [vmem:[#allocation2 + $0x68] sm:$0xff] %v1010_v16 }
  0x30   : > { %372 = vst [vmem:[#allocation2 + $0x70] sm:$0xff] %v1010_v16  ;;  %373 = vst [vmem:[#allocation2 + $0x78] sm:$0xff] %v1010_v16 }
  0x31 PF: > { %v954_v17 = vld [vmem:[%s1099_s7] sm:$0xff]   ;;  %v955_v18 = vld [vmem:[%s1099_s7 + $0x8] sm:$0xff]   ;;  %v956_v19 = vld [vmem:[%s1099_s7 + $0x10] sm:$0xff]   ;;  %p843_p11 = scmp.ne.s32.totalorder %s1000_s14, 4 }
  0x32   : > { %865 = vmatprep.subr.bf16.mxu0 %v954_v17  ;;  %897 = vmatprep.subr.bf16.mxu1 %v954_v17  ;;  %v957_v20 = vld [vmem:[%s1099_s7 + $0x18] sm:$0xff]   ;;  %v962_v21 = vld [vmem:[%s1101_s8] sm:$0xff]   ;;  %v959_v24 = vld [vmem:[%s1099_s7 + $0x28] sm:$0xff]  }
  0x33   : > { %866 = vmatpush3.bf16.msra.mxu0 %v954_v17  ;;  %905 = vmatpush3.bf16.msra.mxu1 %v954_v17  ;;  %v963_v22 = vld [vmem:[%s1101_s8 + $0x20] sm:$0xff]   ;;  %v960_v25 = vld [vmem:[%s1099_s7 + $0x30] sm:$0xff]   ;;  %v961_v26 = vld [vmem:[%s1099_s7 + $0x38] sm:$0xff]  }
  0x34   : > { %867 = vmatprep.subr.bf16.mxu0 %v955_v18  ;;  %898 = vmatprep.subr.bf16.mxu1 %v955_v18  ;;  %v958_v23 = vld [vmem:[%s1099_s7 + $0x20] sm:$0xff]   ;;  %v964_v27 = vld [vmem:[%s1101_s8 + $0x8] sm:$0xff]   ;;  %v966_v29 = vld [vmem:[%s1101_s8 + $0x10] sm:$0xff]  }
  0x35   : > { %881 = vmatprep.mubr.bf16.mxu0 %v962_v21  ;;  %889 = vmatprep.mubr.bf16.mxu1 %v963_v22  ;;  %v965_v28 = vld [vmem:[%s1101_s8 + $0x28] sm:$0xff]   ;;  %v967_v30 = vld [vmem:[%s1101_s8 + $0x30] sm:$0xff]   ;;  %v968_v31 = vld [vmem:[%s1101_s8 + $0x18] sm:$0xff]  }
  0x36   : > { %v969_v32 = vld [vmem:[%s1101_s8 + $0x38] sm:$0xff]   ;;  %v376_v33 = vld [vmem:[#allocation2 + $0x10] sm:$0xff]  ;;  %v374_v35 = vld [vmem:[#allocation2] sm:$0xff] }
  0x37   : > { %868 = vmatpush3.bf16.msra.mxu0 %v955_v18  ;;  %906 = vmatpush3.bf16.msra.mxu1 %v955_v18  ;;  %v384_v34 = vld [vmem:[#allocation2 + $0x50] sm:$0xff]  ;;  %v382_v36 = vld [vmem:[#allocation2 + $0x40] sm:$0xff]  ;;  %v377_v39 = vld [vmem:[#allocation2 + $0x18] sm:$0xff] }
  0x38   : > { %869 = vmatprep.subr.bf16.mxu0 %v956_v19  ;;  %899 = vmatprep.subr.bf16.mxu1 %v956_v19  ;;  %v385_v40 = vld [vmem:[#allocation2 + $0x58] sm:$0xff]  ;;  %v375_v45 = vld [vmem:[#allocation2 + $0x8] sm:$0xff]  ;;  %v380_v57 = vld [vmem:[#allocation2 + $0x30] sm:$0xff] }
  0x39   : > { %v383_v46 = vld [vmem:[#allocation2 + $0x48] sm:$0xff]  ;;  %v388_v58 = vld [vmem:[#allocation2 + $0x70] sm:$0xff]  ;;  %v378_v59 = vld [vmem:[#allocation2 + $0x20] sm:$0xff] }
  0x3a   : > { %v386_v60 = vld [vmem:[#allocation2 + $0x60] sm:$0xff]  ;;  %v381_v63 = vld [vmem:[#allocation2 + $0x38] sm:$0xff]  ;;  %v379_v5 = vld [vmem:[#allocation2 + $0x28] sm:$0xff] }
  0x3b   : > { %870 = vmatpush3.bf16.msra.mxu0 %v956_v19  ;;  %907 = vmatpush3.bf16.msra.mxu1 %v956_v19  ;;  %v389_v0 = vld [vmem:[#allocation2 + $0x78] sm:$0xff]  ;;  %v387_v6 = vld [vmem:[#allocation2 + $0x68] sm:$0xff]  ;;  %v844_v18 = vld [vmem:[%s1189_s2] ss:$0 sm:$0xff] (!%p843_p11) }
  0x3c   : > { %871 = vmatprep.subr.bf16.mxu0 %v957_v20  ;;  %900 = vmatprep.subr.bf16.mxu1 %v957_v20 }
  0x3f   : > { %872 = vmatpush3.bf16.msra.mxu0 %v957_v20  ;;  %908 = vmatpush3.bf16.msra.mxu1 %v957_v20 }
  0x40   : > { %873 = vmatprep.subr.bf16.mxu0 %v958_v23  ;;  %901 = vmatprep.subr.bf16.mxu1 %v958_v23 }
  0x43   : > { %874 = vmatpush3.bf16.msra.mxu0 %v958_v23  ;;  %909 = vmatpush3.bf16.msra.mxu1 %v958_v23 }
  0x44   : > { %875 = vmatprep.subr.bf16.mxu0 %v959_v24  ;;  %902 = vmatprep.subr.bf16.mxu1 %v959_v24 }
  0x47   : > { %876 = vmatpush3.bf16.msra.mxu0 %v959_v24  ;;  %910 = vmatpush3.bf16.msra.mxu1 %v959_v24 }
  0x48   : > { %877 = vmatprep.subr.bf16.mxu0 %v960_v25  ;;  %903 = vmatprep.subr.bf16.mxu1 %v960_v25 }
  0x4b   : > { %878 = vmatpush3.bf16.msra.mxu0 %v960_v25  ;;  %911 = vmatpush3.bf16.msra.mxu1 %v960_v25 }
  0x4c   : > { %879 = vmatprep.subr.bf16.mxu0 %v961_v26  ;;  %904 = vmatprep.subr.bf16.mxu1 %v961_v26 }
  0x4f   : > { %880 = vmatpush3.bf16.msra.mxu0 %v961_v26  ;;  %912 = vmatpush3.bf16.msra.mxu1 %v961_v26 }
  0x52   : > { %882 = vmatmul.mubr.bf16.vlgmr.msra.gmra.mrb[0].mxu0 %v964_v27  ;;  %890 = vmatmul.mubr.bf16.vlgmr.msra.gmra.mrb[0].mxu1 %v965_v28 }
  0x53   : > { %885 = vmatprep.mubr.bf16.mxu0 %v966_v29  ;;  %893 = vmatprep.mubr.bf16.mxu1 %v967_v30 }
  0x5a   : > { %886 = vmatmul.mubr.bf16.gmra.mrb[4].mxu0 %v968_v31  ;;  %894 = vmatmul.mubr.bf16.gmra.mrb[4].mxu1 %v969_v32 }
 0x125   : > { %v883_v37 = vpop.f32.mrb[0].mxu0  ;;  %v891_v38 = vpop.f32.mrb[0].mxu1 }
 0x126   : > { %v617_v41 = vadd.f32 %v883_v37, %v376_v33  ;;  %v625_v42 = vadd.f32 %v891_v38, %v384_v34  ;;  %v552_v43 = vpop.f32.mrb[1].mxu0  ;;  %v584_v44 = vpop.f32.mrb[1].mxu1 }
 0x127   : > { %v615_v47 = vadd.f32 %v552_v43, %v374_v35  ;;  %v623_v48 = vadd.f32 %v584_v44, %v382_v36  ;;  %v884_v49 = vpop.f32.mrb[2].mxu0  ;;  %v892_v50 = vpop.f32.mrb[2].mxu1 }
 0x128   : > { %633 = vst [vmem:[#allocation2 + $0x10] sm:$0xff] %v617_v41  ;;  %641 = vst [vmem:[#allocation2 + $0x50] sm:$0xff] %v625_v42  ;;  %v618_v51 = vadd.f32 %v884_v49, %v377_v39  ;;  %v626_v52 = vadd.f32 %v892_v50, %v385_v40  ;;  %v555_v53 = vpop.f32.mrb[3].mxu0  ;;  %v587_v54 = vpop.f32.mrb[3].mxu1 }
 0x129   : > { %631 = vst [vmem:[#allocation2] sm:$0xff] %v615_v47  ;;  %639 = vst [vmem:[#allocation2 + $0x40] sm:$0xff] %v623_v48  ;;  %v616_v55 = vadd.f32 %v555_v53, %v375_v45  ;;  %v624_v56 = vadd.f32 %v587_v54, %v383_v46 }
 0x12a   : > { %634 = vst [vmem:[#allocation2 + $0x18] sm:$0xff] %v618_v51  ;;  %642 = vst [vmem:[#allocation2 + $0x58] sm:$0xff] %v626_v52 }
 0x12b   : > { %632 = vst [vmem:[#allocation2 + $0x8] sm:$0xff] %v616_v55  ;;  %640 = vst [vmem:[#allocation2 + $0x48] sm:$0xff] %v624_v56 }
 0x12d   : > { %v887_v61 = vpop.f32.mrb[4].mxu0  ;;  %v895_v62 = vpop.f32.mrb[4].mxu1  ;;  %650 = sbr.rel (%p843_p11) target bundleno = 319 (0x13f), region = 81 }
 0x12e   : > { %v621_v1 = vadd.f32 %v887_v61, %v380_v57  ;;  %v629_v2 = vadd.f32 %v895_v62, %v388_v58  ;;  %v568_v3 = vpop.f32.mrb[5].mxu0  ;;  %v600_v4 = vpop.f32.mrb[5].mxu1 }
 0x12f   : > { %v619_v7 = vadd.f32 %v568_v3, %v378_v59  ;;  %v627_v8 = vadd.f32 %v600_v4, %v386_v60  ;;  %v888_v9 = vpop.f32.mrb[6].mxu0  ;;  %v896_v10 = vpop.f32.mrb[6].mxu1  ;;  %v653_v22 = vld [vmem:[#allocation2 + $0x10] sm:$0xff] (!%p843_p11) }
 0x130   : > { %637 = vst [vmem:[#allocation2 + $0x30] sm:$0xff] %v621_v1  ;;  %645 = vst [vmem:[#allocation2 + $0x70] sm:$0xff] %v629_v2  ;;  %v622_v11 = vadd.f32 %v888_v9, %v381_v63  ;;  %v630_v12 = vadd.f32 %v896_v10, %v389_v0  ;;  %v571_v13 = vpop.f32.mrb[7].mxu0  ;;  %v603_v14 = vpop.f32.mrb[7].mxu1  ;;  %v651_v17 = vld [vmem:[#allocation2] sm:$0xff] (!%p843_p11)  ;;  %v676_v25 = vadd.f32 (!%p843_p11), %v844_v18, %v653_v22  ;;  %v661_v36 = vld [vmem:[#allocation2 + $0x50] sm:$0xff] (!%p843_p11) }
 0x131   : > { %635 = vst [vmem:[#allocation2 + $0x20] sm:$0xff] %v619_v7  ;;  %643 = vst [vmem:[#allocation2 + $0x60] sm:$0xff] %v627_v8  ;;  %v620_v15 = vadd.f32 %v571_v13, %v379_v5  ;;  %v628_v16 = vadd.f32 %v603_v14, %v387_v6  ;;  %v674_v20 = vadd.f32 (!%p843_p11), %v844_v18, %v651_v17  ;;  %v654_v23 = vld [vmem:[#allocation2 + $0x18] sm:$0xff] (!%p843_p11)  ;;  %v659_v34 = vld [vmem:[#allocation2 + $0x40] sm:$0xff] (!%p843_p11) }
 0x132   : > { %638 = vst [vmem:[#allocation2 + $0x38] sm:$0xff] %v622_v11  ;;  %646 = vst [vmem:[#allocation2 + $0x78] sm:$0xff] %v630_v12  ;;  %v652_v19 = vld [vmem:[#allocation2 + $0x8] sm:$0xff] (!%p843_p11)  ;;  %v677_v26 = vadd.f32 (!%p843_p11), %v844_v18, %v654_v23  ;;  %v682_v37 = vadd.f32 (!%p843_p11), %v844_v18, %v659_v34  ;;  %v684_v39 = vadd.f32 (!%p843_p11), %v844_v18, %v661_v36  ;;  %v662_v40 = vld [vmem:[#allocation2 + $0x58] sm:$0xff] (!%p843_p11) }
 0x133   : > { %636 = vst [vmem:[#allocation2 + $0x28] sm:$0xff] %v620_v15  ;;  %644 = vst [vmem:[#allocation2 + $0x68] sm:$0xff] %v628_v16  ;;  %v675_v21 = vadd.f32 (!%p843_p11), %v844_v18, %v652_v19  ;;  %v660_v35 = vld [vmem:[#allocation2 + $0x48] sm:$0xff] (!%p843_p11)  ;;  %v685_v43 = vadd.f32 (!%p843_p11), %v844_v18, %v662_v40 }
 0x134   : > { %690 = vst [vmem:[%s1190_s3] sm:$0xff] %v674_v20  ;;  %692 = vst [vmem:[%s1190_s3 + $0x10] sm:$0xff] %v676_v25  ;;  %v683_v38 = vadd.f32 %v844_v18, %v660_v35 }
 0x135   : > { %691 = vst [vmem:[%s1190_s3 + $0x8] sm:$0xff] %v675_v21  ;;  %693 = vst [vmem:[%s1190_s3 + $0x18] sm:$0xff] %v677_v26 }
 0x136   : > { %698 = vst [vmem:[%s1190_s3 + $0x40] sm:$0xff] %v682_v37  ;;  %699 = vst [vmem:[%s1190_s3 + $0x48] sm:$0xff] %v683_v38 }
 0x137   : > { %v657_v29 = vld [vmem:[#allocation2 + $0x30] sm:$0xff]  ;;  %700 = vst [vmem:[%s1190_s3 + $0x50] sm:$0xff] %v684_v39  ;;  %701 = vst [vmem:[%s1190_s3 + $0x58] sm:$0xff] %v685_v43 }
 0x138   : > { %v655_v24 = vld [vmem:[#allocation2 + $0x20] sm:$0xff]  ;;  %v680_v32 = vadd.f32 %v844_v18, %v657_v29  ;;  %v665_v46 = vld [vmem:[#allocation2 + $0x70] sm:$0xff] }
 0x139   : > { %v678_v27 = vadd.f32 %v844_v18, %v655_v24  ;;  %v658_v30 = vld [vmem:[#allocation2 + $0x38] sm:$0xff]  ;;  %v663_v41 = vld [vmem:[#allocation2 + $0x60] sm:$0xff]  ;;  %v688_v48 = vadd.f32 %v844_v18, %v665_v46 }
 0x13a   : > { %v656_v28 = vld [vmem:[#allocation2 + $0x28] sm:$0xff]  ;;  %v681_v33 = vadd.f32 %v844_v18, %v658_v30  ;;  %696 = vst [vmem:[%s1190_s3 + $0x30] sm:$0xff] %v680_v32  ;;  %v686_v44 = vadd.f32 %v844_v18, %v663_v41  ;;  %v666_v47 = vld [vmem:[#allocation2 + $0x78] sm:$0xff] }
 0x13b   : > { %v679_v31 = vadd.f32 %v844_v18, %v656_v28  ;;  %694 = vst [vmem:[%s1190_s3 + $0x20] sm:$0xff] %v678_v27  ;;  %v664_v42 = vld [vmem:[#allocation2 + $0x68] sm:$0xff]  ;;  %v689_v49 = vadd.f32 %v844_v18, %v666_v47  ;;  %704 = vst [vmem:[%s1190_s3 + $0x70] sm:$0xff] %v688_v48 }
 0x13c   : > { %697 = vst [vmem:[%s1190_s3 + $0x38] sm:$0xff] %v681_v33  ;;  %v687_v45 = vadd.f32 %v844_v18, %v664_v42  ;;  %702 = vst [vmem:[%s1190_s3 + $0x60] sm:$0xff] %v686_v44 }
 0x13d   : > { %695 = vst [vmem:[%s1190_s3 + $0x28] sm:$0xff] %v679_v31  ;;  %705 = vst [vmem:[%s1190_s3 + $0x78] sm:$0xff] %v689_v49 }
 0x13e   : > { %703 = vst [vmem:[%s1190_s3 + $0x68] sm:$0xff] %v687_v45 }
 0x13f PF: > { %s13_s16 = sadd.s32 1, %s1008_s16   ;;  %s1191_s12 = smov %s996_s13 }
 0x140   : > { %p10_p12 = scmp.ge.s32.totalorder %s13_s16, 7   ;;  %s1192_s13 = smov %s1066_s20 }
 0x141   : > { %s1193_s14 = smov %s1004_s15  ;;  %s1194_s15 = smov %s1196_s17 }
 0x142   :  { %12 = sbr.rel (!%p10_p12) target bundleno = 3 (0x3), region = 122 }

// kernel: encoder_forward.41
= control target key start
LH: loop header
LB: loop body
LE: loop exit
PB: predicated region body
PF: predicated region fallthrough
CT: control target
= control target key end

     0   :  { %s1107_s12 = smov 0   ;;  %s1109_s13 = smov 0   ;;  %s1274_s0 = inlined_call_operand.vmem [shape: bf16[128,128], index: 0, kind: input, shape index: {}]   ;;  %s1275_s1 = inlined_call_operand.vmem [shape: bf16[128,256], index: 1, kind: input, shape index: {}]   ;;  %s1276_s2 = inlined_call_operand.vmem [shape: f32[1,256], index: 2, kind: input, shape index: {}]   ;;  %s1277_s3 = inlined_call_operand.vmem [shape: f32[128,256], index: 3, kind: output, shape index: {}]  }
   0x1   :  { %s1111_s14 = smov 0   ;;  %s1113_s15 = smov 0  }
   0x2   :  { %s1115_s16 = smov 0  }
   0x3 LB: > { %s28_s17 = sadd.s32 1, %s1081_s15  ;;  %s896_s18 = sadd.s32 4294967295, %s1085_s16   ;;  %s1085_s16 = sphi %s1115_s16, %s13_s16   ;;  %s1081_s15 = sphi %s1113_s15, %s1282_s15   ;;  %s1077_s14 = sphi %s1111_s14, %s1281_s14   ;;  %s1073_s13 = sphi %s1109_s13, %s1280_s13   ;;  %s1069_s12 = sphi %s1107_s12, %s1279_s12  }
   0x4   : > { %p30_p0 = scmp.ge.s32.totalorder %s28_s17, 2  ;;  %p76_p1 = scmp.ne.s32.totalorder %s1073_s13, %s1069_s12 }
   0x5   : > { %p77_p2 = scmp.eq.s32.totalorder %s1085_s16, 0  ;;  %p134_p4 = scmp.eq.s32.totalorder %s896_s18, 1 }
   0x6   : > { %s1284_s17 = smov (%p30_p0, %s28_s17), 0  ;;  %s69_s20 = sadd.s32 1, %s1073_s13 }
   0x7   : > { %p78_p3 = por %p77_p2, %p76_p1  ;;  %s65_s19 = ssub.s32 %s1081_s15, %s1284_s17 }
   0x8   : > { %p67_p5 = scmp.eq.s32.totalorder %s65_s19, 0  ;;  %p1142_p6 = por %p134_p4, %p76_p1 }
   0x9   : > { %p900_p7 = scmp.ge.s32.totalorder %s1085_s16, 2 }
   0xa   : > { %s1147_s22 = scalar_select %p67_p5, %s1073_s13, %s69_s20  }
   0xb   : > { %168 = sbr.rel (%p900_p7) target bundleno = 32 (0x20), region = 20 }
  0x12   : > { %171 = sbr.rel (!%p78_p3) target bundleno = 32 (0x20), region = 24  ;;  %s173_s23 = sand.u32 (%p78_p3), 1, %s1073_s13  }
  0x13   : > { %s902_s24 = sshll.u32 (%p78_p3), %s1081_s15, 2  ;;  %s901_s25 = sshll.u32 (%p78_p3), %s173_s23, 6 }
  0x14   : > { %s1155_s28 = scalar_lea.vmem (%p78_p3), %s1275_s1, %s902_s24  ;;  %s175_s29 = scalar_lea.vmem (%p78_p3), [#allocation3], %s901_s25 }
  0x15   : > { %v196_v0 = vld [vmem:[%s1155_s28] sm:$0xf] (%p78_p3)  ;;  %v198_v1 = vld [vmem:[%s1155_s28 + $0x8] sm:$0xf] (%p78_p3)  ;;  %v200_v2 = vld [vmem:[%s1155_s28 + $0x10] sm:$0xf] (%p78_p3) }
  0x16   : > { %197 = vst [vmem:[%s175_s29] sm:$0xf] (%p78_p3), %v196_v0  ;;  %199 = vst [vmem:[%s175_s29 + $0x4] sm:$0xf] (%p78_p3), %v198_v1  ;;  %v202_v3 = vld [vmem:[%s1155_s28 + $0x18] sm:$0xf] (%p78_p3) }
  0x17   : > { %v204_v4 = vld [vmem:[%s1155_s28 + $0x20] sm:$0xf] (%p78_p3)  ;;  %201 = vst [vmem:[%s175_s29 + $0x8] sm:$0xf] (%p78_p3), %v200_v2  ;;  %203 = vst [vmem:[%s175_s29 + $0xc] sm:$0xf] (%p78_p3), %v202_v3 }
  0x18   : > { %205 = vst [vmem:[%s175_s29 + $0x10] sm:$0xf] (%p78_p3), %v204_v4  ;;  %v206_v5 = vld [vmem:[%s1155_s28 + $0x28] sm:$0xf] (%p78_p3)  ;;  %v208_v6 = vld [vmem:[%s1155_s28 + $0x30] sm:$0xf] (%p78_p3) }
  0x19   : > { %v210_v7 = vld [vmem:[%s1155_s28 + $0x38] sm:$0xf]  ;;  %207 = vst [vmem:[%s175_s29 + $0x14] sm:$0xf] %v206_v5  ;;  %209 = vst [vmem:[%s175_s29 + $0x18] sm:$0xf] %v208_v6 }
  0x1a   : > { %211 = vst [vmem:[%s175_s29 + $0x1c] sm:$0xf] %v210_v7  ;;  %v212_v8 = vld [vmem:[%s1155_s28 + $0x40] sm:$0xf]  ;;  %v214_v9 = vld [vmem:[%s1155_s28 + $0x48] sm:$0xf] }
  0x1b   : > { %v216_v10 = vld [vmem:[%s1155_s28 + $0x50] sm:$0xf]  ;;  %213 = vst [vmem:[%s175_s29 + $0x20] sm:$0xf] %v212_v8  ;;  %215 = vst [vmem:[%s175_s29 + $0x24] sm:$0xf] %v214_v9 }
  0x1c   : > { %217 = vst [vmem:[%s175_s29 + $0x28] sm:$0xf] %v216_v10  ;;  %v218_v11 = vld [vmem:[%s1155_s28 + $0x58] sm:$0xf]  ;;  %v220_v12 = vld [vmem:[%s1155_s28 + $0x60] sm:$0xf] }
  0x1d   : > { %v222_v13 = vld [vmem:[%s1155_s28 + $0x68] sm:$0xf]  ;;  %219 = vst [vmem:[%s175_s29 + $0x2c] sm:$0xf] %v218_v11  ;;  %221 = vst [vmem:[%s175_s29 + $0x30] sm:$0xf] %v220_v12 }
  0x1e   : > { %223 = vst [vmem:[%s175_s29 + $0x34] sm:$0xf] %v222_v13  ;;  %v224_v14 = vld [vmem:[%s1155_s28 + $0x70] sm:$0xf]  ;;  %v226_v15 = vld [vmem:[%s1155_s28 + $0x78] sm:$0xf] }
  0x1f   : > { %225 = vst [vmem:[%s175_s29 + $0x38] sm:$0xf] %v224_v14  ;;  %227 = vst [vmem:[%s175_s29 + $0x3c] sm:$0xf] %v226_v15 }
  0x20 PF: > { %p903_p8 = scmp.ge.s32.totalorder %s1085_s16, 1  ;;  %p287_p9 = scmp.lt.s32.totalorder %s1085_s16, 3 }
  0x22   : > { %p288_p10 = pnand %p903_p8, %p287_p9 }
  0x23   : > { %s294_s30 = sand.u32 (!%p288_p10), 1, %s1069_s12   ;;  %v1039_v16 = vld [vmem:[%s1274_s0] sm:$0xff] (!%p288_p10)   ;;  %v1041_v26 = vld [vmem:[%s1274_s0 + $0x8] sm:$0xff] (!%p288_p10)   ;;  %v1043_v28 = vld [vmem:[%s1274_s0 + $0x10] sm:$0xff] (!%p288_p10)   ;;  %p337_p11 = scmp.lt.s32.totalorder (!%p288_p10), %s1077_s14, 1 }
  0x24   : > { %291 = sbr.rel (%p288_p10) target bundleno = 306 (0x132), region = 69  ;;  %s904_s6 = sshll.u32 (!%p288_p10), %s294_s30, 6  ;;  %v1040_v17 = vld [vmem:[%s1274_s0 + $0x20] sm:$0xff] (!%p288_p10)   ;;  %959 = vmatprep.mubr.bf16.mxu0 (!%p288_p10), %v1039_v16  ;;  %v1042_v27 = vld [vmem:[%s1274_s0 + $0x28] sm:$0xff] (!%p288_p10)   ;;  %v1044_v29 = vld [vmem:[%s1274_s0 + $0x30] sm:$0xff] (!%p288_p10)  }
  0x25   : > { %s1184_s9 = scalar_lea.vmem (!%p288_p10), [#allocation3], %s904_s6  ;;  %967 = vmatprep.mubr.bf16.mxu1 (!%p288_p10), %v1040_v17  ;;  %v1045_v30 = vld [vmem:[%s1274_s0 + $0x18] sm:$0xff] (!%p288_p10)   ;;  %s905_s8 = sshll.u32 (!%p288_p10), %s294_s30, 7 }
  0x26   : > { %v1031_v18 = vld [vmem:[%s1184_s9] sm:$0xff] (!%p288_p10)   ;;  %v1032_v19 = vld [vmem:[%s1184_s9 + $0x8] sm:$0xff] (!%p288_p10)   ;;  %v1033_v20 = vld [vmem:[%s1184_s9 + $0x10] sm:$0xff] (!%p288_p10)  }
  0x27   : > { %943 = vmatprep.subr.bf16.mxu0 (!%p288_p10), %v1031_v18  ;;  %975 = vmatprep.subr.bf16.mxu1 (!%p288_p10), %v1031_v18  ;;  %v1034_v21 = vld [vmem:[%s1184_s9 + $0x18] sm:$0xff] (!%p288_p10)   ;;  %v1035_v22 = vld [vmem:[%s1184_s9 + $0x20] sm:$0xff] (!%p288_p10)   ;;  %v1036_v23 = vld [vmem:[%s1184_s9 + $0x28] sm:$0xff] (!%p288_p10)  }
  0x28   : > { %944 = vmatpush3.bf16.msra.mxu0 (!%p288_p10), %v1031_v18  ;;  %983 = vmatpush3.bf16.msra.mxu1 (!%p288_p10), %v1031_v18  ;;  %v1037_v24 = vld [vmem:[%s1184_s9 + $0x30] sm:$0xff] (!%p288_p10)   ;;  %v1038_v25 = vld [vmem:[%s1184_s9 + $0x38] sm:$0xff] (!%p288_p10)   ;;  %s1219_s9 = scalar_lea.vmem (!%p288_p10), [#allocation4], %s905_s8 }
  0x29   : > { %945 = vmatprep.subr.bf16.mxu0 (!%p288_p10), %v1032_v19  ;;  %976 = vmatprep.subr.bf16.mxu1 (!%p288_p10), %v1032_v19  ;;  %v1046_v31 = vld [vmem:[%s1274_s0 + $0x38] sm:$0xff] (!%p288_p10)  }
  0x2b   : > { %s338_s4 = scalar_select %p337_p11, %s1077_s14, 1 }
  0x2c   : > { %946 = vmatpush3.bf16.msra.mxu0 %v1032_v19  ;;  %984 = vmatpush3.bf16.msra.mxu1 %v1032_v19  ;;  %s924_s12 = sshll.u32 (%p1142_p6), %s1077_s14, 3 }
  0x2d   : > { %947 = vmatprep.subr.bf16.mxu0 %v1033_v20  ;;  %977 = vmatprep.subr.bf16.mxu1 %v1033_v20  ;;  %s339_s7 = scalar_lea.vmem %s1276_s2, %s338_s4  ;;  %s704_s11 = scalar_lea.vmem (%p1142_p6), %s1277_s3, %s924_s12 }
  0x2e   : > { %v922_v32 = vld [vmem:[%s339_s7] ss:$0 sm:$0xff] }
  0x30   : > { %948 = vmatpush3.bf16.msra.mxu0 %v1033_v20  ;;  %985 = vmatpush3.bf16.msra.mxu1 %v1033_v20 }
  0x31   : > { %949 = vmatprep.subr.bf16.mxu0 %v1034_v21  ;;  %978 = vmatprep.subr.bf16.mxu1 %v1034_v21 }
  0x34   : > { %950 = vmatpush3.bf16.msra.mxu0 %v1034_v21  ;;  %986 = vmatpush3.bf16.msra.mxu1 %v1034_v21 }
  0x35   : > { %951 = vmatprep.subr.bf16.mxu0 %v1035_v22  ;;  %979 = vmatprep.subr.bf16.mxu1 %v1035_v22 }
  0x38   : > { %952 = vmatpush3.bf16.msra.mxu0 %v1035_v22  ;;  %987 = vmatpush3.bf16.msra.mxu1 %v1035_v22 }
  0x39   : > { %953 = vmatprep.subr.bf16.mxu0 %v1036_v23  ;;  %980 = vmatprep.subr.bf16.mxu1 %v1036_v23 }
  0x3c   : > { %954 = vmatpush3.bf16.msra.mxu0 %v1036_v23  ;;  %988 = vmatpush3.bf16.msra.mxu1 %v1036_v23 }
  0x3d   : > { %955 = vmatprep.subr.bf16.mxu0 %v1037_v24  ;;  %981 = vmatprep.subr.bf16.mxu1 %v1037_v24 }
  0x40   : > { %956 = vmatpush3.bf16.msra.mxu0 %v1037_v24  ;;  %989 = vmatpush3.bf16.msra.mxu1 %v1037_v24 }
  0x41   : > { %957 = vmatprep.subr.bf16.mxu0 %v1038_v25  ;;  %982 = vmatprep.subr.bf16.mxu1 %v1038_v25 }
  0x44   : > { %958 = vmatpush3.bf16.msra.mxu0 %v1038_v25  ;;  %990 = vmatpush3.bf16.msra.mxu1 %v1038_v25 }
  0x47   : > { %960 = vmatmul.mubr.bf16.vlgmr.msra.gmra.mrb[0].mxu0 %v1041_v26  ;;  %968 = vmatmul.mubr.bf16.vlgmr.msra.gmra.mrb[0].mxu1 %v1042_v27 }
  0x48   : > { %963 = vmatprep.mubr.bf16.mxu0 %v1043_v28  ;;  %971 = vmatprep.mubr.bf16.mxu1 %v1044_v29 }
  0x4f   : > { %964 = vmatmul.mubr.bf16.gmra.mrb[4].mxu0 %v1045_v30  ;;  %972 = vmatmul.mubr.bf16.gmra.mrb[4].mxu1 %v1046_v31 }
 0x11a   : > { %v961_v33 = vpop.f32.mrb[0].mxu0  ;;  %v969_v34 = vpop.f32.mrb[0].mxu1 }
 0x11b   : > { %v663_v35 = vadd.f32 %v961_v33, %v922_v32  ;;  %v671_v36 = vadd.f32 %v969_v34, %v922_v32  ;;  %v540_v37 = vpop.f32.mrb[1].mxu0  ;;  %v572_v38 = vpop.f32.mrb[1].mxu1 }
 0x11c   : > { %v661_v39 = vadd.f32 %v922_v32, %v540_v37  ;;  %v669_v40 = vadd.f32 %v922_v32, %v572_v38  ;;  %v962_v41 = vpop.f32.mrb[2].mxu0  ;;  %v970_v42 = vpop.f32.mrb[2].mxu1 }
 0x11d   : > { %679 = vst [vmem:[%s1219_s9 + $0x10] sm:$0xff] %v663_v35  ;;  %687 = vst [vmem:[%s1219_s9 + $0x50] sm:$0xff] %v671_v36  ;;  %v664_v43 = vadd.f32 %v962_v41, %v922_v32  ;;  %v672_v44 = vadd.f32 %v970_v42, %v922_v32  ;;  %v543_v45 = vpop.f32.mrb[3].mxu0  ;;  %v575_v46 = vpop.f32.mrb[3].mxu1 }
 0x11e   : > { %677 = vst [vmem:[%s1219_s9] sm:$0xff] %v661_v39  ;;  %685 = vst [vmem:[%s1219_s9 + $0x40] sm:$0xff] %v669_v40  ;;  %v662_v47 = vadd.f32 %v922_v32, %v543_v45  ;;  %v670_v48 = vadd.f32 %v922_v32, %v575_v46 }
 0x11f   : > { %680 = vst [vmem:[%s1219_s9 + $0x18] sm:$0xff] %v664_v43  ;;  %688 = vst [vmem:[%s1219_s9 + $0x58] sm:$0xff] %v672_v44 }
 0x120   : > { %678 = vst [vmem:[%s1219_s9 + $0x8] sm:$0xff] %v662_v47  ;;  %686 = vst [vmem:[%s1219_s9 + $0x48] sm:$0xff] %v670_v48 }
 0x122   : > { %v965_v49 = vpop.f32.mrb[4].mxu0  ;;  %v973_v50 = vpop.f32.mrb[4].mxu1  ;;  %699 = sbr.rel (!%p1142_p6) target bundleno = 306 (0x132), region = 85 }
 0x123   : > { %v667_v51 = vadd.f32 %v965_v49, %v922_v32  ;;  %v675_v52 = vadd.f32 %v973_v50, %v922_v32  ;;  %v556_v53 = vpop.f32.mrb[5].mxu0  ;;  %v588_v54 = vpop.f32.mrb[5].mxu1 }
 0x124   : > { %v665_v55 = vadd.f32 %v922_v32, %v556_v53  ;;  %v673_v56 = vadd.f32 %v922_v32, %v588_v54  ;;  %v966_v57 = vpop.f32.mrb[6].mxu0  ;;  %v974_v58 = vpop.f32.mrb[6].mxu1  ;;  %v766_v3 = vld [vmem:[%s1219_s9 + $0x10] sm:$0xff] (%p1142_p6) }
 0x125   : > { %683 = vst [vmem:[%s1219_s9 + $0x30] sm:$0xff] %v667_v51  ;;  %691 = vst [vmem:[%s1219_s9 + $0x70] sm:$0xff] %v675_v52  ;;  %v668_v59 = vadd.f32 %v966_v57, %v922_v32  ;;  %v676_v60 = vadd.f32 %v974_v58, %v922_v32  ;;  %v559_v61 = vpop.f32.mrb[7].mxu0  ;;  %v591_v62 = vpop.f32.mrb[7].mxu1  ;;  %v762_v1 = vld [vmem:[%s1219_s9] sm:$0xff] (%p1142_p6)  ;;  %v782_v11 = vld [vmem:[%s1219_s9 + $0x50] sm:$0xff] (%p1142_p6) }
 0x126   : > { %681 = vst [vmem:[%s1219_s9 + $0x20] sm:$0xff] %v665_v55  ;;  %689 = vst [vmem:[%s1219_s9 + $0x60] sm:$0xff] %v673_v56  ;;  %v666_v63 = vadd.f32 %v922_v32, %v559_v61  ;;  %v674_v0 = vadd.f32 %v922_v32, %v591_v62  ;;  %v768_v4 = vld [vmem:[%s1219_s9 + $0x18] sm:$0xff] (%p1142_p6)  ;;  %v778_v9 = vld [vmem:[%s1219_s9 + $0x40] sm:$0xff] (%p1142_p6) }
 0x127   : > { %684 = vst [vmem:[%s1219_s9 + $0x38] sm:$0xff] %v668_v59  ;;  %692 = vst [vmem:[%s1219_s9 + $0x78] sm:$0xff] %v676_v60  ;;  %v764_v2 = vld [vmem:[%s1219_s9 + $0x8] sm:$0xff] (%p1142_p6)  ;;  %v784_v12 = vld [vmem:[%s1219_s9 + $0x58] sm:$0xff] (%p1142_p6) }
 0x128   : > { %682 = vst [vmem:[%s1219_s9 + $0x28] sm:$0xff] %v666_v63  ;;  %690 = vst [vmem:[%s1219_s9 + $0x68] sm:$0xff] %v674_v0  ;;  %v780_v10 = vld [vmem:[%s1219_s9 + $0x48] sm:$0xff] (%p1142_p6) }
 0x129   : > { %763 = vst [vmem:[%s704_s11] sm:$0xff] %v762_v1  ;;  %765 = vst [vmem:[%s704_s11 + $0x10] sm:$0xff] %v764_v2 }
 0x12a   : > { %767 = vst [vmem:[%s704_s11 + $0x20] sm:$0xff] %v766_v3  ;;  %769 = vst [vmem:[%s704_s11 + $0x30] sm:$0xff] %v768_v4 }
 0x12b   : > { %779 = vst [vmem:[%s704_s11 + $0x80] sm:$0xff] %v778_v9  ;;  %781 = vst [vmem:[%s704_s11 + $0x90] sm:$0xff] %v780_v10 }
 0x12c   : > { %v774_v7 = vld [vmem:[%s1219_s9 + $0x30] sm:$0xff]  ;;  %783 = vst [vmem:[%s704_s11 + $0xa0] sm:$0xff] %v782_v11  ;;  %785 = vst [vmem:[%s704_s11 + $0xb0] sm:$0xff] %v784_v12 }
 0x12d   : > { %v770_v5 = vld [vmem:[%s1219_s9 + $0x20] sm:$0xff]  ;;  %775 = vst [vmem:[%s704_s11 + $0x60] sm:$0xff] %v774_v7  ;;  %v790_v15 = vld [vmem:[%s1219_s9 + $0x70] sm:$0xff] }
 0x12e   : > { %771 = vst [vmem:[%s704_s11 + $0x40] sm:$0xff] %v770_v5  ;;  %v776_v8 = vld [vmem:[%s1219_s9 + $0x38] sm:$0xff]  ;;  %v786_v13 = vld [vmem:[%s1219_s9 + $0x60] sm:$0xff]  ;;  %791 = vst [vmem:[%s704_s11 + $0xe0] sm:$0xff] %v790_v15 }
 0x12f   : > { %v772_v6 = vld [vmem:[%s1219_s9 + $0x28] sm:$0xff]  ;;  %777 = vst [vmem:[%s704_s11 + $0x70] sm:$0xff] %v776_v8  ;;  %787 = vst [vmem:[%s704_s11 + $0xc0] sm:$0xff] %v786_v13  ;;  %v792_v16 = vld [vmem:[%s1219_s9 + $0x78] sm:$0xff] }
 0x130   : > { %773 = vst [vmem:[%s704_s11 + $0x50] sm:$0xff] %v772_v6  ;;  %v788_v14 = vld [vmem:[%s1219_s9 + $0x68] sm:$0xff]  ;;  %793 = vst [vmem:[%s704_s11 + $0xf0] sm:$0xff] %v792_v16 }
 0x131   : > { %789 = vst [vmem:[%s704_s11 + $0xd0] sm:$0xff] %v788_v14 }
 0x132 PF: > { %s13_s16 = sadd.s32 1, %s1085_s16   ;;  %s1279_s12 = smov %s1073_s13 }
 0x133   : > { %p10_p12 = scmp.ge.s32.totalorder %s13_s16, 4   ;;  %s1280_s13 = smov %s1147_s22 }
 0x134   : > { %s1281_s14 = smov %s1081_s15  ;;  %s1282_s15 = smov %s1284_s17 }
 0x135   :  { %12 = sbr.rel (!%p10_p12) target bundleno = 3 (0x3), region = 160 }

// kernel: encoder_forward.42
= control target key start
LH: loop header
LB: loop body
LE: loop exit
PB: predicated region body
PF: predicated region fallthrough
CT: control target
= control target key end

     0   :  { %s749_s12 = smov 0   ;;  %s842_s0 = inlined_call_operand.vmem [shape: f32[2,64,64], index: 0, kind: input, shape index: {}]   ;;  %s843_s1 = inlined_call_operand.vmem [shape: f32[2,64,64], index: 1, kind: input, shape index: {}]   ;;  %s844_s2 = inlined_call_operand.vmem [shape: f32[2,64,64], index: 2, kind: input, shape index: {}]   ;;  %s845_s3 = inlined_call_operand.vmem [shape: f32[2,64,64], index: 3, kind: output, shape index: {}]  }
   0x1 LB: > { %s602_s13 = sadd.s32 4294967295, %s727_s12   ;;  %p606_p0 = scmp.ge.s32.totalorder %s727_s12, 1  ;;  %s727_s12 = sphi %s749_s12, %s13_s12  }
   0x2   : > { %p157_p1 = scmp.lt.s32.totalorder %s727_s12, 3 }
   0x4   : > { %p158_p2 = pnand %p606_p0, %p157_p1 }
   0x5   : > { %p191_p3 = scmp.lt.s32.totalorder (!%p158_p2), %s602_s13, 1  ;;  %vm256_vm0 = vcmask (!%p158_p2), 523264  }
   0x6   : > { %161 = sbr.rel (%p158_p2) target bundleno = 656 (0x290), region = 32 }
   0xd   : > { %s847_s13 = smov (!%p191_p3, %s602_s13), 1 }
   0xe   : > { %s757_s14 = sshll.u32 %s847_s13, 6 }
   0xf   : > { %s200_s17 = scalar_lea.vmem %s843_s1, %s757_s14  ;;  %s767_s20 = scalar_lea.vmem %s842_s0, %s757_s14 }
  0x10   : > { %v232_v0 = vld [vmem:[%s200_s17] sm:$0xff]  ;;  %v233_v1 = vld [vmem:[%s200_s17 + $0x8] sm:$0xff]  ;;  %v234_v2 = vld [vmem:[%s200_s17 + $0x10] sm:$0xff]  ;;  %s205_s23 = scalar_lea.vmem %s844_s2, %s757_s14  ;;  %s821_s26 = scalar_lea.vmem %s845_s3, %s757_s14 }
  0x11   : > { %v240_v3 = vpack.c.bf16 %v233_v1, %v232_v0  ;;  %v235_v4 = vld [vmem:[%s200_s17 + $0x18] sm:$0xff]  ;;  %v212_v6 = vld [vmem:[%s767_s20] sm:$0xff]  ;;  %v213_v8 = vld [vmem:[%s767_s20 + $0x8] sm:$0xff] }
  0x12   : > { %v241_v5 = vpack.c.bf16 %v235_v4, %v234_v2  ;;  %v220_v9 = vmul.f32 0.125, %v212_v6  ;;  %v221_v10 = vmul.f32 0.125, %v213_v8  ;;  %v236_v11 = vld [vmem:[%s200_s17 + $0x20] sm:$0xff]  ;;  %v237_v12 = vld [vmem:[%s200_s17 + $0x28] sm:$0xff]  ;;  %v238_v16 = vld [vmem:[%s200_s17 + $0x30] sm:$0xff] }
  0x13   : > { %677 = vmatprep.subr.msk.bf16.mxu0 %vm256_vm0, %v240_v3  ;;  %v270_v7 = vsel %vm256_vm0, %v240_v3, 0  ;;  %v242_v15 = vpack.c.bf16 %v237_v12, %v236_v11  ;;  %v239_v17 = vld [vmem:[%s200_s17 + $0x38] sm:$0xff]  ;;  %v214_v20 = vld [vmem:[%s767_s20 + $0x10] sm:$0xff]  ;;  %v216_v23 = vld [vmem:[%s767_s20 + $0x20] sm:$0xff] }
  0x14   : > { %646 = vmatpush3.bf16.xpose.msra.mxu0 %v270_v7  ;;  %v228_v13 = vpack.c.bf16 %v221_v10, %v220_v9  ;;  %v273_v14 = vsel %vm256_vm0, %v241_v5, 0  ;;  %v243_v19 = vpack.c.bf16 %v239_v17, %v238_v16  ;;  %v215_v21 = vld [vmem:[%s767_s20 + $0x18] sm:$0xff]  ;;  %v217_v24 = vld [vmem:[%s767_s20 + $0x28] sm:$0xff]  ;;  %v222_v25 = vmul.f32 0.125, %v214_v20  ;;  %v218_v31 = vld [vmem:[%s767_s20 + $0x30] sm:$0xff] }
  0x15   : > { %678 = vmatprep.subr.msk.bf16.mxu0 %vm256_vm0, %v241_v5  ;;  %v276_v18 = vsel %vm256_vm0, %v242_v15, 0  ;;  %v223_v26 = vmul.f32 0.125, %v215_v21  ;;  %v224_v27 = vmul.f32 0.125, %v216_v23  ;;  %v225_v28 = vmul.f32 0.125, %v217_v24  ;;  %v219_v32 = vld [vmem:[%s767_s20 + $0x38] sm:$0xff]  ;;  %v244_v52 = vld [vmem:[%s205_s23] sm:$0xff] }
  0x16   : > { %653 = vmatprep.mubr.msk.bf16.mxu0 %vm256_vm0, %v228_v13  ;;  %v279_v22 = vsel %vm256_vm0, %v243_v19, 0  ;;  %v226_v33 = vmul.f32 0.125, %v218_v31  ;;  %v227_v34 = vmul.f32 0.125, %v219_v32  ;;  %v245_v53 = vld [vmem:[%s205_s23 + $0x8] sm:$0xff]  ;;  %v246_v55 = vld [vmem:[%s205_s23 + $0x10] sm:$0xff]  ;;  %v247_v56 = vld [vmem:[%s205_s23 + $0x18] sm:$0xff] }
  0x17   : > { %v229_v29 = vpack.c.bf16 %v223_v26, %v222_v25  ;;  %v230_v30 = vpack.c.bf16 %v225_v28, %v224_v27  ;;  %v252_v54 = vpack.c.bf16 %v245_v53, %v244_v52  ;;  %v253_v57 = vpack.c.bf16 %v247_v56, %v246_v55  ;;  %v248_v58 = vld [vmem:[%s205_s23 + $0x20] sm:$0xff]  ;;  %v249_v59 = vld [vmem:[%s205_s23 + $0x28] sm:$0xff]  ;;  %v250_v61 = vld [vmem:[%s205_s23 + $0x30] sm:$0xff] }
  0x18   : > { %v231_v35 = vpack.c.bf16 %v227_v34, %v226_v33  ;;  %v254_v60 = vpack.c.bf16 %v249_v59, %v248_v58  ;;  %v251_v62 = vld [vmem:[%s205_s23 + $0x38] sm:$0xff] }
  0x19   : > { %661 = vmatprep.subr.bf16.mxu1 %v252_v54  ;;  %v255_v63 = vpack.c.bf16 %v251_v62, %v250_v61 }
  0x1a   : > { %662 = vmatpush3.bf16.msra.mxu1 %v252_v54 }
  0x1b   : > { %663 = vmatprep.subr.bf16.mxu1 %v253_v57 }
  0x1c   : > { %648 = vmatpush3.bf16.xpose.msra.mxu0 %v273_v14 }
  0x1d   : > { %679 = vmatprep.subr.msk.bf16.mxu0 %vm256_vm0, %v242_v15 }
  0x1e   : > { %664 = vmatpush3.bf16.msra.mxu1 %v253_v57 }
  0x1f   : > { %665 = vmatprep.subr.bf16.mxu1 %v254_v60 }
  0x22   : > { %666 = vmatpush3.bf16.msra.mxu1 %v254_v60 }
  0x23   : > { %667 = vmatprep.subr.bf16.mxu1 %v255_v63 }
  0x24   : > { %650 = vmatpush3.bf16.xpose.msra.mxu0 %v276_v18 }
  0x25   : > { %680 = vmatprep.subr.msk.bf16.mxu0 %vm256_vm0, %v243_v19 }
  0x26   : > { %668 = vmatpush3.bf16.msra.mxu1 %v255_v63 }
  0x2c   : > { %652 = vmatpush3.bf16.xpose.msra.mxu0 %v279_v22 }
  0x33   : > { %654 = vmatmul.mubr.msk.bf16.vlgmr.msra.gmra.mrb[0].mxu0 %vm256_vm0, %v229_v29 }
  0x34   : > { %657 = vmatprep.mubr.msk.bf16.mxu0 %vm256_vm0, %v230_v30 }
  0x3b   : > { %658 = vmatmul.mubr.msk.bf16.gmra.mrb[4].mxu0 %vm256_vm0, %v231_v35 }
 0x106   : > { %v655_v36 = vpop.f32.mrb[0].mxu0 }
 0x107   : > { %v315_v37 = vpop.f32.mrb[1].mxu0  ;;  %v352_v38 = vsel %vm256_vm0, %v655_v36, -inf }
 0x108   : > { %353 = vmax.xlane.f32.xlu1 %v352_v38  ;;  %v656_v39 = vpop.f32.mrb[2].mxu0  ;;  %v346_v40 = vsel %vm256_vm0, %v315_v37, -inf }
 0x109   : > { %347 = vmax.xlane.f32.xlu0 %v346_v40  ;;  %v318_v41 = vpop.f32.mrb[3].mxu0  ;;  %v355_v42 = vsel %vm256_vm0, %v656_v39, -inf }
 0x10a   : > { %v349_v43 = vsel %vm256_vm0, %v318_v41, -inf }
 0x10c   : > { %356 = vmax.xlane.f32.xlu1 %v355_v42 }
 0x10d   : > { %350 = vmax.xlane.f32.xlu0 %v349_v43 }
 0x10e   : > { %v659_v44 = vpop.f32.mrb[4].mxu0 }
 0x10f   : > { %v331_v45 = vpop.f32.mrb[5].mxu0  ;;  %v364_v50 = vsel %vm256_vm0, %v659_v44, -inf }
 0x110   : > { %v793_v46 = vpop.f32.mrb[6].mxu0  ;;  %v358_v47 = vsel %vm256_vm0, %v331_v45, -inf }
 0x111   : > { %359 = vmax.xlane.f32.xlu0 %v358_v47  ;;  %v334_v48 = vpop.f32.mrb[7].mxu0  ;;  %v367_v51 = vsel %vm256_vm0, %v793_v46, -inf }
 0x112   : > { %v361_v49 = vsel %vm256_vm0, %v334_v48, -inf }
 0x113   : > { %362 = vmax.xlane.f32.xlu1 %v361_v49 }
 0x115   : > { %365 = vmax.xlane.f32.xlu0 %v364_v50 }
 0x117   : > { %368 = vmax.xlane.f32.xlu1 %v367_v51 }
 0x195   : > { %v354_v0 = vpop.xlane.xlu1 %353 }
 0x196   : > { %v372_v1 = vsub.f32 %v655_v36, %v354_v0  ;;  %v348_v2 = vpop.xlane.xlu0 %347 }
 0x197   : > { %v370_v3 = vsub.f32 %v315_v37, %v348_v2 }
 0x198   : > { %v382_v4 = vmul.f32 1.442695, %v372_v1 }
 0x199   : > { %v378_v5 = vmul.f32 1.442695, %v370_v3  ;;  %v357_v6 = vpop.xlane.xlu1 %356 }
 0x19a   : > { %689 = vpow2.f32 %v382_v4  ;;  %v373_v7 = vsub.f32 %v656_v39, %v357_v6  ;;  %v351_v8 = vpop.xlane.xlu0 %350 }
 0x19b   : > { %v371_v9 = vsub.f32 %v318_v41, %v351_v8  ;;  %691 = vpow2.f32 %v378_v5 }
 0x19c   : > { %v384_v10 = vmul.f32 1.442695, %v373_v7 }
 0x19d   : > { %v380_v11 = vmul.f32 1.442695, %v371_v9 }
 0x19e   : > { %693 = vpow2.f32 %v384_v10  ;;  %v360_v12 = vpop.xlane.xlu0 %359 }
 0x19f   : > { %695 = vpow2.f32 %v380_v11  ;;  %v374_v13 = vsub.f32 %v331_v45, %v360_v12 }
 0x1a0   : > { %v363_v14 = vpop.xlane.xlu1 %362 }
 0x1a1   : > { %v386_v15 = vmul.f32 1.442695, %v374_v13  ;;  %v375_v16 = vsub.f32 %v334_v48, %v363_v14 }
 0x1a2   : > { %v366_v17 = vpop.xlane.xlu0 %365 }
 0x1a3   : > { %697 = vpow2.f32 %v386_v15  ;;  %v388_v18 = vmul.f32 1.442695, %v375_v16  ;;  %v376_v19 = vsub.f32 %v659_v44, %v366_v17 }
 0x1a4   : > { %v690_v20 = vpop.eup %689  ;;  %v369_v21 = vpop.xlane.xlu1 %368 }
 0x1a5   : > { %699 = vpow2.f32 %v388_v18  ;;  %v390_v22 = vmul.f32 1.442695, %v376_v19  ;;  %v377_v23 = vsub.f32 %v793_v46, %v369_v21  ;;  %v400_v24 = vsel %vm256_vm0, %v690_v20, 0.0  ;;  %v692_v25 = vpop.eup %691 }
 0x1a6   : > { %401 = vadd.xlane.f32.xlu0 %v400_v24  ;;  %v394_v29 = vsel %vm256_vm0, %v692_v25, 0.0 }
 0x1a7   : > { %701 = vpow2.f32 %v390_v22  ;;  %v392_v26 = vmul.f32 1.442695, %v377_v23 }
 0x1a8   : > { %v694_v27 = vpop.eup %693 }
 0x1a9   : > { %v696_v28 = vpop.eup %695  ;;  %703 = vpow2.f32 %v392_v26  ;;  %v403_v30 = vsel %vm256_vm0, %v694_v27, 0.0  ;;  %v419_v31 = vpack.c.bf16 %v694_v27, %v690_v20 }
 0x1aa   : > { %395 = vadd.xlane.f32.xlu0 %v394_v29  ;;  %404 = vadd.xlane.f32.xlu1 %v403_v30  ;;  %v418_v32 = vpack.c.bf16 %v696_v28, %v692_v25  ;;  %v397_v34 = vsel %vm256_vm0, %v696_v28, 0.0 }
 0x1ac   : > { %669 = vmatprep.mubr.msk.bf16.mxu1 %vm256_vm0, %v418_v32 }
 0x1ad   : > { %v698_v33 = vpop.eup %697  ;;  %670 = vmatmul.mubr.msk.bf16.vlgmr.msra.gmra.mrb[0].mxu1 %vm256_vm0, %v419_v31 }
 0x1ae   : > { %398 = vadd.xlane.f32.xlu1 %v397_v34  ;;  %v406_v35 = vsel %vm256_vm0, %v698_v33, 0.0 }
 0x1af   : > { %v700_v36 = vpop.eup %699  ;;  %407 = vadd.xlane.f32.xlu0 %v406_v35 }
 0x1b0   : > { %v420_v37 = vpack.c.bf16 %v700_v36, %v698_v33  ;;  %v409_v38 = vsel %vm256_vm0, %v700_v36, 0.0 }
 0x1b1   : > { %v702_v39 = vpop.eup %701 }
 0x1b2   : > { %673 = vmatprep.mubr.msk.bf16.mxu1 %vm256_vm0, %v420_v37  ;;  %410 = vadd.xlane.f32.xlu1 %v409_v38  ;;  %v412_v40 = vsel %vm256_vm0, %v702_v39, 0.0 }
 0x1b3   : > { %v704_v41 = vpop.eup %703  ;;  %413 = vadd.xlane.f32.xlu0 %v412_v40 }
 0x1b4   : > { %v421_v42 = vpack.c.bf16 %v704_v41, %v702_v39  ;;  %v415_v43 = vsel %vm256_vm0, %v704_v41, 0.0 }
 0x1b6   : > { %674 = vmatmul.mubr.msk.bf16.gmra.mrb[4].mxu1 %vm256_vm0, %v421_v42  ;;  %416 = vadd.xlane.f32.xlu1 %v415_v43 }
 0x233   : > { %v402_v44 = vpop.xlane.xlu0 %401 }
 0x234   : > { %705 = vrcp.f32 %v402_v44 }
 0x237   : > { %v405_v45 = vpop.xlane.xlu1 %404  ;;  %v396_v46 = vpop.xlane.xlu0 %395 }
 0x238   : > { %707 = vrcp.f32 %v396_v46 }
 0x239   : > { %709 = vrcp.f32 %v405_v45 }
 0x23b   : > { %v399_v47 = vpop.xlane.xlu1 %398 }
 0x23c   : > { %v408_v48 = vpop.xlane.xlu0 %407  ;;  %711 = vrcp.f32 %v399_v47 }
 0x23e   : > { %v706_v52 = vpop.eup %705 }
 0x23f   : > { %v411_v49 = vpop.xlane.xlu1 %410 }
 0x240   : > { %v414_v50 = vpop.xlane.xlu0 %413 }
 0x241   : > { %713 = vrcp.f32 %v414_v50 }
 0x242   : > { %715 = vrcp.f32 %v408_v48  ;;  %v708_v54 = vpop.eup %707 }
 0x243   : > { %v417_v51 = vpop.xlane.xlu1 %416  ;;  %v710_v57 = vpop.eup %709 }
 0x244   : > { %717 = vrcp.f32 %v417_v51 }
 0x245   : > { %719 = vrcp.f32 %v411_v49 }
 0x246   : > { %v712_v60 = vpop.eup %711 }
 0x24b   : > { %v714_v0 = vpop.eup %713 }
 0x24c   : > { %v716_v2 = vpop.eup %715 }
 0x24e   : > { %v718_v5 = vpop.eup %717 }
 0x24f   : > { %v720_v8 = vpop.eup %719 }
 0x280   : > { %v671_v53 = vpop.f32.mrb[0].mxu1 }
 0x281   : > { %v509_v55 = vmul.f32 %v706_v52, %v671_v53  ;;  %v468_v56 = vpop.f32.mrb[1].mxu1 }
 0x282   : > { %v507_v58 = vmul.f32 %v708_v54, %v468_v56  ;;  %v672_v59 = vpop.f32.mrb[2].mxu1 }
 0x283   : > { %517 = vst.msk [vmem:[%s821_s26 + $0x10] sm:$0xff] %vm256_vm0, %v509_v55  ;;  %v510_v61 = vmul.f32 %v710_v57, %v672_v59  ;;  %v471_v62 = vpop.f32.mrb[3].mxu1 }
 0x284   : > { %515 = vst.msk [vmem:[%s821_s26] sm:$0xff] %vm256_vm0, %v507_v58  ;;  %v508_v63 = vmul.f32 %v712_v60, %v471_v62 }
 0x285   : > { %518 = vst.msk [vmem:[%s821_s26 + $0x18] sm:$0xff] %vm256_vm0, %v510_v61 }
 0x286   : > { %516 = vst.msk [vmem:[%s821_s26 + $0x8] sm:$0xff] %vm256_vm0, %v508_v63 }
 0x289   : > { %v675_v1 = vpop.f32.mrb[4].mxu1 }
 0x28a   : > { %v513_v3 = vmul.f32 %v714_v0, %v675_v1  ;;  %v484_v4 = vpop.f32.mrb[5].mxu1 }
 0x28b   : > { %v511_v6 = vmul.f32 %v716_v2, %v484_v4  ;;  %v676_v7 = vpop.f32.mrb[6].mxu1 }
 0x28c   : > { %521 = vst.msk [vmem:[%s821_s26 + $0x30] sm:$0xff] %vm256_vm0, %v513_v3  ;;  %v514_v9 = vmul.f32 %v718_v5, %v676_v7  ;;  %v487_v10 = vpop.f32.mrb[7].mxu1 }
 0x28d   : > { %519 = vst.msk [vmem:[%s821_s26 + $0x20] sm:$0xff] %vm256_vm0, %v511_v6  ;;  %v512_v11 = vmul.f32 %v720_v8, %v487_v10 }
 0x28e   : > { %522 = vst.msk [vmem:[%s821_s26 + $0x38] sm:$0xff] %vm256_vm0, %v514_v9 }
 0x28f   : > { %520 = vst.msk [vmem:[%s821_s26 + $0x28] sm:$0xff] %vm256_vm0, %v512_v11 }
 0x290 PF: > { %s13_s12 = sadd.s32 1, %s727_s12  }
 0x291   : > { %p10_p4 = scmp.ge.s32.totalorder %s13_s12, 4  }
 0x293   :  { %12 = sbr.rel (!%p10_p4) target bundleno = 1 (0x1), region = 68 }

// kernel: encoder_forward.43
= control target key start
LH: loop header
LB: loop body
LE: loop exit
PB: predicated region body
PF: predicated region fallthrough
CT: control target
= control target key end

     0   :  { %s692_s1 = inlined_call_operand.vmem [shape: bf16[128,128], index: 1, kind: input, shape index: {}]   ;;  %s693_s0 = inlined_call_operand.vmem [shape: bf16[128,128], index: 0, kind: input, shape index: {}]   ;;  %s694_s2 = inlined_call_operand.vmem [shape: f32[1,128], index: 2, kind: input, shape index: {}]   ;;  %s695_s3 = inlined_call_operand.vmem [shape: f32[128,128], index: 3, kind: input, shape index: {}]   ;;  %s696_s4 = inlined_call_operand.vmem [shape: f32[128,128], index: 4, kind: output, shape index: {}]  }
   0x1   :  { %v486_v0 = vld [vmem:[%s692_s1] sm:$0xff]   ;;  %v487_v1 = vld [vmem:[%s692_s1 + $0x8] sm:$0xff]   ;;  %v488_v2 = vld [vmem:[%s692_s1 + $0x10] sm:$0xff]  }
   0x2   :  { %438 = vmatprep.subr.bf16.mxu0 %v486_v0  ;;  %470 = vmatprep.subr.bf16.mxu1 %v486_v0  ;;  %v489_v3 = vld [vmem:[%s692_s1 + $0x18] sm:$0xff]   ;;  %v494_v4 = vld [vmem:[%s693_s0] sm:$0xff]   ;;  %v491_v7 = vld [vmem:[%s692_s1 + $0x28] sm:$0xff]  }
   0x3   :  { %439 = vmatpush3.bf16.msra.mxu0 %v486_v0  ;;  %478 = vmatpush3.bf16.msra.mxu1 %v486_v0  ;;  %v495_v5 = vld [vmem:[%s693_s0 + $0x20] sm:$0xff]   ;;  %v492_v8 = vld [vmem:[%s692_s1 + $0x30] sm:$0xff]   ;;  %v493_v9 = vld [vmem:[%s692_s1 + $0x38] sm:$0xff]  }
   0x4   :  { %440 = vmatprep.subr.bf16.mxu0 %v487_v1  ;;  %471 = vmatprep.subr.bf16.mxu1 %v487_v1  ;;  %v490_v6 = vld [vmem:[%s692_s1 + $0x20] sm:$0xff]   ;;  %v496_v10 = vld [vmem:[%s693_s0 + $0x8] sm:$0xff]   ;;  %v498_v12 = vld [vmem:[%s693_s0 + $0x10] sm:$0xff]  }
   0x5   :  { %454 = vmatprep.mubr.bf16.mxu0 %v494_v4  ;;  %462 = vmatprep.mubr.bf16.mxu1 %v495_v5  ;;  %v497_v11 = vld [vmem:[%s693_s0 + $0x28] sm:$0xff]   ;;  %v499_v13 = vld [vmem:[%s693_s0 + $0x30] sm:$0xff]   ;;  %v500_v14 = vld [vmem:[%s693_s0 + $0x18] sm:$0xff]  }
   0x6   :  { %v501_v15 = vld [vmem:[%s693_s0 + $0x38] sm:$0xff]   ;;  %v578_v16 = vld [vmem:[%s694_s2] ss:$0 sm:$0xff]  ;;  %v355_v18 = vld [vmem:[%s695_s3 + $0x10] sm:$0xff] }
   0x7   :  { %441 = vmatpush3.bf16.msra.mxu0 %v487_v1  ;;  %479 = vmatpush3.bf16.msra.mxu1 %v487_v1  ;;  %v363_v20 = vld [vmem:[%s695_s3 + $0x50] sm:$0xff]  ;;  %v353_v24 = vld [vmem:[%s695_s3] sm:$0xff]  ;;  %v356_v30 = vld [vmem:[%s695_s3 + $0x18] sm:$0xff] }
   0x8   :  { %442 = vmatprep.subr.bf16.mxu0 %v488_v2  ;;  %472 = vmatprep.subr.bf16.mxu1 %v488_v2  ;;  %v361_v26 = vld [vmem:[%s695_s3 + $0x40] sm:$0xff]  ;;  %v364_v32 = vld [vmem:[%s695_s3 + $0x58] sm:$0xff]  ;;  %v354_v38 = vld [vmem:[%s695_s3 + $0x8] sm:$0xff] }
   0x9   :  { %v362_v40 = vld [vmem:[%s695_s3 + $0x48] sm:$0xff]  ;;  %v359_v50 = vld [vmem:[%s695_s3 + $0x30] sm:$0xff]  ;;  %v357_v56 = vld [vmem:[%s695_s3 + $0x20] sm:$0xff] }
   0xa   :  { %v367_v52 = vld [vmem:[%s695_s3 + $0x70] sm:$0xff]  ;;  %v365_v58 = vld [vmem:[%s695_s3 + $0x60] sm:$0xff]  ;;  %v360_v62 = vld [vmem:[%s695_s3 + $0x38] sm:$0xff] }
   0xb   :  { %443 = vmatpush3.bf16.msra.mxu0 %v488_v2  ;;  %480 = vmatpush3.bf16.msra.mxu1 %v488_v2  ;;  %v368_v0 = vld [vmem:[%s695_s3 + $0x78] sm:$0xff] }
   0xc   :  { %444 = vmatprep.subr.bf16.mxu0 %v489_v3  ;;  %473 = vmatprep.subr.bf16.mxu1 %v489_v3 }
   0xf   :  { %445 = vmatpush3.bf16.msra.mxu0 %v489_v3  ;;  %481 = vmatpush3.bf16.msra.mxu1 %v489_v3 }
  0x10   :  { %446 = vmatprep.subr.bf16.mxu0 %v490_v6  ;;  %474 = vmatprep.subr.bf16.mxu1 %v490_v6 }
  0x13   :  { %447 = vmatpush3.bf16.msra.mxu0 %v490_v6  ;;  %482 = vmatpush3.bf16.msra.mxu1 %v490_v6  ;;  %v358_v6 = vld [vmem:[%s695_s3 + $0x28] sm:$0xff] }
  0x14   :  { %448 = vmatprep.subr.bf16.mxu0 %v491_v7  ;;  %475 = vmatprep.subr.bf16.mxu1 %v491_v7 }
  0x17   :  { %449 = vmatpush3.bf16.msra.mxu0 %v491_v7  ;;  %483 = vmatpush3.bf16.msra.mxu1 %v491_v7 }
  0x18   :  { %450 = vmatprep.subr.bf16.mxu0 %v492_v8  ;;  %476 = vmatprep.subr.bf16.mxu1 %v492_v8 }
  0x1b   :  { %451 = vmatpush3.bf16.msra.mxu0 %v492_v8  ;;  %484 = vmatpush3.bf16.msra.mxu1 %v492_v8  ;;  %v366_v8 = vld [vmem:[%s695_s3 + $0x68] sm:$0xff] }
  0x1c   :  { %452 = vmatprep.subr.bf16.mxu0 %v493_v9  ;;  %477 = vmatprep.subr.bf16.mxu1 %v493_v9 }
  0x1f   :  { %453 = vmatpush3.bf16.msra.mxu0 %v493_v9  ;;  %485 = vmatpush3.bf16.msra.mxu1 %v493_v9 }
  0x22   :  { %455 = vmatmul.mubr.bf16.vlgmr.msra.gmra.mrb[0].mxu0 %v496_v10  ;;  %463 = vmatmul.mubr.bf16.vlgmr.msra.gmra.mrb[0].mxu1 %v497_v11 }
  0x23   :  { %458 = vmatprep.mubr.bf16.mxu0 %v498_v12  ;;  %466 = vmatprep.mubr.bf16.mxu1 %v499_v13 }
  0x2a   :  { %459 = vmatmul.mubr.bf16.gmra.mrb[4].mxu0 %v500_v14  ;;  %467 = vmatmul.mubr.bf16.gmra.mrb[4].mxu1 %v501_v15 }
  0xf5   :  { %v456_v17 = vpop.f32.mrb[0].mxu0  ;;  %v464_v19 = vpop.f32.mrb[0].mxu1 }
  0xf6   :  { %v339_v21 = vadd.f32 %v456_v17, %v578_v16  ;;  %v347_v22 = vadd.f32 %v464_v19, %v578_v16  ;;  %v216_v23 = vpop.f32.mrb[1].mxu0  ;;  %v248_v25 = vpop.f32.mrb[1].mxu1 }
  0xf7   :  { %v337_v27 = vadd.f32 %v578_v16, %v216_v23  ;;  %v345_v28 = vadd.f32 %v578_v16, %v248_v25  ;;  %v457_v29 = vpop.f32.mrb[2].mxu0  ;;  %v465_v31 = vpop.f32.mrb[2].mxu1 }
  0xf8   :  { %v371_v33 = vadd.f32 %v355_v18, %v339_v21  ;;  %v379_v34 = vadd.f32 %v363_v20, %v347_v22  ;;  %v340_v35 = vadd.f32 %v457_v29, %v578_v16  ;;  %v348_v36 = vadd.f32 %v465_v31, %v578_v16  ;;  %v219_v37 = vpop.f32.mrb[3].mxu0  ;;  %v251_v39 = vpop.f32.mrb[3].mxu1 }
  0xf9   :  { %v369_v41 = vadd.f32 %v353_v24, %v337_v27  ;;  %v377_v42 = vadd.f32 %v361_v26, %v345_v28  ;;  %v338_v43 = vadd.f32 %v578_v16, %v219_v37  ;;  %v346_v44 = vadd.f32 %v578_v16, %v251_v39 }
  0xfa   :  { %387 = vst [vmem:[%s696_s4 + $0x10] sm:$0xff] %v371_v33  ;;  %395 = vst [vmem:[%s696_s4 + $0x50] sm:$0xff] %v379_v34  ;;  %v372_v45 = vadd.f32 %v356_v30, %v340_v35  ;;  %v380_v46 = vadd.f32 %v364_v32, %v348_v36 }
  0xfb   :  { %385 = vst [vmem:[%s696_s4] sm:$0xff] %v369_v41  ;;  %393 = vst [vmem:[%s696_s4 + $0x40] sm:$0xff] %v377_v42  ;;  %v370_v47 = vadd.f32 %v354_v38, %v338_v43  ;;  %v378_v48 = vadd.f32 %v362_v40, %v346_v44 }
  0xfc   :  { %388 = vst [vmem:[%s696_s4 + $0x18] sm:$0xff] %v372_v45  ;;  %396 = vst [vmem:[%s696_s4 + $0x58] sm:$0xff] %v380_v46 }
  0xfd   :  { %386 = vst [vmem:[%s696_s4 + $0x8] sm:$0xff] %v370_v47  ;;  %394 = vst [vmem:[%s696_s4 + $0x48] sm:$0xff] %v378_v48  ;;  %v460_v49 = vpop.f32.mrb[4].mxu0  ;;  %v468_v51 = vpop.f32.mrb[4].mxu1 }
  0xfe   :  { %v343_v53 = vadd.f32 %v460_v49, %v578_v16  ;;  %v351_v54 = vadd.f32 %v468_v51, %v578_v16  ;;  %v232_v55 = vpop.f32.mrb[5].mxu0  ;;  %v264_v57 = vpop.f32.mrb[5].mxu1 }
  0xff   :  { %v341_v59 = vadd.f32 %v578_v16, %v232_v55  ;;  %v349_v60 = vadd.f32 %v578_v16, %v264_v57  ;;  %v461_v61 = vpop.f32.mrb[6].mxu0  ;;  %v469_v63 = vpop.f32.mrb[6].mxu1 }
 0x100   :  { %v375_v1 = vadd.f32 %v359_v50, %v343_v53  ;;  %v383_v2 = vadd.f32 %v367_v52, %v351_v54  ;;  %v344_v3 = vadd.f32 %v461_v61, %v578_v16  ;;  %v352_v4 = vadd.f32 %v469_v63, %v578_v16  ;;  %v235_v5 = vpop.f32.mrb[7].mxu0  ;;  %v267_v7 = vpop.f32.mrb[7].mxu1 }
 0x101   :  { %v373_v9 = vadd.f32 %v357_v56, %v341_v59  ;;  %v381_v10 = vadd.f32 %v365_v58, %v349_v60  ;;  %v342_v11 = vadd.f32 %v578_v16, %v235_v5  ;;  %v350_v12 = vadd.f32 %v578_v16, %v267_v7 }
 0x102   :  { %391 = vst [vmem:[%s696_s4 + $0x30] sm:$0xff] %v375_v1  ;;  %399 = vst [vmem:[%s696_s4 + $0x70] sm:$0xff] %v383_v2  ;;  %v376_v13 = vadd.f32 %v360_v62, %v344_v3  ;;  %v384_v14 = vadd.f32 %v368_v0, %v352_v4 }
 0x103   :  { %389 = vst [vmem:[%s696_s4 + $0x20] sm:$0xff] %v373_v9  ;;  %397 = vst [vmem:[%s696_s4 + $0x60] sm:$0xff] %v381_v10  ;;  %v374_v15 = vadd.f32 %v358_v6, %v342_v11  ;;  %v382_v16 = vadd.f32 %v366_v8, %v350_v12 }
 0x104   :  { %392 = vst [vmem:[%s696_s4 + $0x38] sm:$0xff] %v376_v13  ;;  %400 = vst [vmem:[%s696_s4 + $0x78] sm:$0xff] %v384_v14 }
 0x105   :  { %390 = vst [vmem:[%s696_s4 + $0x28] sm:$0xff] %v374_v15  ;;  %398 = vst [vmem:[%s696_s4 + $0x68] sm:$0xff] %v382_v16 }

</bundles_post_ra>
